<compile_context>
chip_gen: v5e
topology: v5e:2x2
jax: 0.10.0
libtpu: 0.0.40
codegen_flags: <defaults>
</compile_context>

<pallas_src>
import math
from functools import partial

import jax
import jax.numpy as jnp
from jax.experimental import pallas as pl
from jax.experimental.pallas import tpu as pltpu

MXU_INPUT_DTYPE = jnp.float32   # flip to jnp.bfloat16 on v6e/v7x if accuracy permits
BN_EPS = 1e-5                   # torch BatchNorm2d default


def _round_up(x, m):
    return ((x + m - 1) // m) * m


# --------------------- fused conv-as-matmul Pallas kernel ---------------------

def _matmul_bn_kernel(x_ref, w_ref, scale_ref, shift_ref, *rest, relu):
    # rest = (res_ref?, o_ref, acc_ref)
    if len(rest) == 3:
        res_ref, o_ref, acc_ref = rest
    else:
        res_ref = None
        o_ref, acc_ref = rest

    k = pl.program_id(2)

    @pl.when(k == 0)
    def _():
        acc_ref[...] = jnp.zeros_like(acc_ref)

    acc_ref[...] += jnp.dot(x_ref[...], w_ref[...],
                            preferred_element_type=jnp.float32)

    @pl.when(k == pl.num_programs(2) - 1)
    def _():
        # folded BatchNorm (inference) + optional residual + optional ReLU,
        # all in the epilogue of the last reduction step.
        y = acc_ref[...] * scale_ref[...] + shift_ref[...]
        if res_ref is not None:
            y = y + res_ref[...].astype(jnp.float32)
        if relu:
            y = jnp.maximum(y, 0.0)
        o_ref[...] = y.astype(o_ref.dtype)


def _pick_tk(K):
    """Reduction tile: big, 128-aligned, and dividing K exactly when possible."""
    if K <= 1024:
        return _round_up(K, 128)
    for tk in (512, 768, 640, 896, 384, 256, 1024):
        if K % tk == 0:
            return tk
    return 512


def fused_matmul_bn(x_col, w_col, scale, shift, residual=None, relu=True):
    """relu?((x_col @ w_col) * scale + shift (+ residual)) with a tiled Pallas matmul."""
    M, K = x_col.shape
    K2, N = w_col.shape
    assert K == K2

    # Tile selection (worst case ~9 MiB VMEM incl. double-buffering -> fits all gens).
    tm = _round_up(M, 8) if M <= 256 else 256
    tn = _round_up(N, 128) if N <= 512 else 512
    tk = _pick_tk(K)
    Mp, Np, Kp = _round_up(M, tm), _round_up(N, tn), _round_up(K, tk)

    xp = jnp.pad(x_col, ((0, Mp - M), (0, Kp - K)))
    wp = jnp.pad(w_col, ((0, Kp - K), (0, Np - N)))
    if MXU_INPUT_DTYPE != jnp.float32:
        xp = xp.astype(MXU_INPUT_DTYPE)
        wp = wp.astype(MXU_INPUT_DTYPE)
    sp = jnp.pad(scale.reshape(1, N), ((0, 0), (0, Np - N)))
    bp = jnp.pad(shift.reshape(1, N), ((0, 0), (0, Np - N)))

    args = [xp, wp, sp, bp]
    in_specs = [
        pl.BlockSpec((tm, tk), lambda i, j, k: (i, k)),
        pl.BlockSpec((tk, tn), lambda i, j, k: (k, j)),
        pl.BlockSpec((1, tn), lambda i, j, k: (0, j)),   # K-independent: no re-DMA per step
        pl.BlockSpec((1, tn), lambda i, j, k: (0, j)),
    ]
    if residual is not None:
        rp = jnp.pad(residual, ((0, Mp - M), (0, Np - N)))
        args.append(rp)
        in_specs.append(pl.BlockSpec((tm, tn), lambda i, j, k: (i, j)))

    out = pl.pallas_call(
        partial(_matmul_bn_kernel, relu=relu),
        out_shape=jax.ShapeDtypeStruct((Mp, Np), jnp.float32),
        grid=(Mp // tm, Np // tn, Kp // tk),
        in_specs=in_specs,
        out_specs=pl.BlockSpec((tm, tn), lambda i, j, k: (i, j)),
        scratch_shapes=[pltpu.VMEM((tm, tn), jnp.float32)],
        compiler_params=pltpu.CompilerParams(
            dimension_semantics=("parallel", "parallel", "arbitrary")),
    )(*args)
    return out[:M, :N]


# ------------------------------- conv wrapper ---------------------------------

def _im2col(x_nhwc, k, stride, pad):
    """Extract conv patches; feature ordering (kh, kw, cin) matches the weight layout."""
    B, H, W, C = x_nhwc.shape
    Ho = (H + 2 * pad - k) // stride + 1
    Wo = (W + 2 * pad - k) // stride + 1
    xp = jnp.pad(x_nhwc, ((0, 0), (pad, pad), (pad, pad), (0, 0)))
    taps = []
    for i in range(k):
        for j in range(k):
            taps.append(xp[:, i:i + stride * Ho:stride, j:j + stride * Wo:stride, :])
    patches = jnp.stack(taps, axis=3)                    # [B, Ho, Wo, k*k, C]
    return patches.reshape(B * Ho * Wo, k * k * C), Ho, Wo


def conv_bn(x_nhwc, p, *, k, stride, pad, relu, residual=None):
    """conv(kxk, stride, pad, bias=False) + folded BN (+ residual) (+ ReLU), one Pallas call."""
    B = x_nhwc.shape[0]
    # TODO(synk): im2col patch extraction is left to XLA (pure layout plumbing).
    x_col, Ho, Wo = _im2col(x_nhwc, k, stride, pad)
    res2d = None
    if residual is not None:
        res2d = residual.reshape(B * Ho * Wo, residual.shape[-1])
    y = fused_matmul_bn(x_col, p["w"], p["scale"], p["shift"],
                        residual=res2d, relu=relu)
    return y.reshape(B, Ho, Wo, -1)


# -------------------------------- max pooling ---------------------------------

def _maxpool_kernel(p_ref, o_ref):
    m = p_ref[0]
    for t in range(1, p_ref.shape[0]):        # static 9-tap unrolled max tree
        m = jnp.maximum(m, p_ref[t])
    o_ref[...] = m.astype(o_ref.dtype)


def maxpool_3x3(x_nhwc, *, stride):
    """MaxPool2d(kernel=3, stride, padding=1) as a Pallas max-of-9-taps kernel."""
    B, H, W, C = x_nhwc.shape
    k, pad = 3, 1
    Ho = (H + 2 * pad - k) // stride + 1
    Wo = (W + 2 * pad - k) // stride + 1
    neg = float(jnp.finfo(jnp.float32).min)
    xp = jnp.pad(x_nhwc, ((0, 0), (pad, pad), (pad, pad), (0, 0)),
                 constant_values=neg)
    taps = [xp[:, i:i + stride * Ho:stride, j:j + stride * Wo:stride, :]
            for i in range(k) for j in range(k)]
    p = jnp.stack(taps, axis=0).reshape(k * k, B * Ho * Wo, C)

    M = B * Ho * Wo
    Mp, Cp = _round_up(M, 8), _round_up(C, 128)
    p = jnp.pad(p, ((0, 0), (0, Mp - M), (0, Cp - C)), constant_values=neg)
    tm = next(t for t in (512, 256, 128, 64, 32, 16, 8) if Mp % t == 0)

    out = pl.pallas_call(
        _maxpool_kernel,
        out_shape=jax.ShapeDtypeStruct((Mp, Cp), x_nhwc.dtype),
        grid=(Mp // tm,),
        in_specs=[pl.BlockSpec((k * k, tm, Cp), lambda i: (0, i, 0))],
        out_specs=pl.BlockSpec((tm, Cp), lambda i: (i, 0)),
        compiler_params=pltpu.CompilerParams(dimension_semantics=("parallel",)),
    )(p)
    return out[:M, :C].reshape(B, Ho, Wo, C)


# -------------------------------- parameters ----------------------------------

def _conv_bn_params(key, cin, cout, ksize):
    # torchvision init: kaiming_normal_(mode='fan_out', nonlinearity='relu'); BN gamma=1, beta=0.
    std = math.sqrt(2.0 / (cout * ksize * ksize))
    w = (std * jax.random.normal(key, (cout, cin, ksize, ksize))).astype(jnp.float32)
    # conv weight [Cout,Cin,kh,kw] -> matmul layout [(kh,kw,cin), Cout]
    w_col = jnp.transpose(w, (2, 3, 1, 0)).reshape(ksize * ksize * cin, cout)
    gamma = jnp.ones((cout,), jnp.float32)
    beta = jnp.zeros((cout,), jnp.float32)
    mean = jnp.zeros((cout,), jnp.float32)
    var = jnp.ones((cout,), jnp.float32)
    scale = gamma / jnp.sqrt(var + BN_EPS)          # BN folded for inference
    shift = beta - mean * scale
    return {"w": w_col, "scale": scale, "shift": shift}


def init_params(key, *, in_chans, layers, strides):
    keys = iter(jax.random.split(key, 64))
    params = {"conv1": _conv_bn_params(next(keys), in_chans, 64, 7)}
    inplanes = 64
    layer_strides = [1, strides[2], strides[3], strides[4]]
    for li in range(4):
        planes = 64 * (2 ** li)
        blocks = []
        for b in range(layers[li]):
            s = layer_strides[li] if b == 0 else 1
            cin = inplanes if b == 0 else planes
            blk = {"conv1": _conv_bn_params(next(keys), cin, planes, 3),
                   "conv2": _conv_bn_params(next(keys), planes, planes, 3)}
            if b == 0 and (s != 1 or inplanes != planes):
                blk["down"] = _conv_bn_params(next(keys), inplanes, planes, 1)
            blocks.append(blk)
        params[f"layer{li + 1}"] = blocks
        inplanes = planes
    return params


# ---------------------------------- forward -----------------------------------

def _basic_layer(x, blocks, *, stride):
    for idx, bp in enumerate(blocks):
        s = stride if idx == 0 else 1
        identity = x
        out = conv_bn(x, bp["conv1"], k=3, stride=s, pad=1, relu=True)
        if "down" in bp:
            identity = conv_bn(x, bp["down"], k=1, stride=s, pad=0, relu=False)
        # conv2 + bn2 + residual add + relu fused into a single kernel epilogue
        x = conv_bn(out, bp["conv2"], k=3, stride=1, pad=1, relu=True,
                    residual=identity)
    return x


def encoder_forward(params, x_nchw, *, strides):
    x_nhwc = jnp.transpose(x_nchw, (0, 2, 3, 1))
    x0 = conv_bn(x_nhwc, params["conv1"], k=7, stride=strides[0], pad=3, relu=True)
    x1 = maxpool_3x3(x0, stride=strides[1]) if strides[1] > 1 else x0
    # TODO(synk): Dropout2d(drop_rate) is identity at inference -> no kernel.
    l1 = _basic_layer(x1, params["layer1"], stride=1)
    l2 = _basic_layer(l1, params["layer2"], stride=strides[2])
    l3 = _basic_layer(l2, params["layer3"], stride=strides[3])
    l4 = _basic_layer(l3, params["layer4"], stride=strides[4])
    to_nchw = lambda t: jnp.transpose(t, (0, 3, 1, 2))
    return [x_nchw, to_nchw(x0), to_nchw(l1), to_nchw(l2), to_nchw(l3), to_nchw(l4)]


# ------------------------------------ main -------------------------------------

if __name__ == "__main__":
    # Encoder('resnet18', in_chans=4, drop_rate=0.1, output_stride=8), eval mode.
    in_chans = 4
    output_stride = 8
    layers = [2, 2, 2, 2]                       # resnet18

    strides, os_ = [], output_stride
    for _ in range(5):
        if os_ > 1:
            strides.append(2)
            os_ //= 2
        else:
            strides.append(1)                   # -> [2, 2, 2, 1, 1]

    B, H, W = 2, 16, 16
    key = jax.random.PRNGKey(0)
    k_img, k_par = jax.random.split(key)
    img = jax.random.normal(k_img, (B, in_chans, H, W), dtype=jnp.float32)
    params = init_params(k_par, in_chans=in_chans, layers=layers, strides=strides)

    fwd = jax.jit(partial(encoder_forward, strides=tuple(strides)))
    outs = fwd(params, img)
    jax.block_until_ready(outs)

    expected = [(B, in_chans, H, W), (B, 64, 8, 8), (B, 64, 4, 4),
                (B, 128, 2, 2), (B, 256, 2, 2), (B, 512, 2, 2)]
    for o, e in zip(outs, expected):
        assert o.shape == e, (o.shape, e)
        assert bool(jnp.all(jnp.isfinite(o))), "non-finite output"
    print("KERNEL_OK")
</pallas_src>

<mosaic_0001>
module attributes {stable_mosaic.version = 11 : i64} {
  func.func @_matmul_bn_kernel(%arg0: i32, %arg1: i32, %arg2: i32, %arg3: memref<128x256xf32, #tpu.memory_space<vmem>>, %arg4: memref<256x128xf32, #tpu.memory_space<vmem>>, %arg5: memref<1x128xf32, #tpu.memory_space<vmem>>, %arg6: memref<1x128xf32, #tpu.memory_space<vmem>>, %arg7: memref<128x128xf32, #tpu.memory_space<vmem>>, %arg8: memref<128x128xf32, #tpu.memory_space<vmem>>) attributes {dimension_semantics = [#tpu.dimension_semantics<parallel>, #tpu.dimension_semantics<parallel>, #tpu.dimension_semantics<arbitrary>], iteration_bounds = array<i64: 1, 1, 1>, scalar_prefetch = 0 : i64, scratch_operands = 1 : i64, tpu.core_type = #tpu.core_type<tc>, window_params = [{transform_indices = @transform_0, window_bounds = array<i64: 128, 256>}, {transform_indices = @transform_1, window_bounds = array<i64: 256, 128>}, {transform_indices = @transform_2, window_bounds = array<i64: 1, 128>}, {transform_indices = @transform_3, window_bounds = array<i64: 1, 128>}, {transform_indices = @transform_4, window_bounds = array<i64: 128, 128>}]} {
    %c0_i32 = arith.constant 0 : i32
    %0 = arith.cmpi eq, %arg2, %c0_i32 : i32
    %1 = arith.extui %0 : i1 to i32
    %c0_i32_0 = arith.constant 0 : i32
    %2 = arith.cmpi ne, %1, %c0_i32_0 : i32
    scf.if %2 {
      %cst_10 = arith.constant 0.000000e+00 : f32
      %12 = vector.broadcast %cst_10 : f32 to vector<128x128xf32>
      %c0_11 = arith.constant 0 : index
      %c0_12 = arith.constant 0 : index
      %13 = vector.load %arg8[%c0_11, %c0_12] : memref<128x128xf32, #tpu.memory_space<vmem>>, vector<128x128xf32>
      tpu.vector_store %arg8[%c0_11, %c0_12], %12 {strides = array<i32>} : memref<128x128xf32, #tpu.memory_space<vmem>>, vector<128x128xf32>,
    } else {
    }
    %c0 = arith.constant 0 : index
    %c0_1 = arith.constant 0 : index
    %3 = vector.load %arg8[%c0, %c0_1] : memref<128x128xf32, #tpu.memory_space<vmem>>, vector<128x128xf32>
    %c0_2 = arith.constant 0 : index
    %c0_3 = arith.constant 0 : index
    %4 = vector.load %arg3[%c0_2, %c0_3] : memref<128x256xf32, #tpu.memory_space<vmem>>, vector<128x256xf32>
    %c0_4 = arith.constant 0 : index
    %c0_5 = arith.constant 0 : index
    %5 = vector.load %arg4[%c0_4, %c0_5] : memref<256x128xf32, #tpu.memory_space<vmem>>, vector<256x128xf32>
    %cst = arith.constant dense<0.000000e+00> : vector<128x128xf32>
    %6 = tpu.matmul %4, %5, %cst {dimension_numbers = #tpu.dot_dimension_numbers<[1], [0], [0], [1], [0, 0, 1, 1], [], []>} : vector<128x256xf32>, vector<256x128xf32>, vector<128x128xf32> -> vector<128x128xf32>
    %7 = arith.addf %3, %6 : vector<128x128xf32>
    %c0_6 = arith.constant 0 : index
    %c0_7 = arith.constant 0 : index
    %8 = vector.load %arg8[%c0_6, %c0_7] : memref<128x128xf32, #tpu.memory_space<vmem>>, vector<128x128xf32>
    tpu.vector_store %arg8[%c0_6, %c0_7], %7 {strides = array<i32>} : memref<128x128xf32, #tpu.memory_space<vmem>>, vector<128x128xf32>,
    %c0_i32_8 = arith.constant 0 : i32
    %9 = arith.cmpi eq, %arg2, %c0_i32_8 : i32
    %10 = arith.extui %9 : i1 to i32
    %c0_i32_9 = arith.constant 0 : i32
    %11 = arith.cmpi ne, %10, %c0_i32_9 : i32
    scf.if %11 {
      %c0_10 = arith.constant 0 : index
      %c0_11 = arith.constant 0 : index
      %12 = vector.load %arg8[%c0_10, %c0_11] : memref<128x128xf32, #tpu.memory_space<vmem>>, vector<128x128xf32>
      %c0_12 = arith.constant 0 : index
      %c0_13 = arith.constant 0 : index
      %13 = vector.load %arg5[%c0_12, %c0_13] : memref<1x128xf32, #tpu.memory_space<vmem>>, vector<1x128xf32>
      %14 = vector.broadcast %13 : vector<1x128xf32> to vector<128x128xf32>
      %15 = arith.mulf %12, %14 : vector<128x128xf32>
      %c0_14 = arith.constant 0 : index
      %c0_15 = arith.constant 0 : index
      %16 = vector.load %arg6[%c0_14, %c0_15] : memref<1x128xf32, #tpu.memory_space<vmem>>, vector<1x128xf32>
      %17 = vector.broadcast %16 : vector<1x128xf32> to vector<128x128xf32>
      %18 = arith.addf %15, %17 : vector<128x128xf32>
      %cst_16 = arith.constant 0.000000e+00 : f32
      %19 = vector.broadcast %cst_16 : f32 to vector<128x128xf32>
      %20 = arith.maximumf %18, %19 : vector<128x128xf32>
      %c0_17 = arith.constant 0 : index
      %c0_18 = arith.constant 0 : index
      %21 = vector.load %arg7[%c0_17, %c0_18] : memref<128x128xf32, #tpu.memory_space<vmem>>, vector<128x128xf32>
      tpu.vector_store %arg7[%c0_17, %c0_18], %20 {strides = array<i32>} : memref<128x128xf32, #tpu.memory_space<vmem>>, vector<128x128xf32>,
    } else {
    }
    return
  }
  func.func @transform_0(%arg0: i32, %arg1: i32, %arg2: i32) -> (i32, i32) {
    %c0_i32 = arith.constant 0 : i32
    return %arg0, %arg2 : i32, i32
  }
  func.func @transform_1(%arg0: i32, %arg1: i32, %arg2: i32) -> (i32, i32) {
    %c0_i32 = arith.constant 0 : i32
    return %arg2, %arg1 : i32, i32
  }
  func.func @transform_2(%arg0: i32, %arg1: i32, %arg2: i32) -> (i32, i32) {
    %c0_i32 = arith.constant 0 : i32
    %c0_i32_0 = arith.constant 0 : i32
    return %c0_i32, %arg1 : i32, i32
  }
  func.func @transform_3(%arg0: i32, %arg1: i32, %arg2: i32) -> (i32, i32) {
    %c0_i32 = arith.constant 0 : i32
    %c0_i32_0 = arith.constant 0 : i32
    return %c0_i32, %arg1 : i32, i32
  }
  func.func @transform_4(%arg0: i32, %arg1: i32, %arg2: i32) -> (i32, i32) {
    %c0_i32 = arith.constant 0 : i32
    return %arg0, %arg1 : i32, i32
  }
}

module attributes {stable_mosaic.version = 11 : i64} {
  func.func @_maxpool_kernel(%arg0: i32, %arg1: memref<9x32x128xf32, #tpu.memory_space<vmem>>, %arg2: memref<32x128xf32, #tpu.memory_space<vmem>>) attributes {dimension_semantics = [#tpu.dimension_semantics<parallel>], iteration_bounds = array<i64: 1>, scalar_prefetch = 0 : i64, scratch_operands = 0 : i64, tpu.core_type = #tpu.core_type<tc>, window_params = [{transform_indices = @transform_0, window_bounds = array<i64: 9, 32, 128>}, {transform_indices = @transform_1, window_bounds = array<i64: 32, 128>}]} {
    %c0 = arith.constant 0 : index
    %c0_0 = arith.constant 0 : index
    %c0_1 = arith.constant 0 : index
    %0 = vector.load %arg1[%c0, %c0_0, %c0_1] : memref<9x32x128xf32, #tpu.memory_space<vmem>>, vector<1x32x128xf32>
    %1 = vector.shape_cast %0 : vector<1x32x128xf32> to vector<32x128xf32>
    %c1 = arith.constant 1 : index
    %c0_2 = arith.constant 0 : index
    %c0_3 = arith.constant 0 : index
    %2 = vector.load %arg1[%c1, %c0_2, %c0_3] : memref<9x32x128xf32, #tpu.memory_space<vmem>>, vector<1x32x128xf32>
    %3 = vector.shape_cast %2 : vector<1x32x128xf32> to vector<32x128xf32>
    %4 = arith.maximumf %1, %3 : vector<32x128xf32>
    %c2 = arith.constant 2 : index
    %c0_4 = arith.constant 0 : index
    %c0_5 = arith.constant 0 : index
    %5 = vector.load %arg1[%c2, %c0_4, %c0_5] : memref<9x32x128xf32, #tpu.memory_space<vmem>>, vector<1x32x128xf32>
    %6 = vector.shape_cast %5 : vector<1x32x128xf32> to vector<32x128xf32>
    %7 = arith.maximumf %4, %6 : vector<32x128xf32>
    %c3 = arith.constant 3 : index
    %c0_6 = arith.constant 0 : index
    %c0_7 = arith.constant 0 : index
    %8 = vector.load %arg1[%c3, %c0_6, %c0_7] : memref<9x32x128xf32, #tpu.memory_space<vmem>>, vector<1x32x128xf32>
    %9 = vector.shape_cast %8 : vector<1x32x128xf32> to vector<32x128xf32>
    %10 = arith.maximumf %7, %9 : vector<32x128xf32>
    %c4 = arith.constant 4 : index
    %c0_8 = arith.constant 0 : index
    %c0_9 = arith.constant 0 : index
    %11 = vector.load %arg1[%c4, %c0_8, %c0_9] : memref<9x32x128xf32, #tpu.memory_space<vmem>>, vector<1x32x128xf32>
    %12 = vector.shape_cast %11 : vector<1x32x128xf32> to vector<32x128xf32>
    %13 = arith.maximumf %10, %12 : vector<32x128xf32>
    %c5 = arith.constant 5 : index
    %c0_10 = arith.constant 0 : index
    %c0_11 = arith.constant 0 : index
    %14 = vector.load %arg1[%c5, %c0_10, %c0_11] : memref<9x32x128xf32, #tpu.memory_space<vmem>>, vector<1x32x128xf32>
    %15 = vector.shape_cast %14 : vector<1x32x128xf32> to vector<32x128xf32>
    %16 = arith.maximumf %13, %15 : vector<32x128xf32>
    %c6 = arith.constant 6 : index
    %c0_12 = arith.constant 0 : index
    %c0_13 = arith.constant 0 : index
    %17 = vector.load %arg1[%c6, %c0_12, %c0_13] : memref<9x32x128xf32, #tpu.memory_space<vmem>>, vector<1x32x128xf32>
    %18 = vector.shape_cast %17 : vector<1x32x128xf32> to vector<32x128xf32>
    %19 = arith.maximumf %16, %18 : vector<32x128xf32>
    %c7 = arith.constant 7 : index
    %c0_14 = arith.constant 0 : index
    %c0_15 = arith.constant 0 : index
    %20 = vector.load %arg1[%c7, %c0_14, %c0_15] : memref<9x32x128xf32, #tpu.memory_space<vmem>>, vector<1x32x128xf32>
    %21 = vector.shape_cast %20 : vector<1x32x128xf32> to vector<32x128xf32>
    %22 = arith.maximumf %19, %21 : vector<32x128xf32>
    %c8 = arith.constant 8 : index
    %c0_16 = arith.constant 0 : index
    %c0_17 = arith.constant 0 : index
    %23 = vector.load %arg1[%c8, %c0_16, %c0_17] : memref<9x32x128xf32, #tpu.memory_space<vmem>>, vector<1x32x128xf32>
    %24 = vector.shape_cast %23 : vector<1x32x128xf32> to vector<32x128xf32>
    %25 = arith.maximumf %22, %24 : vector<32x128xf32>
    %c0_18 = arith.constant 0 : index
    %c0_19 = arith.constant 0 : index
    %26 = vector.load %arg2[%c0_18, %c0_19] : memref<32x128xf32, #tpu.memory_space<vmem>>, vector<32x128xf32>
    tpu.vector_store %arg2[%c0_18, %c0_19], %25 {strides = array<i32>} : memref<32x128xf32, #tpu.memory_space<vmem>>, vector<32x128xf32>,
    return
  }
  func.func @transform_0(%arg0: i32) -> (i32, i32, i32) {
    %c0_i32 = arith.constant 0 : i32
    %c0_i32_0 = arith.constant 0 : i32
    %c0_i32_1 = arith.constant 0 : i32
    return %c0_i32, %arg0, %c0_i32_0 : i32, i32, i32
  }
  func.func @transform_1(%arg0: i32) -> (i32, i32) {
    %c0_i32 = arith.constant 0 : i32
    %c0_i32_0 = arith.constant 0 : i32
    return %arg0, %c0_i32 : i32, i32
  }
}

module attributes {stable_mosaic.version = 11 : i64} {
  func.func @_matmul_bn_kernel(%arg0: i32, %arg1: i32, %arg2: i32, %arg3: memref<32x640xf32, #tpu.memory_space<vmem>>, %arg4: memref<640x128xf32, #tpu.memory_space<vmem>>, %arg5: memref<1x128xf32, #tpu.memory_space<vmem>>, %arg6: memref<1x128xf32, #tpu.memory_space<vmem>>, %arg7: memref<32x128xf32, #tpu.memory_space<vmem>>, %arg8: memref<32x128xf32, #tpu.memory_space<vmem>>) attributes {dimension_semantics = [#tpu.dimension_semantics<parallel>, #tpu.dimension_semantics<parallel>, #tpu.dimension_semantics<arbitrary>], iteration_bounds = array<i64: 1, 1, 1>, scalar_prefetch = 0 : i64, scratch_operands = 1 : i64, tpu.core_type = #tpu.core_type<tc>, window_params = [{transform_indices = @transform_0, window_bounds = array<i64: 32, 640>}, {transform_indices = @transform_1, window_bounds = array<i64: 640, 128>}, {transform_indices = @transform_2, window_bounds = array<i64: 1, 128>}, {transform_indices = @transform_3, window_bounds = array<i64: 1, 128>}, {transform_indices = @transform_4, window_bounds = array<i64: 32, 128>}]} {
    %c0_i32 = arith.constant 0 : i32
    %0 = arith.cmpi eq, %arg2, %c0_i32 : i32
    %1 = arith.extui %0 : i1 to i32
    %c0_i32_0 = arith.constant 0 : i32
    %2 = arith.cmpi ne, %1, %c0_i32_0 : i32
    scf.if %2 {
      %cst_10 = arith.constant 0.000000e+00 : f32
      %12 = vector.broadcast %cst_10 : f32 to vector<32x128xf32>
      %c0_11 = arith.constant 0 : index
      %c0_12 = arith.constant 0 : index
      %13 = vector.load %arg8[%c0_11, %c0_12] : memref<32x128xf32, #tpu.memory_space<vmem>>, vector<32x128xf32>
      tpu.vector_store %arg8[%c0_11, %c0_12], %12 {strides = array<i32>} : memref<32x128xf32, #tpu.memory_space<vmem>>, vector<32x128xf32>,
    } else {
    }
    %c0 = arith.constant 0 : index
    %c0_1 = arith.constant 0 : index
    %3 = vector.load %arg8[%c0, %c0_1] : memref<32x128xf32, #tpu.memory_space<vmem>>, vector<32x128xf32>
    %c0_2 = arith.constant 0 : index
    %c0_3 = arith.constant 0 : index
    %4 = vector.load %arg3[%c0_2, %c0_3] : memref<32x640xf32, #tpu.memory_space<vmem>>, vector<32x640xf32>
    %c0_4 = arith.constant 0 : index
    %c0_5 = arith.constant 0 : index
    %5 = vector.load %arg4[%c0_4, %c0_5] : memref<640x128xf32, #tpu.memory_space<vmem>>, vector<640x128xf32>
    %cst = arith.constant dense<0.000000e+00> : vector<32x128xf32>
    %6 = tpu.matmul %4, %5, %cst {dimension_numbers = #tpu.dot_dimension_numbers<[1], [0], [0], [1], [0, 0, 1, 1], [], []>} : vector<32x640xf32>, vector<640x128xf32>, vector<32x128xf32> -> vector<32x128xf32>
    %7 = arith.addf %3, %6 : vector<32x128xf32>
    %c0_6 = arith.constant 0 : index
    %c0_7 = arith.constant 0 : index
    %8 = vector.load %arg8[%c0_6, %c0_7] : memref<32x128xf32, #tpu.memory_space<vmem>>, vector<32x128xf32>
    tpu.vector_store %arg8[%c0_6, %c0_7], %7 {strides = array<i32>} : memref<32x128xf32, #tpu.memory_space<vmem>>, vector<32x128xf32>,
    %c0_i32_8 = arith.constant 0 : i32
    %9 = arith.cmpi eq, %arg2, %c0_i32_8 : i32
    %10 = arith.extui %9 : i1 to i32
    %c0_i32_9 = arith.constant 0 : i32
    %11 = arith.cmpi ne, %10, %c0_i32_9 : i32
    scf.if %11 {
      %c0_10 = arith.constant 0 : index
      %c0_11 = arith.constant 0 : index
      %12 = vector.load %arg8[%c0_10, %c0_11] : memref<32x128xf32, #tpu.memory_space<vmem>>, vector<32x128xf32>
      %c0_12 = arith.constant 0 : index
      %c0_13 = arith.constant 0 : index
      %13 = vector.load %arg5[%c0_12, %c0_13] : memref<1x128xf32, #tpu.memory_space<vmem>>, vector<1x128xf32>
      %14 = vector.broadcast %13 : vector<1x128xf32> to vector<32x128xf32>
      %15 = arith.mulf %12, %14 : vector<32x128xf32>
      %c0_14 = arith.constant 0 : index
      %c0_15 = arith.constant 0 : index
      %16 = vector.load %arg6[%c0_14, %c0_15] : memref<1x128xf32, #tpu.memory_space<vmem>>, vector<1x128xf32>
      %17 = vector.broadcast %16 : vector<1x128xf32> to vector<32x128xf32>
      %18 = arith.addf %15, %17 : vector<32x128xf32>
      %cst_16 = arith.constant 0.000000e+00 : f32
      %19 = vector.broadcast %cst_16 : f32 to vector<32x128xf32>
      %20 = arith.maximumf %18, %19 : vector<32x128xf32>
      %c0_17 = arith.constant 0 : index
      %c0_18 = arith.constant 0 : index
      %21 = vector.load %arg7[%c0_17, %c0_18] : memref<32x128xf32, #tpu.memory_space<vmem>>, vector<32x128xf32>
      tpu.vector_store %arg7[%c0_17, %c0_18], %20 {strides = array<i32>} : memref<32x128xf32, #tpu.memory_space<vmem>>, vector<32x128xf32>,
    } else {
    }
    return
  }
  func.func @transform_0(%arg0: i32, %arg1: i32, %arg2: i32) -> (i32, i32) {
    %c0_i32 = arith.constant 0 : i32
    return %arg0, %arg2 : i32, i32
  }
  func.func @transform_1(%arg0: i32, %arg1: i32, %arg2: i32) -> (i32, i32) {
    %c0_i32 = arith.constant 0 : i32
    return %arg2, %arg1 : i32, i32
  }
  func.func @transform_2(%arg0: i32, %arg1: i32, %arg2: i32) -> (i32, i32) {
    %c0_i32 = arith.constant 0 : i32
    %c0_i32_0 = arith.constant 0 : i32
    return %c0_i32, %arg1 : i32, i32
  }
  func.func @transform_3(%arg0: i32, %arg1: i32, %arg2: i32) -> (i32, i32) {
    %c0_i32 = arith.constant 0 : i32
    %c0_i32_0 = arith.constant 0 : i32
    return %c0_i32, %arg1 : i32, i32
  }
  func.func @transform_4(%arg0: i32, %arg1: i32, %arg2: i32) -> (i32, i32) {
    %c0_i32 = arith.constant 0 : i32
    return %arg0, %arg1 : i32, i32
  }
}

module attributes {stable_mosaic.version = 11 : i64} {
  func.func @_matmul_bn_kernel(%arg0: i32, %arg1: i32, %arg2: i32, %arg3: memref<32x640xf32, #tpu.memory_space<vmem>>, %arg4: memref<640x128xf32, #tpu.memory_space<vmem>>, %arg5: memref<1x128xf32, #tpu.memory_space<vmem>>, %arg6: memref<1x128xf32, #tpu.memory_space<vmem>>, %arg7: memref<32x128xf32, #tpu.memory_space<vmem>>, %arg8: memref<32x128xf32, #tpu.memory_space<vmem>>, %arg9: memref<32x128xf32, #tpu.memory_space<vmem>>) attributes {dimension_semantics = [#tpu.dimension_semantics<parallel>, #tpu.dimension_semantics<parallel>, #tpu.dimension_semantics<arbitrary>], iteration_bounds = array<i64: 1, 1, 1>, scalar_prefetch = 0 : i64, scratch_operands = 1 : i64, tpu.core_type = #tpu.core_type<tc>, window_params = [{transform_indices = @transform_0, window_bounds = array<i64: 32, 640>}, {transform_indices = @transform_1, window_bounds = array<i64: 640, 128>}, {transform_indices = @transform_2, window_bounds = array<i64: 1, 128>}, {transform_indices = @transform_3, window_bounds = array<i64: 1, 128>}, {transform_indices = @transform_4, window_bounds = array<i64: 32, 128>}, {transform_indices = @transform_5, window_bounds = array<i64: 32, 128>}]} {
    %c0_i32 = arith.constant 0 : i32
    %0 = arith.cmpi eq, %arg2, %c0_i32 : i32
    %1 = arith.extui %0 : i1 to i32
    %c0_i32_0 = arith.constant 0 : i32
    %2 = arith.cmpi ne, %1, %c0_i32_0 : i32
    scf.if %2 {
      %cst_10 = arith.constant 0.000000e+00 : f32
      %12 = vector.broadcast %cst_10 : f32 to vector<32x128xf32>
      %c0_11 = arith.constant 0 : index
      %c0_12 = arith.constant 0 : index
      %13 = vector.load %arg9[%c0_11, %c0_12] : memref<32x128xf32, #tpu.memory_space<vmem>>, vector<32x128xf32>
      tpu.vector_store %arg9[%c0_11, %c0_12], %12 {strides = array<i32>} : memref<32x128xf32, #tpu.memory_space<vmem>>, vector<32x128xf32>,
    } else {
    }
    %c0 = arith.constant 0 : index
    %c0_1 = arith.constant 0 : index
    %3 = vector.load %arg9[%c0, %c0_1] : memref<32x128xf32, #tpu.memory_space<vmem>>, vector<32x128xf32>
    %c0_2 = arith.constant 0 : index
    %c0_3 = arith.constant 0 : index
    %4 = vector.load %arg3[%c0_2, %c0_3] : memref<32x640xf32, #tpu.memory_space<vmem>>, vector<32x640xf32>
    %c0_4 = arith.constant 0 : index
    %c0_5 = arith.constant 0 : index
    %5 = vector.load %arg4[%c0_4, %c0_5] : memref<640x128xf32, #tpu.memory_space<vmem>>, vector<640x128xf32>
    %cst = arith.constant dense<0.000000e+00> : vector<32x128xf32>
    %6 = tpu.matmul %4, %5, %cst {dimension_numbers = #tpu.dot_dimension_numbers<[1], [0], [0], [1], [0, 0, 1, 1], [], []>} : vector<32x640xf32>, vector<640x128xf32>, vector<32x128xf32> -> vector<32x128xf32>
    %7 = arith.addf %3, %6 : vector<32x128xf32>
    %c0_6 = arith.constant 0 : index
    %c0_7 = arith.constant 0 : index
    %8 = vector.load %arg9[%c0_6, %c0_7] : memref<32x128xf32, #tpu.memory_space<vmem>>, vector<32x128xf32>
    tpu.vector_store %arg9[%c0_6, %c0_7], %7 {strides = array<i32>} : memref<32x128xf32, #tpu.memory_space<vmem>>, vector<32x128xf32>,
    %c0_i32_8 = arith.constant 0 : i32
    %9 = arith.cmpi eq, %arg2, %c0_i32_8 : i32
    %10 = arith.extui %9 : i1 to i32
    %c0_i32_9 = arith.constant 0 : i32
    %11 = arith.cmpi ne, %10, %c0_i32_9 : i32
    scf.if %11 {
      %c0_10 = arith.constant 0 : index
      %c0_11 = arith.constant 0 : index
      %12 = vector.load %arg9[%c0_10, %c0_11] : memref<32x128xf32, #tpu.memory_space<vmem>>, vector<32x128xf32>
      %c0_12 = arith.constant 0 : index
      %c0_13 = arith.constant 0 : index
      %13 = vector.load %arg5[%c0_12, %c0_13] : memref<1x128xf32, #tpu.memory_space<vmem>>, vector<1x128xf32>
      %14 = vector.broadcast %13 : vector<1x128xf32> to vector<32x128xf32>
      %15 = arith.mulf %12, %14 : vector<32x128xf32>
      %c0_14 = arith.constant 0 : index
      %c0_15 = arith.constant 0 : index
      %16 = vector.load %arg6[%c0_14, %c0_15] : memref<1x128xf32, #tpu.memory_space<vmem>>, vector<1x128xf32>
      %17 = vector.broadcast %16 : vector<1x128xf32> to vector<32x128xf32>
      %18 = arith.addf %15, %17 : vector<32x128xf32>
      %c0_16 = arith.constant 0 : index
      %c0_17 = arith.constant 0 : index
      %19 = vector.load %arg7[%c0_16, %c0_17] : memref<32x128xf32, #tpu.memory_space<vmem>>, vector<32x128xf32>
      %20 = arith.addf %18, %19 : vector<32x128xf32>
      %cst_18 = arith.constant 0.000000e+00 : f32
      %21 = vector.broadcast %cst_18 : f32 to vector<32x128xf32>
      %22 = arith.maximumf %20, %21 : vector<32x128xf32>
      %c0_19 = arith.constant 0 : index
      %c0_20 = arith.constant 0 : index
      %23 = vector.load %arg8[%c0_19, %c0_20] : memref<32x128xf32, #tpu.memory_space<vmem>>, vector<32x128xf32>
      tpu.vector_store %arg8[%c0_19, %c0_20], %22 {strides = array<i32>} : memref<32x128xf32, #tpu.memory_space<vmem>>, vector<32x128xf32>,
    } else {
    }
    return
  }
  func.func @transform_0(%arg0: i32, %arg1: i32, %arg2: i32) -> (i32, i32) {
    %c0_i32 = arith.constant 0 : i32
    return %arg0, %arg2 : i32, i32
  }
  func.func @transform_1(%arg0: i32, %arg1: i32, %arg2: i32) -> (i32, i32) {
    %c0_i32 = arith.constant 0 : i32
    return %arg2, %arg1 : i32, i32
  }
  func.func @transform_2(%arg0: i32, %arg1: i32, %arg2: i32) -> (i32, i32) {
    %c0_i32 = arith.constant 0 : i32
    %c0_i32_0 = arith.constant 0 : i32
    return %c0_i32, %arg1 : i32, i32
  }
  func.func @transform_3(%arg0: i32, %arg1: i32, %arg2: i32) -> (i32, i32) {
    %c0_i32 = arith.constant 0 : i32
    %c0_i32_0 = arith.constant 0 : i32
    return %c0_i32, %arg1 : i32, i32
  }
  func.func @transform_4(%arg0: i32, %arg1: i32, %arg2: i32) -> (i32, i32) {
    %c0_i32 = arith.constant 0 : i32
    return %arg0, %arg1 : i32, i32
  }
  func.func @transform_5(%arg0: i32, %arg1: i32, %arg2: i32) -> (i32, i32) {
    %c0_i32 = arith.constant 0 : i32
    return %arg0, %arg1 : i32, i32
  }
}

module attributes {stable_mosaic.version = 11 : i64} {
  func.func @_matmul_bn_kernel(%arg0: i32, %arg1: i32, %arg2: i32, %arg3: memref<8x640xf32, #tpu.memory_space<vmem>>, %arg4: memref<640x128xf32, #tpu.memory_space<vmem>>, %arg5: memref<1x128xf32, #tpu.memory_space<vmem>>, %arg6: memref<1x128xf32, #tpu.memory_space<vmem>>, %arg7: memref<8x128xf32, #tpu.memory_space<vmem>>, %arg8: memref<8x128xf32, #tpu.memory_space<vmem>>) attributes {dimension_semantics = [#tpu.dimension_semantics<parallel>, #tpu.dimension_semantics<parallel>, #tpu.dimension_semantics<arbitrary>], iteration_bounds = array<i64: 1, 1, 1>, scalar_prefetch = 0 : i64, scratch_operands = 1 : i64, tpu.core_type = #tpu.core_type<tc>, window_params = [{transform_indices = @transform_0, window_bounds = array<i64: 8, 640>}, {transform_indices = @transform_1, window_bounds = array<i64: 640, 128>}, {transform_indices = @transform_2, window_bounds = array<i64: 1, 128>}, {transform_indices = @transform_3, window_bounds = array<i64: 1, 128>}, {transform_indices = @transform_4, window_bounds = array<i64: 8, 128>}]} {
    %c0_i32 = arith.constant 0 : i32
    %0 = arith.cmpi eq, %arg2, %c0_i32 : i32
    %1 = arith.extui %0 : i1 to i32
    %c0_i32_0 = arith.constant 0 : i32
    %2 = arith.cmpi ne, %1, %c0_i32_0 : i32
    scf.if %2 {
      %cst_10 = arith.constant 0.000000e+00 : f32
      %12 = vector.broadcast %cst_10 : f32 to vector<8x128xf32>
      %c0_11 = arith.constant 0 : index
      %c0_12 = arith.constant 0 : index
      %13 = vector.load %arg8[%c0_11, %c0_12] : memref<8x128xf32, #tpu.memory_space<vmem>>, vector<8x128xf32>
      tpu.vector_store %arg8[%c0_11, %c0_12], %12 {strides = array<i32>} : memref<8x128xf32, #tpu.memory_space<vmem>>, vector<8x128xf32>,
    } else {
    }
    %c0 = arith.constant 0 : index
    %c0_1 = arith.constant 0 : index
    %3 = vector.load %arg8[%c0, %c0_1] : memref<8x128xf32, #tpu.memory_space<vmem>>, vector<8x128xf32>
    %c0_2 = arith.constant 0 : index
    %c0_3 = arith.constant 0 : index
    %4 = vector.load %arg3[%c0_2, %c0_3] : memref<8x640xf32, #tpu.memory_space<vmem>>, vector<8x640xf32>
    %c0_4 = arith.constant 0 : index
    %c0_5 = arith.constant 0 : index
    %5 = vector.load %arg4[%c0_4, %c0_5] : memref<640x128xf32, #tpu.memory_space<vmem>>, vector<640x128xf32>
    %cst = arith.constant dense<0.000000e+00> : vector<8x128xf32>
    %6 = tpu.matmul %4, %5, %cst {dimension_numbers = #tpu.dot_dimension_numbers<[1], [0], [0], [1], [0, 0, 1, 1], [], []>} : vector<8x640xf32>, vector<640x128xf32>, vector<8x128xf32> -> vector<8x128xf32>
    %7 = arith.addf %3, %6 : vector<8x128xf32>
    %c0_6 = arith.constant 0 : index
    %c0_7 = arith.constant 0 : index
    %8 = vector.load %arg8[%c0_6, %c0_7] : memref<8x128xf32, #tpu.memory_space<vmem>>, vector<8x128xf32>
    tpu.vector_store %arg8[%c0_6, %c0_7], %7 {strides = array<i32>} : memref<8x128xf32, #tpu.memory_space<vmem>>, vector<8x128xf32>,
    %c0_i32_8 = arith.constant 0 : i32
    %9 = arith.cmpi eq, %arg2, %c0_i32_8 : i32
    %10 = arith.extui %9 : i1 to i32
    %c0_i32_9 = arith.constant 0 : i32
    %11 = arith.cmpi ne, %10, %c0_i32_9 : i32
    scf.if %11 {
      %c0_10 = arith.constant 0 : index
      %c0_11 = arith.constant 0 : index
      %12 = vector.load %arg8[%c0_10, %c0_11] : memref<8x128xf32, #tpu.memory_space<vmem>>, vector<8x128xf32>
      %c0_12 = arith.constant 0 : index
      %c0_13 = arith.constant 0 : index
      %13 = vector.load %arg5[%c0_12, %c0_13] : memref<1x128xf32, #tpu.memory_space<vmem>>, vector<1x128xf32>
      %14 = vector.broadcast %13 : vector<1x128xf32> to vector<8x128xf32>
      %15 = arith.mulf %12, %14 : vector<8x128xf32>
      %c0_14 = arith.constant 0 : index
      %c0_15 = arith.constant 0 : index
      %16 = vector.load %arg6[%c0_14, %c0_15] : memref<1x128xf32, #tpu.memory_space<vmem>>, vector<1x128xf32>
      %17 = vector.broadcast %16 : vector<1x128xf32> to vector<8x128xf32>
      %18 = arith.addf %15, %17 : vector<8x128xf32>
      %cst_16 = arith.constant 0.000000e+00 : f32
      %19 = vector.broadcast %cst_16 : f32 to vector<8x128xf32>
      %20 = arith.maximumf %18, %19 : vector<8x128xf32>
      %c0_17 = arith.constant 0 : index
      %c0_18 = arith.constant 0 : index
      %21 = vector.load %arg7[%c0_17, %c0_18] : memref<8x128xf32, #tpu.memory_space<vmem>>, vector<8x128xf32>
      tpu.vector_store %arg7[%c0_17, %c0_18], %20 {strides = array<i32>} : memref<8x128xf32, #tpu.memory_space<vmem>>, vector<8x128xf32>,
    } else {
    }
    return
  }
  func.func @transform_0(%arg0: i32, %arg1: i32, %arg2: i32) -> (i32, i32) {
    %c0_i32 = arith.constant 0 : i32
    return %arg0, %arg2 : i32, i32
  }
  func.func @transform_1(%arg0: i32, %arg1: i32, %arg2: i32) -> (i32, i32) {
    %c0_i32 = arith.constant 0 : i32
    return %arg2, %arg1 : i32, i32
  }
  func.func @transform_2(%arg0: i32, %arg1: i32, %arg2: i32) -> (i32, i32) {
    %c0_i32 = arith.constant 0 : i32
    %c0_i32_0 = arith.constant 0 : i32
    return %c0_i32, %arg1 : i32, i32
  }
  func.func @transform_3(%arg0: i32, %arg1: i32, %arg2: i32) -> (i32, i32) {
    %c0_i32 = arith.constant 0 : i32
    %c0_i32_0 = arith.constant 0 : i32
    return %c0_i32, %arg1 : i32, i32
  }
  func.func @transform_4(%arg0: i32, %arg1: i32, %arg2: i32) -> (i32, i32) {
    %c0_i32 = arith.constant 0 : i32
    return %arg0, %arg1 : i32, i32
  }
}

module attributes {stable_mosaic.version = 11 : i64} {
  func.func @_matmul_bn_kernel(%arg0: i32, %arg1: i32, %arg2: i32, %arg3: memref<8x128xf32, #tpu.memory_space<vmem>>, %arg4: memref<128x128xf32, #tpu.memory_space<vmem>>, %arg5: memref<1x128xf32, #tpu.memory_space<vmem>>, %arg6: memref<1x128xf32, #tpu.memory_space<vmem>>, %arg7: memref<8x128xf32, #tpu.memory_space<vmem>>, %arg8: memref<8x128xf32, #tpu.memory_space<vmem>>) attributes {dimension_semantics = [#tpu.dimension_semantics<parallel>, #tpu.dimension_semantics<parallel>, #tpu.dimension_semantics<arbitrary>], iteration_bounds = array<i64: 1, 1, 1>, scalar_prefetch = 0 : i64, scratch_operands = 1 : i64, tpu.core_type = #tpu.core_type<tc>, window_params = [{transform_indices = @transform_0, window_bounds = array<i64: 8, 128>}, {transform_indices = @transform_1, window_bounds = array<i64: 128, 128>}, {transform_indices = @transform_2, window_bounds = array<i64: 1, 128>}, {transform_indices = @transform_3, window_bounds = array<i64: 1, 128>}, {transform_indices = @transform_4, window_bounds = array<i64: 8, 128>}]} {
    %c0_i32 = arith.constant 0 : i32
    %0 = arith.cmpi eq, %arg2, %c0_i32 : i32
    %1 = arith.extui %0 : i1 to i32
    %c0_i32_0 = arith.constant 0 : i32
    %2 = arith.cmpi ne, %1, %c0_i32_0 : i32
    scf.if %2 {
      %cst_10 = arith.constant 0.000000e+00 : f32
      %12 = vector.broadcast %cst_10 : f32 to vector<8x128xf32>
      %c0_11 = arith.constant 0 : index
      %c0_12 = arith.constant 0 : index
      %13 = vector.load %arg8[%c0_11, %c0_12] : memref<8x128xf32, #tpu.memory_space<vmem>>, vector<8x128xf32>
      tpu.vector_store %arg8[%c0_11, %c0_12], %12 {strides = array<i32>} : memref<8x128xf32, #tpu.memory_space<vmem>>, vector<8x128xf32>,
    } else {
    }
    %c0 = arith.constant 0 : index
    %c0_1 = arith.constant 0 : index
    %3 = vector.load %arg8[%c0, %c0_1] : memref<8x128xf32, #tpu.memory_space<vmem>>, vector<8x128xf32>
    %c0_2 = arith.constant 0 : index
    %c0_3 = arith.constant 0 : index
    %4 = vector.load %arg3[%c0_2, %c0_3] : memref<8x128xf32, #tpu.memory_space<vmem>>, vector<8x128xf32>
    %c0_4 = arith.constant 0 : index
    %c0_5 = arith.constant 0 : index
    %5 = vector.load %arg4[%c0_4, %c0_5] : memref<128x128xf32, #tpu.memory_space<vmem>>, vector<128x128xf32>
    %cst = arith.constant dense<0.000000e+00> : vector<8x128xf32>
    %6 = tpu.matmul %4, %5, %cst {dimension_numbers = #tpu.dot_dimension_numbers<[1], [0], [0], [1], [0, 0, 1, 1], [], []>} : vector<8x128xf32>, vector<128x128xf32>, vector<8x128xf32> -> vector<8x128xf32>
    %7 = arith.addf %3, %6 : vector<8x128xf32>
    %c0_6 = arith.constant 0 : index
    %c0_7 = arith.constant 0 : index
    %8 = vector.load %arg8[%c0_6, %c0_7] : memref<8x128xf32, #tpu.memory_space<vmem>>, vector<8x128xf32>
    tpu.vector_store %arg8[%c0_6, %c0_7], %7 {strides = array<i32>} : memref<8x128xf32, #tpu.memory_space<vmem>>, vector<8x128xf32>,
    %c0_i32_8 = arith.constant 0 : i32
    %9 = arith.cmpi eq, %arg2, %c0_i32_8 : i32
    %10 = arith.extui %9 : i1 to i32
    %c0_i32_9 = arith.constant 0 : i32
    %11 = arith.cmpi ne, %10, %c0_i32_9 : i32
    scf.if %11 {
      %c0_10 = arith.constant 0 : index
      %c0_11 = arith.constant 0 : index
      %12 = vector.load %arg8[%c0_10, %c0_11] : memref<8x128xf32, #tpu.memory_space<vmem>>, vector<8x128xf32>
      %c0_12 = arith.constant 0 : index
      %c0_13 = arith.constant 0 : index
      %13 = vector.load %arg5[%c0_12, %c0_13] : memref<1x128xf32, #tpu.memory_space<vmem>>, vector<1x128xf32>
      %14 = vector.broadcast %13 : vector<1x128xf32> to vector<8x128xf32>
      %15 = arith.mulf %12, %14 : vector<8x128xf32>
      %c0_14 = arith.constant 0 : index
      %c0_15 = arith.constant 0 : index
      %16 = vector.load %arg6[%c0_14, %c0_15] : memref<1x128xf32, #tpu.memory_space<vmem>>, vector<1x128xf32>
      %17 = vector.broadcast %16 : vector<1x128xf32> to vector<8x128xf32>
      %18 = arith.addf %15, %17 : vector<8x128xf32>
      %c0_16 = arith.constant 0 : index
      %c0_17 = arith.constant 0 : index
      %19 = vector.load %arg7[%c0_16, %c0_17] : memref<8x128xf32, #tpu.memory_space<vmem>>, vector<8x128xf32>
      tpu.vector_store %arg7[%c0_16, %c0_17], %18 {strides = array<i32>} : memref<8x128xf32, #tpu.memory_space<vmem>>, vector<8x128xf32>,
    } else {
    }
    return
  }
  func.func @transform_0(%arg0: i32, %arg1: i32, %arg2: i32) -> (i32, i32) {
    %c0_i32 = arith.constant 0 : i32
    return %arg0, %arg2 : i32, i32
  }
  func.func @transform_1(%arg0: i32, %arg1: i32, %arg2: i32) -> (i32, i32) {
    %c0_i32 = arith.constant 0 : i32
    return %arg2, %arg1 : i32, i32
  }
  func.func @transform_2(%arg0: i32, %arg1: i32, %arg2: i32) -> (i32, i32) {
    %c0_i32 = arith.constant 0 : i32
    %c0_i32_0 = arith.constant 0 : i32
    return %c0_i32, %arg1 : i32, i32
  }
  func.func @transform_3(%arg0: i32, %arg1: i32, %arg2: i32) -> (i32, i32) {
    %c0_i32 = arith.constant 0 : i32
    %c0_i32_0 = arith.constant 0 : i32
    return %c0_i32, %arg1 : i32, i32
  }
  func.func @transform_4(%arg0: i32, %arg1: i32, %arg2: i32) -> (i32, i32) {
    %c0_i32 = arith.constant 0 : i32
    return %arg0, %arg1 : i32, i32
  }
}

module attributes {stable_mosaic.version = 11 : i64} {
  func.func @_matmul_bn_kernel(%arg0: i32, %arg1: i32, %arg2: i32, %arg3: memref<8x384xf32, #tpu.memory_space<vmem>>, %arg4: memref<384x128xf32, #tpu.memory_space<vmem>>, %arg5: memref<1x128xf32, #tpu.memory_space<vmem>>, %arg6: memref<1x128xf32, #tpu.memory_space<vmem>>, %arg7: memref<8x128xf32, #tpu.memory_space<vmem>>, %arg8: memref<8x128xf32, #tpu.memory_space<vmem>>, %arg9: memref<8x128xf32, #tpu.memory_space<vmem>>) attributes {dimension_semantics = [#tpu.dimension_semantics<parallel>, #tpu.dimension_semantics<parallel>, #tpu.dimension_semantics<arbitrary>], iteration_bounds = array<i64: 1, 1, 3>, scalar_prefetch = 0 : i64, scratch_operands = 1 : i64, tpu.core_type = #tpu.core_type<tc>, window_params = [{transform_indices = @transform_0, window_bounds = array<i64: 8, 384>}, {transform_indices = @transform_1, window_bounds = array<i64: 384, 128>}, {transform_indices = @transform_2, window_bounds = array<i64: 1, 128>}, {transform_indices = @transform_3, window_bounds = array<i64: 1, 128>}, {transform_indices = @transform_4, window_bounds = array<i64: 8, 128>}, {transform_indices = @transform_5, window_bounds = array<i64: 8, 128>}]} {
    %c0_i32 = arith.constant 0 : i32
    %0 = arith.cmpi eq, %arg2, %c0_i32 : i32
    %1 = arith.extui %0 : i1 to i32
    %c0_i32_0 = arith.constant 0 : i32
    %2 = arith.cmpi ne, %1, %c0_i32_0 : i32
    scf.if %2 {
      %cst_9 = arith.constant 0.000000e+00 : f32
      %12 = vector.broadcast %cst_9 : f32 to vector<8x128xf32>
      %c0_10 = arith.constant 0 : index
      %c0_11 = arith.constant 0 : index
      %13 = vector.load %arg9[%c0_10, %c0_11] : memref<8x128xf32, #tpu.memory_space<vmem>>, vector<8x128xf32>
      tpu.vector_store %arg9[%c0_10, %c0_11], %12 {strides = array<i32>} : memref<8x128xf32, #tpu.memory_space<vmem>>, vector<8x128xf32>,
    } else {
    }
    %c0 = arith.constant 0 : index
    %c0_1 = arith.constant 0 : index
    %3 = vector.load %arg9[%c0, %c0_1] : memref<8x128xf32, #tpu.memory_space<vmem>>, vector<8x128xf32>
    %c0_2 = arith.constant 0 : index
    %c0_3 = arith.constant 0 : index
    %4 = vector.load %arg3[%c0_2, %c0_3] : memref<8x384xf32, #tpu.memory_space<vmem>>, vector<8x384xf32>
    %c0_4 = arith.constant 0 : index
    %c0_5 = arith.constant 0 : index
    %5 = vector.load %arg4[%c0_4, %c0_5] : memref<384x128xf32, #tpu.memory_space<vmem>>, vector<384x128xf32>
    %cst = arith.constant dense<0.000000e+00> : vector<8x128xf32>
    %6 = tpu.matmul %4, %5, %cst {dimension_numbers = #tpu.dot_dimension_numbers<[1], [0], [0], [1], [0, 0, 1, 1], [], []>} : vector<8x384xf32>, vector<384x128xf32>, vector<8x128xf32> -> vector<8x128xf32>
    %7 = arith.addf %3, %6 : vector<8x128xf32>
    %c0_6 = arith.constant 0 : index
    %c0_7 = arith.constant 0 : index
    %8 = vector.load %arg9[%c0_6, %c0_7] : memref<8x128xf32, #tpu.memory_space<vmem>>, vector<8x128xf32>
    tpu.vector_store %arg9[%c0_6, %c0_7], %7 {strides = array<i32>} : memref<8x128xf32, #tpu.memory_space<vmem>>, vector<8x128xf32>,
    %c2_i32 = arith.constant 2 : i32
    %9 = arith.cmpi eq, %arg2, %c2_i32 : i32
    %10 = arith.extui %9 : i1 to i32
    %c0_i32_8 = arith.constant 0 : i32
    %11 = arith.cmpi ne, %10, %c0_i32_8 : i32
    scf.if %11 {
      %c0_9 = arith.constant 0 : index
      %c0_10 = arith.constant 0 : index
      %12 = vector.load %arg9[%c0_9, %c0_10] : memref<8x128xf32, #tpu.memory_space<vmem>>, vector<8x128xf32>
      %c0_11 = arith.constant 0 : index
      %c0_12 = arith.constant 0 : index
      %13 = vector.load %arg5[%c0_11, %c0_12] : memref<1x128xf32, #tpu.memory_space<vmem>>, vector<1x128xf32>
      %14 = vector.broadcast %13 : vector<1x128xf32> to vector<8x128xf32>
      %15 = arith.mulf %12, %14 : vector<8x128xf32>
      %c0_13 = arith.constant 0 : index
      %c0_14 = arith.constant 0 : index
      %16 = vector.load %arg6[%c0_13, %c0_14] : memref<1x128xf32, #tpu.memory_space<vmem>>, vector<1x128xf32>
      %17 = vector.broadcast %16 : vector<1x128xf32> to vector<8x128xf32>
      %18 = arith.addf %15, %17 : vector<8x128xf32>
      %c0_15 = arith.constant 0 : index
      %c0_16 = arith.constant 0 : index
      %19 = vector.load %arg7[%c0_15, %c0_16] : memref<8x128xf32, #tpu.memory_space<vmem>>, vector<8x128xf32>
      %20 = arith.addf %18, %19 : vector<8x128xf32>
      %cst_17 = arith.constant 0.000000e+00 : f32
      %21 = vector.broadcast %cst_17 : f32 to vector<8x128xf32>
      %22 = arith.maximumf %20, %21 : vector<8x128xf32>
      %c0_18 = arith.constant 0 : index
      %c0_19 = arith.constant 0 : index
      %23 = vector.load %arg8[%c0_18, %c0_19] : memref<8x128xf32, #tpu.memory_space<vmem>>, vector<8x128xf32>
      tpu.vector_store %arg8[%c0_18, %c0_19], %22 {strides = array<i32>} : memref<8x128xf32, #tpu.memory_space<vmem>>, vector<8x128xf32>,
    } else {
    }
    return
  }
  func.func @transform_0(%arg0: i32, %arg1: i32, %arg2: i32) -> (i32, i32) {
    %c0_i32 = arith.constant 0 : i32
    return %arg0, %arg2 : i32, i32
  }
  func.func @transform_1(%arg0: i32, %arg1: i32, %arg2: i32) -> (i32, i32) {
    %c0_i32 = arith.constant 0 : i32
    return %arg2, %arg1 : i32, i32
  }
  func.func @transform_2(%arg0: i32, %arg1: i32, %arg2: i32) -> (i32, i32) {
    %c0_i32 = arith.constant 0 : i32
    %c0_i32_0 = arith.constant 0 : i32
    return %c0_i32, %arg1 : i32, i32
  }
  func.func @transform_3(%arg0: i32, %arg1: i32, %arg2: i32) -> (i32, i32) {
    %c0_i32 = arith.constant 0 : i32
    %c0_i32_0 = arith.constant 0 : i32
    return %c0_i32, %arg1 : i32, i32
  }
  func.func @transform_4(%arg0: i32, %arg1: i32, %arg2: i32) -> (i32, i32) {
    %c0_i32 = arith.constant 0 : i32
    return %arg0, %arg1 : i32, i32
  }
  func.func @transform_5(%arg0: i32, %arg1: i32, %arg2: i32) -> (i32, i32) {
    %c0_i32 = arith.constant 0 : i32
    return %arg0, %arg1 : i32, i32
  }
}

module attributes {stable_mosaic.version = 11 : i64} {
  func.func @_matmul_bn_kernel(%arg0: i32, %arg1: i32, %arg2: i32, %arg3: memref<8x384xf32, #tpu.memory_space<vmem>>, %arg4: memref<384x128xf32, #tpu.memory_space<vmem>>, %arg5: memref<1x128xf32, #tpu.memory_space<vmem>>, %arg6: memref<1x128xf32, #tpu.memory_space<vmem>>, %arg7: memref<8x128xf32, #tpu.memory_space<vmem>>, %arg8: memref<8x128xf32, #tpu.memory_space<vmem>>) attributes {dimension_semantics = [#tpu.dimension_semantics<parallel>, #tpu.dimension_semantics<parallel>, #tpu.dimension_semantics<arbitrary>], iteration_bounds = array<i64: 1, 1, 3>, scalar_prefetch = 0 : i64, scratch_operands = 1 : i64, tpu.core_type = #tpu.core_type<tc>, window_params = [{transform_indices = @transform_0, window_bounds = array<i64: 8, 384>}, {transform_indices = @transform_1, window_bounds = array<i64: 384, 128>}, {transform_indices = @transform_2, window_bounds = array<i64: 1, 128>}, {transform_indices = @transform_3, window_bounds = array<i64: 1, 128>}, {transform_indices = @transform_4, window_bounds = array<i64: 8, 128>}]} {
    %c0_i32 = arith.constant 0 : i32
    %0 = arith.cmpi eq, %arg2, %c0_i32 : i32
    %1 = arith.extui %0 : i1 to i32
    %c0_i32_0 = arith.constant 0 : i32
    %2 = arith.cmpi ne, %1, %c0_i32_0 : i32
    scf.if %2 {
      %cst_9 = arith.constant 0.000000e+00 : f32
      %12 = vector.broadcast %cst_9 : f32 to vector<8x128xf32>
      %c0_10 = arith.constant 0 : index
      %c0_11 = arith.constant 0 : index
      %13 = vector.load %arg8[%c0_10, %c0_11] : memref<8x128xf32, #tpu.memory_space<vmem>>, vector<8x128xf32>
      tpu.vector_store %arg8[%c0_10, %c0_11], %12 {strides = array<i32>} : memref<8x128xf32, #tpu.memory_space<vmem>>, vector<8x128xf32>,
    } else {
    }
    %c0 = arith.constant 0 : index
    %c0_1 = arith.constant 0 : index
    %3 = vector.load %arg8[%c0, %c0_1] : memref<8x128xf32, #tpu.memory_space<vmem>>, vector<8x128xf32>
    %c0_2 = arith.constant 0 : index
    %c0_3 = arith.constant 0 : index
    %4 = vector.load %arg3[%c0_2, %c0_3] : memref<8x384xf32, #tpu.memory_space<vmem>>, vector<8x384xf32>
    %c0_4 = arith.constant 0 : index
    %c0_5 = arith.constant 0 : index
    %5 = vector.load %arg4[%c0_4, %c0_5] : memref<384x128xf32, #tpu.memory_space<vmem>>, vector<384x128xf32>
    %cst = arith.constant dense<0.000000e+00> : vector<8x128xf32>
    %6 = tpu.matmul %4, %5, %cst {dimension_numbers = #tpu.dot_dimension_numbers<[1], [0], [0], [1], [0, 0, 1, 1], [], []>} : vector<8x384xf32>, vector<384x128xf32>, vector<8x128xf32> -> vector<8x128xf32>
    %7 = arith.addf %3, %6 : vector<8x128xf32>
    %c0_6 = arith.constant 0 : index
    %c0_7 = arith.constant 0 : index
    %8 = vector.load %arg8[%c0_6, %c0_7] : memref<8x128xf32, #tpu.memory_space<vmem>>, vector<8x128xf32>
    tpu.vector_store %arg8[%c0_6, %c0_7], %7 {strides = array<i32>} : memref<8x128xf32, #tpu.memory_space<vmem>>, vector<8x128xf32>,
    %c2_i32 = arith.constant 2 : i32
    %9 = arith.cmpi eq, %arg2, %c2_i32 : i32
    %10 = arith.extui %9 : i1 to i32
    %c0_i32_8 = arith.constant 0 : i32
    %11 = arith.cmpi ne, %10, %c0_i32_8 : i32
    scf.if %11 {
      %c0_9 = arith.constant 0 : index
      %c0_10 = arith.constant 0 : index
      %12 = vector.load %arg8[%c0_9, %c0_10] : memref<8x128xf32, #tpu.memory_space<vmem>>, vector<8x128xf32>
      %c0_11 = arith.constant 0 : index
      %c0_12 = arith.constant 0 : index
      %13 = vector.load %arg5[%c0_11, %c0_12] : memref<1x128xf32, #tpu.memory_space<vmem>>, vector<1x128xf32>
      %14 = vector.broadcast %13 : vector<1x128xf32> to vector<8x128xf32>
      %15 = arith.mulf %12, %14 : vector<8x128xf32>
      %c0_13 = arith.constant 0 : index
      %c0_14 = arith.constant 0 : index
      %16 = vector.load %arg6[%c0_13, %c0_14] : memref<1x128xf32, #tpu.memory_space<vmem>>, vector<1x128xf32>
      %17 = vector.broadcast %16 : vector<1x128xf32> to vector<8x128xf32>
      %18 = arith.addf %15, %17 : vector<8x128xf32>
      %cst_15 = arith.constant 0.000000e+00 : f32
      %19 = vector.broadcast %cst_15 : f32 to vector<8x128xf32>
      %20 = arith.maximumf %18, %19 : vector<8x128xf32>
      %c0_16 = arith.constant 0 : index
      %c0_17 = arith.constant 0 : index
      %21 = vector.load %arg7[%c0_16, %c0_17] : memref<8x128xf32, #tpu.memory_space<vmem>>, vector<8x128xf32>
      tpu.vector_store %arg7[%c0_16, %c0_17], %20 {strides = array<i32>} : memref<8x128xf32, #tpu.memory_space<vmem>>, vector<8x128xf32>,
    } else {
    }
    return
  }
  func.func @transform_0(%arg0: i32, %arg1: i32, %arg2: i32) -> (i32, i32) {
    %c0_i32 = arith.constant 0 : i32
    return %arg0, %arg2 : i32, i32
  }
  func.func @transform_1(%arg0: i32, %arg1: i32, %arg2: i32) -> (i32, i32) {
    %c0_i32 = arith.constant 0 : i32
    return %arg2, %arg1 : i32, i32
  }
  func.func @transform_2(%arg0: i32, %arg1: i32, %arg2: i32) -> (i32, i32) {
    %c0_i32 = arith.constant 0 : i32
    %c0_i32_0 = arith.constant 0 : i32
    return %c0_i32, %arg1 : i32, i32
  }
  func.func @transform_3(%arg0: i32, %arg1: i32, %arg2: i32) -> (i32, i32) {
    %c0_i32 = arith.constant 0 : i32
    %c0_i32_0 = arith.constant 0 : i32
    return %c0_i32, %arg1 : i32, i32
  }
  func.func @transform_4(%arg0: i32, %arg1: i32, %arg2: i32) -> (i32, i32) {
    %c0_i32 = arith.constant 0 : i32
    return %arg0, %arg1 : i32, i32
  }
}

module attributes {stable_mosaic.version = 11 : i64} {
  func.func @_matmul_bn_kernel(%arg0: i32, %arg1: i32, %arg2: i32, %arg3: memref<8x384xf32, #tpu.memory_space<vmem>>, %arg4: memref<384x128xf32, #tpu.memory_space<vmem>>, %arg5: memref<1x128xf32, #tpu.memory_space<vmem>>, %arg6: memref<1x128xf32, #tpu.memory_space<vmem>>, %arg7: memref<8x128xf32, #tpu.memory_space<vmem>>, %arg8: memref<8x128xf32, #tpu.memory_space<vmem>>, %arg9: memref<8x128xf32, #tpu.memory_space<vmem>>) attributes {dimension_semantics = [#tpu.dimension_semantics<parallel>, #tpu.dimension_semantics<parallel>, #tpu.dimension_semantics<arbitrary>], iteration_bounds = array<i64: 1, 1, 3>, scalar_prefetch = 0 : i64, scratch_operands = 1 : i64, tpu.core_type = #tpu.core_type<tc>, window_params = [{transform_indices = @transform_0, window_bounds = array<i64: 8, 384>}, {transform_indices = @transform_1, window_bounds = array<i64: 384, 128>}, {transform_indices = @transform_2, window_bounds = array<i64: 1, 128>}, {transform_indices = @transform_3, window_bounds = array<i64: 1, 128>}, {transform_indices = @transform_4, window_bounds = array<i64: 8, 128>}, {transform_indices = @transform_5, window_bounds = array<i64: 8, 128>}]} {
    %c0_i32 = arith.constant 0 : i32
    %0 = arith.cmpi eq, %arg2, %c0_i32 : i32
    %1 = arith.extui %0 : i1 to i32
    %c0_i32_0 = arith.constant 0 : i32
    %2 = arith.cmpi ne, %1, %c0_i32_0 : i32
    scf.if %2 {
      %cst_9 = arith.constant 0.000000e+00 : f32
      %12 = vector.broadcast %cst_9 : f32 to vector<8x128xf32>
      %c0_10 = arith.constant 0 : index
      %c0_11 = arith.constant 0 : index
      %13 = vector.load %arg9[%c0_10, %c0_11] : memref<8x128xf32, #tpu.memory_space<vmem>>, vector<8x128xf32>
      tpu.vector_store %arg9[%c0_10, %c0_11], %12 {strides = array<i32>} : memref<8x128xf32, #tpu.memory_space<vmem>>, vector<8x128xf32>,
    } else {
    }
    %c0 = arith.constant 0 : index
    %c0_1 = arith.constant 0 : index
    %3 = vector.load %arg9[%c0, %c0_1] : memref<8x128xf32, #tpu.memory_space<vmem>>, vector<8x128xf32>
    %c0_2 = arith.constant 0 : index
    %c0_3 = arith.constant 0 : index
    %4 = vector.load %arg3[%c0_2, %c0_3] : memref<8x384xf32, #tpu.memory_space<vmem>>, vector<8x384xf32>
    %c0_4 = arith.constant 0 : index
    %c0_5 = arith.constant 0 : index
    %5 = vector.load %arg4[%c0_4, %c0_5] : memref<384x128xf32, #tpu.memory_space<vmem>>, vector<384x128xf32>
    %cst = arith.constant dense<0.000000e+00> : vector<8x128xf32>
    %6 = tpu.matmul %4, %5, %cst {dimension_numbers = #tpu.dot_dimension_numbers<[1], [0], [0], [1], [0, 0, 1, 1], [], []>} : vector<8x384xf32>, vector<384x128xf32>, vector<8x128xf32> -> vector<8x128xf32>
    %7 = arith.addf %3, %6 : vector<8x128xf32>
    %c0_6 = arith.constant 0 : index
    %c0_7 = arith.constant 0 : index
    %8 = vector.load %arg9[%c0_6, %c0_7] : memref<8x128xf32, #tpu.memory_space<vmem>>, vector<8x128xf32>
    tpu.vector_store %arg9[%c0_6, %c0_7], %7 {strides = array<i32>} : memref<8x128xf32, #tpu.memory_space<vmem>>, vector<8x128xf32>,
    %c2_i32 = arith.constant 2 : i32
    %9 = arith.cmpi eq, %arg2, %c2_i32 : i32
    %10 = arith.extui %9 : i1 to i32
    %c0_i32_8 = arith.constant 0 : i32
    %11 = arith.cmpi ne, %10, %c0_i32_8 : i32
    scf.if %11 {
      %c0_9 = arith.constant 0 : index
      %c0_10 = arith.constant 0 : index
      %12 = vector.load %arg9[%c0_9, %c0_10] : memref<8x128xf32, #tpu.memory_space<vmem>>, vector<8x128xf32>
      %c0_11 = arith.constant 0 : index
      %c0_12 = arith.constant 0 : index
      %13 = vector.load %arg5[%c0_11, %c0_12] : memref<1x128xf32, #tpu.memory_space<vmem>>, vector<1x128xf32>
      %14 = vector.broadcast %13 : vector<1x128xf32> to vector<8x128xf32>
      %15 = arith.mulf %12, %14 : vector<8x128xf32>
      %c0_13 = arith.constant 0 : index
      %c0_14 = arith.constant 0 : index
      %16 = vector.load %arg6[%c0_13, %c0_14] : memref<1x128xf32, #tpu.memory_space<vmem>>, vector<1x128xf32>
      %17 = vector.broadcast %16 : vector<1x128xf32> to vector<8x128xf32>
      %18 = arith.addf %15, %17 : vector<8x128xf32>
      %c0_15 = arith.constant 0 : index
      %c0_16 = arith.constant 0 : index
      %19 = vector.load %arg7[%c0_15, %c0_16] : memref<8x128xf32, #tpu.memory_space<vmem>>, vector<8x128xf32>
      %20 = arith.addf %18, %19 : vector<8x128xf32>
      %cst_17 = arith.constant 0.000000e+00 : f32
      %21 = vector.broadcast %cst_17 : f32 to vector<8x128xf32>
      %22 = arith.maximumf %20, %21 : vector<8x128xf32>
      %c0_18 = arith.constant 0 : index
      %c0_19 = arith.constant 0 : index
      %23 = vector.load %arg8[%c0_18, %c0_19] : memref<8x128xf32, #tpu.memory_space<vmem>>, vector<8x128xf32>
      tpu.vector_store %arg8[%c0_18, %c0_19], %22 {strides = array<i32>} : memref<8x128xf32, #tpu.memory_space<vmem>>, vector<8x128xf32>,
    } else {
    }
    return
  }
  func.func @transform_0(%arg0: i32, %arg1: i32, %arg2: i32) -> (i32, i32) {
    %c0_i32 = arith.constant 0 : i32
    return %arg0, %arg2 : i32, i32
  }
  func.func @transform_1(%arg0: i32, %arg1: i32, %arg2: i32) -> (i32, i32) {
    %c0_i32 = arith.constant 0 : i32
    return %arg2, %arg1 : i32, i32
  }
  func.func @transform_2(%arg0: i32, %arg1: i32, %arg2: i32) -> (i32, i32) {
    %c0_i32 = arith.constant 0 : i32
    %c0_i32_0 = arith.constant 0 : i32
    return %c0_i32, %arg1 : i32, i32
  }
  func.func @transform_3(%arg0: i32, %arg1: i32, %arg2: i32) -> (i32, i32) {
    %c0_i32 = arith.constant 0 : i32
    %c0_i32_0 = arith.constant 0 : i32
    return %c0_i32, %arg1 : i32, i32
  }
  func.func @transform_4(%arg0: i32, %arg1: i32, %arg2: i32) -> (i32, i32) {
    %c0_i32 = arith.constant 0 : i32
    return %arg0, %arg1 : i32, i32
  }
  func.func @transform_5(%arg0: i32, %arg1: i32, %arg2: i32) -> (i32, i32) {
    %c0_i32 = arith.constant 0 : i32
    return %arg0, %arg1 : i32, i32
  }
}

module attributes {stable_mosaic.version = 11 : i64} {
  func.func @_matmul_bn_kernel(%arg0: i32, %arg1: i32, %arg2: i32, %arg3: memref<8x384xf32, #tpu.memory_space<vmem>>, %arg4: memref<384x256xf32, #tpu.memory_space<vmem>>, %arg5: memref<1x256xf32, #tpu.memory_space<vmem>>, %arg6: memref<1x256xf32, #tpu.memory_space<vmem>>, %arg7: memref<8x256xf32, #tpu.memory_space<vmem>>, %arg8: memref<8x256xf32, #tpu.memory_space<vmem>>) attributes {dimension_semantics = [#tpu.dimension_semantics<parallel>, #tpu.dimension_semantics<parallel>, #tpu.dimension_semantics<arbitrary>], iteration_bounds = array<i64: 1, 1, 3>, scalar_prefetch = 0 : i64, scratch_operands = 1 : i64, tpu.core_type = #tpu.core_type<tc>, window_params = [{transform_indices = @transform_0, window_bounds = array<i64: 8, 384>}, {transform_indices = @transform_1, window_bounds = array<i64: 384, 256>}, {transform_indices = @transform_2, window_bounds = array<i64: 1, 256>}, {transform_indices = @transform_3, window_bounds = array<i64: 1, 256>}, {transform_indices = @transform_4, window_bounds = array<i64: 8, 256>}]} {
    %c0_i32 = arith.constant 0 : i32
    %0 = arith.cmpi eq, %arg2, %c0_i32 : i32
    %1 = arith.extui %0 : i1 to i32
    %c0_i32_0 = arith.constant 0 : i32
    %2 = arith.cmpi ne, %1, %c0_i32_0 : i32
    scf.if %2 {
      %cst_9 = arith.constant 0.000000e+00 : f32
      %12 = vector.broadcast %cst_9 : f32 to vector<8x256xf32>
      %c0_10 = arith.constant 0 : index
      %c0_11 = arith.constant 0 : index
      %13 = vector.load %arg8[%c0_10, %c0_11] : memref<8x256xf32, #tpu.memory_space<vmem>>, vector<8x256xf32>
      tpu.vector_store %arg8[%c0_10, %c0_11], %12 {strides = array<i32>} : memref<8x256xf32, #tpu.memory_space<vmem>>, vector<8x256xf32>,
    } else {
    }
    %c0 = arith.constant 0 : index
    %c0_1 = arith.constant 0 : index
    %3 = vector.load %arg8[%c0, %c0_1] : memref<8x256xf32, #tpu.memory_space<vmem>>, vector<8x256xf32>
    %c0_2 = arith.constant 0 : index
    %c0_3 = arith.constant 0 : index
    %4 = vector.load %arg3[%c0_2, %c0_3] : memref<8x384xf32, #tpu.memory_space<vmem>>, vector<8x384xf32>
    %c0_4 = arith.constant 0 : index
    %c0_5 = arith.constant 0 : index
    %5 = vector.load %arg4[%c0_4, %c0_5] : memref<384x256xf32, #tpu.memory_space<vmem>>, vector<384x256xf32>
    %cst = arith.constant dense<0.000000e+00> : vector<8x256xf32>
    %6 = tpu.matmul %4, %5, %cst {dimension_numbers = #tpu.dot_dimension_numbers<[1], [0], [0], [1], [0, 0, 1, 1], [], []>} : vector<8x384xf32>, vector<384x256xf32>, vector<8x256xf32> -> vector<8x256xf32>
    %7 = arith.addf %3, %6 : vector<8x256xf32>
    %c0_6 = arith.constant 0 : index
    %c0_7 = arith.constant 0 : index
    %8 = vector.load %arg8[%c0_6, %c0_7] : memref<8x256xf32, #tpu.memory_space<vmem>>, vector<8x256xf32>
    tpu.vector_store %arg8[%c0_6, %c0_7], %7 {strides = array<i32>} : memref<8x256xf32, #tpu.memory_space<vmem>>, vector<8x256xf32>,
    %c2_i32 = arith.constant 2 : i32
    %9 = arith.cmpi eq, %arg2, %c2_i32 : i32
    %10 = arith.extui %9 : i1 to i32
    %c0_i32_8 = arith.constant 0 : i32
    %11 = arith.cmpi ne, %10, %c0_i32_8 : i32
    scf.if %11 {
      %c0_9 = arith.constant 0 : index
      %c0_10 = arith.constant 0 : index
      %12 = vector.load %arg8[%c0_9, %c0_10] : memref<8x256xf32, #tpu.memory_space<vmem>>, vector<8x256xf32>
      %c0_11 = arith.constant 0 : index
      %c0_12 = arith.constant 0 : index
      %13 = vector.load %arg5[%c0_11, %c0_12] : memref<1x256xf32, #tpu.memory_space<vmem>>, vector<1x256xf32>
      %14 = vector.broadcast %13 : vector<1x256xf32> to vector<8x256xf32>
      %15 = arith.mulf %12, %14 : vector<8x256xf32>
      %c0_13 = arith.constant 0 : index
      %c0_14 = arith.constant 0 : index
      %16 = vector.load %arg6[%c0_13, %c0_14] : memref<1x256xf32, #tpu.memory_space<vmem>>, vector<1x256xf32>
      %17 = vector.broadcast %16 : vector<1x256xf32> to vector<8x256xf32>
      %18 = arith.addf %15, %17 : vector<8x256xf32>
      %cst_15 = arith.constant 0.000000e+00 : f32
      %19 = vector.broadcast %cst_15 : f32 to vector<8x256xf32>
      %20 = arith.maximumf %18, %19 : vector<8x256xf32>
      %c0_16 = arith.constant 0 : index
      %c0_17 = arith.constant 0 : index
      %21 = vector.load %arg7[%c0_16, %c0_17] : memref<8x256xf32, #tpu.memory_space<vmem>>, vector<8x256xf32>
      tpu.vector_store %arg7[%c0_16, %c0_17], %20 {strides = array<i32>} : memref<8x256xf32, #tpu.memory_space<vmem>>, vector<8x256xf32>,
    } else {
    }
    return
  }
  func.func @transform_0(%arg0: i32, %arg1: i32, %arg2: i32) -> (i32, i32) {
    %c0_i32 = arith.constant 0 : i32
    return %arg0, %arg2 : i32, i32
  }
  func.func @transform_1(%arg0: i32, %arg1: i32, %arg2: i32) -> (i32, i32) {
    %c0_i32 = arith.constant 0 : i32
    return %arg2, %arg1 : i32, i32
  }
  func.func @transform_2(%arg0: i32, %arg1: i32, %arg2: i32) -> (i32, i32) {
    %c0_i32 = arith.constant 0 : i32
    %c0_i32_0 = arith.constant 0 : i32
    return %c0_i32, %arg1 : i32, i32
  }
  func.func @transform_3(%arg0: i32, %arg1: i32, %arg2: i32) -> (i32, i32) {
    %c0_i32 = arith.constant 0 : i32
    %c0_i32_0 = arith.constant 0 : i32
    return %c0_i32, %arg1 : i32, i32
  }
  func.func @transform_4(%arg0: i32, %arg1: i32, %arg2: i32) -> (i32, i32) {
    %c0_i32 = arith.constant 0 : i32
    return %arg0, %arg1 : i32, i32
  }
}

module attributes {stable_mosaic.version = 11 : i64} {
  func.func @_matmul_bn_kernel(%arg0: i32, %arg1: i32, %arg2: i32, %arg3: memref<8x768xf32, #tpu.memory_space<vmem>>, %arg4: memref<768x256xf32, #tpu.memory_space<vmem>>, %arg5: memref<1x256xf32, #tpu.memory_space<vmem>>, %arg6: memref<1x256xf32, #tpu.memory_space<vmem>>, %arg7: memref<8x256xf32, #tpu.memory_space<vmem>>, %arg8: memref<8x256xf32, #tpu.memory_space<vmem>>, %arg9: memref<8x256xf32, #tpu.memory_space<vmem>>) attributes {dimension_semantics = [#tpu.dimension_semantics<parallel>, #tpu.dimension_semantics<parallel>, #tpu.dimension_semantics<arbitrary>], iteration_bounds = array<i64: 1, 1, 3>, scalar_prefetch = 0 : i64, scratch_operands = 1 : i64, tpu.core_type = #tpu.core_type<tc>, window_params = [{transform_indices = @transform_0, window_bounds = array<i64: 8, 768>}, {transform_indices = @transform_1, window_bounds = array<i64: 768, 256>}, {transform_indices = @transform_2, window_bounds = array<i64: 1, 256>}, {transform_indices = @transform_3, window_bounds = array<i64: 1, 256>}, {transform_indices = @transform_4, window_bounds = array<i64: 8, 256>}, {transform_indices = @transform_5, window_bounds = array<i64: 8, 256>}]} {
    %c0_i32 = arith.constant 0 : i32
    %0 = arith.cmpi eq, %arg2, %c0_i32 : i32
    %1 = arith.extui %0 : i1 to i32
    %c0_i32_0 = arith.constant 0 : i32
    %2 = arith.cmpi ne, %1, %c0_i32_0 : i32
    scf.if %2 {
      %cst_9 = arith.constant 0.000000e+00 : f32
      %12 = vector.broadcast %cst_9 : f32 to vector<8x256xf32>
      %c0_10 = arith.constant 0 : index
      %c0_11 = arith.constant 0 : index
      %13 = vector.load %arg9[%c0_10, %c0_11] : memref<8x256xf32, #tpu.memory_space<vmem>>, vector<8x256xf32>
      tpu.vector_store %arg9[%c0_10, %c0_11], %12 {strides = array<i32>} : memref<8x256xf32, #tpu.memory_space<vmem>>, vector<8x256xf32>,
    } else {
    }
    %c0 = arith.constant 0 : index
    %c0_1 = arith.constant 0 : index
    %3 = vector.load %arg9[%c0, %c0_1] : memref<8x256xf32, #tpu.memory_space<vmem>>, vector<8x256xf32>
    %c0_2 = arith.constant 0 : index
    %c0_3 = arith.constant 0 : index
    %4 = vector.load %arg3[%c0_2, %c0_3] : memref<8x768xf32, #tpu.memory_space<vmem>>, vector<8x768xf32>
    %c0_4 = arith.constant 0 : index
    %c0_5 = arith.constant 0 : index
    %5 = vector.load %arg4[%c0_4, %c0_5] : memref<768x256xf32, #tpu.memory_space<vmem>>, vector<768x256xf32>
    %cst = arith.constant dense<0.000000e+00> : vector<8x256xf32>
    %6 = tpu.matmul %4, %5, %cst {dimension_numbers = #tpu.dot_dimension_numbers<[1], [0], [0], [1], [0, 0, 1, 1], [], []>} : vector<8x768xf32>, vector<768x256xf32>, vector<8x256xf32> -> vector<8x256xf32>
    %7 = arith.addf %3, %6 : vector<8x256xf32>
    %c0_6 = arith.constant 0 : index
    %c0_7 = arith.constant 0 : index
    %8 = vector.load %arg9[%c0_6, %c0_7] : memref<8x256xf32, #tpu.memory_space<vmem>>, vector<8x256xf32>
    tpu.vector_store %arg9[%c0_6, %c0_7], %7 {strides = array<i32>} : memref<8x256xf32, #tpu.memory_space<vmem>>, vector<8x256xf32>,
    %c2_i32 = arith.constant 2 : i32
    %9 = arith.cmpi eq, %arg2, %c2_i32 : i32
    %10 = arith.extui %9 : i1 to i32
    %c0_i32_8 = arith.constant 0 : i32
    %11 = arith.cmpi ne, %10, %c0_i32_8 : i32
    scf.if %11 {
      %c0_9 = arith.constant 0 : index
      %c0_10 = arith.constant 0 : index
      %12 = vector.load %arg9[%c0_9, %c0_10] : memref<8x256xf32, #tpu.memory_space<vmem>>, vector<8x256xf32>
      %c0_11 = arith.constant 0 : index
      %c0_12 = arith.constant 0 : index
      %13 = vector.load %arg5[%c0_11, %c0_12] : memref<1x256xf32, #tpu.memory_space<vmem>>, vector<1x256xf32>
      %14 = vector.broadcast %13 : vector<1x256xf32> to vector<8x256xf32>
      %15 = arith.mulf %12, %14 : vector<8x256xf32>
      %c0_13 = arith.constant 0 : index
      %c0_14 = arith.constant 0 : index
      %16 = vector.load %arg6[%c0_13, %c0_14] : memref<1x256xf32, #tpu.memory_space<vmem>>, vector<1x256xf32>
      %17 = vector.broadcast %16 : vector<1x256xf32> to vector<8x256xf32>
      %18 = arith.addf %15, %17 : vector<8x256xf32>
      %c0_15 = arith.constant 0 : index
      %c0_16 = arith.constant 0 : index
      %19 = vector.load %arg7[%c0_15, %c0_16] : memref<8x256xf32, #tpu.memory_space<vmem>>, vector<8x256xf32>
      %20 = arith.addf %18, %19 : vector<8x256xf32>
      %cst_17 = arith.constant 0.000000e+00 : f32
      %21 = vector.broadcast %cst_17 : f32 to vector<8x256xf32>
      %22 = arith.maximumf %20, %21 : vector<8x256xf32>
      %c0_18 = arith.constant 0 : index
      %c0_19 = arith.constant 0 : index
      %23 = vector.load %arg8[%c0_18, %c0_19] : memref<8x256xf32, #tpu.memory_space<vmem>>, vector<8x256xf32>
      tpu.vector_store %arg8[%c0_18, %c0_19], %22 {strides = array<i32>} : memref<8x256xf32, #tpu.memory_space<vmem>>, vector<8x256xf32>,
    } else {
    }
    return
  }
  func.func @transform_0(%arg0: i32, %arg1: i32, %arg2: i32) -> (i32, i32) {
    %c0_i32 = arith.constant 0 : i32
    return %arg0, %arg2 : i32, i32
  }
  func.func @transform_1(%arg0: i32, %arg1: i32, %arg2: i32) -> (i32, i32) {
    %c0_i32 = arith.constant 0 : i32
    return %arg2, %arg1 : i32, i32
  }
  func.func @transform_2(%arg0: i32, %arg1: i32, %arg2: i32) -> (i32, i32) {
    %c0_i32 = arith.constant 0 : i32
    %c0_i32_0 = arith.constant 0 : i32
    return %c0_i32, %arg1 : i32, i32
  }
  func.func @transform_3(%arg0: i32, %arg1: i32, %arg2: i32) -> (i32, i32) {
    %c0_i32 = arith.constant 0 : i32
    %c0_i32_0 = arith.constant 0 : i32
    return %c0_i32, %arg1 : i32, i32
  }
  func.func @transform_4(%arg0: i32, %arg1: i32, %arg2: i32) -> (i32, i32) {
    %c0_i32 = arith.constant 0 : i32
    return %arg0, %arg1 : i32, i32
  }
  func.func @transform_5(%arg0: i32, %arg1: i32, %arg2: i32) -> (i32, i32) {
    %c0_i32 = arith.constant 0 : i32
    return %arg0, %arg1 : i32, i32
  }
}

module attributes {stable_mosaic.version = 11 : i64} {
  func.func @_matmul_bn_kernel(%arg0: i32, %arg1: i32, %arg2: i32, %arg3: memref<8x128xf32, #tpu.memory_space<vmem>>, %arg4: memref<128x256xf32, #tpu.memory_space<vmem>>, %arg5: memref<1x256xf32, #tpu.memory_space<vmem>>, %arg6: memref<1x256xf32, #tpu.memory_space<vmem>>, %arg7: memref<8x256xf32, #tpu.memory_space<vmem>>, %arg8: memref<8x256xf32, #tpu.memory_space<vmem>>) attributes {dimension_semantics = [#tpu.dimension_semantics<parallel>, #tpu.dimension_semantics<parallel>, #tpu.dimension_semantics<arbitrary>], iteration_bounds = array<i64: 1, 1, 1>, scalar_prefetch = 0 : i64, scratch_operands = 1 : i64, tpu.core_type = #tpu.core_type<tc>, window_params = [{transform_indices = @transform_0, window_bounds = array<i64: 8, 128>}, {transform_indices = @transform_1, window_bounds = array<i64: 128, 256>}, {transform_indices = @transform_2, window_bounds = array<i64: 1, 256>}, {transform_indices = @transform_3, window_bounds = array<i64: 1, 256>}, {transform_indices = @transform_4, window_bounds = array<i64: 8, 256>}]} {
    %c0_i32 = arith.constant 0 : i32
    %0 = arith.cmpi eq, %arg2, %c0_i32 : i32
    %1 = arith.extui %0 : i1 to i32
    %c0_i32_0 = arith.constant 0 : i32
    %2 = arith.cmpi ne, %1, %c0_i32_0 : i32
    scf.if %2 {
      %cst_10 = arith.constant 0.000000e+00 : f32
      %12 = vector.broadcast %cst_10 : f32 to vector<8x256xf32>
      %c0_11 = arith.constant 0 : index
      %c0_12 = arith.constant 0 : index
      %13 = vector.load %arg8[%c0_11, %c0_12] : memref<8x256xf32, #tpu.memory_space<vmem>>, vector<8x256xf32>
      tpu.vector_store %arg8[%c0_11, %c0_12], %12 {strides = array<i32>} : memref<8x256xf32, #tpu.memory_space<vmem>>, vector<8x256xf32>,
    } else {
    }
    %c0 = arith.constant 0 : index
    %c0_1 = arith.constant 0 : index
    %3 = vector.load %arg8[%c0, %c0_1] : memref<8x256xf32, #tpu.memory_space<vmem>>, vector<8x256xf32>
    %c0_2 = arith.constant 0 : index
    %c0_3 = arith.constant 0 : index
    %4 = vector.load %arg3[%c0_2, %c0_3] : memref<8x128xf32, #tpu.memory_space<vmem>>, vector<8x128xf32>
    %c0_4 = arith.constant 0 : index
    %c0_5 = arith.constant 0 : index
    %5 = vector.load %arg4[%c0_4, %c0_5] : memref<128x256xf32, #tpu.memory_space<vmem>>, vector<128x256xf32>
    %cst = arith.constant dense<0.000000e+00> : vector<8x256xf32>
    %6 = tpu.matmul %4, %5, %cst {dimension_numbers = #tpu.dot_dimension_numbers<[1], [0], [0], [1], [0, 0, 1, 1], [], []>} : vector<8x128xf32>, vector<128x256xf32>, vector<8x256xf32> -> vector<8x256xf32>
    %7 = arith.addf %3, %6 : vector<8x256xf32>
    %c0_6 = arith.constant 0 : index
    %c0_7 = arith.constant 0 : index
    %8 = vector.load %arg8[%c0_6, %c0_7] : memref<8x256xf32, #tpu.memory_space<vmem>>, vector<8x256xf32>
    tpu.vector_store %arg8[%c0_6, %c0_7], %7 {strides = array<i32>} : memref<8x256xf32, #tpu.memory_space<vmem>>, vector<8x256xf32>,
    %c0_i32_8 = arith.constant 0 : i32
    %9 = arith.cmpi eq, %arg2, %c0_i32_8 : i32
    %10 = arith.extui %9 : i1 to i32
    %c0_i32_9 = arith.constant 0 : i32
    %11 = arith.cmpi ne, %10, %c0_i32_9 : i32
    scf.if %11 {
      %c0_10 = arith.constant 0 : index
      %c0_11 = arith.constant 0 : index
      %12 = vector.load %arg8[%c0_10, %c0_11] : memref<8x256xf32, #tpu.memory_space<vmem>>, vector<8x256xf32>
      %c0_12 = arith.constant 0 : index
      %c0_13 = arith.constant 0 : index
      %13 = vector.load %arg5[%c0_12, %c0_13] : memref<1x256xf32, #tpu.memory_space<vmem>>, vector<1x256xf32>
      %14 = vector.broadcast %13 : vector<1x256xf32> to vector<8x256xf32>
      %15 = arith.mulf %12, %14 : vector<8x256xf32>
      %c0_14 = arith.constant 0 : index
      %c0_15 = arith.constant 0 : index
      %16 = vector.load %arg6[%c0_14, %c0_15] : memref<1x256xf32, #tpu.memory_space<vmem>>, vector<1x256xf32>
      %17 = vector.broadcast %16 : vector<1x256xf32> to vector<8x256xf32>
      %18 = arith.addf %15, %17 : vector<8x256xf32>
      %c0_16 = arith.constant 0 : index
      %c0_17 = arith.constant 0 : index
      %19 = vector.load %arg7[%c0_16, %c0_17] : memref<8x256xf32, #tpu.memory_space<vmem>>, vector<8x256xf32>
      tpu.vector_store %arg7[%c0_16, %c0_17], %18 {strides = array<i32>} : memref<8x256xf32, #tpu.memory_space<vmem>>, vector<8x256xf32>,
    } else {
    }
    return
  }
  func.func @transform_0(%arg0: i32, %arg1: i32, %arg2: i32) -> (i32, i32) {
    %c0_i32 = arith.constant 0 : i32
    return %arg0, %arg2 : i32, i32
  }
  func.func @transform_1(%arg0: i32, %arg1: i32, %arg2: i32) -> (i32, i32) {
    %c0_i32 = arith.constant 0 : i32
    return %arg2, %arg1 : i32, i32
  }
  func.func @transform_2(%arg0: i32, %arg1: i32, %arg2: i32) -> (i32, i32) {
    %c0_i32 = arith.constant 0 : i32
    %c0_i32_0 = arith.constant 0 : i32
    return %c0_i32, %arg1 : i32, i32
  }
  func.func @transform_3(%arg0: i32, %arg1: i32, %arg2: i32) -> (i32, i32) {
    %c0_i32 = arith.constant 0 : i32
    %c0_i32_0 = arith.constant 0 : i32
    return %c0_i32, %arg1 : i32, i32
  }
  func.func @transform_4(%arg0: i32, %arg1: i32, %arg2: i32) -> (i32, i32) {
    %c0_i32 = arith.constant 0 : i32
    return %arg0, %arg1 : i32, i32
  }
}

module attributes {stable_mosaic.version = 11 : i64} {
  func.func @_matmul_bn_kernel(%arg0: i32, %arg1: i32, %arg2: i32, %arg3: memref<8x768xf32, #tpu.memory_space<vmem>>, %arg4: memref<768x256xf32, #tpu.memory_space<vmem>>, %arg5: memref<1x256xf32, #tpu.memory_space<vmem>>, %arg6: memref<1x256xf32, #tpu.memory_space<vmem>>, %arg7: memref<8x256xf32, #tpu.memory_space<vmem>>, %arg8: memref<8x256xf32, #tpu.memory_space<vmem>>) attributes {dimension_semantics = [#tpu.dimension_semantics<parallel>, #tpu.dimension_semantics<parallel>, #tpu.dimension_semantics<arbitrary>], iteration_bounds = array<i64: 1, 1, 3>, scalar_prefetch = 0 : i64, scratch_operands = 1 : i64, tpu.core_type = #tpu.core_type<tc>, window_params = [{transform_indices = @transform_0, window_bounds = array<i64: 8, 768>}, {transform_indices = @transform_1, window_bounds = array<i64: 768, 256>}, {transform_indices = @transform_2, window_bounds = array<i64: 1, 256>}, {transform_indices = @transform_3, window_bounds = array<i64: 1, 256>}, {transform_indices = @transform_4, window_bounds = array<i64: 8, 256>}]} {
    %c0_i32 = arith.constant 0 : i32
    %0 = arith.cmpi eq, %arg2, %c0_i32 : i32
    %1 = arith.extui %0 : i1 to i32
    %c0_i32_0 = arith.constant 0 : i32
    %2 = arith.cmpi ne, %1, %c0_i32_0 : i32
    scf.if %2 {
      %cst_9 = arith.constant 0.000000e+00 : f32
      %12 = vector.broadcast %cst_9 : f32 to vector<8x256xf32>
      %c0_10 = arith.constant 0 : index
      %c0_11 = arith.constant 0 : index
      %13 = vector.load %arg8[%c0_10, %c0_11] : memref<8x256xf32, #tpu.memory_space<vmem>>, vector<8x256xf32>
      tpu.vector_store %arg8[%c0_10, %c0_11], %12 {strides = array<i32>} : memref<8x256xf32, #tpu.memory_space<vmem>>, vector<8x256xf32>,
    } else {
    }
    %c0 = arith.constant 0 : index
    %c0_1 = arith.constant 0 : index
    %3 = vector.load %arg8[%c0, %c0_1] : memref<8x256xf32, #tpu.memory_space<vmem>>, vector<8x256xf32>
    %c0_2 = arith.constant 0 : index
    %c0_3 = arith.constant 0 : index
    %4 = vector.load %arg3[%c0_2, %c0_3] : memref<8x768xf32, #tpu.memory_space<vmem>>, vector<8x768xf32>
    %c0_4 = arith.constant 0 : index
    %c0_5 = arith.constant 0 : index
    %5 = vector.load %arg4[%c0_4, %c0_5] : memref<768x256xf32, #tpu.memory_space<vmem>>, vector<768x256xf32>
    %cst = arith.constant dense<0.000000e+00> : vector<8x256xf32>
    %6 = tpu.matmul %4, %5, %cst {dimension_numbers = #tpu.dot_dimension_numbers<[1], [0], [0], [1], [0, 0, 1, 1], [], []>} : vector<8x768xf32>, vector<768x256xf32>, vector<8x256xf32> -> vector<8x256xf32>
    %7 = arith.addf %3, %6 : vector<8x256xf32>
    %c0_6 = arith.constant 0 : index
    %c0_7 = arith.constant 0 : index
    %8 = vector.load %arg8[%c0_6, %c0_7] : memref<8x256xf32, #tpu.memory_space<vmem>>, vector<8x256xf32>
    tpu.vector_store %arg8[%c0_6, %c0_7], %7 {strides = array<i32>} : memref<8x256xf32, #tpu.memory_space<vmem>>, vector<8x256xf32>,
    %c2_i32 = arith.constant 2 : i32
    %9 = arith.cmpi eq, %arg2, %c2_i32 : i32
    %10 = arith.extui %9 : i1 to i32
    %c0_i32_8 = arith.constant 0 : i32
    %11 = arith.cmpi ne, %10, %c0_i32_8 : i32
    scf.if %11 {
      %c0_9 = arith.constant 0 : index
      %c0_10 = arith.constant 0 : index
      %12 = vector.load %arg8[%c0_9, %c0_10] : memref<8x256xf32, #tpu.memory_space<vmem>>, vector<8x256xf32>
      %c0_11 = arith.constant 0 : index
      %c0_12 = arith.constant 0 : index
      %13 = vector.load %arg5[%c0_11, %c0_12] : memref<1x256xf32, #tpu.memory_space<vmem>>, vector<1x256xf32>
      %14 = vector.broadcast %13 : vector<1x256xf32> to vector<8x256xf32>
      %15 = arith.mulf %12, %14 : vector<8x256xf32>
      %c0_13 = arith.constant 0 : index
      %c0_14 = arith.constant 0 : index
      %16 = vector.load %arg6[%c0_13, %c0_14] : memref<1x256xf32, #tpu.memory_space<vmem>>, vector<1x256xf32>
      %17 = vector.broadcast %16 : vector<1x256xf32> to vector<8x256xf32>
      %18 = arith.addf %15, %17 : vector<8x256xf32>
      %cst_15 = arith.constant 0.000000e+00 : f32
      %19 = vector.broadcast %cst_15 : f32 to vector<8x256xf32>
      %20 = arith.maximumf %18, %19 : vector<8x256xf32>
      %c0_16 = arith.constant 0 : index
      %c0_17 = arith.constant 0 : index
      %21 = vector.load %arg7[%c0_16, %c0_17] : memref<8x256xf32, #tpu.memory_space<vmem>>, vector<8x256xf32>
      tpu.vector_store %arg7[%c0_16, %c0_17], %20 {strides = array<i32>} : memref<8x256xf32, #tpu.memory_space<vmem>>, vector<8x256xf32>,
    } else {
    }
    return
  }
  func.func @transform_0(%arg0: i32, %arg1: i32, %arg2: i32) -> (i32, i32) {
    %c0_i32 = arith.constant 0 : i32
    return %arg0, %arg2 : i32, i32
  }
  func.func @transform_1(%arg0: i32, %arg1: i32, %arg2: i32) -> (i32, i32) {
    %c0_i32 = arith.constant 0 : i32
    return %arg2, %arg1 : i32, i32
  }
  func.func @transform_2(%arg0: i32, %arg1: i32, %arg2: i32) -> (i32, i32) {
    %c0_i32 = arith.constant 0 : i32
    %c0_i32_0 = arith.constant 0 : i32
    return %c0_i32, %arg1 : i32, i32
  }
  func.func @transform_3(%arg0: i32, %arg1: i32, %arg2: i32) -> (i32, i32) {
    %c0_i32 = arith.constant 0 : i32
    %c0_i32_0 = arith.constant 0 : i32
    return %c0_i32, %arg1 : i32, i32
  }
  func.func @transform_4(%arg0: i32, %arg1: i32, %arg2: i32) -> (i32, i32) {
    %c0_i32 = arith.constant 0 : i32
    return %arg0, %arg1 : i32, i32
  }
}

module attributes {stable_mosaic.version = 11 : i64} {
  func.func @_matmul_bn_kernel(%arg0: i32, %arg1: i32, %arg2: i32, %arg3: memref<8x768xf32, #tpu.memory_space<vmem>>, %arg4: memref<768x512xf32, #tpu.memory_space<vmem>>, %arg5: memref<1x512xf32, #tpu.memory_space<vmem>>, %arg6: memref<1x512xf32, #tpu.memory_space<vmem>>, %arg7: memref<8x512xf32, #tpu.memory_space<vmem>>, %arg8: memref<8x512xf32, #tpu.memory_space<vmem>>) attributes {dimension_semantics = [#tpu.dimension_semantics<parallel>, #tpu.dimension_semantics<parallel>, #tpu.dimension_semantics<arbitrary>], iteration_bounds = array<i64: 1, 1, 3>, scalar_prefetch = 0 : i64, scratch_operands = 1 : i64, tpu.core_type = #tpu.core_type<tc>, window_params = [{transform_indices = @transform_0, window_bounds = array<i64: 8, 768>}, {transform_indices = @transform_1, window_bounds = array<i64: 768, 512>}, {transform_indices = @transform_2, window_bounds = array<i64: 1, 512>}, {transform_indices = @transform_3, window_bounds = array<i64: 1, 512>}, {transform_indices = @transform_4, window_bounds = array<i64: 8, 512>}]} {
    %c0_i32 = arith.constant 0 : i32
    %0 = arith.cmpi eq, %arg2, %c0_i32 : i32
    %1 = arith.extui %0 : i1 to i32
    %c0_i32_0 = arith.constant 0 : i32
    %2 = arith.cmpi ne, %1, %c0_i32_0 : i32
    scf.if %2 {
      %cst_9 = arith.constant 0.000000e+00 : f32
      %12 = vector.broadcast %cst_9 : f32 to vector<8x512xf32>
      %c0_10 = arith.constant 0 : index
      %c0_11 = arith.constant 0 : index
      %13 = vector.load %arg8[%c0_10, %c0_11] : memref<8x512xf32, #tpu.memory_space<vmem>>, vector<8x512xf32>
      tpu.vector_store %arg8[%c0_10, %c0_11], %12 {strides = array<i32>} : memref<8x512xf32, #tpu.memory_space<vmem>>, vector<8x512xf32>,
    } else {
    }
    %c0 = arith.constant 0 : index
    %c0_1 = arith.constant 0 : index
    %3 = vector.load %arg8[%c0, %c0_1] : memref<8x512xf32, #tpu.memory_space<vmem>>, vector<8x512xf32>
    %c0_2 = arith.constant 0 : index
    %c0_3 = arith.constant 0 : index
    %4 = vector.load %arg3[%c0_2, %c0_3] : memref<8x768xf32, #tpu.memory_space<vmem>>, vector<8x768xf32>
    %c0_4 = arith.constant 0 : index
    %c0_5 = arith.constant 0 : index
    %5 = vector.load %arg4[%c0_4, %c0_5] : memref<768x512xf32, #tpu.memory_space<vmem>>, vector<768x512xf32>
    %cst = arith.constant dense<0.000000e+00> : vector<8x512xf32>
    %6 = tpu.matmul %4, %5, %cst {dimension_numbers = #tpu.dot_dimension_numbers<[1], [0], [0], [1], [0, 0, 1, 1], [], []>} : vector<8x768xf32>, vector<768x512xf32>, vector<8x512xf32> -> vector<8x512xf32>
    %7 = arith.addf %3, %6 : vector<8x512xf32>
    %c0_6 = arith.constant 0 : index
    %c0_7 = arith.constant 0 : index
    %8 = vector.load %arg8[%c0_6, %c0_7] : memref<8x512xf32, #tpu.memory_space<vmem>>, vector<8x512xf32>
    tpu.vector_store %arg8[%c0_6, %c0_7], %7 {strides = array<i32>} : memref<8x512xf32, #tpu.memory_space<vmem>>, vector<8x512xf32>,
    %c2_i32 = arith.constant 2 : i32
    %9 = arith.cmpi eq, %arg2, %c2_i32 : i32
    %10 = arith.extui %9 : i1 to i32
    %c0_i32_8 = arith.constant 0 : i32
    %11 = arith.cmpi ne, %10, %c0_i32_8 : i32
    scf.if %11 {
      %c0_9 = arith.constant 0 : index
      %c0_10 = arith.constant 0 : index
      %12 = vector.load %arg8[%c0_9, %c0_10] : memref<8x512xf32, #tpu.memory_space<vmem>>, vector<8x512xf32>
      %c0_11 = arith.constant 0 : index
      %c0_12 = arith.constant 0 : index
      %13 = vector.load %arg5[%c0_11, %c0_12] : memref<1x512xf32, #tpu.memory_space<vmem>>, vector<1x512xf32>
      %14 = vector.broadcast %13 : vector<1x512xf32> to vector<8x512xf32>
      %15 = arith.mulf %12, %14 : vector<8x512xf32>
      %c0_13 = arith.constant 0 : index
      %c0_14 = arith.constant 0 : index
      %16 = vector.load %arg6[%c0_13, %c0_14] : memref<1x512xf32, #tpu.memory_space<vmem>>, vector<1x512xf32>
      %17 = vector.broadcast %16 : vector<1x512xf32> to vector<8x512xf32>
      %18 = arith.addf %15, %17 : vector<8x512xf32>
      %cst_15 = arith.constant 0.000000e+00 : f32
      %19 = vector.broadcast %cst_15 : f32 to vector<8x512xf32>
      %20 = arith.maximumf %18, %19 : vector<8x512xf32>
      %c0_16 = arith.constant 0 : index
      %c0_17 = arith.constant 0 : index
      %21 = vector.load %arg7[%c0_16, %c0_17] : memref<8x512xf32, #tpu.memory_space<vmem>>, vector<8x512xf32>
      tpu.vector_store %arg7[%c0_16, %c0_17], %20 {strides = array<i32>} : memref<8x512xf32, #tpu.memory_space<vmem>>, vector<8x512xf32>,
    } else {
    }
    return
  }
  func.func @transform_0(%arg0: i32, %arg1: i32, %arg2: i32) -> (i32, i32) {
    %c0_i32 = arith.constant 0 : i32
    return %arg0, %arg2 : i32, i32
  }
  func.func @transform_1(%arg0: i32, %arg1: i32, %arg2: i32) -> (i32, i32) {
    %c0_i32 = arith.constant 0 : i32
    return %arg2, %arg1 : i32, i32
  }
  func.func @transform_2(%arg0: i32, %arg1: i32, %arg2: i32) -> (i32, i32) {
    %c0_i32 = arith.constant 0 : i32
    %c0_i32_0 = arith.constant 0 : i32
    return %c0_i32, %arg1 : i32, i32
  }
  func.func @transform_3(%arg0: i32, %arg1: i32, %arg2: i32) -> (i32, i32) {
    %c0_i32 = arith.constant 0 : i32
    %c0_i32_0 = arith.constant 0 : i32
    return %c0_i32, %arg1 : i32, i32
  }
  func.func @transform_4(%arg0: i32, %arg1: i32, %arg2: i32) -> (i32, i32) {
    %c0_i32 = arith.constant 0 : i32
    return %arg0, %arg1 : i32, i32
  }
}

module attributes {stable_mosaic.version = 11 : i64} {
  func.func @_matmul_bn_kernel(%arg0: i32, %arg1: i32, %arg2: i32, %arg3: memref<8x256xf32, #tpu.memory_space<vmem>>, %arg4: memref<256x512xf32, #tpu.memory_space<vmem>>, %arg5: memref<1x512xf32, #tpu.memory_space<vmem>>, %arg6: memref<1x512xf32, #tpu.memory_space<vmem>>, %arg7: memref<8x512xf32, #tpu.memory_space<vmem>>, %arg8: memref<8x512xf32, #tpu.memory_space<vmem>>) attributes {dimension_semantics = [#tpu.dimension_semantics<parallel>, #tpu.dimension_semantics<parallel>, #tpu.dimension_semantics<arbitrary>], iteration_bounds = array<i64: 1, 1, 1>, scalar_prefetch = 0 : i64, scratch_operands = 1 : i64, tpu.core_type = #tpu.core_type<tc>, window_params = [{transform_indices = @transform_0, window_bounds = array<i64: 8, 256>}, {transform_indices = @transform_1, window_bounds = array<i64: 256, 512>}, {transform_indices = @transform_2, window_bounds = array<i64: 1, 512>}, {transform_indices = @transform_3, window_bounds = array<i64: 1, 512>}, {transform_indices = @transform_4, window_bounds = array<i64: 8, 512>}]} {
    %c0_i32 = arith.constant 0 : i32
    %0 = arith.cmpi eq, %arg2, %c0_i32 : i32
    %1 = arith.extui %0 : i1 to i32
    %c0_i32_0 = arith.constant 0 : i32
    %2 = arith.cmpi ne, %1, %c0_i32_0 : i32
    scf.if %2 {
      %cst_10 = arith.constant 0.000000e+00 : f32
      %12 = vector.broadcast %cst_10 : f32 to vector<8x512xf32>
      %c0_11 = arith.constant 0 : index
      %c0_12 = arith.constant 0 : index
      %13 = vector.load %arg8[%c0_11, %c0_12] : memref<8x512xf32, #tpu.memory_space<vmem>>, vector<8x512xf32>
      tpu.vector_store %arg8[%c0_11, %c0_12], %12 {strides = array<i32>} : memref<8x512xf32, #tpu.memory_space<vmem>>, vector<8x512xf32>,
    } else {
    }
    %c0 = arith.constant 0 : index
    %c0_1 = arith.constant 0 : index
    %3 = vector.load %arg8[%c0, %c0_1] : memref<8x512xf32, #tpu.memory_space<vmem>>, vector<8x512xf32>
    %c0_2 = arith.constant 0 : index
    %c0_3 = arith.constant 0 : index
    %4 = vector.load %arg3[%c0_2, %c0_3] : memref<8x256xf32, #tpu.memory_space<vmem>>, vector<8x256xf32>
    %c0_4 = arith.constant 0 : index
    %c0_5 = arith.constant 0 : index
    %5 = vector.load %arg4[%c0_4, %c0_5] : memref<256x512xf32, #tpu.memory_space<vmem>>, vector<256x512xf32>
    %cst = arith.constant dense<0.000000e+00> : vector<8x512xf32>
    %6 = tpu.matmul %4, %5, %cst {dimension_numbers = #tpu.dot_dimension_numbers<[1], [0], [0], [1], [0, 0, 1, 1], [], []>} : vector<8x256xf32>, vector<256x512xf32>, vector<8x512xf32> -> vector<8x512xf32>
    %7 = arith.addf %3, %6 : vector<8x512xf32>
    %c0_6 = arith.constant 0 : index
    %c0_7 = arith.constant 0 : index
    %8 = vector.load %arg8[%c0_6, %c0_7] : memref<8x512xf32, #tpu.memory_space<vmem>>, vector<8x512xf32>
    tpu.vector_store %arg8[%c0_6, %c0_7], %7 {strides = array<i32>} : memref<8x512xf32, #tpu.memory_space<vmem>>, vector<8x512xf32>,
    %c0_i32_8 = arith.constant 0 : i32
    %9 = arith.cmpi eq, %arg2, %c0_i32_8 : i32
    %10 = arith.extui %9 : i1 to i32
    %c0_i32_9 = arith.constant 0 : i32
    %11 = arith.cmpi ne, %10, %c0_i32_9 : i32
    scf.if %11 {
      %c0_10 = arith.constant 0 : index
      %c0_11 = arith.constant 0 : index
      %12 = vector.load %arg8[%c0_10, %c0_11] : memref<8x512xf32, #tpu.memory_space<vmem>>, vector<8x512xf32>
      %c0_12 = arith.constant 0 : index
      %c0_13 = arith.constant 0 : index
      %13 = vector.load %arg5[%c0_12, %c0_13] : memref<1x512xf32, #tpu.memory_space<vmem>>, vector<1x512xf32>
      %14 = vector.broadcast %13 : vector<1x512xf32> to vector<8x512xf32>
      %15 = arith.mulf %12, %14 : vector<8x512xf32>
      %c0_14 = arith.constant 0 : index
      %c0_15 = arith.constant 0 : index
      %16 = vector.load %arg6[%c0_14, %c0_15] : memref<1x512xf32, #tpu.memory_space<vmem>>, vector<1x512xf32>
      %17 = vector.broadcast %16 : vector<1x512xf32> to vector<8x512xf32>
      %18 = arith.addf %15, %17 : vector<8x512xf32>
      %c0_16 = arith.constant 0 : index
      %c0_17 = arith.constant 0 : index
      %19 = vector.load %arg7[%c0_16, %c0_17] : memref<8x512xf32, #tpu.memory_space<vmem>>, vector<8x512xf32>
      tpu.vector_store %arg7[%c0_16, %c0_17], %18 {strides = array<i32>} : memref<8x512xf32, #tpu.memory_space<vmem>>, vector<8x512xf32>,
    } else {
    }
    return
  }
  func.func @transform_0(%arg0: i32, %arg1: i32, %arg2: i32) -> (i32, i32) {
    %c0_i32 = arith.constant 0 : i32
    return %arg0, %arg2 : i32, i32
  }
  func.func @transform_1(%arg0: i32, %arg1: i32, %arg2: i32) -> (i32, i32) {
    %c0_i32 = arith.constant 0 : i32
    return %arg2, %arg1 : i32, i32
  }
  func.func @transform_2(%arg0: i32, %arg1: i32, %arg2: i32) -> (i32, i32) {
    %c0_i32 = arith.constant 0 : i32
    %c0_i32_0 = arith.constant 0 : i32
    return %c0_i32, %arg1 : i32, i32
  }
  func.func @transform_3(%arg0: i32, %arg1: i32, %arg2: i32) -> (i32, i32) {
    %c0_i32 = arith.constant 0 : i32
    %c0_i32_0 = arith.constant 0 : i32
    return %c0_i32, %arg1 : i32, i32
  }
  func.func @transform_4(%arg0: i32, %arg1: i32, %arg2: i32) -> (i32, i32) {
    %c0_i32 = arith.constant 0 : i32
    return %arg0, %arg1 : i32, i32
  }
}

module attributes {stable_mosaic.version = 11 : i64} {
  func.func @_matmul_bn_kernel(%arg0: i32, %arg1: i32, %arg2: i32, %arg3: memref<8x512xf32, #tpu.memory_space<vmem>>, %arg4: memref<512x512xf32, #tpu.memory_space<vmem>>, %arg5: memref<1x512xf32, #tpu.memory_space<vmem>>, %arg6: memref<1x512xf32, #tpu.memory_space<vmem>>, %arg7: memref<8x512xf32, #tpu.memory_space<vmem>>, %arg8: memref<8x512xf32, #tpu.memory_space<vmem>>, %arg9: memref<8x512xf32, #tpu.memory_space<vmem>>) attributes {dimension_semantics = [#tpu.dimension_semantics<parallel>, #tpu.dimension_semantics<parallel>, #tpu.dimension_semantics<arbitrary>], iteration_bounds = array<i64: 1, 1, 9>, scalar_prefetch = 0 : i64, scratch_operands = 1 : i64, tpu.core_type = #tpu.core_type<tc>, window_params = [{transform_indices = @transform_0, window_bounds = array<i64: 8, 512>}, {transform_indices = @transform_1, window_bounds = array<i64: 512, 512>}, {transform_indices = @transform_2, window_bounds = array<i64: 1, 512>}, {transform_indices = @transform_3, window_bounds = array<i64: 1, 512>}, {transform_indices = @transform_4, window_bounds = array<i64: 8, 512>}, {transform_indices = @transform_5, window_bounds = array<i64: 8, 512>}]} {
    %c0_i32 = arith.constant 0 : i32
    %0 = arith.cmpi eq, %arg2, %c0_i32 : i32
    %1 = arith.extui %0 : i1 to i32
    %c0_i32_0 = arith.constant 0 : i32
    %2 = arith.cmpi ne, %1, %c0_i32_0 : i32
    scf.if %2 {
      %cst_9 = arith.constant 0.000000e+00 : f32
      %12 = vector.broadcast %cst_9 : f32 to vector<8x512xf32>
      %c0_10 = arith.constant 0 : index
      %c0_11 = arith.constant 0 : index
      %13 = vector.load %arg9[%c0_10, %c0_11] : memref<8x512xf32, #tpu.memory_space<vmem>>, vector<8x512xf32>
      tpu.vector_store %arg9[%c0_10, %c0_11], %12 {strides = array<i32>} : memref<8x512xf32, #tpu.memory_space<vmem>>, vector<8x512xf32>,
    } else {
    }
    %c0 = arith.constant 0 : index
    %c0_1 = arith.constant 0 : index
    %3 = vector.load %arg9[%c0, %c0_1] : memref<8x512xf32, #tpu.memory_space<vmem>>, vector<8x512xf32>
    %c0_2 = arith.constant 0 : index
    %c0_3 = arith.constant 0 : index
    %4 = vector.load %arg3[%c0_2, %c0_3] : memref<8x512xf32, #tpu.memory_space<vmem>>, vector<8x512xf32>
    %c0_4 = arith.constant 0 : index
    %c0_5 = arith.constant 0 : index
    %5 = vector.load %arg4[%c0_4, %c0_5] : memref<512x512xf32, #tpu.memory_space<vmem>>, vector<512x512xf32>
    %cst = arith.constant dense<0.000000e+00> : vector<8x512xf32>
    %6 = tpu.matmul %4, %5, %cst {dimension_numbers = #tpu.dot_dimension_numbers<[1], [0], [0], [1], [0, 0, 1, 1], [], []>} : vector<8x512xf32>, vector<512x512xf32>, vector<8x512xf32> -> vector<8x512xf32>
    %7 = arith.addf %3, %6 : vector<8x512xf32>
    %c0_6 = arith.constant 0 : index
    %c0_7 = arith.constant 0 : index
    %8 = vector.load %arg9[%c0_6, %c0_7] : memref<8x512xf32, #tpu.memory_space<vmem>>, vector<8x512xf32>
    tpu.vector_store %arg9[%c0_6, %c0_7], %7 {strides = array<i32>} : memref<8x512xf32, #tpu.memory_space<vmem>>, vector<8x512xf32>,
    %c8_i32 = arith.constant 8 : i32
    %9 = arith.cmpi eq, %arg2, %c8_i32 : i32
    %10 = arith.extui %9 : i1 to i32
    %c0_i32_8 = arith.constant 0 : i32
    %11 = arith.cmpi ne, %10, %c0_i32_8 : i32
    scf.if %11 {
      %c0_9 = arith.constant 0 : index
      %c0_10 = arith.constant 0 : index
      %12 = vector.load %arg9[%c0_9, %c0_10] : memref<8x512xf32, #tpu.memory_space<vmem>>, vector<8x512xf32>
      %c0_11 = arith.constant 0 : index
      %c0_12 = arith.constant 0 : index
      %13 = vector.load %arg5[%c0_11, %c0_12] : memref<1x512xf32, #tpu.memory_space<vmem>>, vector<1x512xf32>
      %14 = vector.broadcast %13 : vector<1x512xf32> to vector<8x512xf32>
      %15 = arith.mulf %12, %14 : vector<8x512xf32>
      %c0_13 = arith.constant 0 : index
      %c0_14 = arith.constant 0 : index
      %16 = vector.load %arg6[%c0_13, %c0_14] : memref<1x512xf32, #tpu.memory_space<vmem>>, vector<1x512xf32>
      %17 = vector.broadcast %16 : vector<1x512xf32> to vector<8x512xf32>
      %18 = arith.addf %15, %17 : vector<8x512xf32>
      %c0_15 = arith.constant 0 : index
      %c0_16 = arith.constant 0 : index
      %19 = vector.load %arg7[%c0_15, %c0_16] : memref<8x512xf32, #tpu.memory_space<vmem>>, vector<8x512xf32>
      %20 = arith.addf %18, %19 : vector<8x512xf32>
      %cst_17 = arith.constant 0.000000e+00 : f32
      %21 = vector.broadcast %cst_17 : f32 to vector<8x512xf32>
      %22 = arith.maximumf %20, %21 : vector<8x512xf32>
      %c0_18 = arith.constant 0 : index
      %c0_19 = arith.constant 0 : index
      %23 = vector.load %arg8[%c0_18, %c0_19] : memref<8x512xf32, #tpu.memory_space<vmem>>, vector<8x512xf32>
      tpu.vector_store %arg8[%c0_18, %c0_19], %22 {strides = array<i32>} : memref<8x512xf32, #tpu.memory_space<vmem>>, vector<8x512xf32>,
    } else {
    }
    return
  }
  func.func @transform_0(%arg0: i32, %arg1: i32, %arg2: i32) -> (i32, i32) {
    %c0_i32 = arith.constant 0 : i32
    return %arg0, %arg2 : i32, i32
  }
  func.func @transform_1(%arg0: i32, %arg1: i32, %arg2: i32) -> (i32, i32) {
    %c0_i32 = arith.constant 0 : i32
    return %arg2, %arg1 : i32, i32
  }
  func.func @transform_2(%arg0: i32, %arg1: i32, %arg2: i32) -> (i32, i32) {
    %c0_i32 = arith.constant 0 : i32
    %c0_i32_0 = arith.constant 0 : i32
    return %c0_i32, %arg1 : i32, i32
  }
  func.func @transform_3(%arg0: i32, %arg1: i32, %arg2: i32) -> (i32, i32) {
    %c0_i32 = arith.constant 0 : i32
    %c0_i32_0 = arith.constant 0 : i32
    return %c0_i32, %arg1 : i32, i32
  }
  func.func @transform_4(%arg0: i32, %arg1: i32, %arg2: i32) -> (i32, i32) {
    %c0_i32 = arith.constant 0 : i32
    return %arg0, %arg1 : i32, i32
  }
  func.func @transform_5(%arg0: i32, %arg1: i32, %arg2: i32) -> (i32, i32) {
    %c0_i32 = arith.constant 0 : i32
    return %arg0, %arg1 : i32, i32
  }
}

module attributes {stable_mosaic.version = 11 : i64} {
  func.func @_matmul_bn_kernel(%arg0: i32, %arg1: i32, %arg2: i32, %arg3: memref<8x512xf32, #tpu.memory_space<vmem>>, %arg4: memref<512x512xf32, #tpu.memory_space<vmem>>, %arg5: memref<1x512xf32, #tpu.memory_space<vmem>>, %arg6: memref<1x512xf32, #tpu.memory_space<vmem>>, %arg7: memref<8x512xf32, #tpu.memory_space<vmem>>, %arg8: memref<8x512xf32, #tpu.memory_space<vmem>>) attributes {dimension_semantics = [#tpu.dimension_semantics<parallel>, #tpu.dimension_semantics<parallel>, #tpu.dimension_semantics<arbitrary>], iteration_bounds = array<i64: 1, 1, 9>, scalar_prefetch = 0 : i64, scratch_operands = 1 : i64, tpu.core_type = #tpu.core_type<tc>, window_params = [{transform_indices = @transform_0, window_bounds = array<i64: 8, 512>}, {transform_indices = @transform_1, window_bounds = array<i64: 512, 512>}, {transform_indices = @transform_2, window_bounds = array<i64: 1, 512>}, {transform_indices = @transform_3, window_bounds = array<i64: 1, 512>}, {transform_indices = @transform_4, window_bounds = array<i64: 8, 512>}]} {
    %c0_i32 = arith.constant 0 : i32
    %0 = arith.cmpi eq, %arg2, %c0_i32 : i32
    %1 = arith.extui %0 : i1 to i32
    %c0_i32_0 = arith.constant 0 : i32
    %2 = arith.cmpi ne, %1, %c0_i32_0 : i32
    scf.if %2 {
      %cst_9 = arith.constant 0.000000e+00 : f32
      %12 = vector.broadcast %cst_9 : f32 to vector<8x512xf32>
      %c0_10 = arith.constant 0 : index
      %c0_11 = arith.constant 0 : index
      %13 = vector.load %arg8[%c0_10, %c0_11] : memref<8x512xf32, #tpu.memory_space<vmem>>, vector<8x512xf32>
      tpu.vector_store %arg8[%c0_10, %c0_11], %12 {strides = array<i32>} : memref<8x512xf32, #tpu.memory_space<vmem>>, vector<8x512xf32>,
    } else {
    }
    %c0 = arith.constant 0 : index
    %c0_1 = arith.constant 0 : index
    %3 = vector.load %arg8[%c0, %c0_1] : memref<8x512xf32, #tpu.memory_space<vmem>>, vector<8x512xf32>
    %c0_2 = arith.constant 0 : index
    %c0_3 = arith.constant 0 : index
    %4 = vector.load %arg3[%c0_2, %c0_3] : memref<8x512xf32, #tpu.memory_space<vmem>>, vector<8x512xf32>
    %c0_4 = arith.constant 0 : index
    %c0_5 = arith.constant 0 : index
    %5 = vector.load %arg4[%c0_4, %c0_5] : memref<512x512xf32, #tpu.memory_space<vmem>>, vector<512x512xf32>
    %cst = arith.constant dense<0.000000e+00> : vector<8x512xf32>
    %6 = tpu.matmul %4, %5, %cst {dimension_numbers = #tpu.dot_dimension_numbers<[1], [0], [0], [1], [0, 0, 1, 1], [], []>} : vector<8x512xf32>, vector<512x512xf32>, vector<8x512xf32> -> vector<8x512xf32>
    %7 = arith.addf %3, %6 : vector<8x512xf32>
    %c0_6 = arith.constant 0 : index
    %c0_7 = arith.constant 0 : index
    %8 = vector.load %arg8[%c0_6, %c0_7] : memref<8x512xf32, #tpu.memory_space<vmem>>, vector<8x512xf32>
    tpu.vector_store %arg8[%c0_6, %c0_7], %7 {strides = array<i32>} : memref<8x512xf32, #tpu.memory_space<vmem>>, vector<8x512xf32>,
    %c8_i32 = arith.constant 8 : i32
    %9 = arith.cmpi eq, %arg2, %c8_i32 : i32
    %10 = arith.extui %9 : i1 to i32
    %c0_i32_8 = arith.constant 0 : i32
    %11 = arith.cmpi ne, %10, %c0_i32_8 : i32
    scf.if %11 {
      %c0_9 = arith.constant 0 : index
      %c0_10 = arith.constant 0 : index
      %12 = vector.load %arg8[%c0_9, %c0_10] : memref<8x512xf32, #tpu.memory_space<vmem>>, vector<8x512xf32>
      %c0_11 = arith.constant 0 : index
      %c0_12 = arith.constant 0 : index
      %13 = vector.load %arg5[%c0_11, %c0_12] : memref<1x512xf32, #tpu.memory_space<vmem>>, vector<1x512xf32>
      %14 = vector.broadcast %13 : vector<1x512xf32> to vector<8x512xf32>
      %15 = arith.mulf %12, %14 : vector<8x512xf32>
      %c0_13 = arith.constant 0 : index
      %c0_14 = arith.constant 0 : index
      %16 = vector.load %arg6[%c0_13, %c0_14] : memref<1x512xf32, #tpu.memory_space<vmem>>, vector<1x512xf32>
      %17 = vector.broadcast %16 : vector<1x512xf32> to vector<8x512xf32>
      %18 = arith.addf %15, %17 : vector<8x512xf32>
      %cst_15 = arith.constant 0.000000e+00 : f32
      %19 = vector.broadcast %cst_15 : f32 to vector<8x512xf32>
      %20 = arith.maximumf %18, %19 : vector<8x512xf32>
      %c0_16 = arith.constant 0 : index
      %c0_17 = arith.constant 0 : index
      %21 = vector.load %arg7[%c0_16, %c0_17] : memref<8x512xf32, #tpu.memory_space<vmem>>, vector<8x512xf32>
      tpu.vector_store %arg7[%c0_16, %c0_17], %20 {strides = array<i32>} : memref<8x512xf32, #tpu.memory_space<vmem>>, vector<8x512xf32>,
    } else {
    }
    return
  }
  func.func @transform_0(%arg0: i32, %arg1: i32, %arg2: i32) -> (i32, i32) {
    %c0_i32 = arith.constant 0 : i32
    return %arg0, %arg2 : i32, i32
  }
  func.func @transform_1(%arg0: i32, %arg1: i32, %arg2: i32) -> (i32, i32) {
    %c0_i32 = arith.constant 0 : i32
    return %arg2, %arg1 : i32, i32
  }
  func.func @transform_2(%arg0: i32, %arg1: i32, %arg2: i32) -> (i32, i32) {
    %c0_i32 = arith.constant 0 : i32
    %c0_i32_0 = arith.constant 0 : i32
    return %c0_i32, %arg1 : i32, i32
  }
  func.func @transform_3(%arg0: i32, %arg1: i32, %arg2: i32) -> (i32, i32) {
    %c0_i32 = arith.constant 0 : i32
    %c0_i32_0 = arith.constant 0 : i32
    return %c0_i32, %arg1 : i32, i32
  }
  func.func @transform_4(%arg0: i32, %arg1: i32, %arg2: i32) -> (i32, i32) {
    %c0_i32 = arith.constant 0 : i32
    return %arg0, %arg1 : i32, i32
  }
}

</mosaic_0001>

<bundles_post_ra>
// kernel: encoder_forward.21
= control target key start
LH: loop header
LB: loop body
LE: loop exit
PB: predicated region body
PF: predicated region fallthrough
CT: control target
= control target key end

     0   :  { %s715_s1 = inlined_call_operand.vmem [shape: f32[256,128], index: 1, kind: input, shape index: {}]   ;;  %s716_s0 = inlined_call_operand.vmem [shape: f32[128,256], index: 0, kind: input, shape index: {}]   ;;  %s717_s2 = inlined_call_operand.vmem [shape: f32[1,128], index: 2, kind: input, shape index: {}]   ;;  %s718_s3 = inlined_call_operand.vmem [shape: f32[1,128], index: 3, kind: input, shape index: {}]   ;;  %s719_s4 = inlined_call_operand.vmem [shape: f32[128,128], index: 4, kind: output, shape index: {}]  }
   0x1   :  { %v100_v0 = vld [vmem:[%s715_s1 + $0x78] sm:$0xff]  ;;  %v99_v2 = vld [vmem:[%s715_s1 + $0x70] sm:$0xff]  ;;  %v98_v4 = vld [vmem:[%s715_s1 + $0x68] sm:$0xff] }
   0x2   :  { %v116_v1 = vld [vmem:[%s715_s1 + $0xf8] sm:$0xff]  ;;  %374 = vmatpush.msra.mxu2 %v100_v0  ;;  %v115_v3 = vld [vmem:[%s715_s1 + $0xf0] sm:$0xff]  ;;  %v114_v5 = vld [vmem:[%s715_s1 + $0xe8] sm:$0xff]  ;;  %117 = vmatpush.msra.mxu0 %v100_v0 }
   0x3   :  { %390 = vmatpush.msra.mxu3 %v116_v1  ;;  %182 = vmatpush.msra.mxu1 %v116_v1  ;;  %v97_v6 = vld [vmem:[%s715_s1 + $0x60] sm:$0xff]  ;;  %v96_v8 = vld [vmem:[%s715_s1 + $0x58] sm:$0xff]  ;;  %v95_v10 = vld [vmem:[%s715_s1 + $0x50] sm:$0xff] }
   0x4   :  { %375 = vmatpush.msra.mxu2 %v99_v2  ;;  %v113_v7 = vld [vmem:[%s715_s1 + $0xe0] sm:$0xff]  ;;  %118 = vmatpush.msra.mxu0 %v99_v2  ;;  %v112_v9 = vld [vmem:[%s715_s1 + $0xd8] sm:$0xff]  ;;  %v111_v11 = vld [vmem:[%s715_s1 + $0xd0] sm:$0xff] }
   0x5   :  { %391 = vmatpush.msra.mxu3 %v115_v3  ;;  %183 = vmatpush.msra.mxu1 %v115_v3  ;;  %v94_v12 = vld [vmem:[%s715_s1 + $0x48] sm:$0xff]  ;;  %v93_v14 = vld [vmem:[%s715_s1 + $0x40] sm:$0xff]  ;;  %v92_v16 = vld [vmem:[%s715_s1 + $0x38] sm:$0xff] }
   0x6   :  { %376 = vmatpush.msra.mxu2 %v98_v4  ;;  %119 = vmatpush.msra.mxu0 %v98_v4  ;;  %v110_v13 = vld [vmem:[%s715_s1 + $0xc8] sm:$0xff]  ;;  %v109_v15 = vld [vmem:[%s715_s1 + $0xc0] sm:$0xff]  ;;  %v108_v17 = vld [vmem:[%s715_s1 + $0xb8] sm:$0xff] }
   0x7   :  { %392 = vmatpush.msra.mxu3 %v114_v5  ;;  %184 = vmatpush.msra.mxu1 %v114_v5  ;;  %v91_v18 = vld [vmem:[%s715_s1 + $0x30] sm:$0xff]  ;;  %v90_v20 = vld [vmem:[%s715_s1 + $0x28] sm:$0xff]  ;;  %v89_v22 = vld [vmem:[%s715_s1 + $0x20] sm:$0xff] }
   0x8   :  { %377 = vmatpush.msra.mxu2 %v97_v6  ;;  %120 = vmatpush.msra.mxu0 %v97_v6  ;;  %v107_v19 = vld [vmem:[%s715_s1 + $0xb0] sm:$0xff]  ;;  %v106_v21 = vld [vmem:[%s715_s1 + $0xa8] sm:$0xff]  ;;  %v105_v23 = vld [vmem:[%s715_s1 + $0xa0] sm:$0xff] }
   0x9   :  { %393 = vmatpush.msra.mxu3 %v113_v7  ;;  %185 = vmatpush.msra.mxu1 %v113_v7  ;;  %v88_v24 = vld [vmem:[%s715_s1 + $0x18] sm:$0xff]  ;;  %v87_v26 = vld [vmem:[%s715_s1 + $0x10] sm:$0xff]  ;;  %v86_v28 = vld [vmem:[%s715_s1 + $0x8] sm:$0xff] }
   0xa   :  { %378 = vmatpush.msra.mxu2 %v96_v8  ;;  %121 = vmatpush.msra.mxu0 %v96_v8  ;;  %v104_v25 = vld [vmem:[%s715_s1 + $0x98] sm:$0xff]  ;;  %v103_v27 = vld [vmem:[%s715_s1 + $0x90] sm:$0xff]  ;;  %v102_v29 = vld [vmem:[%s715_s1 + $0x88] sm:$0xff] }
   0xb   :  { %394 = vmatpush.msra.mxu3 %v112_v9  ;;  %186 = vmatpush.msra.mxu1 %v112_v9  ;;  %v85_v30 = vld [vmem:[%s715_s1] sm:$0xff]  ;;  %v70_v33 = vld [vmem:[%s716_s0 + $0x88] sm:$0xff]  ;;  %v71_v36 = vld [vmem:[%s716_s0 + $0x90] sm:$0xff] }
   0xc   :  { %379 = vmatpush.msra.mxu2 %v95_v10  ;;  %122 = vmatpush.msra.mxu0 %v95_v10  ;;  %v101_v31 = vld [vmem:[%s715_s1 + $0x80] sm:$0xff]  ;;  %v54_v35 = vld [vmem:[%s716_s0 + $0x8] sm:$0xff]  ;;  %v72_v37 = vld [vmem:[%s716_s0 + $0x98] sm:$0xff] }
   0xd   :  { %395 = vmatpush.msra.mxu3 %v111_v11  ;;  %187 = vmatpush.msra.mxu1 %v111_v11  ;;  %v69_v32 = vld [vmem:[%s716_s0 + $0x80] sm:$0xff]  ;;  %v55_v38 = vld [vmem:[%s716_s0 + $0x10] sm:$0xff]  ;;  %v56_v39 = vld [vmem:[%s716_s0 + $0x18] sm:$0xff] }
   0xe   :  { %380 = vmatpush.msra.mxu2 %v94_v12  ;;  %123 = vmatpush.msra.mxu0 %v94_v12  ;;  %v53_v34 = vld [vmem:[%s716_s0] sm:$0xff]  ;;  %v74_v41 = vld [vmem:[%s716_s0 + $0xa8] sm:$0xff]  ;;  %v75_v44 = vld [vmem:[%s716_s0 + $0xb0] sm:$0xff] }
   0xf   :  { %396 = vmatpush.msra.mxu3 %v110_v13  ;;  %188 = vmatpush.msra.mxu1 %v110_v13  ;;  %v73_v40 = vld [vmem:[%s716_s0 + $0xa0] sm:$0xff]  ;;  %v58_v43 = vld [vmem:[%s716_s0 + $0x28] sm:$0xff]  ;;  %v76_v45 = vld [vmem:[%s716_s0 + $0xb8] sm:$0xff] }
  0x10   :  { %381 = vmatpush.msra.mxu2 %v93_v14  ;;  %124 = vmatpush.msra.mxu0 %v93_v14  ;;  %v57_v42 = vld [vmem:[%s716_s0 + $0x20] sm:$0xff]  ;;  %v59_v46 = vld [vmem:[%s716_s0 + $0x30] sm:$0xff]  ;;  %v60_v47 = vld [vmem:[%s716_s0 + $0x38] sm:$0xff] }
  0x11   :  { %397 = vmatpush.msra.mxu3 %v109_v15  ;;  %189 = vmatpush.msra.mxu1 %v109_v15  ;;  %v77_v48 = vld [vmem:[%s716_s0 + $0xc0] sm:$0xff]  ;;  %v78_v49 = vld [vmem:[%s716_s0 + $0xc8] sm:$0xff]  ;;  %v79_v52 = vld [vmem:[%s716_s0 + $0xd0] sm:$0xff] }
  0x12   :  { %382 = vmatpush.msra.mxu2 %v92_v16  ;;  %125 = vmatpush.msra.mxu0 %v92_v16  ;;  %v61_v50 = vld [vmem:[%s716_s0 + $0x40] sm:$0xff]  ;;  %v62_v51 = vld [vmem:[%s716_s0 + $0x48] sm:$0xff]  ;;  %v80_v53 = vld [vmem:[%s716_s0 + $0xd8] sm:$0xff] }
  0x13   :  { %398 = vmatpush.msra.mxu3 %v108_v17  ;;  %190 = vmatpush.msra.mxu1 %v108_v17  ;;  %v63_v54 = vld [vmem:[%s716_s0 + $0x50] sm:$0xff]  ;;  %v64_v55 = vld [vmem:[%s716_s0 + $0x58] sm:$0xff]  ;;  %v81_v56 = vld [vmem:[%s716_s0 + $0xe0] sm:$0xff] }
  0x14   :  { %383 = vmatpush.msra.mxu2 %v91_v18  ;;  %126 = vmatpush.msra.mxu0 %v91_v18  ;;  %v82_v57 = vld [vmem:[%s716_s0 + $0xe8] sm:$0xff]  ;;  %v65_v58 = vld [vmem:[%s716_s0 + $0x60] sm:$0xff]  ;;  %v83_v60 = vld [vmem:[%s716_s0 + $0xf0] sm:$0xff] }
  0x15   :  { %399 = vmatpush.msra.mxu3 %v107_v19  ;;  %191 = vmatpush.msra.mxu1 %v107_v19  ;;  %v66_v59 = vld [vmem:[%s716_s0 + $0x68] sm:$0xff]  ;;  %v84_v61 = vld [vmem:[%s716_s0 + $0xf8] sm:$0xff]  ;;  %v67_v62 = vld [vmem:[%s716_s0 + $0x70] sm:$0xff] }
  0x16   :  { %384 = vmatpush.msra.mxu2 %v90_v20  ;;  %127 = vmatpush.msra.mxu0 %v90_v20  ;;  %v68_v63 = vld [vmem:[%s716_s0 + $0x78] sm:$0xff]  ;;  %v628_v0 = vld [vmem:[%s717_s2] ss:$0 sm:$0xff] }
  0x17   :  { %400 = vmatpush.msra.mxu3 %v106_v21  ;;  %192 = vmatpush.msra.mxu1 %v106_v21  ;;  %v633_v4 = vld [vmem:[%s718_s3] ss:$0 sm:$0xff] }
  0x18   :  { %385 = vmatpush.msra.mxu2 %v89_v22  ;;  %128 = vmatpush.msra.mxu0 %v89_v22 }
  0x19   :  { %401 = vmatpush.msra.mxu3 %v105_v23  ;;  %193 = vmatpush.msra.mxu1 %v105_v23 }
  0x1a   :  { %386 = vmatpush.msra.mxu2 %v88_v24  ;;  %129 = vmatpush.msra.mxu0 %v88_v24 }
  0x1b   :  { %402 = vmatpush.msra.mxu3 %v104_v25  ;;  %194 = vmatpush.msra.mxu1 %v104_v25 }
  0x1c   :  { %387 = vmatpush.msra.mxu2 %v87_v26  ;;  %130 = vmatpush.msra.mxu0 %v87_v26 }
  0x1d   :  { %403 = vmatpush.msra.mxu3 %v103_v27  ;;  %195 = vmatpush.msra.mxu1 %v103_v27 }
  0x1e   :  { %388 = vmatpush.msra.mxu2 %v86_v28  ;;  %131 = vmatpush.msra.mxu0 %v86_v28 }
  0x1f   :  { %404 = vmatpush.msra.mxu3 %v102_v29  ;;  %196 = vmatpush.msra.mxu1 %v102_v29 }
  0x20   :  { %389 = vmatpush.msra.mxu2 %v85_v30  ;;  %132 = vmatpush.msra.mxu0 %v85_v30 }
  0x21   :  { %405 = vmatpush.msra.mxu3 %v101_v31  ;;  %157 = vmatmul.f32.vlgmr.msra.gmra.mxu2 %v69_v32 }
  0x22   :  { %222 = vmatmul.f32.vlgmr.msra.gmra.mxu3 %v70_v33  ;;  %197 = vmatpush.msra.mxu1 %v101_v31 }
  0x23   :  { %133 = vmatmul.f32.vlgmr.msra.gmra.mxu0 %v53_v34  ;;  %198 = vmatmul.f32.vlgmr.msra.gmra.mxu1 %v54_v35 }
  0x29   :  { %160 = vmatmul.f32.gmra.mxu2 %v71_v36 }
  0x2a   :  { %225 = vmatmul.f32.gmra.mxu3 %v72_v37 }
  0x2b   :  { %136 = vmatmul.f32.gmra.mxu0 %v55_v38  ;;  %201 = vmatmul.f32.gmra.mxu1 %v56_v39 }
  0x31   :  { %163 = vmatmul.f32.gmra.mxu2 %v73_v40 }
  0x32   :  { %228 = vmatmul.f32.gmra.mxu3 %v74_v41 }
  0x33   :  { %139 = vmatmul.f32.gmra.mxu0 %v57_v42  ;;  %204 = vmatmul.f32.gmra.mxu1 %v58_v43 }
  0x39   :  { %166 = vmatmul.f32.gmra.mxu2 %v75_v44 }
  0x3a   :  { %231 = vmatmul.f32.gmra.mxu3 %v76_v45 }
  0x3b   :  { %142 = vmatmul.f32.gmra.mxu0 %v59_v46  ;;  %207 = vmatmul.f32.gmra.mxu1 %v60_v47 }
  0x41   :  { %169 = vmatmul.f32.gmra.mxu2 %v77_v48 }
  0x42   :  { %234 = vmatmul.f32.gmra.mxu3 %v78_v49 }
  0x43   :  { %145 = vmatmul.f32.gmra.mxu0 %v61_v50  ;;  %210 = vmatmul.f32.gmra.mxu1 %v62_v51 }
  0x49   :  { %172 = vmatmul.f32.gmra.mxu2 %v79_v52 }
  0x4a   :  { %237 = vmatmul.f32.gmra.mxu3 %v80_v53 }
  0x4b   :  { %148 = vmatmul.f32.gmra.mxu0 %v63_v54  ;;  %213 = vmatmul.f32.gmra.mxu1 %v64_v55 }
  0x51   :  { %175 = vmatmul.f32.gmra.mxu2 %v81_v56 }
  0x52   :  { %240 = vmatmul.f32.gmra.mxu3 %v82_v57 }
  0x53   :  { %151 = vmatmul.f32.gmra.mxu0 %v65_v58  ;;  %216 = vmatmul.f32.gmra.mxu1 %v66_v59 }
  0x59   :  { %178 = vmatmul.f32.gmra.mxu2 %v83_v60 }
  0x5a   :  { %243 = vmatmul.f32.gmra.mxu3 %v84_v61 }
  0x5b   :  { %154 = vmatmul.f32.gmra.mxu0 %v67_v62  ;;  %219 = vmatmul.f32.gmra.mxu1 %v68_v63 }
  0xa0   :  { %v134_v1 = vpop.f32.mrf.mxu0  ;;  %v199_v2 = vpop.f32.mrf.mxu1 }
  0xa1   :  { %v200_v3 = vadd.f32 %v199_v2, %v134_v1 }
  0xa3   :  { %v302_v5 = vmul.f32 %v628_v0, %v200_v3 }
  0xa4   :  { %v158_v6 = vpop.f32.mrf.mxu2 }
  0xa5   :  { %v223_v7 = vpop.f32.mrf.mxu3  ;;  %v322_v8 = vadd.f32 %v633_v4, %v302_v5 }
  0xa6   :  { %v224_v9 = vadd.f32 %v223_v7, %v158_v6 }
  0xa7   :  { %v338_v10 = vmax.f32 %v322_v8, 0.0 }
  0xa8   :  { %v310_v11 = vmul.f32 %v628_v0, %v224_v9  ;;  %v137_v12 = vpop.f32.mrf.mxu0  ;;  %v202_v13 = vpop.f32.mrf.mxu1 }
  0xa9   :  { %354 = vst [vmem:[%s719_s4] sm:$0xff] %v338_v10  ;;  %v203_v15 = vadd.f32 %v202_v13, %v137_v12 }
  0xaa   :  { %v330_v14 = vadd.f32 %v633_v4, %v310_v11 }
  0xab   :  { %v303_v17 = vmul.f32 %v628_v0, %v203_v15 }
  0xac   :  { %v346_v16 = vmax.f32 %v330_v14, 0.0  ;;  %v161_v18 = vpop.f32.mrf.mxu2 }
  0xad   :  { %v226_v19 = vpop.f32.mrf.mxu3  ;;  %v323_v20 = vadd.f32 %v633_v4, %v303_v17 }
  0xae   :  { %362 = vst [vmem:[%s719_s4 + $0x40] sm:$0xff] %v346_v16  ;;  %v227_v21 = vadd.f32 %v226_v19, %v161_v18 }
  0xaf   :  { %v339_v22 = vmax.f32 %v323_v20, 0.0 }
  0xb0   :  { %v311_v23 = vmul.f32 %v628_v0, %v227_v21  ;;  %v140_v24 = vpop.f32.mrf.mxu0  ;;  %v205_v25 = vpop.f32.mrf.mxu1 }
  0xb1   :  { %355 = vst [vmem:[%s719_s4 + $0x8] sm:$0xff] %v339_v22  ;;  %v206_v27 = vadd.f32 %v205_v25, %v140_v24 }
  0xb2   :  { %v331_v26 = vadd.f32 %v633_v4, %v311_v23 }
  0xb3   :  { %v304_v29 = vmul.f32 %v628_v0, %v206_v27 }
  0xb4   :  { %v347_v28 = vmax.f32 %v331_v26, 0.0  ;;  %v164_v30 = vpop.f32.mrf.mxu2 }
  0xb5   :  { %v229_v31 = vpop.f32.mrf.mxu3  ;;  %v324_v32 = vadd.f32 %v633_v4, %v304_v29 }
  0xb6   :  { %363 = vst [vmem:[%s719_s4 + $0x48] sm:$0xff] %v347_v28  ;;  %v230_v33 = vadd.f32 %v229_v31, %v164_v30 }
  0xb7   :  { %v340_v34 = vmax.f32 %v324_v32, 0.0 }
  0xb8   :  { %v312_v35 = vmul.f32 %v628_v0, %v230_v33  ;;  %v143_v36 = vpop.f32.mrf.mxu0  ;;  %v208_v37 = vpop.f32.mrf.mxu1 }
  0xb9   :  { %356 = vst [vmem:[%s719_s4 + $0x10] sm:$0xff] %v340_v34  ;;  %v209_v39 = vadd.f32 %v208_v37, %v143_v36 }
  0xba   :  { %v332_v38 = vadd.f32 %v633_v4, %v312_v35 }
  0xbb   :  { %v305_v41 = vmul.f32 %v628_v0, %v209_v39 }
  0xbc   :  { %v348_v40 = vmax.f32 %v332_v38, 0.0  ;;  %v167_v42 = vpop.f32.mrf.mxu2 }
  0xbd   :  { %v232_v43 = vpop.f32.mrf.mxu3  ;;  %v325_v44 = vadd.f32 %v633_v4, %v305_v41 }
  0xbe   :  { %364 = vst [vmem:[%s719_s4 + $0x50] sm:$0xff] %v348_v40  ;;  %v233_v45 = vadd.f32 %v232_v43, %v167_v42 }
  0xbf   :  { %v341_v46 = vmax.f32 %v325_v44, 0.0 }
  0xc0   :  { %v313_v47 = vmul.f32 %v628_v0, %v233_v45  ;;  %v146_v48 = vpop.f32.mrf.mxu0  ;;  %v211_v49 = vpop.f32.mrf.mxu1 }
  0xc1   :  { %357 = vst [vmem:[%s719_s4 + $0x18] sm:$0xff] %v341_v46  ;;  %v212_v51 = vadd.f32 %v211_v49, %v146_v48 }
  0xc2   :  { %v333_v50 = vadd.f32 %v633_v4, %v313_v47 }
  0xc3   :  { %v306_v53 = vmul.f32 %v628_v0, %v212_v51 }
  0xc4   :  { %v349_v52 = vmax.f32 %v333_v50, 0.0  ;;  %v170_v54 = vpop.f32.mrf.mxu2 }
  0xc5   :  { %v235_v55 = vpop.f32.mrf.mxu3  ;;  %v326_v56 = vadd.f32 %v633_v4, %v306_v53 }
  0xc6   :  { %365 = vst [vmem:[%s719_s4 + $0x58] sm:$0xff] %v349_v52  ;;  %v236_v57 = vadd.f32 %v235_v55, %v170_v54 }
  0xc7   :  { %v342_v58 = vmax.f32 %v326_v56, 0.0 }
  0xc8   :  { %v314_v59 = vmul.f32 %v628_v0, %v236_v57  ;;  %v149_v60 = vpop.f32.mrf.mxu0  ;;  %v214_v61 = vpop.f32.mrf.mxu1 }
  0xc9   :  { %358 = vst [vmem:[%s719_s4 + $0x20] sm:$0xff] %v342_v58  ;;  %v215_v63 = vadd.f32 %v214_v61, %v149_v60 }
  0xca   :  { %v334_v62 = vadd.f32 %v633_v4, %v314_v59 }
  0xcb   :  { %v307_v2 = vmul.f32 %v628_v0, %v215_v63 }
  0xcc   :  { %v350_v1 = vmax.f32 %v334_v62, 0.0  ;;  %v173_v3 = vpop.f32.mrf.mxu2 }
  0xcd   :  { %v238_v5 = vpop.f32.mrf.mxu3  ;;  %v327_v6 = vadd.f32 %v633_v4, %v307_v2 }
  0xce   :  { %366 = vst [vmem:[%s719_s4 + $0x60] sm:$0xff] %v350_v1  ;;  %v239_v7 = vadd.f32 %v238_v5, %v173_v3 }
  0xcf   :  { %v343_v8 = vmax.f32 %v327_v6, 0.0 }
  0xd0   :  { %v315_v9 = vmul.f32 %v628_v0, %v239_v7  ;;  %v152_v10 = vpop.f32.mrf.mxu0  ;;  %v217_v11 = vpop.f32.mrf.mxu1 }
  0xd1   :  { %359 = vst [vmem:[%s719_s4 + $0x28] sm:$0xff] %v343_v8  ;;  %v218_v13 = vadd.f32 %v217_v11, %v152_v10 }
  0xd2   :  { %v335_v12 = vadd.f32 %v633_v4, %v315_v9 }
  0xd3   :  { %v308_v15 = vmul.f32 %v628_v0, %v218_v13 }
  0xd4   :  { %v351_v14 = vmax.f32 %v335_v12, 0.0  ;;  %v176_v16 = vpop.f32.mrf.mxu2 }
  0xd5   :  { %v241_v17 = vpop.f32.mrf.mxu3  ;;  %v328_v18 = vadd.f32 %v633_v4, %v308_v15 }
  0xd6   :  { %367 = vst [vmem:[%s719_s4 + $0x68] sm:$0xff] %v351_v14  ;;  %v242_v19 = vadd.f32 %v241_v17, %v176_v16 }
  0xd7   :  { %v344_v20 = vmax.f32 %v328_v18, 0.0 }
  0xd8   :  { %v316_v21 = vmul.f32 %v628_v0, %v242_v19  ;;  %v155_v22 = vpop.f32.mrf.mxu0  ;;  %v220_v23 = vpop.f32.mrf.mxu1 }
  0xd9   :  { %360 = vst [vmem:[%s719_s4 + $0x30] sm:$0xff] %v344_v20  ;;  %v221_v25 = vadd.f32 %v220_v23, %v155_v22 }
  0xda   :  { %v336_v24 = vadd.f32 %v633_v4, %v316_v21 }
  0xdb   :  { %v309_v27 = vmul.f32 %v628_v0, %v221_v25 }
  0xdc   :  { %v352_v26 = vmax.f32 %v336_v24, 0.0  ;;  %v179_v28 = vpop.f32.mrf.mxu2 }
  0xdd   :  { %v244_v29 = vpop.f32.mrf.mxu3  ;;  %v329_v30 = vadd.f32 %v633_v4, %v309_v27 }
  0xde   :  { %368 = vst [vmem:[%s719_s4 + $0x70] sm:$0xff] %v352_v26  ;;  %v245_v31 = vadd.f32 %v244_v29, %v179_v28 }
  0xdf   :  { %v345_v32 = vmax.f32 %v329_v30, 0.0 }
  0xe0   :  { %v317_v33 = vmul.f32 %v628_v0, %v245_v31 }
  0xe1   :  { %361 = vst [vmem:[%s719_s4 + $0x38] sm:$0xff] %v345_v32 }
  0xe2   :  { %v337_v34 = vadd.f32 %v633_v4, %v317_v33 }
  0xe4   :  { %v353_v35 = vmax.f32 %v337_v34, 0.0 }
  0xe6   :  { %369 = vst [vmem:[%s719_s4 + $0x78] sm:$0xff] %v353_v35 }

// kernel: encoder_forward.22
= control target key start
LH: loop header
LB: loop body
LE: loop exit
PB: predicated region body
PF: predicated region fallthrough
CT: control target
= control target key end

     0   :  { %s254_s0 = inlined_call_operand.vmem [shape: f32[9,32,128], index: 0, kind: input, shape index: {}]   ;;  %s255_s1 = inlined_call_operand.vmem [shape: f32[32,128], index: 1, kind: output, shape index: {}]  }
   0x1   :  { %v8_v0 = vld [vmem:[%s254_s0] sm:$0xff]  ;;  %v9_v6 = vld [vmem:[%s254_s0 + $0x8] sm:$0xff]  ;;  %v10_v15 = vld [vmem:[%s254_s0 + $0x10] sm:$0xff] }
   0x2   :  { %v92_v1 = vld [vmem:[%s254_s0 + $0x20] sm:$0xff]  ;;  %v93_v7 = vld [vmem:[%s254_s0 + $0x28] sm:$0xff]  ;;  %v94_v16 = vld [vmem:[%s254_s0 + $0x30] sm:$0xff] }
   0x3   :  { %v96_v2 = vld [vmem:[%s254_s0 + $0x40] sm:$0xff]  ;;  %v17_v3 = vmax.f32 %v8_v0, %v92_v1  ;;  %v97_v8 = vld [vmem:[%s254_s0 + $0x48] sm:$0xff]  ;;  %v18_v10 = vmax.f32 %v9_v6, %v93_v7  ;;  %v98_v17 = vld [vmem:[%s254_s0 + $0x50] sm:$0xff]  ;;  %v19_v20 = vmax.f32 %v10_v15, %v94_v16 }
   0x4   :  { %v100_v4 = vld [vmem:[%s254_s0 + $0x60] sm:$0xff]  ;;  %v101_v13 = vld [vmem:[%s254_s0 + $0x68] sm:$0xff]  ;;  %v102_v24 = vld [vmem:[%s254_s0 + $0x70] sm:$0xff] }
   0x5   :  { %v26_v5 = vmax.f32 %v17_v3, %v96_v2  ;;  %v104_v9 = vld [vmem:[%s254_s0 + $0x80] sm:$0xff]  ;;  %v27_v14 = vmax.f32 %v18_v10, %v97_v8  ;;  %v105_v19 = vld [vmem:[%s254_s0 + $0x88] sm:$0xff]  ;;  %v28_v26 = vmax.f32 %v19_v20, %v98_v17  ;;  %v11_v27 = vld [vmem:[%s254_s0 + $0x18] sm:$0xff] }
   0x6   :  { %v108_v12 = vld [vmem:[%s254_s0 + $0xa0] sm:$0xff]  ;;  %v109_v23 = vld [vmem:[%s254_s0 + $0xa8] sm:$0xff]  ;;  %v95_v28 = vld [vmem:[%s254_s0 + $0x38] sm:$0xff] }
   0x7   :  { %v35_v11 = vmax.f32 %v26_v5, %v100_v4  ;;  %v112_v21 = vld [vmem:[%s254_s0 + $0xc0] sm:$0xff]  ;;  %v36_v22 = vmax.f32 %v27_v14, %v101_v13  ;;  %v99_v29 = vld [vmem:[%s254_s0 + $0x58] sm:$0xff]  ;;  %v106_v32 = vld [vmem:[%s254_s0 + $0x90] sm:$0xff]  ;;  %v20_v33 = vmax.f32 %v11_v27, %v95_v28  ;;  %v37_v36 = vmax.f32 %v28_v26, %v102_v24 }
   0x8   :  { %v116_v30 = vld [vmem:[%s254_s0 + $0xe0] sm:$0xff]  ;;  %v113_v35 = vld [vmem:[%s254_s0 + $0xc8] sm:$0xff]  ;;  %v103_v37 = vld [vmem:[%s254_s0 + $0x78] sm:$0xff] }
   0x9   :  { %v44_v18 = vmax.f32 %v35_v11, %v104_v9  ;;  %v45_v31 = vmax.f32 %v36_v22, %v105_v19  ;;  %v120_v38 = vld [vmem:[%s254_s0 + $0x100] sm:$0xff]  ;;  %v110_v40 = vld [vmem:[%s254_s0 + $0xb0] sm:$0xff]  ;;  %v29_v41 = vmax.f32 %v20_v33, %v99_v29  ;;  %v117_v43 = vld [vmem:[%s254_s0 + $0xe8] sm:$0xff]  ;;  %v46_v44 = vmax.f32 %v37_v36, %v106_v32 }
   0xa   :  { %v107_v45 = vld [vmem:[%s254_s0 + $0x98] sm:$0xff]  ;;  %v114_v47 = vld [vmem:[%s254_s0 + $0xd0] sm:$0xff]  ;;  %v121_v50 = vld [vmem:[%s254_s0 + $0x108] sm:$0xff] }
   0xb   :  { %v53_v25 = vmax.f32 %v44_v18, %v108_v12  ;;  %v54_v39 = vmax.f32 %v45_v31, %v109_v23  ;;  %v38_v48 = vmax.f32 %v29_v41, %v103_v37  ;;  %v55_v51 = vmax.f32 %v46_v44, %v110_v40  ;;  %v111_v52 = vld [vmem:[%s254_s0 + $0xb8] sm:$0xff]  ;;  %v118_v54 = vld [vmem:[%s254_s0 + $0xf0] sm:$0xff] }
   0xc   :  { %v115_v57 = vld [vmem:[%s254_s0 + $0xd8] sm:$0xff]  ;;  %v122_v59 = vld [vmem:[%s254_s0 + $0x110] sm:$0xff] }
   0xd   :  { %v62_v34 = vmax.f32 %v53_v25, %v112_v21  ;;  %v63_v46 = vmax.f32 %v54_v39, %v113_v35  ;;  %v47_v55 = vmax.f32 %v38_v48, %v107_v45  ;;  %v64_v56 = vmax.f32 %v55_v51, %v114_v47  ;;  %v119_v62 = vld [vmem:[%s254_s0 + $0xf8] sm:$0xff] }
   0xe   :  { %v123_v1 = vld [vmem:[%s254_s0 + $0x118] sm:$0xff] }
   0xf   :  { %v71_v42 = vmax.f32 %v62_v34, %v116_v30  ;;  %v72_v53 = vmax.f32 %v63_v46, %v117_v43  ;;  %v56_v60 = vmax.f32 %v47_v55, %v111_v52  ;;  %v73_v61 = vmax.f32 %v64_v56, %v118_v54 }
  0x11   :  { %v80_v49 = vmax.f32 %v71_v42, %v120_v38  ;;  %v81_v58 = vmax.f32 %v72_v53, %v121_v50  ;;  %v65_v63 = vmax.f32 %v56_v60, %v115_v57  ;;  %v82_v0 = vmax.f32 %v73_v61, %v122_v59 }
  0x13   :  { %84 = vst [vmem:[%s255_s1] sm:$0xff] %v80_v49  ;;  %v74_v2 = vmax.f32 %v65_v63, %v119_v62 }
  0x14   :  { %85 = vst [vmem:[%s255_s1 + $0x8] sm:$0xff] %v81_v58 }
  0x15   :  { %86 = vst [vmem:[%s255_s1 + $0x10] sm:$0xff] %v82_v0  ;;  %v83_v3 = vmax.f32 %v74_v2, %v123_v1 }
  0x17   :  { %87 = vst [vmem:[%s255_s1 + $0x18] sm:$0xff] %v83_v3 }

// kernel: encoder_forward.23
= control target key start
LH: loop header
LB: loop body
LE: loop exit
PB: predicated region body
PF: predicated region fallthrough
CT: control target
= control target key end

     0   :  { %s710_s1 = inlined_call_operand.vmem [shape: f32[640,128], index: 1, kind: input, shape index: {}]   ;;  %s711_s0 = inlined_call_operand.vmem [shape: f32[32,640], index: 0, kind: input, shape index: {}]   ;;  %s712_s2 = inlined_call_operand.vmem [shape: f32[1,128], index: 2, kind: input, shape index: {}]   ;;  %s713_s3 = inlined_call_operand.vmem [shape: f32[1,128], index: 3, kind: input, shape index: {}]   ;;  %s714_s4 = inlined_call_operand.vmem [shape: f32[32,128], index: 4, kind: output, shape index: {}]  }
   0x1   :  { %v64_v0 = vld [vmem:[%s710_s1 + $0x78] sm:$0xff]  ;;  %v63_v4 = vld [vmem:[%s710_s1 + $0x70] sm:$0xff]  ;;  %v62_v8 = vld [vmem:[%s710_s1 + $0x68] sm:$0xff] }
   0x2   :  { %v80_v1 = vld [vmem:[%s710_s1 + $0xf8] sm:$0xff]  ;;  %129 = vmatpush.msra.mxu0 %v64_v0  ;;  %v79_v5 = vld [vmem:[%s710_s1 + $0xf0] sm:$0xff]  ;;  %v78_v9 = vld [vmem:[%s710_s1 + $0xe8] sm:$0xff] }
   0x3   :  { %v96_v2 = vld [vmem:[%s710_s1 + $0x178] sm:$0xff]  ;;  %158 = vmatpush.msra.mxu1 %v80_v1  ;;  %v95_v6 = vld [vmem:[%s710_s1 + $0x170] sm:$0xff]  ;;  %v94_v10 = vld [vmem:[%s710_s1 + $0x168] sm:$0xff] }
   0x4   :  { %v112_v3 = vld [vmem:[%s710_s1 + $0x1f8] sm:$0xff]  ;;  %187 = vmatpush.msra.mxu2 %v96_v2  ;;  %v111_v7 = vld [vmem:[%s710_s1 + $0x1f0] sm:$0xff]  ;;  %130 = vmatpush.msra.mxu0 %v63_v4  ;;  %v110_v11 = vld [vmem:[%s710_s1 + $0x1e8] sm:$0xff] }
   0x5   :  { %216 = vmatpush.msra.mxu3 %v112_v3  ;;  %159 = vmatpush.msra.mxu1 %v79_v5  ;;  %v61_v12 = vld [vmem:[%s710_s1 + $0x60] sm:$0xff]  ;;  %v60_v16 = vld [vmem:[%s710_s1 + $0x58] sm:$0xff]  ;;  %v59_v20 = vld [vmem:[%s710_s1 + $0x50] sm:$0xff] }
   0x6   :  { %188 = vmatpush.msra.mxu2 %v95_v6  ;;  %v77_v13 = vld [vmem:[%s710_s1 + $0xe0] sm:$0xff]  ;;  %131 = vmatpush.msra.mxu0 %v62_v8  ;;  %v76_v17 = vld [vmem:[%s710_s1 + $0xd8] sm:$0xff]  ;;  %v75_v21 = vld [vmem:[%s710_s1 + $0xd0] sm:$0xff] }
   0x7   :  { %217 = vmatpush.msra.mxu3 %v111_v7  ;;  %160 = vmatpush.msra.mxu1 %v78_v9  ;;  %v93_v14 = vld [vmem:[%s710_s1 + $0x160] sm:$0xff]  ;;  %v92_v18 = vld [vmem:[%s710_s1 + $0x158] sm:$0xff]  ;;  %v91_v22 = vld [vmem:[%s710_s1 + $0x150] sm:$0xff] }
   0x8   :  { %v109_v15 = vld [vmem:[%s710_s1 + $0x1e0] sm:$0xff]  ;;  %189 = vmatpush.msra.mxu2 %v94_v10  ;;  %132 = vmatpush.msra.mxu0 %v61_v12  ;;  %v108_v19 = vld [vmem:[%s710_s1 + $0x1d8] sm:$0xff]  ;;  %v107_v23 = vld [vmem:[%s710_s1 + $0x1d0] sm:$0xff] }
   0x9   :  { %218 = vmatpush.msra.mxu3 %v110_v11  ;;  %161 = vmatpush.msra.mxu1 %v77_v13  ;;  %v58_v24 = vld [vmem:[%s710_s1 + $0x48] sm:$0xff]  ;;  %v57_v28 = vld [vmem:[%s710_s1 + $0x40] sm:$0xff]  ;;  %v56_v32 = vld [vmem:[%s710_s1 + $0x38] sm:$0xff] }
   0xa   :  { %190 = vmatpush.msra.mxu2 %v93_v14  ;;  %133 = vmatpush.msra.mxu0 %v60_v16  ;;  %v74_v25 = vld [vmem:[%s710_s1 + $0xc8] sm:$0xff]  ;;  %v73_v29 = vld [vmem:[%s710_s1 + $0xc0] sm:$0xff]  ;;  %v72_v33 = vld [vmem:[%s710_s1 + $0xb8] sm:$0xff] }
   0xb   :  { %219 = vmatpush.msra.mxu3 %v109_v15  ;;  %162 = vmatpush.msra.mxu1 %v76_v17  ;;  %v90_v26 = vld [vmem:[%s710_s1 + $0x148] sm:$0xff]  ;;  %v89_v30 = vld [vmem:[%s710_s1 + $0x140] sm:$0xff]  ;;  %v88_v34 = vld [vmem:[%s710_s1 + $0x138] sm:$0xff] }
   0xc   :  { %191 = vmatpush.msra.mxu2 %v92_v18  ;;  %134 = vmatpush.msra.mxu0 %v59_v20  ;;  %v106_v27 = vld [vmem:[%s710_s1 + $0x1c8] sm:$0xff]  ;;  %v105_v31 = vld [vmem:[%s710_s1 + $0x1c0] sm:$0xff]  ;;  %v104_v35 = vld [vmem:[%s710_s1 + $0x1b8] sm:$0xff] }
   0xd   :  { %220 = vmatpush.msra.mxu3 %v108_v19  ;;  %163 = vmatpush.msra.mxu1 %v75_v21  ;;  %v55_v36 = vld [vmem:[%s710_s1 + $0x30] sm:$0xff]  ;;  %v54_v40 = vld [vmem:[%s710_s1 + $0x28] sm:$0xff]  ;;  %v53_v44 = vld [vmem:[%s710_s1 + $0x20] sm:$0xff] }
   0xe   :  { %192 = vmatpush.msra.mxu2 %v91_v22  ;;  %135 = vmatpush.msra.mxu0 %v58_v24  ;;  %v71_v37 = vld [vmem:[%s710_s1 + $0xb0] sm:$0xff]  ;;  %v70_v41 = vld [vmem:[%s710_s1 + $0xa8] sm:$0xff]  ;;  %v69_v45 = vld [vmem:[%s710_s1 + $0xa0] sm:$0xff] }
   0xf   :  { %221 = vmatpush.msra.mxu3 %v107_v23  ;;  %164 = vmatpush.msra.mxu1 %v74_v25  ;;  %v87_v38 = vld [vmem:[%s710_s1 + $0x130] sm:$0xff]  ;;  %v86_v42 = vld [vmem:[%s710_s1 + $0x128] sm:$0xff]  ;;  %v85_v46 = vld [vmem:[%s710_s1 + $0x120] sm:$0xff] }
  0x10   :  { %193 = vmatpush.msra.mxu2 %v90_v26  ;;  %136 = vmatpush.msra.mxu0 %v57_v28  ;;  %v103_v39 = vld [vmem:[%s710_s1 + $0x1b0] sm:$0xff]  ;;  %v102_v43 = vld [vmem:[%s710_s1 + $0x1a8] sm:$0xff]  ;;  %v101_v47 = vld [vmem:[%s710_s1 + $0x1a0] sm:$0xff] }
  0x11   :  { %222 = vmatpush.msra.mxu3 %v106_v27  ;;  %165 = vmatpush.msra.mxu1 %v73_v29  ;;  %v52_v48 = vld [vmem:[%s710_s1 + $0x18] sm:$0xff]  ;;  %v51_v52 = vld [vmem:[%s710_s1 + $0x10] sm:$0xff]  ;;  %v50_v56 = vld [vmem:[%s710_s1 + $0x8] sm:$0xff] }
  0x12   :  { %194 = vmatpush.msra.mxu2 %v89_v30  ;;  %137 = vmatpush.msra.mxu0 %v56_v32  ;;  %v68_v49 = vld [vmem:[%s710_s1 + $0x98] sm:$0xff]  ;;  %v67_v53 = vld [vmem:[%s710_s1 + $0x90] sm:$0xff]  ;;  %v66_v57 = vld [vmem:[%s710_s1 + $0x88] sm:$0xff] }
  0x13   :  { %223 = vmatpush.msra.mxu3 %v105_v31  ;;  %166 = vmatpush.msra.mxu1 %v72_v33  ;;  %v84_v50 = vld [vmem:[%s710_s1 + $0x118] sm:$0xff]  ;;  %v83_v54 = vld [vmem:[%s710_s1 + $0x110] sm:$0xff]  ;;  %v82_v58 = vld [vmem:[%s710_s1 + $0x108] sm:$0xff] }
  0x14   :  { %195 = vmatpush.msra.mxu2 %v88_v34  ;;  %138 = vmatpush.msra.mxu0 %v55_v36  ;;  %v100_v51 = vld [vmem:[%s710_s1 + $0x198] sm:$0xff]  ;;  %v99_v55 = vld [vmem:[%s710_s1 + $0x190] sm:$0xff]  ;;  %v98_v59 = vld [vmem:[%s710_s1 + $0x188] sm:$0xff] }
  0x15   :  { %224 = vmatpush.msra.mxu3 %v104_v35  ;;  %167 = vmatpush.msra.mxu1 %v71_v37  ;;  %v49_v60 = vld [vmem:[%s710_s1] sm:$0xff]  ;;  %v30_v1 = vld [vmem:[%s711_s0 + $0x8] sm:$0xff]  ;;  %v31_v2 = vld [vmem:[%s711_s0 + $0x10] sm:$0xff] }
  0x16   :  { %196 = vmatpush.msra.mxu2 %v87_v38  ;;  %139 = vmatpush.msra.mxu0 %v54_v40  ;;  %v65_v61 = vld [vmem:[%s710_s1 + $0x80] sm:$0xff]  ;;  %v32_v3 = vld [vmem:[%s711_s0 + $0x18] sm:$0xff]  ;;  %v127_v5 = vld [vmem:[%s710_s1 + $0x270] sm:$0xff] }
  0x17   :  { %225 = vmatpush.msra.mxu3 %v103_v39  ;;  %168 = vmatpush.msra.mxu1 %v70_v41  ;;  %v81_v62 = vld [vmem:[%s710_s1 + $0x100] sm:$0xff]  ;;  %v128_v4 = vld [vmem:[%s710_s1 + $0x278] sm:$0xff]  ;;  %v126_v6 = vld [vmem:[%s710_s1 + $0x268] sm:$0xff] }
  0x18   :  { %197 = vmatpush.msra.mxu2 %v86_v42  ;;  %140 = vmatpush.msra.mxu0 %v53_v44  ;;  %v97_v63 = vld [vmem:[%s710_s1 + $0x180] sm:$0xff]  ;;  %v34_v8 = vld [vmem:[%s711_s0 + $0x28] sm:$0xff]  ;;  %v35_v9 = vld [vmem:[%s711_s0 + $0x30] sm:$0xff] }
  0x19   :  { %226 = vmatpush.msra.mxu3 %v102_v43  ;;  %169 = vmatpush.msra.mxu1 %v69_v45  ;;  %v29_v0 = vld [vmem:[%s711_s0] sm:$0xff]  ;;  %v36_v10 = vld [vmem:[%s711_s0 + $0x38] sm:$0xff]  ;;  %v123_v13 = vld [vmem:[%s710_s1 + $0x250] sm:$0xff] }
  0x1a   :  { %198 = vmatpush.msra.mxu2 %v85_v46  ;;  %141 = vmatpush.msra.mxu0 %v52_v48  ;;  %v125_v7 = vld [vmem:[%s710_s1 + $0x260] sm:$0xff]  ;;  %v124_v12 = vld [vmem:[%s710_s1 + $0x258] sm:$0xff]  ;;  %v122_v14 = vld [vmem:[%s710_s1 + $0x248] sm:$0xff] }
  0x1b   :  { %227 = vmatpush.msra.mxu3 %v101_v47  ;;  %170 = vmatpush.msra.mxu1 %v68_v49  ;;  %v37_v11 = vld [vmem:[%s711_s0 + $0x40] sm:$0xff]  ;;  %v39_v16 = vld [vmem:[%s711_s0 + $0x50] sm:$0xff]  ;;  %v40_v17 = vld [vmem:[%s711_s0 + $0x58] sm:$0xff] }
  0x1c   :  { %199 = vmatpush.msra.mxu2 %v84_v50  ;;  %142 = vmatpush.msra.mxu0 %v51_v52  ;;  %v121_v15 = vld [vmem:[%s710_s1 + $0x240] sm:$0xff]  ;;  %v42_v19 = vld [vmem:[%s711_s0 + $0x68] sm:$0xff]  ;;  %v120_v20 = vld [vmem:[%s710_s1 + $0x238] sm:$0xff] }
  0x1d   :  { %228 = vmatpush.msra.mxu3 %v100_v51  ;;  %171 = vmatpush.msra.mxu1 %v67_v53  ;;  %v41_v18 = vld [vmem:[%s711_s0 + $0x60] sm:$0xff]  ;;  %v119_v21 = vld [vmem:[%s710_s1 + $0x230] sm:$0xff]  ;;  %v118_v22 = vld [vmem:[%s710_s1 + $0x228] sm:$0xff] }
  0x1e   :  { %200 = vmatpush.msra.mxu2 %v83_v54  ;;  %143 = vmatpush.msra.mxu0 %v50_v56  ;;  %v117_v23 = vld [vmem:[%s710_s1 + $0x220] sm:$0xff]  ;;  %v44_v24 = vld [vmem:[%s711_s0 + $0x78] sm:$0xff]  ;;  %v46_v26 = vld [vmem:[%s711_s0 + $0x88] sm:$0xff] }
  0x1f   :  { %229 = vmatpush.msra.mxu3 %v99_v55  ;;  %172 = vmatpush.msra.mxu1 %v66_v57  ;;  %v45_v25 = vld [vmem:[%s711_s0 + $0x80] sm:$0xff]  ;;  %v47_v27 = vld [vmem:[%s711_s0 + $0x90] sm:$0xff]  ;;  %v116_v28 = vld [vmem:[%s710_s1 + $0x218] sm:$0xff] }
  0x20   :  { %201 = vmatpush.msra.mxu2 %v82_v58  ;;  %144 = vmatpush.msra.mxu0 %v49_v60  ;;  %v115_v29 = vld [vmem:[%s710_s1 + $0x210] sm:$0xff]  ;;  %v114_v30 = vld [vmem:[%s710_s1 + $0x208] sm:$0xff]  ;;  %v113_v31 = vld [vmem:[%s710_s1 + $0x200] sm:$0xff] }
  0x21   :  { %230 = vmatpush.msra.mxu3 %v98_v59  ;;  %173 = vmatpush.msra.mxu1 %v65_v61  ;;  %v33_v32 = vld [vmem:[%s711_s0 + $0x20] sm:$0xff]  ;;  %v38_v33 = vld [vmem:[%s711_s0 + $0x48] sm:$0xff]  ;;  %v43_v34 = vld [vmem:[%s711_s0 + $0x70] sm:$0xff] }
  0x22   :  { %202 = vmatpush.msra.mxu2 %v81_v62  ;;  %145 = vmatmul.f32.vlgmr.msra.gmra.mxu0 %v29_v0  ;;  %v48_v35 = vld [vmem:[%s711_s0 + $0x98] sm:$0xff]  ;;  %v365_v60 = vld [vmem:[%s712_s2] ss:$0 sm:$0xff] }
  0x23   :  { %231 = vmatpush.msra.mxu3 %v97_v63  ;;  %174 = vmatmul.f32.vlgmr.msra.gmra.mxu1 %v30_v1  ;;  %v366_v0 = vld [vmem:[%s713_s3] ss:$0 sm:$0xff] }
  0x24   :  { %203 = vmatmul.f32.vlgmr.msra.gmra.mxu2 %v31_v2  ;;  %232 = vmatmul.f32.vlgmr.msra.gmra.mxu3 %v32_v3 }
  0x25   :  { %318 = vmatpush.msrb.mxu2 %v128_v4  ;;  %319 = vmatpush.msrb.mxu3 %v128_v4 }
  0x26   :  { %245 = vmatpush.msrb.mxu0 %v128_v4  ;;  %317 = vmatpush.msrb.mxu1 %v128_v4 }
  0x27   :  { %321 = vmatpush.msrb.mxu2 %v127_v5  ;;  %322 = vmatpush.msrb.mxu3 %v127_v5 }
  0x28   :  { %246 = vmatpush.msrb.mxu0 %v127_v5  ;;  %320 = vmatpush.msrb.mxu1 %v127_v5 }
  0x29   :  { %324 = vmatpush.msrb.mxu2 %v126_v6  ;;  %325 = vmatpush.msrb.mxu3 %v126_v6 }
  0x2a   :  { %247 = vmatpush.msrb.mxu0 %v126_v6  ;;  %323 = vmatpush.msrb.mxu1 %v126_v6 }
  0x2b   :  { %327 = vmatpush.msrb.mxu2 %v125_v7  ;;  %328 = vmatpush.msrb.mxu3 %v125_v7 }
  0x2c   :  { %248 = vmatpush.msrb.mxu0 %v125_v7  ;;  %326 = vmatpush.msrb.mxu1 %v125_v7 }
  0x2d   :  { %148 = vmatmul.f32.gmra.mxu0 %v34_v8  ;;  %177 = vmatmul.f32.gmra.mxu1 %v35_v9 }
  0x2e   :  { %206 = vmatmul.f32.gmra.mxu2 %v36_v10  ;;  %235 = vmatmul.f32.gmra.mxu3 %v37_v11 }
  0x2f   :  { %330 = vmatpush.msrb.mxu2 %v124_v12  ;;  %331 = vmatpush.msrb.mxu3 %v124_v12 }
  0x30   :  { %249 = vmatpush.msrb.mxu0 %v124_v12  ;;  %329 = vmatpush.msrb.mxu1 %v124_v12 }
  0x31   :  { %333 = vmatpush.msrb.mxu2 %v123_v13  ;;  %334 = vmatpush.msrb.mxu3 %v123_v13 }
  0x32   :  { %250 = vmatpush.msrb.mxu0 %v123_v13  ;;  %332 = vmatpush.msrb.mxu1 %v123_v13 }
  0x33   :  { %336 = vmatpush.msrb.mxu2 %v122_v14  ;;  %337 = vmatpush.msrb.mxu3 %v122_v14 }
  0x34   :  { %251 = vmatpush.msrb.mxu0 %v122_v14  ;;  %335 = vmatpush.msrb.mxu1 %v122_v14 }
  0x35   :  { %339 = vmatpush.msrb.mxu2 %v121_v15  ;;  %340 = vmatpush.msrb.mxu3 %v121_v15 }
  0x36   :  { %252 = vmatpush.msrb.mxu0 %v121_v15  ;;  %338 = vmatpush.msrb.mxu1 %v121_v15 }
  0x37   :  { %151 = vmatmul.f32.gmra.mxu0 %v39_v16  ;;  %180 = vmatmul.f32.gmra.mxu1 %v40_v17 }
  0x38   :  { %209 = vmatmul.f32.gmra.mxu2 %v41_v18  ;;  %238 = vmatmul.f32.gmra.mxu3 %v42_v19 }
  0x39   :  { %342 = vmatpush.msrb.mxu2 %v120_v20  ;;  %343 = vmatpush.msrb.mxu3 %v120_v20 }
  0x3a   :  { %253 = vmatpush.msrb.mxu0 %v120_v20  ;;  %341 = vmatpush.msrb.mxu1 %v120_v20 }
  0x3b   :  { %345 = vmatpush.msrb.mxu2 %v119_v21  ;;  %346 = vmatpush.msrb.mxu3 %v119_v21 }
  0x3c   :  { %254 = vmatpush.msrb.mxu0 %v119_v21  ;;  %344 = vmatpush.msrb.mxu1 %v119_v21 }
  0x3d   :  { %348 = vmatpush.msrb.mxu2 %v118_v22  ;;  %349 = vmatpush.msrb.mxu3 %v118_v22 }
  0x3e   :  { %255 = vmatpush.msrb.mxu0 %v118_v22  ;;  %347 = vmatpush.msrb.mxu1 %v118_v22 }
  0x3f   :  { %351 = vmatpush.msrb.mxu2 %v117_v23  ;;  %352 = vmatpush.msrb.mxu3 %v117_v23 }
  0x40   :  { %256 = vmatpush.msrb.mxu0 %v117_v23  ;;  %350 = vmatpush.msrb.mxu1 %v117_v23 }
  0x41   :  { %154 = vmatmul.f32.gmra.mxu0 %v44_v24  ;;  %183 = vmatmul.f32.gmra.mxu1 %v45_v25 }
  0x42   :  { %212 = vmatmul.f32.gmra.mxu2 %v46_v26  ;;  %241 = vmatmul.f32.gmra.mxu3 %v47_v27 }
  0x43   :  { %354 = vmatpush.msrb.mxu2 %v116_v28  ;;  %355 = vmatpush.msrb.mxu3 %v116_v28 }
  0x44   :  { %257 = vmatpush.msrb.mxu0 %v116_v28  ;;  %353 = vmatpush.msrb.mxu1 %v116_v28 }
  0x45   :  { %357 = vmatpush.msrb.mxu2 %v115_v29  ;;  %358 = vmatpush.msrb.mxu3 %v115_v29 }
  0x46   :  { %258 = vmatpush.msrb.mxu0 %v115_v29  ;;  %356 = vmatpush.msrb.mxu1 %v115_v29 }
  0x47   :  { %360 = vmatpush.msrb.mxu2 %v114_v30  ;;  %361 = vmatpush.msrb.mxu3 %v114_v30 }
  0x48   :  { %259 = vmatpush.msrb.mxu0 %v114_v30  ;;  %359 = vmatpush.msrb.mxu1 %v114_v30 }
  0x49   :  { %363 = vmatpush.msrb.mxu2 %v113_v31  ;;  %364 = vmatpush.msrb.mxu3 %v113_v31 }
  0x4a   :  { %260 = vmatpush.msrb.mxu0 %v113_v31  ;;  %362 = vmatpush.msrb.mxu1 %v113_v31 }
  0x4b   :  { %261 = vmatmul.f32.vlgmr.msrb.gmra.mxu0 %v33_v32  ;;  %264 = vmatmul.f32.vlgmr.msrb.gmra.mxu1 %v38_v33 }
  0x4c   :  { %267 = vmatmul.f32.vlgmr.msrb.gmra.mxu2 %v43_v34  ;;  %270 = vmatmul.f32.vlgmr.msrb.gmra.mxu3 %v48_v35 }
  0x9f   :  { %v146_v36 = vpop.f32.mrf.mxu0 }
  0xa0   :  { %v175_v37 = vpop.f32.mrf.mxu1 }
  0xa1   :  { %v176_v50 = vadd.f32 %v175_v37, %v146_v36 }
  0xa7   :  { %v204_v38 = vpop.f32.mrf.mxu2  ;;  %v233_v39 = vpop.f32.mrf.mxu3 }
  0xa8   :  { %v205_v52 = vadd.f32 %v204_v38, %v176_v50 }
  0xaa   :  { %v149_v40 = vpop.f32.mrf.mxu0  ;;  %v178_v41 = vpop.f32.mrf.mxu1  ;;  %v234_v58 = vadd.f32 %v233_v39, %v205_v52 }
  0xab   :  { %v179_v51 = vadd.f32 %v178_v41, %v149_v40 }
  0xb1   :  { %v207_v42 = vpop.f32.mrf.mxu2  ;;  %v236_v43 = vpop.f32.mrf.mxu3 }
  0xb2   :  { %v208_v53 = vadd.f32 %v207_v42, %v179_v51 }
  0xb4   :  { %v152_v44 = vpop.f32.mrf.mxu0  ;;  %v181_v45 = vpop.f32.mrf.mxu1  ;;  %v237_v59 = vadd.f32 %v236_v43, %v208_v53 }
  0xb5   :  { %v182_v56 = vadd.f32 %v181_v45, %v152_v44 }
  0xbb   :  { %v210_v46 = vpop.f32.mrf.mxu2  ;;  %v239_v47 = vpop.f32.mrf.mxu3 }
  0xbc   :  { %v211_v2 = vadd.f32 %v210_v46, %v182_v56 }
  0xbe   :  { %v155_v48 = vpop.f32.mrf.mxu0  ;;  %v184_v49 = vpop.f32.mrf.mxu1  ;;  %v240_v8 = vadd.f32 %v239_v47, %v211_v2 }
  0xbf   :  { %v185_v57 = vadd.f32 %v184_v49, %v155_v48 }
  0xc5   :  { %v213_v54 = vpop.f32.mrf.mxu2  ;;  %v242_v55 = vpop.f32.mrf.mxu3 }
  0xc6   :  { %v214_v3 = vadd.f32 %v213_v54, %v185_v57 }
  0xc8   :  { %v262_v61 = vpop.f32.mrf.mxu0  ;;  %v265_v62 = vpop.f32.mrf.mxu1  ;;  %v243_v9 = vadd.f32 %v242_v55, %v214_v3 }
  0xc9   :  { %v263_v63 = vadd.f32 %v262_v61, %v234_v58  ;;  %v266_v1 = vadd.f32 %v265_v62, %v237_v59 }
  0xcb   :  { %v293_v4 = vmul.f32 %v365_v60, %v263_v63  ;;  %v294_v5 = vmul.f32 %v365_v60, %v266_v1 }
  0xcd   :  { %v301_v6 = vadd.f32 %v366_v0, %v293_v4  ;;  %v302_v7 = vadd.f32 %v366_v0, %v294_v5 }
  0xcf   :  { %v305_v10 = vmax.f32 %v301_v6, 0.0  ;;  %v306_v11 = vmax.f32 %v302_v7, 0.0  ;;  %v268_v12 = vpop.f32.mrf.mxu2  ;;  %v271_v13 = vpop.f32.mrf.mxu3 }
  0xd0   :  { %v269_v14 = vadd.f32 %v268_v12, %v240_v8  ;;  %v272_v15 = vadd.f32 %v271_v13, %v243_v9 }
  0xd1   :  { %309 = vst [vmem:[%s714_s4] sm:$0xff] %v305_v10 }
  0xd2   :  { %310 = vst [vmem:[%s714_s4 + $0x8] sm:$0xff] %v306_v11  ;;  %v295_v16 = vmul.f32 %v365_v60, %v269_v14  ;;  %v296_v17 = vmul.f32 %v365_v60, %v272_v15 }
  0xd4   :  { %v303_v18 = vadd.f32 %v366_v0, %v295_v16  ;;  %v304_v19 = vadd.f32 %v366_v0, %v296_v17 }
  0xd6   :  { %v307_v20 = vmax.f32 %v303_v18, 0.0  ;;  %v308_v21 = vmax.f32 %v304_v19, 0.0 }
  0xd8   :  { %311 = vst [vmem:[%s714_s4 + $0x10] sm:$0xff] %v307_v20 }
  0xd9   :  { %312 = vst [vmem:[%s714_s4 + $0x18] sm:$0xff] %v308_v21 }

// kernel: encoder_forward.24
= control target key start
LH: loop header
LB: loop body
LE: loop exit
PB: predicated region body
PF: predicated region fallthrough
CT: control target
= control target key end

     0   :  { %s738_s1 = inlined_call_operand.vmem [shape: f32[640,128], index: 1, kind: input, shape index: {}]   ;;  %s739_s0 = inlined_call_operand.vmem [shape: f32[32,640], index: 0, kind: input, shape index: {}]   ;;  %s740_s2 = inlined_call_operand.vmem [shape: f32[1,128], index: 2, kind: input, shape index: {}]   ;;  %s741_s3 = inlined_call_operand.vmem [shape: f32[1,128], index: 3, kind: input, shape index: {}]   ;;  %s742_s4 = inlined_call_operand.vmem [shape: f32[32,128], index: 4, kind: input, shape index: {}]   ;;  %s743_s5 = inlined_call_operand.vmem [shape: f32[32,128], index: 5, kind: output, shape index: {}]  }
   0x1   :  { %v67_v0 = vld [vmem:[%s738_s1 + $0x78] sm:$0xff]  ;;  %v66_v4 = vld [vmem:[%s738_s1 + $0x70] sm:$0xff]  ;;  %v65_v8 = vld [vmem:[%s738_s1 + $0x68] sm:$0xff] }
   0x2   :  { %v83_v1 = vld [vmem:[%s738_s1 + $0xf8] sm:$0xff]  ;;  %132 = vmatpush.msra.mxu0 %v67_v0  ;;  %v82_v5 = vld [vmem:[%s738_s1 + $0xf0] sm:$0xff]  ;;  %v81_v9 = vld [vmem:[%s738_s1 + $0xe8] sm:$0xff] }
   0x3   :  { %v99_v2 = vld [vmem:[%s738_s1 + $0x178] sm:$0xff]  ;;  %161 = vmatpush.msra.mxu1 %v83_v1  ;;  %v98_v6 = vld [vmem:[%s738_s1 + $0x170] sm:$0xff]  ;;  %v97_v10 = vld [vmem:[%s738_s1 + $0x168] sm:$0xff] }
   0x4   :  { %v115_v3 = vld [vmem:[%s738_s1 + $0x1f8] sm:$0xff]  ;;  %190 = vmatpush.msra.mxu2 %v99_v2  ;;  %v114_v7 = vld [vmem:[%s738_s1 + $0x1f0] sm:$0xff]  ;;  %133 = vmatpush.msra.mxu0 %v66_v4  ;;  %v113_v11 = vld [vmem:[%s738_s1 + $0x1e8] sm:$0xff] }
   0x5   :  { %219 = vmatpush.msra.mxu3 %v115_v3  ;;  %162 = vmatpush.msra.mxu1 %v82_v5  ;;  %v64_v12 = vld [vmem:[%s738_s1 + $0x60] sm:$0xff]  ;;  %v63_v16 = vld [vmem:[%s738_s1 + $0x58] sm:$0xff]  ;;  %v62_v20 = vld [vmem:[%s738_s1 + $0x50] sm:$0xff] }
   0x6   :  { %191 = vmatpush.msra.mxu2 %v98_v6  ;;  %v80_v13 = vld [vmem:[%s738_s1 + $0xe0] sm:$0xff]  ;;  %134 = vmatpush.msra.mxu0 %v65_v8  ;;  %v79_v17 = vld [vmem:[%s738_s1 + $0xd8] sm:$0xff]  ;;  %v78_v21 = vld [vmem:[%s738_s1 + $0xd0] sm:$0xff] }
   0x7   :  { %220 = vmatpush.msra.mxu3 %v114_v7  ;;  %163 = vmatpush.msra.mxu1 %v81_v9  ;;  %v96_v14 = vld [vmem:[%s738_s1 + $0x160] sm:$0xff]  ;;  %v95_v18 = vld [vmem:[%s738_s1 + $0x158] sm:$0xff]  ;;  %v94_v22 = vld [vmem:[%s738_s1 + $0x150] sm:$0xff] }
   0x8   :  { %v112_v15 = vld [vmem:[%s738_s1 + $0x1e0] sm:$0xff]  ;;  %192 = vmatpush.msra.mxu2 %v97_v10  ;;  %135 = vmatpush.msra.mxu0 %v64_v12  ;;  %v111_v19 = vld [vmem:[%s738_s1 + $0x1d8] sm:$0xff]  ;;  %v110_v23 = vld [vmem:[%s738_s1 + $0x1d0] sm:$0xff] }
   0x9   :  { %221 = vmatpush.msra.mxu3 %v113_v11  ;;  %164 = vmatpush.msra.mxu1 %v80_v13  ;;  %v61_v24 = vld [vmem:[%s738_s1 + $0x48] sm:$0xff]  ;;  %v60_v28 = vld [vmem:[%s738_s1 + $0x40] sm:$0xff]  ;;  %v59_v32 = vld [vmem:[%s738_s1 + $0x38] sm:$0xff] }
   0xa   :  { %193 = vmatpush.msra.mxu2 %v96_v14  ;;  %136 = vmatpush.msra.mxu0 %v63_v16  ;;  %v77_v25 = vld [vmem:[%s738_s1 + $0xc8] sm:$0xff]  ;;  %v76_v29 = vld [vmem:[%s738_s1 + $0xc0] sm:$0xff]  ;;  %v75_v33 = vld [vmem:[%s738_s1 + $0xb8] sm:$0xff] }
   0xb   :  { %222 = vmatpush.msra.mxu3 %v112_v15  ;;  %165 = vmatpush.msra.mxu1 %v79_v17  ;;  %v93_v26 = vld [vmem:[%s738_s1 + $0x148] sm:$0xff]  ;;  %v92_v30 = vld [vmem:[%s738_s1 + $0x140] sm:$0xff]  ;;  %v91_v34 = vld [vmem:[%s738_s1 + $0x138] sm:$0xff] }
   0xc   :  { %194 = vmatpush.msra.mxu2 %v95_v18  ;;  %137 = vmatpush.msra.mxu0 %v62_v20  ;;  %v109_v27 = vld [vmem:[%s738_s1 + $0x1c8] sm:$0xff]  ;;  %v108_v31 = vld [vmem:[%s738_s1 + $0x1c0] sm:$0xff]  ;;  %v107_v35 = vld [vmem:[%s738_s1 + $0x1b8] sm:$0xff] }
   0xd   :  { %223 = vmatpush.msra.mxu3 %v111_v19  ;;  %166 = vmatpush.msra.mxu1 %v78_v21  ;;  %v58_v36 = vld [vmem:[%s738_s1 + $0x30] sm:$0xff]  ;;  %v57_v40 = vld [vmem:[%s738_s1 + $0x28] sm:$0xff]  ;;  %v56_v44 = vld [vmem:[%s738_s1 + $0x20] sm:$0xff] }
   0xe   :  { %195 = vmatpush.msra.mxu2 %v94_v22  ;;  %138 = vmatpush.msra.mxu0 %v61_v24  ;;  %v74_v37 = vld [vmem:[%s738_s1 + $0xb0] sm:$0xff]  ;;  %v73_v41 = vld [vmem:[%s738_s1 + $0xa8] sm:$0xff]  ;;  %v72_v45 = vld [vmem:[%s738_s1 + $0xa0] sm:$0xff] }
   0xf   :  { %224 = vmatpush.msra.mxu3 %v110_v23  ;;  %167 = vmatpush.msra.mxu1 %v77_v25  ;;  %v90_v38 = vld [vmem:[%s738_s1 + $0x130] sm:$0xff]  ;;  %v89_v42 = vld [vmem:[%s738_s1 + $0x128] sm:$0xff]  ;;  %v88_v46 = vld [vmem:[%s738_s1 + $0x120] sm:$0xff] }
  0x10   :  { %196 = vmatpush.msra.mxu2 %v93_v26  ;;  %139 = vmatpush.msra.mxu0 %v60_v28  ;;  %v106_v39 = vld [vmem:[%s738_s1 + $0x1b0] sm:$0xff]  ;;  %v105_v43 = vld [vmem:[%s738_s1 + $0x1a8] sm:$0xff]  ;;  %v104_v47 = vld [vmem:[%s738_s1 + $0x1a0] sm:$0xff] }
  0x11   :  { %225 = vmatpush.msra.mxu3 %v109_v27  ;;  %168 = vmatpush.msra.mxu1 %v76_v29  ;;  %v55_v48 = vld [vmem:[%s738_s1 + $0x18] sm:$0xff]  ;;  %v54_v52 = vld [vmem:[%s738_s1 + $0x10] sm:$0xff]  ;;  %v53_v56 = vld [vmem:[%s738_s1 + $0x8] sm:$0xff] }
  0x12   :  { %197 = vmatpush.msra.mxu2 %v92_v30  ;;  %140 = vmatpush.msra.mxu0 %v59_v32  ;;  %v71_v49 = vld [vmem:[%s738_s1 + $0x98] sm:$0xff]  ;;  %v70_v53 = vld [vmem:[%s738_s1 + $0x90] sm:$0xff]  ;;  %v69_v57 = vld [vmem:[%s738_s1 + $0x88] sm:$0xff] }
  0x13   :  { %226 = vmatpush.msra.mxu3 %v108_v31  ;;  %169 = vmatpush.msra.mxu1 %v75_v33  ;;  %v87_v50 = vld [vmem:[%s738_s1 + $0x118] sm:$0xff]  ;;  %v86_v54 = vld [vmem:[%s738_s1 + $0x110] sm:$0xff]  ;;  %v85_v58 = vld [vmem:[%s738_s1 + $0x108] sm:$0xff] }
  0x14   :  { %198 = vmatpush.msra.mxu2 %v91_v34  ;;  %141 = vmatpush.msra.mxu0 %v58_v36  ;;  %v103_v51 = vld [vmem:[%s738_s1 + $0x198] sm:$0xff]  ;;  %v102_v55 = vld [vmem:[%s738_s1 + $0x190] sm:$0xff]  ;;  %v101_v59 = vld [vmem:[%s738_s1 + $0x188] sm:$0xff] }
  0x15   :  { %227 = vmatpush.msra.mxu3 %v107_v35  ;;  %170 = vmatpush.msra.mxu1 %v74_v37  ;;  %v52_v60 = vld [vmem:[%s738_s1] sm:$0xff]  ;;  %v33_v1 = vld [vmem:[%s739_s0 + $0x8] sm:$0xff]  ;;  %v34_v2 = vld [vmem:[%s739_s0 + $0x10] sm:$0xff] }
  0x16   :  { %199 = vmatpush.msra.mxu2 %v90_v38  ;;  %142 = vmatpush.msra.mxu0 %v57_v40  ;;  %v68_v61 = vld [vmem:[%s738_s1 + $0x80] sm:$0xff]  ;;  %v35_v3 = vld [vmem:[%s739_s0 + $0x18] sm:$0xff]  ;;  %v130_v5 = vld [vmem:[%s738_s1 + $0x270] sm:$0xff] }
  0x17   :  { %228 = vmatpush.msra.mxu3 %v106_v39  ;;  %171 = vmatpush.msra.mxu1 %v73_v41  ;;  %v84_v62 = vld [vmem:[%s738_s1 + $0x100] sm:$0xff]  ;;  %v131_v4 = vld [vmem:[%s738_s1 + $0x278] sm:$0xff]  ;;  %v129_v6 = vld [vmem:[%s738_s1 + $0x268] sm:$0xff] }
  0x18   :  { %200 = vmatpush.msra.mxu2 %v89_v42  ;;  %143 = vmatpush.msra.mxu0 %v56_v44  ;;  %v100_v63 = vld [vmem:[%s738_s1 + $0x180] sm:$0xff]  ;;  %v37_v8 = vld [vmem:[%s739_s0 + $0x28] sm:$0xff]  ;;  %v38_v9 = vld [vmem:[%s739_s0 + $0x30] sm:$0xff] }
  0x19   :  { %229 = vmatpush.msra.mxu3 %v105_v43  ;;  %172 = vmatpush.msra.mxu1 %v72_v45  ;;  %v32_v0 = vld [vmem:[%s739_s0] sm:$0xff]  ;;  %v39_v10 = vld [vmem:[%s739_s0 + $0x38] sm:$0xff]  ;;  %v126_v13 = vld [vmem:[%s738_s1 + $0x250] sm:$0xff] }
  0x1a   :  { %201 = vmatpush.msra.mxu2 %v88_v46  ;;  %144 = vmatpush.msra.mxu0 %v55_v48  ;;  %v128_v7 = vld [vmem:[%s738_s1 + $0x260] sm:$0xff]  ;;  %v127_v12 = vld [vmem:[%s738_s1 + $0x258] sm:$0xff]  ;;  %v125_v14 = vld [vmem:[%s738_s1 + $0x248] sm:$0xff] }
  0x1b   :  { %230 = vmatpush.msra.mxu3 %v104_v47  ;;  %173 = vmatpush.msra.mxu1 %v71_v49  ;;  %v40_v11 = vld [vmem:[%s739_s0 + $0x40] sm:$0xff]  ;;  %v42_v16 = vld [vmem:[%s739_s0 + $0x50] sm:$0xff]  ;;  %v43_v17 = vld [vmem:[%s739_s0 + $0x58] sm:$0xff] }
  0x1c   :  { %202 = vmatpush.msra.mxu2 %v87_v50  ;;  %145 = vmatpush.msra.mxu0 %v54_v52  ;;  %v124_v15 = vld [vmem:[%s738_s1 + $0x240] sm:$0xff]  ;;  %v45_v19 = vld [vmem:[%s739_s0 + $0x68] sm:$0xff]  ;;  %v123_v20 = vld [vmem:[%s738_s1 + $0x238] sm:$0xff] }
  0x1d   :  { %231 = vmatpush.msra.mxu3 %v103_v51  ;;  %174 = vmatpush.msra.mxu1 %v70_v53  ;;  %v44_v18 = vld [vmem:[%s739_s0 + $0x60] sm:$0xff]  ;;  %v122_v21 = vld [vmem:[%s738_s1 + $0x230] sm:$0xff]  ;;  %v121_v22 = vld [vmem:[%s738_s1 + $0x228] sm:$0xff] }
  0x1e   :  { %203 = vmatpush.msra.mxu2 %v86_v54  ;;  %146 = vmatpush.msra.mxu0 %v53_v56  ;;  %v120_v23 = vld [vmem:[%s738_s1 + $0x220] sm:$0xff]  ;;  %v47_v24 = vld [vmem:[%s739_s0 + $0x78] sm:$0xff]  ;;  %v49_v26 = vld [vmem:[%s739_s0 + $0x88] sm:$0xff] }
  0x1f   :  { %232 = vmatpush.msra.mxu3 %v102_v55  ;;  %175 = vmatpush.msra.mxu1 %v69_v57  ;;  %v48_v25 = vld [vmem:[%s739_s0 + $0x80] sm:$0xff]  ;;  %v50_v27 = vld [vmem:[%s739_s0 + $0x90] sm:$0xff]  ;;  %v119_v28 = vld [vmem:[%s738_s1 + $0x218] sm:$0xff] }
  0x20   :  { %204 = vmatpush.msra.mxu2 %v85_v58  ;;  %147 = vmatpush.msra.mxu0 %v52_v60  ;;  %v118_v29 = vld [vmem:[%s738_s1 + $0x210] sm:$0xff]  ;;  %v117_v30 = vld [vmem:[%s738_s1 + $0x208] sm:$0xff]  ;;  %v116_v31 = vld [vmem:[%s738_s1 + $0x200] sm:$0xff] }
  0x21   :  { %233 = vmatpush.msra.mxu3 %v101_v59  ;;  %176 = vmatpush.msra.mxu1 %v68_v61  ;;  %v36_v32 = vld [vmem:[%s739_s0 + $0x20] sm:$0xff]  ;;  %v41_v33 = vld [vmem:[%s739_s0 + $0x48] sm:$0xff]  ;;  %v46_v34 = vld [vmem:[%s739_s0 + $0x70] sm:$0xff] }
  0x22   :  { %205 = vmatpush.msra.mxu2 %v84_v62  ;;  %148 = vmatmul.f32.vlgmr.msra.gmra.mxu0 %v32_v0  ;;  %v51_v35 = vld [vmem:[%s739_s0 + $0x98] sm:$0xff]  ;;  %v376_v60 = vld [vmem:[%s740_s2] ss:$0 sm:$0xff] }
  0x23   :  { %234 = vmatpush.msra.mxu3 %v100_v63  ;;  %177 = vmatmul.f32.vlgmr.msra.gmra.mxu1 %v33_v1  ;;  %v377_v0 = vld [vmem:[%s741_s3] ss:$0 sm:$0xff] }
  0x24   :  { %206 = vmatmul.f32.vlgmr.msra.gmra.mxu2 %v34_v2  ;;  %235 = vmatmul.f32.vlgmr.msra.gmra.mxu3 %v35_v3 }
  0x25   :  { %329 = vmatpush.msrb.mxu2 %v131_v4  ;;  %330 = vmatpush.msrb.mxu3 %v131_v4 }
  0x26   :  { %248 = vmatpush.msrb.mxu0 %v131_v4  ;;  %328 = vmatpush.msrb.mxu1 %v131_v4 }
  0x27   :  { %332 = vmatpush.msrb.mxu2 %v130_v5  ;;  %333 = vmatpush.msrb.mxu3 %v130_v5 }
  0x28   :  { %249 = vmatpush.msrb.mxu0 %v130_v5  ;;  %331 = vmatpush.msrb.mxu1 %v130_v5 }
  0x29   :  { %335 = vmatpush.msrb.mxu2 %v129_v6  ;;  %336 = vmatpush.msrb.mxu3 %v129_v6 }
  0x2a   :  { %250 = vmatpush.msrb.mxu0 %v129_v6  ;;  %334 = vmatpush.msrb.mxu1 %v129_v6  ;;  %v308_v6 = vld [vmem:[%s742_s4] sm:$0xff] }
  0x2b   :  { %338 = vmatpush.msrb.mxu2 %v128_v7  ;;  %339 = vmatpush.msrb.mxu3 %v128_v7 }
  0x2c   :  { %251 = vmatpush.msrb.mxu0 %v128_v7  ;;  %337 = vmatpush.msrb.mxu1 %v128_v7  ;;  %v309_v7 = vld [vmem:[%s742_s4 + $0x8] sm:$0xff] }
  0x2d   :  { %151 = vmatmul.f32.gmra.mxu0 %v37_v8  ;;  %180 = vmatmul.f32.gmra.mxu1 %v38_v9 }
  0x2e   :  { %209 = vmatmul.f32.gmra.mxu2 %v39_v10  ;;  %238 = vmatmul.f32.gmra.mxu3 %v40_v11 }
  0x2f   :  { %341 = vmatpush.msrb.mxu2 %v127_v12  ;;  %342 = vmatpush.msrb.mxu3 %v127_v12 }
  0x30   :  { %252 = vmatpush.msrb.mxu0 %v127_v12  ;;  %340 = vmatpush.msrb.mxu1 %v127_v12 }
  0x31   :  { %344 = vmatpush.msrb.mxu2 %v126_v13  ;;  %345 = vmatpush.msrb.mxu3 %v126_v13 }
  0x32   :  { %253 = vmatpush.msrb.mxu0 %v126_v13  ;;  %343 = vmatpush.msrb.mxu1 %v126_v13 }
  0x33   :  { %347 = vmatpush.msrb.mxu2 %v125_v14  ;;  %348 = vmatpush.msrb.mxu3 %v125_v14 }
  0x34   :  { %254 = vmatpush.msrb.mxu0 %v125_v14  ;;  %346 = vmatpush.msrb.mxu1 %v125_v14 }
  0x35   :  { %350 = vmatpush.msrb.mxu2 %v124_v15  ;;  %351 = vmatpush.msrb.mxu3 %v124_v15 }
  0x36   :  { %255 = vmatpush.msrb.mxu0 %v124_v15  ;;  %349 = vmatpush.msrb.mxu1 %v124_v15 }
  0x37   :  { %154 = vmatmul.f32.gmra.mxu0 %v42_v16  ;;  %183 = vmatmul.f32.gmra.mxu1 %v43_v17 }
  0x38   :  { %212 = vmatmul.f32.gmra.mxu2 %v44_v18  ;;  %241 = vmatmul.f32.gmra.mxu3 %v45_v19 }
  0x39   :  { %353 = vmatpush.msrb.mxu2 %v123_v20  ;;  %354 = vmatpush.msrb.mxu3 %v123_v20 }
  0x3a   :  { %256 = vmatpush.msrb.mxu0 %v123_v20  ;;  %352 = vmatpush.msrb.mxu1 %v123_v20 }
  0x3b   :  { %356 = vmatpush.msrb.mxu2 %v122_v21  ;;  %357 = vmatpush.msrb.mxu3 %v122_v21 }
  0x3c   :  { %257 = vmatpush.msrb.mxu0 %v122_v21  ;;  %355 = vmatpush.msrb.mxu1 %v122_v21 }
  0x3d   :  { %359 = vmatpush.msrb.mxu2 %v121_v22  ;;  %360 = vmatpush.msrb.mxu3 %v121_v22 }
  0x3e   :  { %258 = vmatpush.msrb.mxu0 %v121_v22  ;;  %358 = vmatpush.msrb.mxu1 %v121_v22  ;;  %v310_v22 = vld [vmem:[%s742_s4 + $0x10] sm:$0xff] }
  0x3f   :  { %362 = vmatpush.msrb.mxu2 %v120_v23  ;;  %363 = vmatpush.msrb.mxu3 %v120_v23 }
  0x40   :  { %259 = vmatpush.msrb.mxu0 %v120_v23  ;;  %361 = vmatpush.msrb.mxu1 %v120_v23  ;;  %v311_v23 = vld [vmem:[%s742_s4 + $0x18] sm:$0xff] }
  0x41   :  { %157 = vmatmul.f32.gmra.mxu0 %v47_v24  ;;  %186 = vmatmul.f32.gmra.mxu1 %v48_v25 }
  0x42   :  { %215 = vmatmul.f32.gmra.mxu2 %v49_v26  ;;  %244 = vmatmul.f32.gmra.mxu3 %v50_v27 }
  0x43   :  { %365 = vmatpush.msrb.mxu2 %v119_v28  ;;  %366 = vmatpush.msrb.mxu3 %v119_v28 }
  0x44   :  { %260 = vmatpush.msrb.mxu0 %v119_v28  ;;  %364 = vmatpush.msrb.mxu1 %v119_v28 }
  0x45   :  { %368 = vmatpush.msrb.mxu2 %v118_v29  ;;  %369 = vmatpush.msrb.mxu3 %v118_v29 }
  0x46   :  { %261 = vmatpush.msrb.mxu0 %v118_v29  ;;  %367 = vmatpush.msrb.mxu1 %v118_v29 }
  0x47   :  { %371 = vmatpush.msrb.mxu2 %v117_v30  ;;  %372 = vmatpush.msrb.mxu3 %v117_v30 }
  0x48   :  { %262 = vmatpush.msrb.mxu0 %v117_v30  ;;  %370 = vmatpush.msrb.mxu1 %v117_v30 }
  0x49   :  { %374 = vmatpush.msrb.mxu2 %v116_v31  ;;  %375 = vmatpush.msrb.mxu3 %v116_v31 }
  0x4a   :  { %263 = vmatpush.msrb.mxu0 %v116_v31  ;;  %373 = vmatpush.msrb.mxu1 %v116_v31 }
  0x4b   :  { %264 = vmatmul.f32.vlgmr.msrb.gmra.mxu0 %v36_v32  ;;  %267 = vmatmul.f32.vlgmr.msrb.gmra.mxu1 %v41_v33 }
  0x4c   :  { %270 = vmatmul.f32.vlgmr.msrb.gmra.mxu2 %v46_v34  ;;  %273 = vmatmul.f32.vlgmr.msrb.gmra.mxu3 %v51_v35 }
  0x9f   :  { %v149_v36 = vpop.f32.mrf.mxu0 }
  0xa0   :  { %v178_v37 = vpop.f32.mrf.mxu1 }
  0xa1   :  { %v179_v50 = vadd.f32 %v178_v37, %v149_v36 }
  0xa7   :  { %v207_v38 = vpop.f32.mrf.mxu2  ;;  %v236_v39 = vpop.f32.mrf.mxu3 }
  0xa8   :  { %v208_v52 = vadd.f32 %v207_v38, %v179_v50 }
  0xaa   :  { %v152_v40 = vpop.f32.mrf.mxu0  ;;  %v181_v41 = vpop.f32.mrf.mxu1  ;;  %v237_v58 = vadd.f32 %v236_v39, %v208_v52 }
  0xab   :  { %v182_v51 = vadd.f32 %v181_v41, %v152_v40 }
  0xb1   :  { %v210_v42 = vpop.f32.mrf.mxu2  ;;  %v239_v43 = vpop.f32.mrf.mxu3 }
  0xb2   :  { %v211_v53 = vadd.f32 %v210_v42, %v182_v51 }
  0xb4   :  { %v155_v44 = vpop.f32.mrf.mxu0  ;;  %v184_v45 = vpop.f32.mrf.mxu1  ;;  %v240_v59 = vadd.f32 %v239_v43, %v211_v53 }
  0xb5   :  { %v185_v56 = vadd.f32 %v184_v45, %v155_v44 }
  0xbb   :  { %v213_v46 = vpop.f32.mrf.mxu2  ;;  %v242_v47 = vpop.f32.mrf.mxu3 }
  0xbc   :  { %v214_v2 = vadd.f32 %v213_v46, %v185_v56 }
  0xbe   :  { %v158_v48 = vpop.f32.mrf.mxu0  ;;  %v187_v49 = vpop.f32.mrf.mxu1  ;;  %v243_v10 = vadd.f32 %v242_v47, %v214_v2 }
  0xbf   :  { %v188_v57 = vadd.f32 %v187_v49, %v158_v48 }
  0xc5   :  { %v216_v54 = vpop.f32.mrf.mxu2  ;;  %v245_v55 = vpop.f32.mrf.mxu3 }
  0xc6   :  { %v217_v3 = vadd.f32 %v216_v54, %v188_v57 }
  0xc8   :  { %v265_v61 = vpop.f32.mrf.mxu0  ;;  %v268_v62 = vpop.f32.mrf.mxu1  ;;  %v246_v11 = vadd.f32 %v245_v55, %v217_v3 }
  0xc9   :  { %v266_v63 = vadd.f32 %v265_v61, %v237_v58  ;;  %v269_v1 = vadd.f32 %v268_v62, %v240_v59 }
  0xcb   :  { %v296_v4 = vmul.f32 %v376_v60, %v266_v63  ;;  %v297_v5 = vmul.f32 %v376_v60, %v269_v1 }
  0xcd   :  { %v304_v8 = vadd.f32 %v377_v0, %v296_v4  ;;  %v305_v9 = vadd.f32 %v377_v0, %v297_v5 }
  0xcf   :  { %v312_v12 = vadd.f32 %v308_v6, %v304_v8  ;;  %v313_v13 = vadd.f32 %v309_v7, %v305_v9  ;;  %v271_v14 = vpop.f32.mrf.mxu2  ;;  %v274_v15 = vpop.f32.mrf.mxu3 }
  0xd0   :  { %v272_v16 = vadd.f32 %v271_v14, %v243_v10  ;;  %v275_v17 = vadd.f32 %v274_v15, %v246_v11 }
  0xd1   :  { %v316_v18 = vmax.f32 %v312_v12, 0.0  ;;  %v317_v19 = vmax.f32 %v313_v13, 0.0 }
  0xd2   :  { %v298_v20 = vmul.f32 %v376_v60, %v272_v16  ;;  %v299_v21 = vmul.f32 %v376_v60, %v275_v17 }
  0xd3   :  { %320 = vst [vmem:[%s743_s5] sm:$0xff] %v316_v18 }
  0xd4   :  { %321 = vst [vmem:[%s743_s5 + $0x8] sm:$0xff] %v317_v19  ;;  %v306_v24 = vadd.f32 %v377_v0, %v298_v20  ;;  %v307_v25 = vadd.f32 %v377_v0, %v299_v21 }
  0xd6   :  { %v314_v26 = vadd.f32 %v310_v22, %v306_v24  ;;  %v315_v27 = vadd.f32 %v311_v23, %v307_v25 }
  0xd8   :  { %v318_v28 = vmax.f32 %v314_v26, 0.0  ;;  %v319_v29 = vmax.f32 %v315_v27, 0.0 }
  0xda   :  { %322 = vst [vmem:[%s743_s5 + $0x10] sm:$0xff] %v318_v28 }
  0xdb   :  { %323 = vst [vmem:[%s743_s5 + $0x18] sm:$0xff] %v319_v29 }

// kernel: encoder_forward.27
= control target key start
LH: loop header
LB: loop body
LE: loop exit
PB: predicated region body
PF: predicated region fallthrough
CT: control target
= control target key end

     0   :  { %s521_s1 = inlined_call_operand.vmem [shape: f32[640,128], index: 1, kind: input, shape index: {}]   ;;  %s522_s0 = inlined_call_operand.vmem [shape: f32[8,640], index: 0, kind: input, shape index: {}]   ;;  %s523_s2 = inlined_call_operand.vmem [shape: f32[1,128], index: 2, kind: input, shape index: {}]   ;;  %s524_s3 = inlined_call_operand.vmem [shape: f32[1,128], index: 3, kind: input, shape index: {}]   ;;  %s525_s4 = inlined_call_operand.vmem [shape: f32[8,128], index: 4, kind: output, shape index: {}]  }
   0x1   :  { %v43_v0 = vld [vmem:[%s521_s1 + $0x78] sm:$0xff]  ;;  %v42_v1 = vld [vmem:[%s521_s1 + $0x70] sm:$0xff]  ;;  %v41_v2 = vld [vmem:[%s521_s1 + $0x68] sm:$0xff] }
   0x2   :  { %108 = vmatpush.msra.mxu0 %v43_v0  ;;  %v75_v3 = vld [vmem:[%s521_s1 + $0x178] sm:$0xff]  ;;  %v40_v4 = vld [vmem:[%s521_s1 + $0x60] sm:$0xff]  ;;  %v74_v5 = vld [vmem:[%s521_s1 + $0x170] sm:$0xff] }
   0x3   :  { %148 = vmatpush.msra.mxu2 %v75_v3  ;;  %v91_v6 = vld [vmem:[%s521_s1 + $0x1f8] sm:$0xff]  ;;  %v73_v8 = vld [vmem:[%s521_s1 + $0x168] sm:$0xff]  ;;  %v90_v9 = vld [vmem:[%s521_s1 + $0x1f0] sm:$0xff] }
   0x4   :  { %109 = vmatpush.msra.mxu0 %v42_v1  ;;  %168 = vmatpush.msra.mxu3 %v91_v6  ;;  %v59_v7 = vld [vmem:[%s521_s1 + $0xf8] sm:$0xff]  ;;  %v58_v11 = vld [vmem:[%s521_s1 + $0xf0] sm:$0xff]  ;;  %v72_v12 = vld [vmem:[%s521_s1 + $0x160] sm:$0xff] }
   0x5   :  { %v39_v10 = vld [vmem:[%s521_s1 + $0x58] sm:$0xff]  ;;  %149 = vmatpush.msra.mxu2 %v74_v5  ;;  %128 = vmatpush.msra.mxu1 %v59_v7  ;;  %v89_v13 = vld [vmem:[%s521_s1 + $0x1e8] sm:$0xff]  ;;  %v38_v15 = vld [vmem:[%s521_s1 + $0x50] sm:$0xff] }
   0x6   :  { %110 = vmatpush.msra.mxu0 %v41_v2  ;;  %169 = vmatpush.msra.mxu3 %v90_v9  ;;  %v57_v14 = vld [vmem:[%s521_s1 + $0xe8] sm:$0xff]  ;;  %v88_v16 = vld [vmem:[%s521_s1 + $0x1e0] sm:$0xff]  ;;  %v71_v17 = vld [vmem:[%s521_s1 + $0x158] sm:$0xff] }
   0x7   :  { %150 = vmatpush.msra.mxu2 %v73_v8  ;;  %129 = vmatpush.msra.mxu1 %v58_v11  ;;  %v56_v18 = vld [vmem:[%s521_s1 + $0xe0] sm:$0xff]  ;;  %v37_v19 = vld [vmem:[%s521_s1 + $0x48] sm:$0xff]  ;;  %v87_v20 = vld [vmem:[%s521_s1 + $0x1d8] sm:$0xff] }
   0x8   :  { %111 = vmatpush.msra.mxu0 %v40_v4  ;;  %170 = vmatpush.msra.mxu3 %v89_v13  ;;  %v70_v21 = vld [vmem:[%s521_s1 + $0x150] sm:$0xff]  ;;  %v55_v22 = vld [vmem:[%s521_s1 + $0xd8] sm:$0xff]  ;;  %v36_v23 = vld [vmem:[%s521_s1 + $0x40] sm:$0xff] }
   0x9   :  { %151 = vmatpush.msra.mxu2 %v72_v12  ;;  %130 = vmatpush.msra.mxu1 %v57_v14  ;;  %v86_v24 = vld [vmem:[%s521_s1 + $0x1d0] sm:$0xff]  ;;  %v69_v25 = vld [vmem:[%s521_s1 + $0x148] sm:$0xff]  ;;  %v35_v27 = vld [vmem:[%s521_s1 + $0x38] sm:$0xff] }
   0xa   :  { %112 = vmatpush.msra.mxu0 %v39_v10  ;;  %171 = vmatpush.msra.mxu3 %v88_v16  ;;  %v54_v26 = vld [vmem:[%s521_s1 + $0xd0] sm:$0xff]  ;;  %v85_v28 = vld [vmem:[%s521_s1 + $0x1c8] sm:$0xff]  ;;  %v68_v29 = vld [vmem:[%s521_s1 + $0x140] sm:$0xff] }
   0xb   :  { %152 = vmatpush.msra.mxu2 %v71_v17  ;;  %131 = vmatpush.msra.mxu1 %v56_v18  ;;  %v53_v30 = vld [vmem:[%s521_s1 + $0xc8] sm:$0xff]  ;;  %v34_v31 = vld [vmem:[%s521_s1 + $0x30] sm:$0xff]  ;;  %v84_v32 = vld [vmem:[%s521_s1 + $0x1c0] sm:$0xff] }
   0xc   :  { %113 = vmatpush.msra.mxu0 %v38_v15  ;;  %172 = vmatpush.msra.mxu3 %v87_v20  ;;  %v67_v33 = vld [vmem:[%s521_s1 + $0x138] sm:$0xff]  ;;  %v52_v34 = vld [vmem:[%s521_s1 + $0xc0] sm:$0xff]  ;;  %v33_v35 = vld [vmem:[%s521_s1 + $0x28] sm:$0xff] }
   0xd   :  { %153 = vmatpush.msra.mxu2 %v70_v21  ;;  %132 = vmatpush.msra.mxu1 %v55_v22  ;;  %v83_v36 = vld [vmem:[%s521_s1 + $0x1b8] sm:$0xff]  ;;  %v66_v37 = vld [vmem:[%s521_s1 + $0x130] sm:$0xff]  ;;  %v32_v39 = vld [vmem:[%s521_s1 + $0x20] sm:$0xff] }
   0xe   :  { %114 = vmatpush.msra.mxu0 %v37_v19  ;;  %173 = vmatpush.msra.mxu3 %v86_v24  ;;  %v51_v38 = vld [vmem:[%s521_s1 + $0xb8] sm:$0xff]  ;;  %v82_v40 = vld [vmem:[%s521_s1 + $0x1b0] sm:$0xff]  ;;  %v65_v41 = vld [vmem:[%s521_s1 + $0x128] sm:$0xff] }
   0xf   :  { %154 = vmatpush.msra.mxu2 %v69_v25  ;;  %133 = vmatpush.msra.mxu1 %v54_v26  ;;  %v50_v42 = vld [vmem:[%s521_s1 + $0xb0] sm:$0xff]  ;;  %v31_v43 = vld [vmem:[%s521_s1 + $0x18] sm:$0xff]  ;;  %v81_v44 = vld [vmem:[%s521_s1 + $0x1a8] sm:$0xff] }
  0x10   :  { %115 = vmatpush.msra.mxu0 %v36_v23  ;;  %174 = vmatpush.msra.mxu3 %v85_v28  ;;  %v64_v45 = vld [vmem:[%s521_s1 + $0x120] sm:$0xff]  ;;  %v49_v46 = vld [vmem:[%s521_s1 + $0xa8] sm:$0xff]  ;;  %v30_v47 = vld [vmem:[%s521_s1 + $0x10] sm:$0xff] }
  0x11   :  { %155 = vmatpush.msra.mxu2 %v68_v29  ;;  %134 = vmatpush.msra.mxu1 %v53_v30  ;;  %v80_v48 = vld [vmem:[%s521_s1 + $0x1a0] sm:$0xff]  ;;  %v63_v49 = vld [vmem:[%s521_s1 + $0x118] sm:$0xff]  ;;  %v29_v51 = vld [vmem:[%s521_s1 + $0x8] sm:$0xff] }
  0x12   :  { %116 = vmatpush.msra.mxu0 %v35_v27  ;;  %175 = vmatpush.msra.mxu3 %v84_v32  ;;  %v48_v50 = vld [vmem:[%s521_s1 + $0xa0] sm:$0xff]  ;;  %v79_v52 = vld [vmem:[%s521_s1 + $0x198] sm:$0xff]  ;;  %v62_v53 = vld [vmem:[%s521_s1 + $0x110] sm:$0xff] }
  0x13   :  { %156 = vmatpush.msra.mxu2 %v67_v33  ;;  %135 = vmatpush.msra.mxu1 %v52_v34  ;;  %v47_v54 = vld [vmem:[%s521_s1 + $0x98] sm:$0xff]  ;;  %v28_v55 = vld [vmem:[%s521_s1] sm:$0xff]  ;;  %v78_v56 = vld [vmem:[%s521_s1 + $0x190] sm:$0xff] }
  0x14   :  { %117 = vmatpush.msra.mxu0 %v34_v31  ;;  %176 = vmatpush.msra.mxu3 %v83_v36  ;;  %v107_v57 = vld [vmem:[%s521_s1 + $0x278] sm:$0xff]  ;;  %v61_v58 = vld [vmem:[%s521_s1 + $0x108] sm:$0xff]  ;;  %v46_v59 = vld [vmem:[%s521_s1 + $0x90] sm:$0xff] }
  0x15   :  { %157 = vmatpush.msra.mxu2 %v66_v37  ;;  %136 = vmatpush.msra.mxu1 %v51_v38  ;;  %v77_v60 = vld [vmem:[%s521_s1 + $0x188] sm:$0xff]  ;;  %v106_v61 = vld [vmem:[%s521_s1 + $0x270] sm:$0xff]  ;;  %v60_v62 = vld [vmem:[%s521_s1 + $0x100] sm:$0xff] }
  0x16   :  { %118 = vmatpush.msra.mxu0 %v33_v35  ;;  %177 = vmatpush.msra.mxu3 %v82_v40  ;;  %v25_v63 = vld [vmem:[%s522_s0 + $0x10] sm:$0xff]  ;;  %v45_v0 = vld [vmem:[%s521_s1 + $0x88] sm:$0xff]  ;;  %v76_v2 = vld [vmem:[%s521_s1 + $0x180] sm:$0xff] }
  0x17   :  { %158 = vmatpush.msra.mxu2 %v65_v41  ;;  %137 = vmatpush.msra.mxu1 %v50_v42  ;;  %v105_v1 = vld [vmem:[%s521_s1 + $0x268] sm:$0xff]  ;;  %v26_v3 = vld [vmem:[%s522_s0 + $0x18] sm:$0xff]  ;;  %v44_v4 = vld [vmem:[%s521_s1 + $0x80] sm:$0xff] }
  0x18   :  { %119 = vmatpush.msra.mxu0 %v32_v39  ;;  %178 = vmatpush.msra.mxu3 %v81_v44  ;;  %v104_v5 = vld [vmem:[%s521_s1 + $0x260] sm:$0xff]  ;;  %v24_v6 = vld [vmem:[%s522_s0 + $0x8] sm:$0xff]  ;;  %v103_v8 = vld [vmem:[%s521_s1 + $0x258] sm:$0xff] }
  0x19   :  { %159 = vmatpush.msra.mxu2 %v64_v45  ;;  %138 = vmatpush.msra.mxu1 %v49_v46  ;;  %v23_v7 = vld [vmem:[%s522_s0] sm:$0xff]  ;;  %v102_v9 = vld [vmem:[%s521_s1 + $0x250] sm:$0xff]  ;;  %v101_v10 = vld [vmem:[%s521_s1 + $0x248] sm:$0xff] }
  0x1a   :  { %120 = vmatpush.msra.mxu0 %v31_v43  ;;  %179 = vmatpush.msra.mxu3 %v80_v48  ;;  %v100_v11 = vld [vmem:[%s521_s1 + $0x240] sm:$0xff]  ;;  %v99_v12 = vld [vmem:[%s521_s1 + $0x238] sm:$0xff]  ;;  %v98_v13 = vld [vmem:[%s521_s1 + $0x230] sm:$0xff] }
  0x1b   :  { %160 = vmatpush.msra.mxu2 %v63_v49  ;;  %139 = vmatpush.msra.mxu1 %v48_v50  ;;  %v97_v14 = vld [vmem:[%s521_s1 + $0x228] sm:$0xff]  ;;  %v96_v15 = vld [vmem:[%s521_s1 + $0x220] sm:$0xff]  ;;  %v95_v16 = vld [vmem:[%s521_s1 + $0x218] sm:$0xff] }
  0x1c   :  { %121 = vmatpush.msra.mxu0 %v30_v47  ;;  %180 = vmatpush.msra.mxu3 %v79_v52  ;;  %v94_v17 = vld [vmem:[%s521_s1 + $0x210] sm:$0xff]  ;;  %v93_v18 = vld [vmem:[%s521_s1 + $0x208] sm:$0xff]  ;;  %v92_v19 = vld [vmem:[%s521_s1 + $0x200] sm:$0xff] }
  0x1d   :  { %161 = vmatpush.msra.mxu2 %v62_v53  ;;  %140 = vmatpush.msra.mxu1 %v47_v54  ;;  %v27_v20 = vld [vmem:[%s522_s0 + $0x20] sm:$0xff] }
  0x1e   :  { %122 = vmatpush.msra.mxu0 %v29_v51  ;;  %181 = vmatpush.msra.mxu3 %v78_v56  ;;  %v230_v28 = vld [vmem:[%s523_s2] ss:$0 sm:$0xff] }
  0x1f   :  { %162 = vmatpush.msra.mxu2 %v61_v58  ;;  %141 = vmatpush.msra.mxu1 %v46_v59  ;;  %v231_v31 = vld [vmem:[%s524_s3] ss:$0 sm:$0xff] }
  0x20   :  { %123 = vmatpush.msra.mxu0 %v28_v55  ;;  %182 = vmatpush.msra.mxu3 %v77_v60 }
  0x21   :  { %163 = vmatpush.msra.mxu2 %v60_v62  ;;  %142 = vmatpush.msra.mxu1 %v45_v0 }
  0x22   :  { %188 = vmatpush.msrb.mxu0 %v107_v57  ;;  %164 = vmatmul.f32.vlgmr.msra.gmra.mxu2 %v25_v63 }
  0x23   :  { %183 = vmatpush.msra.mxu3 %v76_v2  ;;  %143 = vmatpush.msra.mxu1 %v44_v4 }
  0x24   :  { %189 = vmatpush.msrb.mxu0 %v106_v61  ;;  %184 = vmatmul.f32.vlgmr.msra.gmra.mxu3 %v26_v3 }
  0x25   :  { %144 = vmatmul.f32.vlgmr.msra.gmra.mxu1 %v24_v6  ;;  %124 = vmatmul.f32.vlgmr.msra.gmra.mxu0 %v23_v7 }
  0x26   :  { %190 = vmatpush.msrb.mxu0 %v105_v1 }
  0x28   :  { %191 = vmatpush.msrb.mxu0 %v104_v5 }
  0x2a   :  { %192 = vmatpush.msrb.mxu0 %v103_v8 }
  0x2c   :  { %193 = vmatpush.msrb.mxu0 %v102_v9 }
  0x2e   :  { %194 = vmatpush.msrb.mxu0 %v101_v10 }
  0x30   :  { %195 = vmatpush.msrb.mxu0 %v100_v11 }
  0x32   :  { %196 = vmatpush.msrb.mxu0 %v99_v12 }
  0x34   :  { %197 = vmatpush.msrb.mxu0 %v98_v13 }
  0x36   :  { %198 = vmatpush.msrb.mxu0 %v97_v14 }
  0x38   :  { %199 = vmatpush.msrb.mxu0 %v96_v15 }
  0x3a   :  { %200 = vmatpush.msrb.mxu0 %v95_v16 }
  0x3c   :  { %201 = vmatpush.msrb.mxu0 %v94_v17 }
  0x3e   :  { %202 = vmatpush.msrb.mxu0 %v93_v18 }
  0x40   :  { %203 = vmatpush.msrb.mxu0 %v92_v19 }
  0x41   :  { %204 = vmatmul.f32.vlgmr.msrb.gmra.mxu0 %v27_v20 }
  0xa2   :  { %v125_v21 = vpop.f32.mrf.mxu0  ;;  %v145_v22 = vpop.f32.mrf.mxu1 }
  0xa3   :  { %v146_v23 = vadd.f32 %v145_v22, %v125_v21 }
  0xa5   :  { %v165_v24 = vpop.f32.mrf.mxu2 }
  0xa6   :  { %v166_v25 = vadd.f32 %v165_v24, %v146_v23 }
  0xa7   :  { %v185_v26 = vpop.f32.mrf.mxu3 }
  0xa8   :  { %v186_v27 = vadd.f32 %v185_v26, %v166_v25 }
  0xbe   :  { %v205_v29 = vpop.f32.mrf.mxu0 }
  0xbf   :  { %v206_v30 = vadd.f32 %v205_v29, %v186_v27 }
  0xc1   :  { %v218_v32 = vmul.f32 %v230_v28, %v206_v30 }
  0xc3   :  { %v223_v33 = vadd.f32 %v231_v31, %v218_v32 }
  0xc5   :  { %v224_v34 = vmax.f32 %v223_v33, 0.0 }
  0xc7   :  { %225 = vst [vmem:[%s525_s4] sm:$0xff] %v224_v34 }

// kernel: encoder_forward.28
= control target key start
LH: loop header
LB: loop body
LE: loop exit
PB: predicated region body
PF: predicated region fallthrough
CT: control target
= control target key end

     0   :  { %s168_s1 = inlined_call_operand.vmem [shape: f32[128,128], index: 1, kind: input, shape index: {}]   ;;  %s169_s2 = inlined_call_operand.vmem [shape: f32[1,128], index: 2, kind: input, shape index: {}]   ;;  %s170_s3 = inlined_call_operand.vmem [shape: f32[1,128], index: 3, kind: input, shape index: {}]   ;;  %s171_s0 = inlined_call_operand.vmem [shape: f32[8,128], index: 0, kind: input, shape index: {}]   ;;  %s172_s4 = inlined_call_operand.vmem [shape: f32[8,128], index: 4, kind: output, shape index: {}]  }
   0x1   :  { %v39_v0 = vld [vmem:[%s168_s1 + $0x78] sm:$0xff]  ;;  %v38_v1 = vld [vmem:[%s168_s1 + $0x70] sm:$0xff]  ;;  %v37_v2 = vld [vmem:[%s168_s1 + $0x68] sm:$0xff] }
   0x2   :  { %40 = vmatpush.msra.mxu0 %v39_v0  ;;  %v36_v3 = vld [vmem:[%s168_s1 + $0x60] sm:$0xff]  ;;  %v35_v4 = vld [vmem:[%s168_s1 + $0x58] sm:$0xff]  ;;  %v34_v5 = vld [vmem:[%s168_s1 + $0x50] sm:$0xff] }
   0x3   :  { %v33_v6 = vld [vmem:[%s168_s1 + $0x48] sm:$0xff]  ;;  %v32_v7 = vld [vmem:[%s168_s1 + $0x40] sm:$0xff]  ;;  %v31_v8 = vld [vmem:[%s168_s1 + $0x38] sm:$0xff] }
   0x4   :  { %41 = vmatpush.msra.mxu0 %v38_v1  ;;  %v30_v9 = vld [vmem:[%s168_s1 + $0x30] sm:$0xff]  ;;  %v29_v10 = vld [vmem:[%s168_s1 + $0x28] sm:$0xff]  ;;  %v28_v11 = vld [vmem:[%s168_s1 + $0x20] sm:$0xff] }
   0x5   :  { %v27_v12 = vld [vmem:[%s168_s1 + $0x18] sm:$0xff]  ;;  %v26_v13 = vld [vmem:[%s168_s1 + $0x10] sm:$0xff]  ;;  %v25_v14 = vld [vmem:[%s168_s1 + $0x8] sm:$0xff] }
   0x6   :  { %42 = vmatpush.msra.mxu0 %v37_v2  ;;  %v24_v15 = vld [vmem:[%s168_s1] sm:$0xff] }
   0x7   :  { %v23_v16 = vld [vmem:[%s171_s0] sm:$0xff] }
   0x8   :  { %43 = vmatpush.msra.mxu0 %v36_v3  ;;  %v81_v17 = vld [vmem:[%s169_s2] ss:$0 sm:$0xff] }
   0x9   :  { %v82_v18 = vld [vmem:[%s170_s3] ss:$0 sm:$0xff] }
   0xa   :  { %44 = vmatpush.msra.mxu0 %v35_v4 }
   0xc   :  { %45 = vmatpush.msra.mxu0 %v34_v5 }
   0xe   :  { %46 = vmatpush.msra.mxu0 %v33_v6 }
  0x10   :  { %47 = vmatpush.msra.mxu0 %v32_v7 }
  0x12   :  { %48 = vmatpush.msra.mxu0 %v31_v8 }
  0x14   :  { %49 = vmatpush.msra.mxu0 %v30_v9 }
  0x16   :  { %50 = vmatpush.msra.mxu0 %v29_v10 }
  0x18   :  { %51 = vmatpush.msra.mxu0 %v28_v11 }
  0x1a   :  { %52 = vmatpush.msra.mxu0 %v27_v12 }
  0x1c   :  { %53 = vmatpush.msra.mxu0 %v26_v13 }
  0x1e   :  { %54 = vmatpush.msra.mxu0 %v25_v14 }
  0x20   :  { %55 = vmatpush.msra.mxu0 %v24_v15 }
  0x21   :  { %56 = vmatmul.f32.vlgmr.msra.gmra.mxu0 %v23_v16 }
  0x9e   :  { %v57_v19 = vpop.f32.mrf.mxu0 }
  0x9f   :  { %v70_v20 = vmul.f32 %v81_v17, %v57_v19 }
  0xa1   :  { %v75_v21 = vadd.f32 %v82_v18, %v70_v20 }
  0xa3   :  { %76 = vst [vmem:[%s172_s4] sm:$0xff] %v75_v21 }

// kernel: encoder_forward.29
= control target key start
LH: loop header
LB: loop body
LE: loop exit
PB: predicated region body
PF: predicated region fallthrough
CT: control target
= control target key end

     0   :  { %s724_s18 = smov 0   ;;  %s726_s19 = smov 0   ;;  %s830_s0 = inlined_call_operand.vmem [shape: f32[8,1152], index: 0, kind: input, shape index: {}]   ;;  %s831_s1 = inlined_call_operand.vmem [shape: f32[1152,128], index: 1, kind: input, shape index: {}]   ;;  %s832_s2 = inlined_call_operand.vmem [shape: f32[1,128], index: 2, kind: input, shape index: {}]   ;;  %s833_s3 = inlined_call_operand.vmem [shape: f32[1,128], index: 3, kind: input, shape index: {}]   ;;  %s834_s4 = inlined_call_operand.vmem [shape: f32[8,128], index: 4, kind: input, shape index: {}]   ;;  %s835_s5 = inlined_call_operand.vmem [shape: f32[8,128], index: 5, kind: output, shape index: {}]  }
   0x1   :  { %s728_s20 = smov 0  }
   0x2 LB: > { %s27_s21 = sadd.s32 1, %s687_s19  ;;  %p634_p0 = scmp.ge.s32.totalorder %s691_s20, 1  ;;  %s691_s20 = sphi %s728_s20, %s15_s20   ;;  %s687_s19 = sphi %s726_s19, %s837_s19   ;;  %s683_s18 = sphi %s724_s18, %s836_s18  }
   0x3   : > { %p28_p1 = scmp.ge.s32.totalorder %s27_s21, 3  ;;  %p261_p2 = scmp.lt.s32.totalorder %s691_s20, 4 }
   0x5   : > { %s839_s21 = smov (%p28_p1, %s27_s21), 0  ;;  %p262_p3 = pnand %p634_p0, %p261_p2 }
   0x6   : > { %s316_s22 = smul.u32 (!%p262_p3), 3, %s683_s18  ;;  %p637_p6 = scmp.ne.s32.totalorder (!%p262_p3), %s683_s18, 0 }
   0x7   : > { %265 = sbr.rel (%p262_p3) target bundleno = 207 (0xcf), region = 40 }
   0x8   : > { %s326_s23 = smul.u32 (!%p262_p3), 48, %s683_s18  ;;  %p319_p4 = scmp.lt.s32.totalorder (!%p262_p3), %s316_s22, 8 }
   0xa   : > { %p327_p5 = scmp.lt.s32.totalorder (!%p262_p3), %s326_s23, 143 }
   0xc   : > { %s841_s22 = smov (!%p319_p4, %s316_s22), 8  ;;  %s843_s23 = smov (!%p327_p5, %s326_s23), 143 }
   0xd   : > { %s635_s24 = sshll.u32 %s841_s22, 3  ;;  %s636_s28 = sshll.u32 %s843_s23, 3 }
   0xe   : > { %s749_s27 = scalar_lea.vmem %s830_s0, %s635_s24  ;;  %s754_s6 = scalar_lea.vmem %s831_s1, %s636_s28 }
   0xf   : > { %358 = sbr.rel (%p637_p6) target bundleno = 22 (0x16), region = 44 }
  0x14   : > { %v693_v0 = vmov 0.0  }
  0x15   : > { %359 = vst [vmem:[#allocation2] sm:$0xff] %v693_v0 }
  0x16 PF: > { %v411_v1 = vld [vmem:[%s754_s6 + $0x178] sm:$0xff]  ;;  %v410_v2 = vld [vmem:[%s754_s6 + $0x170] sm:$0xff]  ;;  %v409_v6 = vld [vmem:[%s754_s6 + $0x168] sm:$0xff]  ;;  %p638_p7 = scmp.ne.s32.totalorder %s683_s18, 2 }
  0x17   : > { %v379_v3 = vld [vmem:[%s754_s6 + $0x78] sm:$0xff]  ;;  %452 = vmatpush.msra.mxu2 %v411_v1  ;;  %v378_v5 = vld [vmem:[%s754_s6 + $0x70] sm:$0xff]  ;;  %v377_v8 = vld [vmem:[%s754_s6 + $0x68] sm:$0xff] }
  0x18   : > { %412 = vmatpush.msra.mxu0 %v379_v3  ;;  %v395_v4 = vld [vmem:[%s754_s6 + $0xf8] sm:$0xff]  ;;  %v394_v7 = vld [vmem:[%s754_s6 + $0xf0] sm:$0xff]  ;;  %v393_v9 = vld [vmem:[%s754_s6 + $0xe8] sm:$0xff] }
  0x19   : > { %432 = vmatpush.msra.mxu1 %v395_v4  ;;  %453 = vmatpush.msra.mxu2 %v410_v2  ;;  %v408_v10 = vld [vmem:[%s754_s6 + $0x160] sm:$0xff]  ;;  %v407_v13 = vld [vmem:[%s754_s6 + $0x158] sm:$0xff]  ;;  %v406_v16 = vld [vmem:[%s754_s6 + $0x150] sm:$0xff] }
  0x1a   : > { %413 = vmatpush.msra.mxu0 %v378_v5  ;;  %v376_v11 = vld [vmem:[%s754_s6 + $0x60] sm:$0xff]  ;;  %v375_v14 = vld [vmem:[%s754_s6 + $0x58] sm:$0xff]  ;;  %v374_v17 = vld [vmem:[%s754_s6 + $0x50] sm:$0xff] }
  0x1b   : > { %433 = vmatpush.msra.mxu1 %v394_v7  ;;  %454 = vmatpush.msra.mxu2 %v409_v6  ;;  %v392_v12 = vld [vmem:[%s754_s6 + $0xe0] sm:$0xff]  ;;  %v391_v15 = vld [vmem:[%s754_s6 + $0xd8] sm:$0xff]  ;;  %v390_v18 = vld [vmem:[%s754_s6 + $0xd0] sm:$0xff] }
  0x1c   : > { %414 = vmatpush.msra.mxu0 %v377_v8  ;;  %v405_v19 = vld [vmem:[%s754_s6 + $0x148] sm:$0xff]  ;;  %v404_v22 = vld [vmem:[%s754_s6 + $0x140] sm:$0xff]  ;;  %v403_v25 = vld [vmem:[%s754_s6 + $0x138] sm:$0xff] }
  0x1d   : > { %434 = vmatpush.msra.mxu1 %v393_v9  ;;  %455 = vmatpush.msra.mxu2 %v408_v10  ;;  %v373_v20 = vld [vmem:[%s754_s6 + $0x48] sm:$0xff]  ;;  %v372_v23 = vld [vmem:[%s754_s6 + $0x40] sm:$0xff]  ;;  %v371_v26 = vld [vmem:[%s754_s6 + $0x38] sm:$0xff] }
  0x1e   : > { %415 = vmatpush.msra.mxu0 %v376_v11  ;;  %v389_v21 = vld [vmem:[%s754_s6 + $0xc8] sm:$0xff]  ;;  %v388_v24 = vld [vmem:[%s754_s6 + $0xc0] sm:$0xff]  ;;  %v387_v27 = vld [vmem:[%s754_s6 + $0xb8] sm:$0xff] }
  0x1f   : > { %435 = vmatpush.msra.mxu1 %v392_v12  ;;  %456 = vmatpush.msra.mxu2 %v407_v13  ;;  %v402_v28 = vld [vmem:[%s754_s6 + $0x130] sm:$0xff]  ;;  %v401_v31 = vld [vmem:[%s754_s6 + $0x128] sm:$0xff]  ;;  %v400_v34 = vld [vmem:[%s754_s6 + $0x120] sm:$0xff] }
  0x20   : > { %416 = vmatpush.msra.mxu0 %v375_v14  ;;  %v370_v29 = vld [vmem:[%s754_s6 + $0x30] sm:$0xff]  ;;  %v369_v32 = vld [vmem:[%s754_s6 + $0x28] sm:$0xff]  ;;  %v368_v35 = vld [vmem:[%s754_s6 + $0x20] sm:$0xff] }
  0x21   : > { %436 = vmatpush.msra.mxu1 %v391_v15  ;;  %457 = vmatpush.msra.mxu2 %v406_v16  ;;  %v386_v30 = vld [vmem:[%s754_s6 + $0xb0] sm:$0xff]  ;;  %v385_v33 = vld [vmem:[%s754_s6 + $0xa8] sm:$0xff]  ;;  %v384_v36 = vld [vmem:[%s754_s6 + $0xa0] sm:$0xff] }
  0x22   : > { %417 = vmatpush.msra.mxu0 %v374_v17  ;;  %v399_v37 = vld [vmem:[%s754_s6 + $0x118] sm:$0xff]  ;;  %v398_v40 = vld [vmem:[%s754_s6 + $0x110] sm:$0xff]  ;;  %v397_v43 = vld [vmem:[%s754_s6 + $0x108] sm:$0xff] }
  0x23   : > { %437 = vmatpush.msra.mxu1 %v390_v18  ;;  %458 = vmatpush.msra.mxu2 %v405_v19  ;;  %v367_v38 = vld [vmem:[%s754_s6 + $0x18] sm:$0xff]  ;;  %v366_v41 = vld [vmem:[%s754_s6 + $0x10] sm:$0xff]  ;;  %v365_v44 = vld [vmem:[%s754_s6 + $0x8] sm:$0xff] }
  0x24   : > { %418 = vmatpush.msra.mxu0 %v373_v20  ;;  %v383_v39 = vld [vmem:[%s754_s6 + $0x98] sm:$0xff]  ;;  %v382_v42 = vld [vmem:[%s754_s6 + $0x90] sm:$0xff]  ;;  %v381_v45 = vld [vmem:[%s754_s6 + $0x88] sm:$0xff] }
  0x25   : > { %438 = vmatpush.msra.mxu1 %v389_v21  ;;  %459 = vmatpush.msra.mxu2 %v404_v22  ;;  %v396_v46 = vld [vmem:[%s754_s6 + $0x100] sm:$0xff]  ;;  %v363_v48 = vld [vmem:[%s749_s27 + $0x10] sm:$0xff]  ;;  %v362_v51 = vld [vmem:[%s749_s27 + $0x8] sm:$0xff] }
  0x26   : > { %419 = vmatpush.msra.mxu0 %v372_v23  ;;  %v364_v47 = vld [vmem:[%s754_s6] sm:$0xff] }
  0x27   : > { %439 = vmatpush.msra.mxu1 %v388_v24  ;;  %460 = vmatpush.msra.mxu2 %v403_v25  ;;  %v380_v49 = vld [vmem:[%s754_s6 + $0x80] sm:$0xff] }
  0x28   : > { %420 = vmatpush.msra.mxu0 %v371_v26  ;;  %v361_v50 = vld [vmem:[%s749_s27] sm:$0xff] }
  0x29   : > { %440 = vmatpush.msra.mxu1 %v387_v27  ;;  %461 = vmatpush.msra.mxu2 %v402_v28  ;;  %v360_v55 = vld [vmem:[#allocation2] sm:$0xff] }
  0x2a   : > { %421 = vmatpush.msra.mxu0 %v370_v29 }
  0x2b   : > { %441 = vmatpush.msra.mxu1 %v386_v30  ;;  %462 = vmatpush.msra.mxu2 %v401_v31 }
  0x2c   : > { %422 = vmatpush.msra.mxu0 %v369_v32 }
  0x2d   : > { %442 = vmatpush.msra.mxu1 %v385_v33  ;;  %463 = vmatpush.msra.mxu2 %v400_v34 }
  0x2e   : > { %423 = vmatpush.msra.mxu0 %v368_v35 }
  0x2f   : > { %443 = vmatpush.msra.mxu1 %v384_v36  ;;  %464 = vmatpush.msra.mxu2 %v399_v37 }
  0x30   : > { %424 = vmatpush.msra.mxu0 %v367_v38 }
  0x31   : > { %444 = vmatpush.msra.mxu1 %v383_v39  ;;  %465 = vmatpush.msra.mxu2 %v398_v40 }
  0x32   : > { %425 = vmatpush.msra.mxu0 %v366_v41 }
  0x33   : > { %445 = vmatpush.msra.mxu1 %v382_v42  ;;  %466 = vmatpush.msra.mxu2 %v397_v43 }
  0x34   : > { %426 = vmatpush.msra.mxu0 %v365_v44 }
  0x35   : > { %446 = vmatpush.msra.mxu1 %v381_v45  ;;  %467 = vmatpush.msra.mxu2 %v396_v46 }
  0x36   : > { %427 = vmatpush.msra.mxu0 %v364_v47  ;;  %468 = vmatmul.f32.vlgmr.msra.gmra.mxu2 %v363_v48 }
  0x37   : > { %447 = vmatpush.msra.mxu1 %v380_v49  ;;  %428 = vmatmul.f32.vlgmr.msra.gmra.mxu0 %v361_v50 }
  0x38   : > { %448 = vmatmul.f32.vlgmr.msra.gmra.mxu1 %v362_v51 }
  0xb4   : > { %v429_v52 = vpop.f32.mrf.mxu0 }
  0xb5   : > { %v449_v53 = vpop.f32.mrf.mxu1 }
  0xb6   : > { %v450_v54 = vadd.f32 %v449_v53, %v429_v52 }
  0xb9   : > { %v469_v56 = vpop.f32.mrf.mxu2 }
  0xba   : > { %v470_v57 = vadd.f32 %v469_v56, %v450_v54  ;;  %477 = sbr.rel (%p638_p7) target bundleno = 207 (0xcf), region = 48 }
  0xbc   : > { %v472_v58 = vadd.f32 %v470_v57, %v360_v55 }
  0xbe   : > { %473 = vst [vmem:[#allocation2] sm:$0xff] %v472_v58 }
  0xbf   : > { %v667_v60 = vld [vmem:[%s832_s2] ss:$0 sm:$0xff] }
  0xc0   : > { %v668_v61 = vld [vmem:[%s833_s3] ss:$0 sm:$0xff] }
  0xc1   : > { %v489_v63 = vld [vmem:[%s834_s4] sm:$0xff] }
  0xc5   : > { %v478_v59 = vld [vmem:[#allocation2] sm:$0xff] }
  0xc6   : > { %v483_v62 = vmul.f32 %v667_v60, %v478_v59 }
  0xc8   : > { %v488_v0 = vadd.f32 %v668_v61, %v483_v62 }
  0xca   : > { %v490_v1 = vadd.f32 %v489_v63, %v488_v0 }
  0xcc   : > { %v491_v2 = vmax.f32 %v490_v1, 0.0 }
  0xce   : > { %492 = vst [vmem:[%s835_s5] sm:$0xff] %v491_v2 }
  0xcf PF: > { %s15_s20 = sadd.s32 1, %s691_s20   ;;  %s836_s18 = smov %s687_s19 }
  0xd0   : > { %p12_p8 = scmp.ge.s32.totalorder %s15_s20, 5   ;;  %s837_s19 = smov %s839_s21 }
  0xd2   :  { %14 = sbr.rel (!%p12_p8) target bundleno = 2 (0x2), region = 90 }

// kernel: encoder_forward.30
= control target key start
LH: loop header
LB: loop body
LE: loop exit
PB: predicated region body
PF: predicated region fallthrough
CT: control target
= control target key end

     0   :  { %9 = vsyncpa [#allocation4], 0  ;;  %s876_s0 = inlined_call_operand.vmem [shape: f32[8,1152], index: 0, kind: input, shape index: {}]   ;;  %s877_s1 = inlined_call_operand.vmem [shape: f32[1152,128], index: 1, kind: input, shape index: {}]   ;;  %s878_s2 = inlined_call_operand.hbm [shape: f32[1,128], index: 2, kind: input, shape index: {}]   ;;  %s879_s3 = inlined_call_operand.hbm [shape: f32[1,128], index: 3, kind: input, shape index: {}]   ;;  %s880_s4 = inlined_call_operand.vmem [shape: f32[8,128], index: 4, kind: output, shape index: {}]  }
   0x1   :  { %10 = vsyncpa [#allocation6], 0  ;;  %s750_s15 = smov 0   ;;  %s752_s16 = smov 0  }
   0x2   :  { %s754_s17 = smov 0  }
   0x3 LB: > { %s567_s18 = sadd.s32 4294967295, %s720_s17   ;;  %s28_s19 = sadd.s32 1, %s716_s16  ;;  %s720_s17 = sphi %s754_s17, %s16_s17   ;;  %s716_s16 = sphi %s752_s16, %s884_s16   ;;  %s712_s15 = sphi %s750_s15, %s883_s15  }
   0x4   : > { %p29_p0 = scmp.ge.s32.totalorder %s28_s19, 3  ;;  %p568_p1 = scmp.ge.s32.totalorder %s720_s17, 1 }
   0x5   : > { %p176_p2 = scmp.lt.s32.totalorder %s720_s17, 4  ;;  %p775_p4 = scmp.eq.s32.totalorder %s567_s18, 0 }
   0x6   : > { %s886_s19 = smov (%p29_p0, %s28_s19), 0  ;;  %s189_s24 = sshll.u32 %s878_s2, 4  ;;  %s190_s24 = int_to_ptr.hbm [resolvable:$true] %s189_s24 }
   0x7   : > { %p771_p3 = pnand %p568_p1, %p176_p2  ;;  %s722_s25 = smov [#allocation3]  }
   0x8   : > { %s191_s26 = sshll.u32 %s722_s25, 4  ;;  %s202_s29 = sshll.u32 %s879_s3, 4  ;;  %s192_s26 = int_to_ptr.vmem [resolvable:$true] %s191_s26  ;;  %s203_s29 = int_to_ptr.hbm [resolvable:$true] %s202_s29 }
   0x9   : > { %p590_p5 = pneg %p771_p3  ;;  %s723_s30 = smov [#allocation5]  }
   0xa   : > { %s204_s5 = sshll.u32 %s723_s30, 4  ;;  %242 = sbr.rel (%p771_p3) target bundleno = 211 (0xd3), region = 36  ;;  %s205_s5 = int_to_ptr.vmem [resolvable:$true] %s204_s5 }
   0xb   : > { %p591_p6 = pnand %p775_p4, %p590_p5 }
   0xd   : > { %593 = dma.hbm_to_vmem [thread:$0]  (!%p591_p6), %s190_s24, 16, %s192_s26, [#allocation4]  }
   0xe   : > { %596 = dma.hbm_to_vmem [thread:$0]  (!%p591_p6), %s203_s29, 16, %s205_s5, [#allocation6]  }
   0xf   : > { %703 = dma.done.wait (%p775_p4), [#allocation4], 16  }
  0x10   : > { %705 = vsyncadd (%p775_p4), [#allocation4], 4294967280 }
  0x11   : > { %707 = dma.done.wait (%p775_p4), [#allocation6], 16  }
  0x12   : > { %709 = vsyncadd (%p775_p4), [#allocation6], 4294967280  ;;  %s288_s6 = smul.u32 3, %s712_s15  ;;  %p577_p9 = scmp.ne.s32.totalorder %s712_s15, 0 }
  0x13   : > { %s298_s7 = smul.u32 48, %s712_s15 }
  0x14   : > { %p291_p7 = scmp.lt.s32.totalorder %s288_s6, 8 }
  0x15   : > { %p299_p8 = scmp.lt.s32.totalorder %s298_s7, 143  ;;  %317 = sbr.rel (%p577_p9) target bundleno = 28 (0x1c), region = 48 }
  0x16   : > { %s888_s6 = smov (!%p291_p7, %s288_s6), 8 }
  0x17   : > { %s890_s7 = smov (!%p299_p8, %s298_s7), 143  ;;  %s575_s8 = sshll.u32 %s888_s6, 3 }
  0x18   : > { %s804_s11 = scalar_lea.vmem %s876_s0, %s575_s8  ;;  %s576_s12 = sshll.u32 %s890_s7, 3 }
  0x19   : > { %s809_s18 = scalar_lea.vmem %s877_s1, %s576_s12 }
  0x1a   : > { %v724_v0 = vmov 0.0  }
  0x1b   : > { %318 = vst [vmem:[#allocation2] sm:$0xff] %v724_v0 }
  0x1c PF: > { %v370_v1 = vld [vmem:[%s809_s18 + $0x178] sm:$0xff]  ;;  %v369_v2 = vld [vmem:[%s809_s18 + $0x170] sm:$0xff]  ;;  %v368_v6 = vld [vmem:[%s809_s18 + $0x168] sm:$0xff]  ;;  %p578_p10 = scmp.ne.s32.totalorder %s712_s15, 2 }
  0x1d   : > { %v338_v3 = vld [vmem:[%s809_s18 + $0x78] sm:$0xff]  ;;  %411 = vmatpush.msra.mxu2 %v370_v1  ;;  %v337_v5 = vld [vmem:[%s809_s18 + $0x70] sm:$0xff]  ;;  %v336_v8 = vld [vmem:[%s809_s18 + $0x68] sm:$0xff] }
  0x1e   : > { %371 = vmatpush.msra.mxu0 %v338_v3  ;;  %v354_v4 = vld [vmem:[%s809_s18 + $0xf8] sm:$0xff]  ;;  %v353_v7 = vld [vmem:[%s809_s18 + $0xf0] sm:$0xff]  ;;  %v352_v9 = vld [vmem:[%s809_s18 + $0xe8] sm:$0xff] }
  0x1f   : > { %391 = vmatpush.msra.mxu1 %v354_v4  ;;  %412 = vmatpush.msra.mxu2 %v369_v2  ;;  %v367_v10 = vld [vmem:[%s809_s18 + $0x160] sm:$0xff]  ;;  %v366_v13 = vld [vmem:[%s809_s18 + $0x158] sm:$0xff]  ;;  %v365_v16 = vld [vmem:[%s809_s18 + $0x150] sm:$0xff] }
  0x20   : > { %372 = vmatpush.msra.mxu0 %v337_v5  ;;  %v335_v11 = vld [vmem:[%s809_s18 + $0x60] sm:$0xff]  ;;  %v334_v14 = vld [vmem:[%s809_s18 + $0x58] sm:$0xff]  ;;  %v333_v17 = vld [vmem:[%s809_s18 + $0x50] sm:$0xff] }
  0x21   : > { %392 = vmatpush.msra.mxu1 %v353_v7  ;;  %413 = vmatpush.msra.mxu2 %v368_v6  ;;  %v351_v12 = vld [vmem:[%s809_s18 + $0xe0] sm:$0xff]  ;;  %v350_v15 = vld [vmem:[%s809_s18 + $0xd8] sm:$0xff]  ;;  %v349_v18 = vld [vmem:[%s809_s18 + $0xd0] sm:$0xff] }
  0x22   : > { %373 = vmatpush.msra.mxu0 %v336_v8  ;;  %v364_v19 = vld [vmem:[%s809_s18 + $0x148] sm:$0xff]  ;;  %v363_v22 = vld [vmem:[%s809_s18 + $0x140] sm:$0xff]  ;;  %v362_v25 = vld [vmem:[%s809_s18 + $0x138] sm:$0xff] }
  0x23   : > { %393 = vmatpush.msra.mxu1 %v352_v9  ;;  %414 = vmatpush.msra.mxu2 %v367_v10  ;;  %v332_v20 = vld [vmem:[%s809_s18 + $0x48] sm:$0xff]  ;;  %v331_v23 = vld [vmem:[%s809_s18 + $0x40] sm:$0xff]  ;;  %v330_v26 = vld [vmem:[%s809_s18 + $0x38] sm:$0xff] }
  0x24   : > { %374 = vmatpush.msra.mxu0 %v335_v11  ;;  %v348_v21 = vld [vmem:[%s809_s18 + $0xc8] sm:$0xff]  ;;  %v347_v24 = vld [vmem:[%s809_s18 + $0xc0] sm:$0xff]  ;;  %v346_v27 = vld [vmem:[%s809_s18 + $0xb8] sm:$0xff] }
  0x25   : > { %394 = vmatpush.msra.mxu1 %v351_v12  ;;  %415 = vmatpush.msra.mxu2 %v366_v13  ;;  %v361_v28 = vld [vmem:[%s809_s18 + $0x130] sm:$0xff]  ;;  %v360_v31 = vld [vmem:[%s809_s18 + $0x128] sm:$0xff]  ;;  %v359_v34 = vld [vmem:[%s809_s18 + $0x120] sm:$0xff] }
  0x26   : > { %375 = vmatpush.msra.mxu0 %v334_v14  ;;  %v329_v29 = vld [vmem:[%s809_s18 + $0x30] sm:$0xff]  ;;  %v328_v32 = vld [vmem:[%s809_s18 + $0x28] sm:$0xff]  ;;  %v327_v35 = vld [vmem:[%s809_s18 + $0x20] sm:$0xff] }
  0x27   : > { %395 = vmatpush.msra.mxu1 %v350_v15  ;;  %416 = vmatpush.msra.mxu2 %v365_v16  ;;  %v345_v30 = vld [vmem:[%s809_s18 + $0xb0] sm:$0xff]  ;;  %v344_v33 = vld [vmem:[%s809_s18 + $0xa8] sm:$0xff]  ;;  %v343_v36 = vld [vmem:[%s809_s18 + $0xa0] sm:$0xff] }
  0x28   : > { %376 = vmatpush.msra.mxu0 %v333_v17  ;;  %v358_v37 = vld [vmem:[%s809_s18 + $0x118] sm:$0xff]  ;;  %v357_v40 = vld [vmem:[%s809_s18 + $0x110] sm:$0xff]  ;;  %v356_v43 = vld [vmem:[%s809_s18 + $0x108] sm:$0xff] }
  0x29   : > { %396 = vmatpush.msra.mxu1 %v349_v18  ;;  %417 = vmatpush.msra.mxu2 %v364_v19  ;;  %v326_v38 = vld [vmem:[%s809_s18 + $0x18] sm:$0xff]  ;;  %v325_v41 = vld [vmem:[%s809_s18 + $0x10] sm:$0xff]  ;;  %v324_v44 = vld [vmem:[%s809_s18 + $0x8] sm:$0xff] }
  0x2a   : > { %377 = vmatpush.msra.mxu0 %v332_v20  ;;  %v342_v39 = vld [vmem:[%s809_s18 + $0x98] sm:$0xff]  ;;  %v341_v42 = vld [vmem:[%s809_s18 + $0x90] sm:$0xff]  ;;  %v340_v45 = vld [vmem:[%s809_s18 + $0x88] sm:$0xff] }
  0x2b   : > { %397 = vmatpush.msra.mxu1 %v348_v21  ;;  %418 = vmatpush.msra.mxu2 %v363_v22  ;;  %v355_v46 = vld [vmem:[%s809_s18 + $0x100] sm:$0xff]  ;;  %v322_v48 = vld [vmem:[%s804_s11 + $0x10] sm:$0xff]  ;;  %v321_v51 = vld [vmem:[%s804_s11 + $0x8] sm:$0xff] }
  0x2c   : > { %378 = vmatpush.msra.mxu0 %v331_v23  ;;  %v323_v47 = vld [vmem:[%s809_s18] sm:$0xff] }
  0x2d   : > { %398 = vmatpush.msra.mxu1 %v347_v24  ;;  %419 = vmatpush.msra.mxu2 %v362_v25  ;;  %v339_v49 = vld [vmem:[%s809_s18 + $0x80] sm:$0xff] }
  0x2e   : > { %379 = vmatpush.msra.mxu0 %v330_v26  ;;  %v320_v50 = vld [vmem:[%s804_s11] sm:$0xff] }
  0x2f   : > { %399 = vmatpush.msra.mxu1 %v346_v27  ;;  %420 = vmatpush.msra.mxu2 %v361_v28  ;;  %v319_v55 = vld [vmem:[#allocation2] sm:$0xff] }
  0x30   : > { %380 = vmatpush.msra.mxu0 %v329_v29 }
  0x31   : > { %400 = vmatpush.msra.mxu1 %v345_v30  ;;  %421 = vmatpush.msra.mxu2 %v360_v31 }
  0x32   : > { %381 = vmatpush.msra.mxu0 %v328_v32 }
  0x33   : > { %401 = vmatpush.msra.mxu1 %v344_v33  ;;  %422 = vmatpush.msra.mxu2 %v359_v34 }
  0x34   : > { %382 = vmatpush.msra.mxu0 %v327_v35 }
  0x35   : > { %402 = vmatpush.msra.mxu1 %v343_v36  ;;  %423 = vmatpush.msra.mxu2 %v358_v37 }
  0x36   : > { %383 = vmatpush.msra.mxu0 %v326_v38 }
  0x37   : > { %403 = vmatpush.msra.mxu1 %v342_v39  ;;  %424 = vmatpush.msra.mxu2 %v357_v40 }
  0x38   : > { %384 = vmatpush.msra.mxu0 %v325_v41 }
  0x39   : > { %404 = vmatpush.msra.mxu1 %v341_v42  ;;  %425 = vmatpush.msra.mxu2 %v356_v43 }
  0x3a   : > { %385 = vmatpush.msra.mxu0 %v324_v44 }
  0x3b   : > { %405 = vmatpush.msra.mxu1 %v340_v45  ;;  %426 = vmatpush.msra.mxu2 %v355_v46 }
  0x3c   : > { %386 = vmatpush.msra.mxu0 %v323_v47  ;;  %427 = vmatmul.f32.vlgmr.msra.gmra.mxu2 %v322_v48 }
  0x3d   : > { %406 = vmatpush.msra.mxu1 %v339_v49  ;;  %387 = vmatmul.f32.vlgmr.msra.gmra.mxu0 %v320_v50 }
  0x3e   : > { %407 = vmatmul.f32.vlgmr.msra.gmra.mxu1 %v321_v51 }
  0xba   : > { %v388_v52 = vpop.f32.mrf.mxu0 }
  0xbb   : > { %v408_v53 = vpop.f32.mrf.mxu1 }
  0xbc   : > { %v409_v54 = vadd.f32 %v408_v53, %v388_v52 }
  0xbf   : > { %v428_v56 = vpop.f32.mrf.mxu2 }
  0xc0   : > { %v429_v57 = vadd.f32 %v428_v56, %v409_v54  ;;  %436 = sbr.rel (%p578_p10) target bundleno = 211 (0xd3), region = 52 }
  0xc2   : > { %v431_v58 = vadd.f32 %v429_v57, %v319_v55 }
  0xc4   : > { %432 = vst [vmem:[#allocation2] sm:$0xff] %v431_v58 }
  0xc5   : > { %v628_v60 = vld [vmem:[#allocation3] ss:$0 sm:$0xff]  ;;  %v629_v61 = vld [vmem:[#allocation5] ss:$0 sm:$0xff] }
  0xcb   : > { %v437_v59 = vld [vmem:[#allocation2] sm:$0xff] }
  0xcc   : > { %v442_v62 = vmul.f32 %v628_v60, %v437_v59 }
  0xce   : > { %v447_v63 = vadd.f32 %v629_v61, %v442_v62 }
  0xd0   : > { %v448_v0 = vmax.f32 %v447_v63, 0.0 }
  0xd2   : > { %449 = vst [vmem:[%s880_s4] sm:$0xff] %v448_v0 }
  0xd3 PF: > { %s16_s17 = sadd.s32 1, %s720_s17   ;;  %s883_s15 = smov %s716_s16 }
  0xd4   : > { %p13_p11 = scmp.ge.s32.totalorder %s16_s17, 5   ;;  %s884_s16 = smov %s886_s19 }
  0xd6   :  { %15 = sbr.rel (!%p13_p11) target bundleno = 3 (0x3), region = 88 }
  0xdb   :  { %475 = vsyncpa [#allocation4], 1 }
  0xdc   :  { %477 = vsyncpa [#allocation4 + $0x1], 1 }
  0xdd   :  { %478 = vsyncpa [#allocation6], 1 }

// kernel: encoder_forward.31
= control target key start
LH: loop header
LB: loop body
LE: loop exit
PB: predicated region body
PF: predicated region fallthrough
CT: control target
= control target key end

     0   :  { %10 = vsyncpa [#allocation4], 0  ;;  %s960_s0 = inlined_call_operand.vmem [shape: f32[8,1152], index: 0, kind: input, shape index: {}]   ;;  %s961_s1 = inlined_call_operand.vmem [shape: f32[1152,128], index: 1, kind: input, shape index: {}]   ;;  %s962_s2 = inlined_call_operand.hbm [shape: f32[1,128], index: 2, kind: input, shape index: {}]   ;;  %s963_s3 = inlined_call_operand.hbm [shape: f32[1,128], index: 3, kind: input, shape index: {}]   ;;  %s964_s4 = inlined_call_operand.vmem [shape: f32[8,128], index: 4, kind: input, shape index: {}]   ;;  %s965_s5 = inlined_call_operand.vmem [shape: f32[8,128], index: 5, kind: output, shape index: {}]  }
   0x1   :  { %11 = vsyncpa [#allocation6], 0  ;;  %s831_s18 = smov 0   ;;  %s833_s19 = smov 0  }
   0x2   :  { %s835_s20 = smov 0  }
   0x3 LB: > { %s642_s21 = sadd.s32 4294967295, %s796_s20   ;;  %s29_s22 = sadd.s32 1, %s792_s19  ;;  %s796_s20 = sphi %s835_s20, %s17_s20   ;;  %s792_s19 = sphi %s833_s19, %s969_s19   ;;  %s788_s18 = sphi %s831_s18, %s968_s18  }
   0x4   : > { %p30_p0 = scmp.ge.s32.totalorder %s29_s22, 3  ;;  %p643_p1 = scmp.ge.s32.totalorder %s796_s20, 1 }
   0x5   : > { %p205_p2 = scmp.lt.s32.totalorder %s796_s20, 4  ;;  %p856_p4 = scmp.eq.s32.totalorder %s642_s21, 0 }
   0x6   : > { %s971_s22 = smov (%p30_p0, %s29_s22), 0  ;;  %s218_s27 = sshll.u32 %s962_s2, 4  ;;  %s219_s27 = int_to_ptr.hbm [resolvable:$true] %s218_s27 }
   0x7   : > { %p852_p3 = pnand %p643_p1, %p205_p2  ;;  %s798_s28 = smov [#allocation3]  }
   0x8   : > { %s220_s29 = sshll.u32 %s798_s28, 4  ;;  %s231_s7 = sshll.u32 %s963_s3, 4  ;;  %s221_s29 = int_to_ptr.vmem [resolvable:$true] %s220_s29  ;;  %s232_s7 = int_to_ptr.hbm [resolvable:$true] %s231_s7 }
   0x9   : > { %p666_p5 = pneg %p852_p3  ;;  %s799_s8 = smov [#allocation5]  }
   0xa   : > { %s233_s9 = sshll.u32 %s799_s8, 4  ;;  %281 = sbr.rel (%p852_p3) target bundleno = 213 (0xd5), region = 40  ;;  %s234_s9 = int_to_ptr.vmem [resolvable:$true] %s233_s9 }
   0xb   : > { %p667_p6 = pnand %p856_p4, %p666_p5 }
   0xd   : > { %669 = dma.hbm_to_vmem [thread:$0]  (!%p667_p6), %s219_s27, 16, %s221_s29, [#allocation4]  }
   0xe   : > { %672 = dma.hbm_to_vmem [thread:$0]  (!%p667_p6), %s232_s7, 16, %s234_s9, [#allocation6]  }
   0xf   : > { %779 = dma.done.wait (%p856_p4), [#allocation4], 16  }
  0x10   : > { %781 = vsyncadd (%p856_p4), [#allocation4], 4294967280 }
  0x11   : > { %783 = dma.done.wait (%p856_p4), [#allocation6], 16  }
  0x12   : > { %785 = vsyncadd (%p856_p4), [#allocation6], 4294967280  ;;  %s336_s10 = smul.u32 3, %s788_s18  ;;  %p653_p9 = scmp.ne.s32.totalorder %s788_s18, 0 }
  0x13   : > { %s346_s11 = smul.u32 48, %s788_s18 }
  0x14   : > { %p339_p7 = scmp.lt.s32.totalorder %s336_s10, 8 }
  0x15   : > { %p347_p8 = scmp.lt.s32.totalorder %s346_s11, 143  ;;  %372 = sbr.rel (%p653_p9) target bundleno = 28 (0x1c), region = 52 }
  0x16   : > { %s973_s10 = smov (!%p339_p7, %s336_s10), 8 }
  0x17   : > { %s975_s11 = smov (!%p347_p8, %s346_s11), 143  ;;  %s651_s12 = sshll.u32 %s973_s10, 3 }
  0x18   : > { %s885_s15 = scalar_lea.vmem %s960_s0, %s651_s12  ;;  %s652_s16 = sshll.u32 %s975_s11, 3 }
  0x19   : > { %s890_s23 = scalar_lea.vmem %s961_s1, %s652_s16 }
  0x1a   : > { %v800_v0 = vmov 0.0  }
  0x1b   : > { %373 = vst [vmem:[#allocation2] sm:$0xff] %v800_v0 }
  0x1c PF: > { %v425_v1 = vld [vmem:[%s890_s23 + $0x178] sm:$0xff]  ;;  %v424_v2 = vld [vmem:[%s890_s23 + $0x170] sm:$0xff]  ;;  %v423_v6 = vld [vmem:[%s890_s23 + $0x168] sm:$0xff]  ;;  %p654_p10 = scmp.ne.s32.totalorder %s788_s18, 2 }
  0x1d   : > { %v393_v3 = vld [vmem:[%s890_s23 + $0x78] sm:$0xff]  ;;  %466 = vmatpush.msra.mxu2 %v425_v1  ;;  %v392_v5 = vld [vmem:[%s890_s23 + $0x70] sm:$0xff]  ;;  %v391_v8 = vld [vmem:[%s890_s23 + $0x68] sm:$0xff] }
  0x1e   : > { %426 = vmatpush.msra.mxu0 %v393_v3  ;;  %v409_v4 = vld [vmem:[%s890_s23 + $0xf8] sm:$0xff]  ;;  %v408_v7 = vld [vmem:[%s890_s23 + $0xf0] sm:$0xff]  ;;  %v407_v9 = vld [vmem:[%s890_s23 + $0xe8] sm:$0xff] }
  0x1f   : > { %446 = vmatpush.msra.mxu1 %v409_v4  ;;  %467 = vmatpush.msra.mxu2 %v424_v2  ;;  %v422_v10 = vld [vmem:[%s890_s23 + $0x160] sm:$0xff]  ;;  %v421_v13 = vld [vmem:[%s890_s23 + $0x158] sm:$0xff]  ;;  %v420_v16 = vld [vmem:[%s890_s23 + $0x150] sm:$0xff] }
  0x20   : > { %427 = vmatpush.msra.mxu0 %v392_v5  ;;  %v390_v11 = vld [vmem:[%s890_s23 + $0x60] sm:$0xff]  ;;  %v389_v14 = vld [vmem:[%s890_s23 + $0x58] sm:$0xff]  ;;  %v388_v17 = vld [vmem:[%s890_s23 + $0x50] sm:$0xff] }
  0x21   : > { %447 = vmatpush.msra.mxu1 %v408_v7  ;;  %468 = vmatpush.msra.mxu2 %v423_v6  ;;  %v406_v12 = vld [vmem:[%s890_s23 + $0xe0] sm:$0xff]  ;;  %v405_v15 = vld [vmem:[%s890_s23 + $0xd8] sm:$0xff]  ;;  %v404_v18 = vld [vmem:[%s890_s23 + $0xd0] sm:$0xff] }
  0x22   : > { %428 = vmatpush.msra.mxu0 %v391_v8  ;;  %v419_v19 = vld [vmem:[%s890_s23 + $0x148] sm:$0xff]  ;;  %v418_v22 = vld [vmem:[%s890_s23 + $0x140] sm:$0xff]  ;;  %v417_v25 = vld [vmem:[%s890_s23 + $0x138] sm:$0xff] }
  0x23   : > { %448 = vmatpush.msra.mxu1 %v407_v9  ;;  %469 = vmatpush.msra.mxu2 %v422_v10  ;;  %v387_v20 = vld [vmem:[%s890_s23 + $0x48] sm:$0xff]  ;;  %v386_v23 = vld [vmem:[%s890_s23 + $0x40] sm:$0xff]  ;;  %v385_v26 = vld [vmem:[%s890_s23 + $0x38] sm:$0xff] }
  0x24   : > { %429 = vmatpush.msra.mxu0 %v390_v11  ;;  %v403_v21 = vld [vmem:[%s890_s23 + $0xc8] sm:$0xff]  ;;  %v402_v24 = vld [vmem:[%s890_s23 + $0xc0] sm:$0xff]  ;;  %v401_v27 = vld [vmem:[%s890_s23 + $0xb8] sm:$0xff] }
  0x25   : > { %449 = vmatpush.msra.mxu1 %v406_v12  ;;  %470 = vmatpush.msra.mxu2 %v421_v13  ;;  %v416_v28 = vld [vmem:[%s890_s23 + $0x130] sm:$0xff]  ;;  %v415_v31 = vld [vmem:[%s890_s23 + $0x128] sm:$0xff]  ;;  %v414_v34 = vld [vmem:[%s890_s23 + $0x120] sm:$0xff] }
  0x26   : > { %430 = vmatpush.msra.mxu0 %v389_v14  ;;  %v384_v29 = vld [vmem:[%s890_s23 + $0x30] sm:$0xff]  ;;  %v383_v32 = vld [vmem:[%s890_s23 + $0x28] sm:$0xff]  ;;  %v382_v35 = vld [vmem:[%s890_s23 + $0x20] sm:$0xff] }
  0x27   : > { %450 = vmatpush.msra.mxu1 %v405_v15  ;;  %471 = vmatpush.msra.mxu2 %v420_v16  ;;  %v400_v30 = vld [vmem:[%s890_s23 + $0xb0] sm:$0xff]  ;;  %v399_v33 = vld [vmem:[%s890_s23 + $0xa8] sm:$0xff]  ;;  %v398_v36 = vld [vmem:[%s890_s23 + $0xa0] sm:$0xff] }
  0x28   : > { %431 = vmatpush.msra.mxu0 %v388_v17  ;;  %v413_v37 = vld [vmem:[%s890_s23 + $0x118] sm:$0xff]  ;;  %v412_v40 = vld [vmem:[%s890_s23 + $0x110] sm:$0xff]  ;;  %v411_v43 = vld [vmem:[%s890_s23 + $0x108] sm:$0xff] }
  0x29   : > { %451 = vmatpush.msra.mxu1 %v404_v18  ;;  %472 = vmatpush.msra.mxu2 %v419_v19  ;;  %v381_v38 = vld [vmem:[%s890_s23 + $0x18] sm:$0xff]  ;;  %v380_v41 = vld [vmem:[%s890_s23 + $0x10] sm:$0xff]  ;;  %v379_v44 = vld [vmem:[%s890_s23 + $0x8] sm:$0xff] }
  0x2a   : > { %432 = vmatpush.msra.mxu0 %v387_v20  ;;  %v397_v39 = vld [vmem:[%s890_s23 + $0x98] sm:$0xff]  ;;  %v396_v42 = vld [vmem:[%s890_s23 + $0x90] sm:$0xff]  ;;  %v395_v45 = vld [vmem:[%s890_s23 + $0x88] sm:$0xff] }
  0x2b   : > { %452 = vmatpush.msra.mxu1 %v403_v21  ;;  %473 = vmatpush.msra.mxu2 %v418_v22  ;;  %v410_v46 = vld [vmem:[%s890_s23 + $0x100] sm:$0xff]  ;;  %v377_v48 = vld [vmem:[%s885_s15 + $0x10] sm:$0xff]  ;;  %v376_v51 = vld [vmem:[%s885_s15 + $0x8] sm:$0xff] }
  0x2c   : > { %433 = vmatpush.msra.mxu0 %v386_v23  ;;  %v378_v47 = vld [vmem:[%s890_s23] sm:$0xff] }
  0x2d   : > { %453 = vmatpush.msra.mxu1 %v402_v24  ;;  %474 = vmatpush.msra.mxu2 %v417_v25  ;;  %v394_v49 = vld [vmem:[%s890_s23 + $0x80] sm:$0xff] }
  0x2e   : > { %434 = vmatpush.msra.mxu0 %v385_v26  ;;  %v375_v50 = vld [vmem:[%s885_s15] sm:$0xff] }
  0x2f   : > { %454 = vmatpush.msra.mxu1 %v401_v27  ;;  %475 = vmatpush.msra.mxu2 %v416_v28  ;;  %v374_v55 = vld [vmem:[#allocation2] sm:$0xff] }
  0x30   : > { %435 = vmatpush.msra.mxu0 %v384_v29 }
  0x31   : > { %455 = vmatpush.msra.mxu1 %v400_v30  ;;  %476 = vmatpush.msra.mxu2 %v415_v31 }
  0x32   : > { %436 = vmatpush.msra.mxu0 %v383_v32 }
  0x33   : > { %456 = vmatpush.msra.mxu1 %v399_v33  ;;  %477 = vmatpush.msra.mxu2 %v414_v34 }
  0x34   : > { %437 = vmatpush.msra.mxu0 %v382_v35 }
  0x35   : > { %457 = vmatpush.msra.mxu1 %v398_v36  ;;  %478 = vmatpush.msra.mxu2 %v413_v37 }
  0x36   : > { %438 = vmatpush.msra.mxu0 %v381_v38 }
  0x37   : > { %458 = vmatpush.msra.mxu1 %v397_v39  ;;  %479 = vmatpush.msra.mxu2 %v412_v40 }
  0x38   : > { %439 = vmatpush.msra.mxu0 %v380_v41 }
  0x39   : > { %459 = vmatpush.msra.mxu1 %v396_v42  ;;  %480 = vmatpush.msra.mxu2 %v411_v43 }
  0x3a   : > { %440 = vmatpush.msra.mxu0 %v379_v44 }
  0x3b   : > { %460 = vmatpush.msra.mxu1 %v395_v45  ;;  %481 = vmatpush.msra.mxu2 %v410_v46 }
  0x3c   : > { %441 = vmatpush.msra.mxu0 %v378_v47  ;;  %482 = vmatmul.f32.vlgmr.msra.gmra.mxu2 %v377_v48 }
  0x3d   : > { %461 = vmatpush.msra.mxu1 %v394_v49  ;;  %442 = vmatmul.f32.vlgmr.msra.gmra.mxu0 %v375_v50 }
  0x3e   : > { %462 = vmatmul.f32.vlgmr.msra.gmra.mxu1 %v376_v51 }
  0xba   : > { %v443_v52 = vpop.f32.mrf.mxu0 }
  0xbb   : > { %v463_v53 = vpop.f32.mrf.mxu1 }
  0xbc   : > { %v464_v54 = vadd.f32 %v463_v53, %v443_v52 }
  0xbf   : > { %v483_v56 = vpop.f32.mrf.mxu2 }
  0xc0   : > { %v484_v57 = vadd.f32 %v483_v56, %v464_v54  ;;  %491 = sbr.rel (%p654_p10) target bundleno = 213 (0xd5), region = 56 }
  0xc2   : > { %v486_v58 = vadd.f32 %v484_v57, %v374_v55 }
  0xc4   : > { %487 = vst [vmem:[#allocation2] sm:$0xff] %v486_v58 }
  0xc5   : > { %v704_v60 = vld [vmem:[#allocation3] ss:$0 sm:$0xff]  ;;  %v705_v61 = vld [vmem:[#allocation5] ss:$0 sm:$0xff]  ;;  %v503_v63 = vld [vmem:[%s964_s4] sm:$0xff] }
  0xcb   : > { %v492_v59 = vld [vmem:[#allocation2] sm:$0xff] }
  0xcc   : > { %v497_v62 = vmul.f32 %v704_v60, %v492_v59 }
  0xce   : > { %v502_v0 = vadd.f32 %v705_v61, %v497_v62 }
  0xd0   : > { %v504_v1 = vadd.f32 %v503_v63, %v502_v0 }
  0xd2   : > { %v505_v2 = vmax.f32 %v504_v1, 0.0 }
  0xd4   : > { %506 = vst [vmem:[%s965_s5] sm:$0xff] %v505_v2 }
  0xd5 PF: > { %s17_s20 = sadd.s32 1, %s796_s20   ;;  %s968_s18 = smov %s792_s19 }
  0xd6   : > { %p14_p11 = scmp.ge.s32.totalorder %s17_s20, 5   ;;  %s969_s19 = smov %s971_s22 }
  0xd8   :  { %16 = sbr.rel (!%p14_p11) target bundleno = 3 (0x3), region = 95 }
  0xdd   :  { %532 = vsyncpa [#allocation4], 1 }
  0xde   :  { %534 = vsyncpa [#allocation4 + $0x1], 1 }
  0xdf   :  { %535 = vsyncpa [#allocation6], 1 }

// kernel: encoder_forward.32
= control target key start
LH: loop header
LB: loop body
LE: loop exit
PB: predicated region body
PF: predicated region fallthrough
CT: control target
= control target key end

     0   :  { %s800_s15 = smov 0   ;;  %s802_s16 = smov 0   ;;  %s954_s0 = inlined_call_operand.vmem [shape: f32[8,1152], index: 0, kind: input, shape index: {}]   ;;  %s955_s1 = inlined_call_operand.vmem [shape: f32[1152,256], index: 1, kind: input, shape index: {}]   ;;  %s956_s2 = inlined_call_operand.vmem [shape: f32[1,256], index: 2, kind: input, shape index: {}]   ;;  %s957_s3 = inlined_call_operand.vmem [shape: f32[1,256], index: 3, kind: input, shape index: {}]   ;;  %s958_s4 = inlined_call_operand.vmem [shape: f32[8,256], index: 4, kind: output, shape index: {}]  }
   0x1   :  { %s804_s17 = smov 0  }
   0x2 LB: > { %s26_s18 = sadd.s32 1, %s768_s16  ;;  %p714_p0 = scmp.ge.s32.totalorder %s772_s17, 1  ;;  %s772_s17 = sphi %s804_s17, %s14_s17   ;;  %s768_s16 = sphi %s802_s16, %s960_s16   ;;  %s764_s15 = sphi %s800_s15, %s959_s15  }
   0x3   : > { %p27_p1 = scmp.ge.s32.totalorder %s26_s18, 3  ;;  %p229_p2 = scmp.lt.s32.totalorder %s772_s17, 4 }
   0x5   : > { %s962_s18 = smov (%p27_p1, %s26_s18), 0  ;;  %p230_p3 = pnand %p714_p0, %p229_p2 }
   0x6   : > { %s281_s19 = smul.u32 (!%p230_p3), 3, %s764_s15  ;;  %p718_p6 = scmp.ne.s32.totalorder (!%p230_p3), %s764_s15, 0 }
   0x7   : > { %233 = sbr.rel (%p230_p3) target bundleno = 234 (0xea), region = 36 }
   0x8   : > { %s291_s20 = smul.u32 (!%p230_p3), 48, %s764_s15  ;;  %p284_p4 = scmp.lt.s32.totalorder (!%p230_p3), %s281_s19, 8 }
   0xa   : > { %p293_p5 = scmp.lt.s32.totalorder (!%p230_p3), %s291_s20, 143 }
   0xc   : > { %s964_s19 = smov (!%p284_p4, %s281_s19), 8  ;;  %s966_s20 = smov (!%p293_p5, %s291_s20), 143 }
   0xd   : > { %s715_s21 = sshll.u32 %s964_s19, 3  ;;  %s724_s25 = sshll.u32 %s966_s20, 4 }
   0xe   : > { %s825_s24 = scalar_lea.vmem %s954_s0, %s715_s21  ;;  %s830_s28 = scalar_lea.vmem %s955_s1, %s724_s25 }
   0xf   : > { %326 = sbr.rel (%p718_p6) target bundleno = 23 (0x17), region = 40 }
  0x14   : > { %v774_v0 = vmov 0.0  }
  0x15   : > { %327 = vst [vmem:[#allocation2] sm:$0xff] %v774_v0 }
  0x16   : > { %328 = vst [vmem:[#allocation2 + $0x8] sm:$0xff] %v774_v0 }
  0x17 PF: > { %v364_v1 = vld [vmem:[%s830_s28 + $0xf0] sm:$0xff]  ;;  %v362_v2 = vld [vmem:[%s830_s28 + $0xe0] sm:$0xff]  ;;  %v365_v16 = vld [vmem:[%s830_s28 + $0xf8] sm:$0xff]  ;;  %p719_p7 = scmp.ne.s32.totalorder %s764_s15, 2 }
  0x18   : > { %v396_v3 = vld [vmem:[%s830_s28 + $0x1f0] sm:$0xff]  ;;  %430 = vmatpush.msra.mxu0 %v364_v1  ;;  %v394_v4 = vld [vmem:[%s830_s28 + $0x1e0] sm:$0xff]  ;;  %490 = vmatpush.msra.mxu3 %v365_v16  ;;  %v363_v20 = vld [vmem:[%s830_s28 + $0xe8] sm:$0xff] }
  0x19   : > { %450 = vmatpush.msra.mxu1 %v396_v3  ;;  %v360_v5 = vld [vmem:[%s830_s28 + $0xd0] sm:$0xff]  ;;  %v358_v7 = vld [vmem:[%s830_s28 + $0xc0] sm:$0xff]  ;;  %v361_v23 = vld [vmem:[%s830_s28 + $0xd8] sm:$0xff] }
  0x1a   : > { %v392_v6 = vld [vmem:[%s830_s28 + $0x1d0] sm:$0xff]  ;;  %431 = vmatpush.msra.mxu0 %v362_v2  ;;  %v390_v8 = vld [vmem:[%s830_s28 + $0x1c0] sm:$0xff]  ;;  %491 = vmatpush.msra.mxu3 %v363_v20  ;;  %v359_v25 = vld [vmem:[%s830_s28 + $0xc8] sm:$0xff] }
  0x1b   : > { %451 = vmatpush.msra.mxu1 %v394_v4  ;;  %v356_v9 = vld [vmem:[%s830_s28 + $0xb0] sm:$0xff]  ;;  %v426_v12 = vld [vmem:[%s830_s28 + $0x2e0] sm:$0xff]  ;;  %v357_v29 = vld [vmem:[%s830_s28 + $0xb8] sm:$0xff] }
  0x1c   : > { %432 = vmatpush.msra.mxu0 %v360_v5  ;;  %v388_v10 = vld [vmem:[%s830_s28 + $0x1b0] sm:$0xff]  ;;  %v354_v13 = vld [vmem:[%s830_s28 + $0xa0] sm:$0xff]  ;;  %492 = vmatpush.msra.mxu3 %v361_v23  ;;  %v355_v33 = vld [vmem:[%s830_s28 + $0xa8] sm:$0xff] }
  0x1d   : > { %452 = vmatpush.msra.mxu1 %v392_v6  ;;  %v428_v11 = vld [vmem:[%s830_s28 + $0x2f0] sm:$0xff]  ;;  %v386_v14 = vld [vmem:[%s830_s28 + $0x1a0] sm:$0xff]  ;;  %v353_v37 = vld [vmem:[%s830_s28 + $0x98] sm:$0xff] }
  0x1e   : > { %433 = vmatpush.msra.mxu0 %v358_v7  ;;  %470 = vmatpush.msra.mxu2 %v428_v11  ;;  %v424_v15 = vld [vmem:[%s830_s28 + $0x2d0] sm:$0xff]  ;;  %v422_v19 = vld [vmem:[%s830_s28 + $0x2c0] sm:$0xff]  ;;  %v351_v41 = vld [vmem:[%s830_s28 + $0x88] sm:$0xff] }
  0x1f   : > { %453 = vmatpush.msra.mxu1 %v390_v8  ;;  %v352_v17 = vld [vmem:[%s830_s28 + $0x90] sm:$0xff]  ;;  %v350_v21 = vld [vmem:[%s830_s28 + $0x80] sm:$0xff]  ;;  %493 = vmatpush.msra.mxu3 %v359_v25  ;;  %v349_v45 = vld [vmem:[%s830_s28 + $0x78] sm:$0xff] }
  0x20   : > { %434 = vmatpush.msra.mxu0 %v356_v9  ;;  %v384_v18 = vld [vmem:[%s830_s28 + $0x190] sm:$0xff]  ;;  %471 = vmatpush.msra.mxu2 %v426_v12  ;;  %v382_v22 = vld [vmem:[%s830_s28 + $0x180] sm:$0xff]  ;;  %v347_v49 = vld [vmem:[%s830_s28 + $0x68] sm:$0xff] }
  0x21   : > { %454 = vmatpush.msra.mxu1 %v388_v10  ;;  %v420_v24 = vld [vmem:[%s830_s28 + $0x2b0] sm:$0xff]  ;;  %v418_v28 = vld [vmem:[%s830_s28 + $0x2a0] sm:$0xff]  ;;  %494 = vmatpush.msra.mxu3 %v357_v29  ;;  %v345_v53 = vld [vmem:[%s830_s28 + $0x58] sm:$0xff] }
  0x22   : > { %435 = vmatpush.msra.mxu0 %v354_v13  ;;  %472 = vmatpush.msra.mxu2 %v424_v15  ;;  %v348_v26 = vld [vmem:[%s830_s28 + $0x70] sm:$0xff]  ;;  %v346_v30 = vld [vmem:[%s830_s28 + $0x60] sm:$0xff]  ;;  %v397_v56 = vld [vmem:[%s830_s28 + $0x1f8] sm:$0xff] }
  0x23   : > { %455 = vmatpush.msra.mxu1 %v386_v14  ;;  %v380_v27 = vld [vmem:[%s830_s28 + $0x170] sm:$0xff]  ;;  %v378_v31 = vld [vmem:[%s830_s28 + $0x160] sm:$0xff]  ;;  %495 = vmatpush.msra.mxu3 %v355_v33  ;;  %v429_v57 = vld [vmem:[%s830_s28 + $0x2f8] sm:$0xff] }
  0x24   : > { %436 = vmatpush.msra.mxu0 %v352_v17  ;;  %473 = vmatpush.msra.mxu2 %v422_v19  ;;  %v416_v32 = vld [vmem:[%s830_s28 + $0x290] sm:$0xff]  ;;  %v414_v36 = vld [vmem:[%s830_s28 + $0x280] sm:$0xff]  ;;  %v343_v59 = vld [vmem:[%s830_s28 + $0x48] sm:$0xff] }
  0x25   : > { %456 = vmatpush.msra.mxu1 %v384_v18  ;;  %v344_v34 = vld [vmem:[%s830_s28 + $0x50] sm:$0xff]  ;;  %v342_v38 = vld [vmem:[%s830_s28 + $0x40] sm:$0xff]  ;;  %496 = vmatpush.msra.mxu3 %v353_v37  ;;  %v395_v60 = vld [vmem:[%s830_s28 + $0x1e8] sm:$0xff] }
  0x26   : > { %437 = vmatpush.msra.mxu0 %v350_v21  ;;  %474 = vmatpush.msra.mxu2 %v420_v24  ;;  %v376_v35 = vld [vmem:[%s830_s28 + $0x150] sm:$0xff]  ;;  %v374_v39 = vld [vmem:[%s830_s28 + $0x140] sm:$0xff]  ;;  %v427_v61 = vld [vmem:[%s830_s28 + $0x2e8] sm:$0xff] }
  0x27   : > { %457 = vmatpush.msra.mxu1 %v382_v22  ;;  %v412_v40 = vld [vmem:[%s830_s28 + $0x270] sm:$0xff]  ;;  %v410_v44 = vld [vmem:[%s830_s28 + $0x260] sm:$0xff]  ;;  %497 = vmatpush.msra.mxu3 %v351_v41  ;;  %v341_v63 = vld [vmem:[%s830_s28 + $0x38] sm:$0xff] }
  0x28   : > { %438 = vmatpush.msra.mxu0 %v348_v26  ;;  %475 = vmatpush.msra.mxu2 %v418_v28  ;;  %v340_v42 = vld [vmem:[%s830_s28 + $0x30] sm:$0xff]  ;;  %v338_v46 = vld [vmem:[%s830_s28 + $0x20] sm:$0xff]  ;;  %v393_v0 = vld [vmem:[%s830_s28 + $0x1d8] sm:$0xff] }
  0x29   : > { %458 = vmatpush.msra.mxu1 %v380_v27  ;;  %v372_v43 = vld [vmem:[%s830_s28 + $0x130] sm:$0xff]  ;;  %v370_v47 = vld [vmem:[%s830_s28 + $0x120] sm:$0xff]  ;;  %498 = vmatpush.msra.mxu3 %v349_v45  ;;  %v425_v1 = vld [vmem:[%s830_s28 + $0x2d8] sm:$0xff] }
  0x2a   : > { %439 = vmatpush.msra.mxu0 %v346_v30  ;;  %476 = vmatpush.msra.mxu2 %v416_v32  ;;  %v408_v48 = vld [vmem:[%s830_s28 + $0x250] sm:$0xff]  ;;  %v406_v52 = vld [vmem:[%s830_s28 + $0x240] sm:$0xff]  ;;  %v339_v3 = vld [vmem:[%s830_s28 + $0x28] sm:$0xff] }
  0x2b   : > { %459 = vmatpush.msra.mxu1 %v378_v31  ;;  %v336_v50 = vld [vmem:[%s830_s28 + $0x10] sm:$0xff]  ;;  %v334_v54 = vld [vmem:[%s830_s28] sm:$0xff]  ;;  %499 = vmatpush.msra.mxu3 %v347_v49  ;;  %v391_v4 = vld [vmem:[%s830_s28 + $0x1c8] sm:$0xff] }
  0x2c   : > { %440 = vmatpush.msra.mxu0 %v344_v34  ;;  %477 = vmatpush.msra.mxu2 %v414_v36  ;;  %v368_v51 = vld [vmem:[%s830_s28 + $0x110] sm:$0xff]  ;;  %v366_v55 = vld [vmem:[%s830_s28 + $0x100] sm:$0xff]  ;;  %v423_v5 = vld [vmem:[%s830_s28 + $0x2c8] sm:$0xff] }
  0x2d   : > { %460 = vmatpush.msra.mxu1 %v376_v35  ;;  %v404_v58 = vld [vmem:[%s830_s28 + $0x230] sm:$0xff]  ;;  %500 = vmatpush.msra.mxu3 %v345_v53  ;;  %v402_v62 = vld [vmem:[%s830_s28 + $0x220] sm:$0xff]  ;;  %v337_v7 = vld [vmem:[%s830_s28 + $0x18] sm:$0xff] }
  0x2e   : > { %441 = vmatpush.msra.mxu0 %v342_v38  ;;  %478 = vmatpush.msra.mxu2 %v412_v40  ;;  %v400_v2 = vld [vmem:[%s830_s28 + $0x210] sm:$0xff]  ;;  %v398_v6 = vld [vmem:[%s830_s28 + $0x200] sm:$0xff]  ;;  %v389_v8 = vld [vmem:[%s830_s28 + $0x1b8] sm:$0xff] }
  0x2f   : > { %461 = vmatpush.msra.mxu1 %v374_v39  ;;  %501 = vmatpush.msra.mxu3 %v343_v59  ;;  %v421_v9 = vld [vmem:[%s830_s28 + $0x2b8] sm:$0xff]  ;;  %v333_v10 = vld [vmem:[%s825_s24 + $0x10] sm:$0xff]  ;;  %v331_v11 = vld [vmem:[%s825_s24] sm:$0xff] }
  0x30   : > { %442 = vmatpush.msra.mxu0 %v340_v42  ;;  %479 = vmatpush.msra.mxu2 %v410_v44  ;;  %v387_v12 = vld [vmem:[%s830_s28 + $0x1a8] sm:$0xff]  ;;  %v385_v16 = vld [vmem:[%s830_s28 + $0x198] sm:$0xff]  ;;  %v329_v39 = vld [vmem:[#allocation2] sm:$0xff] }
  0x31   : > { %462 = vmatpush.msra.mxu1 %v372_v43  ;;  %502 = vmatpush.msra.mxu3 %v341_v63  ;;  %v419_v13 = vld [vmem:[%s830_s28 + $0x2a8] sm:$0xff]  ;;  %v417_v17 = vld [vmem:[%s830_s28 + $0x298] sm:$0xff] }
  0x32   : > { %443 = vmatpush.msra.mxu0 %v338_v46  ;;  %480 = vmatpush.msra.mxu2 %v408_v48  ;;  %v332_v14 = vld [vmem:[%s825_s24 + $0x8] sm:$0xff]  ;;  %v381_v20 = vld [vmem:[%s830_s28 + $0x178] sm:$0xff] }
  0x33   : > { %463 = vmatpush.msra.mxu1 %v370_v47  ;;  %503 = vmatpush.msra.mxu3 %v339_v3  ;;  %v335_v15 = vld [vmem:[%s830_s28 + $0x8] sm:$0xff]  ;;  %v413_v21 = vld [vmem:[%s830_s28 + $0x278] sm:$0xff] }
  0x34   : > { %444 = vmatpush.msra.mxu0 %v336_v50  ;;  %481 = vmatpush.msra.mxu2 %v406_v52  ;;  %v383_v18 = vld [vmem:[%s830_s28 + $0x188] sm:$0xff]  ;;  %v377_v24 = vld [vmem:[%s830_s28 + $0x158] sm:$0xff] }
  0x35   : > { %464 = vmatpush.msra.mxu1 %v368_v51  ;;  %504 = vmatpush.msra.mxu3 %v337_v7  ;;  %v415_v19 = vld [vmem:[%s830_s28 + $0x288] sm:$0xff]  ;;  %v409_v25 = vld [vmem:[%s830_s28 + $0x258] sm:$0xff] }
  0x36   : > { %445 = vmatpush.msra.mxu0 %v334_v54  ;;  %482 = vmatpush.msra.mxu2 %v404_v58  ;;  %v379_v22 = vld [vmem:[%s830_s28 + $0x168] sm:$0xff]  ;;  %v373_v28 = vld [vmem:[%s830_s28 + $0x138] sm:$0xff] }
  0x37   : > { %465 = vmatpush.msra.mxu1 %v366_v55  ;;  %446 = vmatmul.f32.vlgmr.msra.gmra.mxu0 %v331_v11  ;;  %v411_v23 = vld [vmem:[%s830_s28 + $0x268] sm:$0xff]  ;;  %v405_v29 = vld [vmem:[%s830_s28 + $0x238] sm:$0xff] }
  0x38   : > { %510 = vmatpush.msrb.mxu0 %v397_v56  ;;  %483 = vmatpush.msra.mxu2 %v402_v62  ;;  %v375_v26 = vld [vmem:[%s830_s28 + $0x148] sm:$0xff]  ;;  %v369_v32 = vld [vmem:[%s830_s28 + $0x118] sm:$0xff] }
  0x39   : > { %530 = vmatpush.msrb.mxu1 %v429_v57  ;;  %505 = vmatpush.msra.mxu3 %v335_v15  ;;  %v407_v27 = vld [vmem:[%s830_s28 + $0x248] sm:$0xff]  ;;  %v401_v33 = vld [vmem:[%s830_s28 + $0x218] sm:$0xff] }
  0x3a   : > { %511 = vmatpush.msrb.mxu0 %v395_v60  ;;  %484 = vmatpush.msra.mxu2 %v400_v2  ;;  %v371_v30 = vld [vmem:[%s830_s28 + $0x128] sm:$0xff] }
  0x3b   : > { %531 = vmatpush.msrb.mxu1 %v427_v61  ;;  %506 = vmatmul.f32.vlgmr.msra.gmra.mxu3 %v331_v11  ;;  %v403_v31 = vld [vmem:[%s830_s28 + $0x228] sm:$0xff] }
  0x3c   : > { %512 = vmatpush.msrb.mxu0 %v393_v0  ;;  %485 = vmatpush.msra.mxu2 %v398_v6  ;;  %v367_v34 = vld [vmem:[%s830_s28 + $0x108] sm:$0xff] }
  0x3d   : > { %532 = vmatpush.msrb.mxu1 %v425_v1  ;;  %486 = vmatmul.f32.vlgmr.msra.gmra.mxu2 %v333_v10  ;;  %v399_v35 = vld [vmem:[%s830_s28 + $0x208] sm:$0xff] }
  0x3e   : > { %513 = vmatpush.msrb.mxu0 %v391_v4  ;;  %466 = vmatmul.f32.vlgmr.msra.gmra.mxu1 %v332_v14  ;;  %v330_v47 = vld [vmem:[#allocation2 + $0x8] sm:$0xff] }
  0x3f   : > { %533 = vmatpush.msrb.mxu1 %v423_v5 }
  0x40   : > { %514 = vmatpush.msrb.mxu0 %v389_v8 }
  0x41   : > { %534 = vmatpush.msrb.mxu1 %v421_v9 }
  0x42   : > { %515 = vmatpush.msrb.mxu0 %v387_v12 }
  0x43   : > { %535 = vmatpush.msrb.mxu1 %v419_v13 }
  0x44   : > { %516 = vmatpush.msrb.mxu0 %v385_v16 }
  0x45   : > { %536 = vmatpush.msrb.mxu1 %v417_v17 }
  0x46   : > { %517 = vmatpush.msrb.mxu0 %v383_v18 }
  0x47   : > { %537 = vmatpush.msrb.mxu1 %v415_v19 }
  0x48   : > { %518 = vmatpush.msrb.mxu0 %v381_v20 }
  0x49   : > { %538 = vmatpush.msrb.mxu1 %v413_v21 }
  0x4a   : > { %519 = vmatpush.msrb.mxu0 %v379_v22 }
  0x4b   : > { %539 = vmatpush.msrb.mxu1 %v411_v23 }
  0x4c   : > { %520 = vmatpush.msrb.mxu0 %v377_v24 }
  0x4d   : > { %540 = vmatpush.msrb.mxu1 %v409_v25 }
  0x4e   : > { %521 = vmatpush.msrb.mxu0 %v375_v26 }
  0x4f   : > { %541 = vmatpush.msrb.mxu1 %v407_v27 }
  0x50   : > { %522 = vmatpush.msrb.mxu0 %v373_v28 }
  0x51   : > { %542 = vmatpush.msrb.mxu1 %v405_v29 }
  0x52   : > { %523 = vmatpush.msrb.mxu0 %v371_v30 }
  0x53   : > { %543 = vmatpush.msrb.mxu1 %v403_v31 }
  0x54   : > { %524 = vmatpush.msrb.mxu0 %v369_v32 }
  0x55   : > { %544 = vmatpush.msrb.mxu1 %v401_v33 }
  0x56   : > { %525 = vmatpush.msrb.mxu0 %v367_v34 }
  0x57   : > { %545 = vmatpush.msrb.mxu1 %v399_v35  ;;  %526 = vmatmul.f32.vlgmr.msrb.gmra.mxu0 %v332_v14 }
  0x58   : > { %546 = vmatmul.f32.vlgmr.msrb.gmra.mxu1 %v333_v10 }
  0xb4   : > { %v447_v36 = vpop.f32.mrf.mxu0 }
  0xbb   : > { %v467_v37 = vpop.f32.mrf.mxu1 }
  0xbc   : > { %v468_v38 = vadd.f32 %v467_v37, %v447_v36 }
  0xbe   : > { %v507_v43 = vpop.f32.mrf.mxu3 }
  0xc0   : > { %v487_v40 = vpop.f32.mrf.mxu2 }
  0xc1   : > { %v488_v41 = vadd.f32 %v487_v40, %v468_v38 }
  0xc3   : > { %v550_v42 = vadd.f32 %v488_v41, %v329_v39 }
  0xc5   : > { %552 = vst [vmem:[#allocation2] sm:$0xff] %v550_v42 }
  0xd4   : > { %v527_v44 = vpop.f32.mrf.mxu0 }
  0xd5   : > { %v547_v45 = vpop.f32.mrf.mxu1  ;;  %v528_v46 = vadd.f32 %v527_v44, %v507_v43 }
  0xd7   : > { %v548_v48 = vadd.f32 %v547_v45, %v528_v46  ;;  %557 = sbr.rel (%p719_p7) target bundleno = 234 (0xea), region = 44 }
  0xd9   : > { %v551_v49 = vadd.f32 %v548_v48, %v330_v47 }
  0xdb   : > { %553 = vst [vmem:[#allocation2 + $0x8] sm:$0xff] %v551_v49 }
  0xdc   : > { %v558_v50 = vld [vmem:[#allocation2] sm:$0xff] }
  0xdd   : > { %v560_v51 = vld [vmem:[%s956_s2] sm:$0x3] }
  0xde   : > { %v568_v52 = vld [vmem:[%s957_s3] sm:$0x3]  ;;  %v562_v53 = vperm.slane %v560_v51, 0  ;;  %v563_v56 = vperm.slane %v560_v51, 1 }
  0xdf   : > { %v570_v54 = vperm.slane %v568_v52, 0  ;;  %v571_v57 = vperm.slane %v568_v52, 1 }
  0xe0   : > { %v566_v58 = vmul.f32 %v562_v53, %v558_v50 }
  0xe2   : > { %v559_v55 = vld [vmem:[#allocation2 + $0x8] sm:$0xff]  ;;  %v574_v60 = vadd.f32 %v570_v54, %v566_v58 }
  0xe3   : > { %v567_v59 = vmul.f32 %v563_v56, %v559_v55 }
  0xe4   : > { %v576_v62 = vmax.f32 %v574_v60, 0.0 }
  0xe5   : > { %v575_v61 = vadd.f32 %v571_v57, %v567_v59 }
  0xe6   : > { %578 = vst [vmem:[%s958_s4] sm:$0xff] %v576_v62 }
  0xe7   : > { %v577_v63 = vmax.f32 %v575_v61, 0.0 }
  0xe9   : > { %579 = vst [vmem:[%s958_s4 + $0x8] sm:$0xff] %v577_v63 }
  0xea PF: > { %s14_s17 = sadd.s32 1, %s772_s17   ;;  %s959_s15 = smov %s768_s16 }
  0xeb   : > { %p11_p8 = scmp.ge.s32.totalorder %s14_s17, 5   ;;  %s960_s16 = smov %s962_s18 }
  0xed   :  { %13 = sbr.rel (!%p11_p8) target bundleno = 2 (0x2), region = 83 }

// kernel: encoder_forward.33
= control target key start
LH: loop header
LB: loop body
LE: loop exit
PB: predicated region body
PF: predicated region fallthrough
CT: control target
= control target key end

     0   :  { %s265_s1 = inlined_call_operand.vmem [shape: f32[128,256], index: 1, kind: input, shape index: {}]   ;;  %s266_s0 = inlined_call_operand.vmem [shape: f32[8,128], index: 0, kind: input, shape index: {}]   ;;  %s267_s2 = inlined_call_operand.vmem [shape: f32[1,256], index: 2, kind: input, shape index: {}]   ;;  %s268_s3 = inlined_call_operand.vmem [shape: f32[1,256], index: 3, kind: input, shape index: {}]   ;;  %s269_s4 = inlined_call_operand.vmem [shape: f32[8,256], index: 4, kind: output, shape index: {}]  }
   0x1   :  { %v56_v0 = vld [vmem:[%s265_s1 + $0xf0] sm:$0xff]  ;;  %v57_v1 = vld [vmem:[%s265_s1 + $0xf8] sm:$0xff]  ;;  %v54_v2 = vld [vmem:[%s265_s1 + $0xe0] sm:$0xff] }
   0x2   :  { %58 = vmatpush.msra.mxu0 %v56_v0  ;;  %78 = vmatpush.msra.mxu1 %v57_v1  ;;  %v55_v3 = vld [vmem:[%s265_s1 + $0xe8] sm:$0xff]  ;;  %v52_v4 = vld [vmem:[%s265_s1 + $0xd0] sm:$0xff]  ;;  %v53_v5 = vld [vmem:[%s265_s1 + $0xd8] sm:$0xff] }
   0x3   :  { %v50_v6 = vld [vmem:[%s265_s1 + $0xc0] sm:$0xff]  ;;  %v51_v7 = vld [vmem:[%s265_s1 + $0xc8] sm:$0xff]  ;;  %v48_v8 = vld [vmem:[%s265_s1 + $0xb0] sm:$0xff] }
   0x4   :  { %59 = vmatpush.msra.mxu0 %v54_v2  ;;  %79 = vmatpush.msra.mxu1 %v55_v3  ;;  %v49_v9 = vld [vmem:[%s265_s1 + $0xb8] sm:$0xff]  ;;  %v46_v10 = vld [vmem:[%s265_s1 + $0xa0] sm:$0xff]  ;;  %v47_v11 = vld [vmem:[%s265_s1 + $0xa8] sm:$0xff] }
   0x5   :  { %v44_v12 = vld [vmem:[%s265_s1 + $0x90] sm:$0xff]  ;;  %v45_v13 = vld [vmem:[%s265_s1 + $0x98] sm:$0xff]  ;;  %v42_v14 = vld [vmem:[%s265_s1 + $0x80] sm:$0xff] }
   0x6   :  { %60 = vmatpush.msra.mxu0 %v52_v4  ;;  %80 = vmatpush.msra.mxu1 %v53_v5  ;;  %v43_v15 = vld [vmem:[%s265_s1 + $0x88] sm:$0xff]  ;;  %v40_v16 = vld [vmem:[%s265_s1 + $0x70] sm:$0xff]  ;;  %v41_v17 = vld [vmem:[%s265_s1 + $0x78] sm:$0xff] }
   0x7   :  { %v38_v18 = vld [vmem:[%s265_s1 + $0x60] sm:$0xff]  ;;  %v39_v19 = vld [vmem:[%s265_s1 + $0x68] sm:$0xff]  ;;  %v36_v20 = vld [vmem:[%s265_s1 + $0x50] sm:$0xff] }
   0x8   :  { %61 = vmatpush.msra.mxu0 %v50_v6  ;;  %81 = vmatpush.msra.mxu1 %v51_v7  ;;  %v37_v21 = vld [vmem:[%s265_s1 + $0x58] sm:$0xff]  ;;  %v34_v22 = vld [vmem:[%s265_s1 + $0x40] sm:$0xff]  ;;  %v35_v23 = vld [vmem:[%s265_s1 + $0x48] sm:$0xff] }
   0x9   :  { %v32_v24 = vld [vmem:[%s265_s1 + $0x30] sm:$0xff]  ;;  %v33_v25 = vld [vmem:[%s265_s1 + $0x38] sm:$0xff]  ;;  %v30_v26 = vld [vmem:[%s265_s1 + $0x20] sm:$0xff] }
   0xa   :  { %62 = vmatpush.msra.mxu0 %v48_v8  ;;  %82 = vmatpush.msra.mxu1 %v49_v9  ;;  %v31_v27 = vld [vmem:[%s265_s1 + $0x28] sm:$0xff]  ;;  %v28_v28 = vld [vmem:[%s265_s1 + $0x10] sm:$0xff]  ;;  %v29_v29 = vld [vmem:[%s265_s1 + $0x18] sm:$0xff] }
   0xb   :  { %v26_v30 = vld [vmem:[%s265_s1] sm:$0xff]  ;;  %v27_v31 = vld [vmem:[%s265_s1 + $0x8] sm:$0xff] }
   0xc   :  { %63 = vmatpush.msra.mxu0 %v46_v10  ;;  %83 = vmatpush.msra.mxu1 %v47_v11  ;;  %v25_v32 = vld [vmem:[%s266_s0] sm:$0xff] }
   0xd   :  { %v107_v33 = vld [vmem:[%s267_s2] sm:$0x3] }
   0xe   :  { %64 = vmatpush.msra.mxu0 %v44_v12  ;;  %84 = vmatpush.msra.mxu1 %v45_v13  ;;  %v115_v34 = vld [vmem:[%s268_s3] sm:$0x3]  ;;  %v109_v35 = vperm.slane %v107_v33, 0  ;;  %v110_v36 = vperm.slane %v107_v33, 1 }
   0xf   :  { %v117_v37 = vperm.slane %v115_v34, 0  ;;  %v118_v38 = vperm.slane %v115_v34, 1 }
  0x10   :  { %65 = vmatpush.msra.mxu0 %v42_v14  ;;  %85 = vmatpush.msra.mxu1 %v43_v15 }
  0x12   :  { %66 = vmatpush.msra.mxu0 %v40_v16  ;;  %86 = vmatpush.msra.mxu1 %v41_v17 }
  0x14   :  { %67 = vmatpush.msra.mxu0 %v38_v18  ;;  %87 = vmatpush.msra.mxu1 %v39_v19 }
  0x16   :  { %68 = vmatpush.msra.mxu0 %v36_v20  ;;  %88 = vmatpush.msra.mxu1 %v37_v21 }
  0x18   :  { %69 = vmatpush.msra.mxu0 %v34_v22  ;;  %89 = vmatpush.msra.mxu1 %v35_v23 }
  0x1a   :  { %70 = vmatpush.msra.mxu0 %v32_v24  ;;  %90 = vmatpush.msra.mxu1 %v33_v25 }
  0x1c   :  { %71 = vmatpush.msra.mxu0 %v30_v26  ;;  %91 = vmatpush.msra.mxu1 %v31_v27 }
  0x1e   :  { %72 = vmatpush.msra.mxu0 %v28_v28  ;;  %92 = vmatpush.msra.mxu1 %v29_v29 }
  0x20   :  { %73 = vmatpush.msra.mxu0 %v26_v30  ;;  %93 = vmatpush.msra.mxu1 %v27_v31 }
  0x21   :  { %74 = vmatmul.f32.vlgmr.msra.gmra.mxu0 %v25_v32  ;;  %94 = vmatmul.f32.vlgmr.msra.gmra.mxu1 %v25_v32 }
  0x9e   :  { %v75_v39 = vpop.f32.mrf.mxu0  ;;  %v95_v40 = vpop.f32.mrf.mxu1 }
  0x9f   :  { %v113_v41 = vmul.f32 %v109_v35, %v75_v39  ;;  %v114_v42 = vmul.f32 %v110_v36, %v95_v40 }
  0xa1   :  { %v121_v43 = vadd.f32 %v117_v37, %v113_v41  ;;  %v122_v44 = vadd.f32 %v118_v38, %v114_v42 }
  0xa3   :  { %123 = vst [vmem:[%s269_s4] sm:$0xff] %v121_v43 }
  0xa4   :  { %124 = vst [vmem:[%s269_s4 + $0x8] sm:$0xff] %v122_v44 }

// kernel: encoder_forward.34
= control target key start
LH: loop header
LB: loop body
LE: loop exit
PB: predicated region body
PF: predicated region fallthrough
CT: control target
= control target key end

     0   :  { %s1113_s18 = smov 0   ;;  %s1115_s19 = smov 0   ;;  %s1396_s0 = inlined_call_operand.vmem [shape: f32[8,2304], index: 0, kind: input, shape index: {}]   ;;  %s1397_s1 = inlined_call_operand.vmem [shape: f32[2304,256], index: 1, kind: input, shape index: {}]   ;;  %s1398_s2 = inlined_call_operand.vmem [shape: f32[1,256], index: 2, kind: input, shape index: {}]   ;;  %s1399_s3 = inlined_call_operand.vmem [shape: f32[1,256], index: 3, kind: input, shape index: {}]   ;;  %s1400_s4 = inlined_call_operand.vmem [shape: f32[8,256], index: 4, kind: input, shape index: {}]   ;;  %s1401_s5 = inlined_call_operand.vmem [shape: f32[8,256], index: 5, kind: output, shape index: {}]  }
   0x1   :  { %s1117_s20 = smov 0  }
   0x2 LB: > { %s27_s21 = sadd.s32 1, %s1076_s19  ;;  %p1022_p0 = scmp.ge.s32.totalorder %s1080_s20, 1  ;;  %s1080_s20 = sphi %s1117_s20, %s15_s20   ;;  %s1076_s19 = sphi %s1115_s19, %s1403_s19   ;;  %s1072_s18 = sphi %s1113_s18, %s1402_s18  }
   0x3   : > { %p28_p1 = scmp.ge.s32.totalorder %s27_s21, 3  ;;  %p271_p2 = scmp.lt.s32.totalorder %s1080_s20, 4 }
   0x5   : > { %s1405_s21 = smov (%p28_p1, %s27_s21), 0  ;;  %p272_p3 = pnand %p1022_p0, %p271_p2 }
   0x6   : > { %s334_s22 = smul.u32 (!%p272_p3), 6, %s1072_s18  ;;  %p1026_p6 = scmp.ne.s32.totalorder (!%p272_p3), %s1072_s18, 0 }
   0x7   : > { %275 = sbr.rel (%p272_p3) target bundleno = 279 (0x117), region = 40 }
   0x8   : > { %s344_s23 = smul.u32 (!%p272_p3), 96, %s1072_s18  ;;  %p337_p4 = scmp.lt.s32.totalorder (!%p272_p3), %s334_s22, 17 }
   0xa   : > { %p346_p5 = scmp.lt.s32.totalorder (!%p272_p3), %s344_s23, 287 }
   0xc   : > { %s1407_s22 = smov (!%p337_p4, %s334_s22), 17  ;;  %s1409_s23 = smov (!%p346_p5, %s344_s23), 287 }
   0xd   : > { %s1023_s24 = sshll.u32 %s1407_s22, 3  ;;  %s1032_s28 = sshll.u32 %s1409_s23, 4 }
   0xe   : > { %s1138_s27 = scalar_lea.vmem %s1396_s0, %s1023_s24  ;;  %s1143_s6 = scalar_lea.vmem %s1397_s1, %s1032_s28 }
   0xf   : > { %389 = sbr.rel (%p1026_p6) target bundleno = 23 (0x17), region = 44 }
  0x14   : > { %v1082_v0 = vmov 0.0  }
  0x15   : > { %390 = vst [vmem:[#allocation2] sm:$0xff] %v1082_v0 }
  0x16   : > { %391 = vst [vmem:[#allocation2 + $0x8] sm:$0xff] %v1082_v0 }
  0x17 PF: > { %v430_v1 = vld [vmem:[%s1143_s6 + $0xf0] sm:$0xff]  ;;  %v428_v3 = vld [vmem:[%s1143_s6 + $0xe0] sm:$0xff]  ;;  %v431_v0 = vld [vmem:[%s1143_s6 + $0xf8] sm:$0xff]  ;;  %p1027_p7 = scmp.ne.s32.totalorder %s1072_s18, 2 }
  0x18   : > { %v494_v2 = vld [vmem:[%s1143_s6 + $0x2f0] sm:$0xff]  ;;  %592 = vmatpush.msra.mxu0 %v430_v1  ;;  %v492_v5 = vld [vmem:[%s1143_s6 + $0x2e0] sm:$0xff] }
  0x19   : > { %632 = vmatpush.msra.mxu2 %v494_v2  ;;  %v462_v4 = vld [vmem:[%s1143_s6 + $0x1f0] sm:$0xff]  ;;  %v460_v8 = vld [vmem:[%s1143_s6 + $0x1e0] sm:$0xff] }
  0x1a   : > { %v526_v6 = vld [vmem:[%s1143_s6 + $0x3f0] sm:$0xff]  ;;  %612 = vmatpush.msra.mxu1 %v462_v4  ;;  %593 = vmatpush.msra.mxu0 %v428_v3  ;;  %v524_v10 = vld [vmem:[%s1143_s6 + $0x3e0] sm:$0xff] }
  0x1b   : > { %652 = vmatpush.msra.mxu3 %v526_v6  ;;  %v426_v7 = vld [vmem:[%s1143_s6 + $0xd0] sm:$0xff]  ;;  %633 = vmatpush.msra.mxu2 %v492_v5  ;;  %v424_v12 = vld [vmem:[%s1143_s6 + $0xc0] sm:$0xff]  ;;  %v429_v5 = vld [vmem:[%s1143_s6 + $0xe8] sm:$0xff] }
  0x1c   : > { %v490_v9 = vld [vmem:[%s1143_s6 + $0x2d0] sm:$0xff]  ;;  %613 = vmatpush.msra.mxu1 %v460_v8  ;;  %v488_v13 = vld [vmem:[%s1143_s6 + $0x2c0] sm:$0xff]  ;;  %594 = vmatpush.msra.mxu0 %v426_v7  ;;  %v463_v6 = vld [vmem:[%s1143_s6 + $0x1f8] sm:$0xff] }
  0x1d   : > { %v458_v11 = vld [vmem:[%s1143_s6 + $0x1d0] sm:$0xff]  ;;  %653 = vmatpush.msra.mxu3 %v524_v10  ;;  %634 = vmatpush.msra.mxu2 %v490_v9  ;;  %v456_v15 = vld [vmem:[%s1143_s6 + $0x1c0] sm:$0xff]  ;;  %v427_v9 = vld [vmem:[%s1143_s6 + $0xd8] sm:$0xff] }
  0x1e   : > { %v522_v14 = vld [vmem:[%s1143_s6 + $0x3d0] sm:$0xff]  ;;  %v520_v16 = vld [vmem:[%s1143_s6 + $0x3c0] sm:$0xff]  ;;  %614 = vmatpush.msra.mxu1 %v458_v11  ;;  %595 = vmatpush.msra.mxu0 %v424_v12  ;;  %v461_v10 = vld [vmem:[%s1143_s6 + $0x1e8] sm:$0xff] }
  0x1f   : > { %654 = vmatpush.msra.mxu3 %v522_v14  ;;  %v422_v17 = vld [vmem:[%s1143_s6 + $0xb0] sm:$0xff]  ;;  %635 = vmatpush.msra.mxu2 %v488_v13  ;;  %v420_v21 = vld [vmem:[%s1143_s6 + $0xa0] sm:$0xff]  ;;  %v425_v13 = vld [vmem:[%s1143_s6 + $0xc8] sm:$0xff] }
  0x20   : > { %v486_v18 = vld [vmem:[%s1143_s6 + $0x2b0] sm:$0xff]  ;;  %615 = vmatpush.msra.mxu1 %v456_v15  ;;  %v484_v22 = vld [vmem:[%s1143_s6 + $0x2a0] sm:$0xff]  ;;  %596 = vmatpush.msra.mxu0 %v422_v17  ;;  %v459_v14 = vld [vmem:[%s1143_s6 + $0x1d8] sm:$0xff] }
  0x21   : > { %v454_v19 = vld [vmem:[%s1143_s6 + $0x1b0] sm:$0xff]  ;;  %655 = vmatpush.msra.mxu3 %v520_v16  ;;  %636 = vmatpush.msra.mxu2 %v486_v18  ;;  %v452_v23 = vld [vmem:[%s1143_s6 + $0x1a0] sm:$0xff]  ;;  %v423_v17 = vld [vmem:[%s1143_s6 + $0xb8] sm:$0xff] }
  0x22   : > { %v518_v20 = vld [vmem:[%s1143_s6 + $0x3b0] sm:$0xff]  ;;  %v516_v24 = vld [vmem:[%s1143_s6 + $0x3a0] sm:$0xff]  ;;  %616 = vmatpush.msra.mxu1 %v454_v19  ;;  %597 = vmatpush.msra.mxu0 %v420_v21  ;;  %v457_v18 = vld [vmem:[%s1143_s6 + $0x1c8] sm:$0xff] }
  0x23   : > { %656 = vmatpush.msra.mxu3 %v518_v20  ;;  %v418_v25 = vld [vmem:[%s1143_s6 + $0x90] sm:$0xff]  ;;  %637 = vmatpush.msra.mxu2 %v484_v22  ;;  %v416_v29 = vld [vmem:[%s1143_s6 + $0x80] sm:$0xff]  ;;  %v421_v21 = vld [vmem:[%s1143_s6 + $0xa8] sm:$0xff] }
  0x24   : > { %v482_v26 = vld [vmem:[%s1143_s6 + $0x290] sm:$0xff]  ;;  %617 = vmatpush.msra.mxu1 %v452_v23  ;;  %v480_v30 = vld [vmem:[%s1143_s6 + $0x280] sm:$0xff]  ;;  %598 = vmatpush.msra.mxu0 %v418_v25  ;;  %v455_v22 = vld [vmem:[%s1143_s6 + $0x1b8] sm:$0xff] }
  0x25   : > { %v450_v27 = vld [vmem:[%s1143_s6 + $0x190] sm:$0xff]  ;;  %657 = vmatpush.msra.mxu3 %v516_v24  ;;  %638 = vmatpush.msra.mxu2 %v482_v26  ;;  %v448_v31 = vld [vmem:[%s1143_s6 + $0x180] sm:$0xff]  ;;  %v419_v25 = vld [vmem:[%s1143_s6 + $0x98] sm:$0xff] }
  0x26   : > { %v514_v28 = vld [vmem:[%s1143_s6 + $0x390] sm:$0xff]  ;;  %v512_v32 = vld [vmem:[%s1143_s6 + $0x380] sm:$0xff]  ;;  %618 = vmatpush.msra.mxu1 %v450_v27  ;;  %599 = vmatpush.msra.mxu0 %v416_v29  ;;  %v453_v26 = vld [vmem:[%s1143_s6 + $0x1a8] sm:$0xff] }
  0x27   : > { %658 = vmatpush.msra.mxu3 %v514_v28  ;;  %v414_v33 = vld [vmem:[%s1143_s6 + $0x70] sm:$0xff]  ;;  %639 = vmatpush.msra.mxu2 %v480_v30  ;;  %v412_v37 = vld [vmem:[%s1143_s6 + $0x60] sm:$0xff]  ;;  %v417_v29 = vld [vmem:[%s1143_s6 + $0x88] sm:$0xff] }
  0x28   : > { %v478_v34 = vld [vmem:[%s1143_s6 + $0x270] sm:$0xff]  ;;  %619 = vmatpush.msra.mxu1 %v448_v31  ;;  %v476_v38 = vld [vmem:[%s1143_s6 + $0x260] sm:$0xff]  ;;  %600 = vmatpush.msra.mxu0 %v414_v33  ;;  %v451_v30 = vld [vmem:[%s1143_s6 + $0x198] sm:$0xff] }
  0x29   : > { %v446_v35 = vld [vmem:[%s1143_s6 + $0x170] sm:$0xff]  ;;  %659 = vmatpush.msra.mxu3 %v512_v32  ;;  %640 = vmatpush.msra.mxu2 %v478_v34  ;;  %v444_v39 = vld [vmem:[%s1143_s6 + $0x160] sm:$0xff]  ;;  %v415_v33 = vld [vmem:[%s1143_s6 + $0x78] sm:$0xff] }
  0x2a   : > { %v510_v36 = vld [vmem:[%s1143_s6 + $0x370] sm:$0xff]  ;;  %v508_v40 = vld [vmem:[%s1143_s6 + $0x360] sm:$0xff]  ;;  %620 = vmatpush.msra.mxu1 %v446_v35  ;;  %601 = vmatpush.msra.mxu0 %v412_v37  ;;  %v449_v34 = vld [vmem:[%s1143_s6 + $0x188] sm:$0xff] }
  0x2b   : > { %660 = vmatpush.msra.mxu3 %v510_v36  ;;  %v410_v41 = vld [vmem:[%s1143_s6 + $0x50] sm:$0xff]  ;;  %641 = vmatpush.msra.mxu2 %v476_v38  ;;  %v408_v45 = vld [vmem:[%s1143_s6 + $0x40] sm:$0xff]  ;;  %v413_v37 = vld [vmem:[%s1143_s6 + $0x68] sm:$0xff] }
  0x2c   : > { %v474_v42 = vld [vmem:[%s1143_s6 + $0x250] sm:$0xff]  ;;  %621 = vmatpush.msra.mxu1 %v444_v39  ;;  %v472_v46 = vld [vmem:[%s1143_s6 + $0x240] sm:$0xff]  ;;  %602 = vmatpush.msra.mxu0 %v410_v41  ;;  %v447_v38 = vld [vmem:[%s1143_s6 + $0x178] sm:$0xff] }
  0x2d   : > { %v442_v43 = vld [vmem:[%s1143_s6 + $0x150] sm:$0xff]  ;;  %661 = vmatpush.msra.mxu3 %v508_v40  ;;  %642 = vmatpush.msra.mxu2 %v474_v42  ;;  %v440_v47 = vld [vmem:[%s1143_s6 + $0x140] sm:$0xff]  ;;  %v411_v41 = vld [vmem:[%s1143_s6 + $0x58] sm:$0xff] }
  0x2e   : > { %v506_v44 = vld [vmem:[%s1143_s6 + $0x350] sm:$0xff]  ;;  %v504_v48 = vld [vmem:[%s1143_s6 + $0x340] sm:$0xff]  ;;  %622 = vmatpush.msra.mxu1 %v442_v43  ;;  %603 = vmatpush.msra.mxu0 %v408_v45  ;;  %v445_v42 = vld [vmem:[%s1143_s6 + $0x168] sm:$0xff] }
  0x2f   : > { %662 = vmatpush.msra.mxu3 %v506_v44  ;;  %v406_v49 = vld [vmem:[%s1143_s6 + $0x30] sm:$0xff]  ;;  %643 = vmatpush.msra.mxu2 %v472_v46  ;;  %v404_v53 = vld [vmem:[%s1143_s6 + $0x20] sm:$0xff]  ;;  %v409_v45 = vld [vmem:[%s1143_s6 + $0x48] sm:$0xff] }
  0x30   : > { %v470_v50 = vld [vmem:[%s1143_s6 + $0x230] sm:$0xff]  ;;  %623 = vmatpush.msra.mxu1 %v440_v47  ;;  %v468_v54 = vld [vmem:[%s1143_s6 + $0x220] sm:$0xff]  ;;  %604 = vmatpush.msra.mxu0 %v406_v49  ;;  %v443_v46 = vld [vmem:[%s1143_s6 + $0x158] sm:$0xff] }
  0x31   : > { %v438_v51 = vld [vmem:[%s1143_s6 + $0x130] sm:$0xff]  ;;  %663 = vmatpush.msra.mxu3 %v504_v48  ;;  %644 = vmatpush.msra.mxu2 %v470_v50  ;;  %v436_v55 = vld [vmem:[%s1143_s6 + $0x120] sm:$0xff]  ;;  %v407_v49 = vld [vmem:[%s1143_s6 + $0x38] sm:$0xff] }
  0x32   : > { %v502_v52 = vld [vmem:[%s1143_s6 + $0x330] sm:$0xff]  ;;  %v500_v56 = vld [vmem:[%s1143_s6 + $0x320] sm:$0xff]  ;;  %624 = vmatpush.msra.mxu1 %v438_v51  ;;  %605 = vmatpush.msra.mxu0 %v404_v53  ;;  %v441_v50 = vld [vmem:[%s1143_s6 + $0x148] sm:$0xff] }
  0x33   : > { %664 = vmatpush.msra.mxu3 %v502_v52  ;;  %v402_v57 = vld [vmem:[%s1143_s6 + $0x10] sm:$0xff]  ;;  %645 = vmatpush.msra.mxu2 %v468_v54  ;;  %v400_v61 = vld [vmem:[%s1143_s6] sm:$0xff]  ;;  %v405_v53 = vld [vmem:[%s1143_s6 + $0x28] sm:$0xff] }
  0x34   : > { %v466_v58 = vld [vmem:[%s1143_s6 + $0x210] sm:$0xff]  ;;  %625 = vmatpush.msra.mxu1 %v436_v55  ;;  %v464_v62 = vld [vmem:[%s1143_s6 + $0x200] sm:$0xff]  ;;  %606 = vmatpush.msra.mxu0 %v402_v57  ;;  %v439_v54 = vld [vmem:[%s1143_s6 + $0x138] sm:$0xff] }
  0x35   : > { %v434_v59 = vld [vmem:[%s1143_s6 + $0x110] sm:$0xff]  ;;  %665 = vmatpush.msra.mxu3 %v500_v56  ;;  %646 = vmatpush.msra.mxu2 %v466_v58  ;;  %v432_v1 = vld [vmem:[%s1143_s6 + $0x100] sm:$0xff]  ;;  %v403_v57 = vld [vmem:[%s1143_s6 + $0x18] sm:$0xff] }
  0x36   : > { %v498_v60 = vld [vmem:[%s1143_s6 + $0x310] sm:$0xff]  ;;  %626 = vmatpush.msra.mxu1 %v434_v59  ;;  %v496_v2 = vld [vmem:[%s1143_s6 + $0x300] sm:$0xff]  ;;  %607 = vmatpush.msra.mxu0 %v400_v61  ;;  %v437_v58 = vld [vmem:[%s1143_s6 + $0x128] sm:$0xff] }
  0x37   : > { %v558_v63 = vld [vmem:[%s1143_s6 + $0x4f0] sm:$0xff]  ;;  %666 = vmatpush.msra.mxu3 %v498_v60  ;;  %647 = vmatpush.msra.mxu2 %v464_v62  ;;  %v556_v3 = vld [vmem:[%s1143_s6 + $0x4e0] sm:$0xff]  ;;  %v401_v62 = vld [vmem:[%s1143_s6 + $0x8] sm:$0xff] }
  0x38   : > { %v590_v4 = vld [vmem:[%s1143_s6 + $0x5f0] sm:$0xff]  ;;  %672 = vmatpush.msrb.mxu0 %v558_v63  ;;  %627 = vmatpush.msra.mxu1 %v432_v1  ;;  %v588_v8 = vld [vmem:[%s1143_s6 + $0x5e0] sm:$0xff]  ;;  %v435_v63 = vld [vmem:[%s1143_s6 + $0x118] sm:$0xff] }
  0x39   : > { %712 = vmatpush.msrb.mxu2 %v431_v0  ;;  %667 = vmatpush.msra.mxu3 %v496_v2  ;;  %v554_v7 = vld [vmem:[%s1143_s6 + $0x4d0] sm:$0xff]  ;;  %v552_v11 = vld [vmem:[%s1143_s6 + $0x4c0] sm:$0xff]  ;;  %v1280_v1 = vld [vmem:[%s1138_s27 + $0x18] sm:$0xff] }
  0x3a   : > { %673 = vmatpush.msrb.mxu0 %v556_v3  ;;  %692 = vmatpush.msrb.mxu1 %v590_v4  ;;  %v586_v12 = vld [vmem:[%s1143_s6 + $0x5d0] sm:$0xff]  ;;  %v584_v16 = vld [vmem:[%s1143_s6 + $0x5c0] sm:$0xff]  ;;  %v495_v2 = vld [vmem:[%s1143_s6 + $0x2f8] sm:$0xff] }
  0x3b   : > { %713 = vmatpush.msrb.mxu2 %v429_v5  ;;  %732 = vmatpush.msrb.mxu3 %v463_v6  ;;  %v550_v15 = vld [vmem:[%s1143_s6 + $0x4b0] sm:$0xff]  ;;  %v548_v19 = vld [vmem:[%s1143_s6 + $0x4a0] sm:$0xff]  ;;  %v559_v3 = vld [vmem:[%s1143_s6 + $0x4f8] sm:$0xff] }
  0x3c   : > { %674 = vmatpush.msrb.mxu0 %v554_v7  ;;  %693 = vmatpush.msrb.mxu1 %v588_v8  ;;  %v582_v20 = vld [vmem:[%s1143_s6 + $0x5b0] sm:$0xff]  ;;  %v580_v24 = vld [vmem:[%s1143_s6 + $0x5a0] sm:$0xff]  ;;  %v433_v5 = vld [vmem:[%s1143_s6 + $0x108] sm:$0xff] }
  0x3d   : > { %714 = vmatpush.msrb.mxu2 %v427_v9  ;;  %733 = vmatpush.msrb.mxu3 %v461_v10  ;;  %v546_v23 = vld [vmem:[%s1143_s6 + $0x490] sm:$0xff]  ;;  %v544_v27 = vld [vmem:[%s1143_s6 + $0x480] sm:$0xff]  ;;  %v1288_v6 = vld [vmem:[%s1138_s27 + $0x8] sm:$0xff] }
  0x3e   : > { %675 = vmatpush.msrb.mxu0 %v552_v11  ;;  %694 = vmatpush.msrb.mxu1 %v586_v12  ;;  %v578_v28 = vld [vmem:[%s1143_s6 + $0x590] sm:$0xff]  ;;  %v576_v32 = vld [vmem:[%s1143_s6 + $0x580] sm:$0xff]  ;;  %v493_v7 = vld [vmem:[%s1143_s6 + $0x2e8] sm:$0xff] }
  0x3f   : > { %715 = vmatpush.msrb.mxu2 %v425_v13  ;;  %734 = vmatpush.msrb.mxu3 %v459_v14  ;;  %v542_v31 = vld [vmem:[%s1143_s6 + $0x470] sm:$0xff]  ;;  %v540_v35 = vld [vmem:[%s1143_s6 + $0x460] sm:$0xff]  ;;  %v527_v8 = vld [vmem:[%s1143_s6 + $0x3f8] sm:$0xff] }
  0x40   : > { %676 = vmatpush.msrb.mxu0 %v550_v15  ;;  %695 = vmatpush.msrb.mxu1 %v584_v16  ;;  %v574_v36 = vld [vmem:[%s1143_s6 + $0x570] sm:$0xff]  ;;  %v572_v40 = vld [vmem:[%s1143_s6 + $0x560] sm:$0xff]  ;;  %v557_v9 = vld [vmem:[%s1143_s6 + $0x4e8] sm:$0xff] }
  0x41   : > { %716 = vmatpush.msrb.mxu2 %v423_v17  ;;  %735 = vmatpush.msrb.mxu3 %v457_v18  ;;  %v538_v39 = vld [vmem:[%s1143_s6 + $0x450] sm:$0xff]  ;;  %v536_v43 = vld [vmem:[%s1143_s6 + $0x440] sm:$0xff]  ;;  %v591_v10 = vld [vmem:[%s1143_s6 + $0x5f8] sm:$0xff] }
  0x42   : > { %677 = vmatpush.msrb.mxu0 %v548_v19  ;;  %696 = vmatpush.msrb.mxu1 %v582_v20  ;;  %v570_v44 = vld [vmem:[%s1143_s6 + $0x550] sm:$0xff]  ;;  %v568_v48 = vld [vmem:[%s1143_s6 + $0x540] sm:$0xff]  ;;  %v491_v11 = vld [vmem:[%s1143_s6 + $0x2d8] sm:$0xff] }
  0x43   : > { %717 = vmatpush.msrb.mxu2 %v421_v21  ;;  %736 = vmatpush.msrb.mxu3 %v455_v22  ;;  %v534_v47 = vld [vmem:[%s1143_s6 + $0x430] sm:$0xff]  ;;  %v532_v51 = vld [vmem:[%s1143_s6 + $0x420] sm:$0xff]  ;;  %v525_v12 = vld [vmem:[%s1143_s6 + $0x3e8] sm:$0xff] }
  0x44   : > { %678 = vmatpush.msrb.mxu0 %v546_v23  ;;  %697 = vmatpush.msrb.mxu1 %v580_v24  ;;  %v566_v52 = vld [vmem:[%s1143_s6 + $0x530] sm:$0xff]  ;;  %v564_v56 = vld [vmem:[%s1143_s6 + $0x520] sm:$0xff]  ;;  %v555_v13 = vld [vmem:[%s1143_s6 + $0x4d8] sm:$0xff] }
  0x45   : > { %718 = vmatpush.msrb.mxu2 %v419_v25  ;;  %737 = vmatpush.msrb.mxu3 %v453_v26  ;;  %v530_v55 = vld [vmem:[%s1143_s6 + $0x410] sm:$0xff]  ;;  %v528_v60 = vld [vmem:[%s1143_s6 + $0x400] sm:$0xff]  ;;  %v589_v14 = vld [vmem:[%s1143_s6 + $0x5e8] sm:$0xff] }
  0x46   : > { %679 = vmatpush.msrb.mxu0 %v544_v27  ;;  %698 = vmatpush.msrb.mxu1 %v578_v28  ;;  %v1269_v59 = vld [vmem:[%s1138_s27 + $0x10] sm:$0xff]  ;;  %v1276_v0 = vld [vmem:[%s1138_s27] sm:$0xff]  ;;  %v489_v15 = vld [vmem:[%s1143_s6 + $0x2c8] sm:$0xff] }
  0x47   : > { %719 = vmatpush.msrb.mxu2 %v417_v29  ;;  %738 = vmatpush.msrb.mxu3 %v451_v30  ;;  %v562_v61 = vld [vmem:[%s1143_s6 + $0x510] sm:$0xff]  ;;  %v560_v4 = vld [vmem:[%s1143_s6 + $0x500] sm:$0xff]  ;;  %v523_v16 = vld [vmem:[%s1143_s6 + $0x3d8] sm:$0xff] }
  0x48   : > { %680 = vmatpush.msrb.mxu0 %v542_v31  ;;  %699 = vmatpush.msrb.mxu1 %v576_v32  ;;  %v553_v17 = vld [vmem:[%s1143_s6 + $0x4c8] sm:$0xff]  ;;  %v587_v18 = vld [vmem:[%s1143_s6 + $0x5d8] sm:$0xff]  ;;  %v1305_v19 = vld [vmem:[%s1138_s27 + $0x20] sm:$0xff] }
  0x49   : > { %720 = vmatpush.msrb.mxu2 %v415_v33  ;;  %739 = vmatpush.msrb.mxu3 %v449_v34  ;;  %v521_v20 = vld [vmem:[%s1143_s6 + $0x3c8] sm:$0xff]  ;;  %v487_v21 = vld [vmem:[%s1143_s6 + $0x2b8] sm:$0xff] }
  0x4a   : > { %681 = vmatpush.msrb.mxu0 %v540_v35  ;;  %700 = vmatpush.msrb.mxu1 %v574_v36  ;;  %v551_v22 = vld [vmem:[%s1143_s6 + $0x4b8] sm:$0xff]  ;;  %v585_v23 = vld [vmem:[%s1143_s6 + $0x5c8] sm:$0xff] }
  0x4b   : > { %721 = vmatpush.msrb.mxu2 %v413_v37  ;;  %740 = vmatpush.msrb.mxu3 %v447_v38  ;;  %v1312_v24 = vld [vmem:[%s1138_s27 + $0x28] sm:$0xff]  ;;  %v519_v26 = vld [vmem:[%s1143_s6 + $0x3b8] sm:$0xff] }
  0x4c   : > { %682 = vmatpush.msrb.mxu0 %v538_v39  ;;  %701 = vmatpush.msrb.mxu1 %v572_v40  ;;  %v485_v25 = vld [vmem:[%s1143_s6 + $0x2a8] sm:$0xff]  ;;  %v583_v28 = vld [vmem:[%s1143_s6 + $0x5b8] sm:$0xff] }
  0x4d   : > { %722 = vmatpush.msrb.mxu2 %v411_v41  ;;  %741 = vmatpush.msrb.mxu3 %v445_v42  ;;  %v549_v27 = vld [vmem:[%s1143_s6 + $0x4a8] sm:$0xff]  ;;  %v483_v29 = vld [vmem:[%s1143_s6 + $0x298] sm:$0xff] }
  0x4e   : > { %683 = vmatpush.msrb.mxu0 %v536_v43  ;;  %702 = vmatpush.msrb.mxu1 %v570_v44  ;;  %v517_v30 = vld [vmem:[%s1143_s6 + $0x3a8] sm:$0xff]  ;;  %v547_v31 = vld [vmem:[%s1143_s6 + $0x498] sm:$0xff] }
  0x4f   : > { %723 = vmatpush.msrb.mxu2 %v409_v45  ;;  %742 = vmatpush.msrb.mxu3 %v443_v46  ;;  %v581_v32 = vld [vmem:[%s1143_s6 + $0x5a8] sm:$0xff]  ;;  %v515_v34 = vld [vmem:[%s1143_s6 + $0x398] sm:$0xff] }
  0x50   : > { %684 = vmatpush.msrb.mxu0 %v534_v47  ;;  %703 = vmatpush.msrb.mxu1 %v568_v48  ;;  %v481_v33 = vld [vmem:[%s1143_s6 + $0x288] sm:$0xff]  ;;  %v579_v36 = vld [vmem:[%s1143_s6 + $0x598] sm:$0xff] }
  0x51   : > { %724 = vmatpush.msrb.mxu2 %v407_v49  ;;  %743 = vmatpush.msrb.mxu3 %v441_v50  ;;  %v545_v35 = vld [vmem:[%s1143_s6 + $0x488] sm:$0xff]  ;;  %v479_v37 = vld [vmem:[%s1143_s6 + $0x278] sm:$0xff] }
  0x52   : > { %685 = vmatpush.msrb.mxu0 %v532_v51  ;;  %704 = vmatpush.msrb.mxu1 %v566_v52  ;;  %v513_v38 = vld [vmem:[%s1143_s6 + $0x388] sm:$0xff]  ;;  %v543_v39 = vld [vmem:[%s1143_s6 + $0x478] sm:$0xff] }
  0x53   : > { %725 = vmatpush.msrb.mxu2 %v405_v53  ;;  %744 = vmatpush.msrb.mxu3 %v439_v54  ;;  %v577_v40 = vld [vmem:[%s1143_s6 + $0x588] sm:$0xff]  ;;  %v511_v42 = vld [vmem:[%s1143_s6 + $0x378] sm:$0xff] }
  0x54   : > { %686 = vmatpush.msrb.mxu0 %v530_v55  ;;  %705 = vmatpush.msrb.mxu1 %v564_v56  ;;  %v477_v41 = vld [vmem:[%s1143_s6 + $0x268] sm:$0xff]  ;;  %v575_v44 = vld [vmem:[%s1143_s6 + $0x578] sm:$0xff] }
  0x55   : > { %726 = vmatpush.msrb.mxu2 %v403_v57  ;;  %745 = vmatpush.msrb.mxu3 %v437_v58  ;;  %v541_v43 = vld [vmem:[%s1143_s6 + $0x468] sm:$0xff]  ;;  %v475_v45 = vld [vmem:[%s1143_s6 + $0x258] sm:$0xff] }
  0x56   : > { %648 = vmatmul.f32.vlgmr.msra.gmra.mxu2 %v1269_v59  ;;  %687 = vmatpush.msrb.mxu0 %v528_v60  ;;  %v509_v46 = vld [vmem:[%s1143_s6 + $0x368] sm:$0xff]  ;;  %v539_v47 = vld [vmem:[%s1143_s6 + $0x458] sm:$0xff] }
  0x57   : > { %706 = vmatpush.msrb.mxu1 %v562_v61  ;;  %727 = vmatpush.msrb.mxu2 %v401_v62  ;;  %v573_v48 = vld [vmem:[%s1143_s6 + $0x568] sm:$0xff]  ;;  %v507_v50 = vld [vmem:[%s1143_s6 + $0x358] sm:$0xff] }
  0x58   : > { %746 = vmatpush.msrb.mxu3 %v435_v63  ;;  %608 = vmatmul.f32.vlgmr.msra.gmra.mxu0 %v1276_v0  ;;  %v473_v49 = vld [vmem:[%s1143_s6 + $0x248] sm:$0xff]  ;;  %v571_v52 = vld [vmem:[%s1143_s6 + $0x558] sm:$0xff] }
  0x59   : > { %668 = vmatmul.f32.vlgmr.msra.gmra.mxu3 %v1280_v1  ;;  %752 = vmatpush.msra.mxu0 %v495_v2  ;;  %v537_v51 = vld [vmem:[%s1143_s6 + $0x448] sm:$0xff]  ;;  %v471_v53 = vld [vmem:[%s1143_s6 + $0x238] sm:$0xff] }
  0x5a   : > { %792 = vmatpush.msra.mxu2 %v559_v3  ;;  %707 = vmatpush.msrb.mxu1 %v560_v4  ;;  %v505_v54 = vld [vmem:[%s1143_s6 + $0x348] sm:$0xff]  ;;  %v535_v55 = vld [vmem:[%s1143_s6 + $0x438] sm:$0xff] }
  0x5b   : > { %747 = vmatpush.msrb.mxu3 %v433_v5  ;;  %628 = vmatmul.f32.vlgmr.msra.gmra.mxu1 %v1288_v6  ;;  %v569_v56 = vld [vmem:[%s1143_s6 + $0x548] sm:$0xff]  ;;  %v503_v58 = vld [vmem:[%s1143_s6 + $0x338] sm:$0xff] }
  0x5c   : > { %753 = vmatpush.msra.mxu0 %v493_v7  ;;  %772 = vmatpush.msra.mxu1 %v527_v8  ;;  %v469_v57 = vld [vmem:[%s1143_s6 + $0x228] sm:$0xff]  ;;  %v567_v61 = vld [vmem:[%s1143_s6 + $0x538] sm:$0xff] }
  0x5d   : > { %793 = vmatpush.msra.mxu2 %v557_v9  ;;  %812 = vmatpush.msra.mxu3 %v591_v10  ;;  %v533_v60 = vld [vmem:[%s1143_s6 + $0x428] sm:$0xff]  ;;  %v467_v62 = vld [vmem:[%s1143_s6 + $0x218] sm:$0xff] }
  0x5e   : > { %754 = vmatpush.msra.mxu0 %v491_v11  ;;  %773 = vmatpush.msra.mxu1 %v525_v12  ;;  %v501_v63 = vld [vmem:[%s1143_s6 + $0x328] sm:$0xff]  ;;  %v499_v4 = vld [vmem:[%s1143_s6 + $0x318] sm:$0xff] }
  0x5f   : > { %794 = vmatpush.msra.mxu2 %v555_v13  ;;  %813 = vmatpush.msra.mxu3 %v589_v14  ;;  %v565_v2 = vld [vmem:[%s1143_s6 + $0x528] sm:$0xff] }
  0x60   : > { %755 = vmatpush.msra.mxu0 %v489_v15  ;;  %774 = vmatpush.msra.mxu1 %v523_v16  ;;  %v465_v3 = vld [vmem:[%s1143_s6 + $0x208] sm:$0xff] }
  0x61   : > { %795 = vmatpush.msra.mxu2 %v553_v17  ;;  %814 = vmatpush.msra.mxu3 %v587_v18  ;;  %v529_v5 = vld [vmem:[%s1143_s6 + $0x408] sm:$0xff]  ;;  %v392_v18 = vld [vmem:[#allocation2] sm:$0xff] }
  0x62   : > { %688 = vmatmul.f32.vlgmr.msrb.gmra.mxu0 %v1305_v19  ;;  %775 = vmatpush.msra.mxu1 %v521_v20  ;;  %v497_v7 = vld [vmem:[%s1143_s6 + $0x308] sm:$0xff] }
  0x63   : > { %756 = vmatpush.msra.mxu0 %v487_v21  ;;  %796 = vmatpush.msra.mxu2 %v551_v22  ;;  %v561_v8 = vld [vmem:[%s1143_s6 + $0x508] sm:$0xff] }
  0x64   : > { %815 = vmatpush.msra.mxu3 %v585_v23  ;;  %708 = vmatmul.f32.vlgmr.msrb.gmra.mxu1 %v1312_v24 }
  0x65   : > { %757 = vmatpush.msra.mxu0 %v485_v25  ;;  %776 = vmatpush.msra.mxu1 %v519_v26 }
  0x66   : > { %797 = vmatpush.msra.mxu2 %v549_v27  ;;  %816 = vmatpush.msra.mxu3 %v583_v28 }
  0x67   : > { %758 = vmatpush.msra.mxu0 %v483_v29  ;;  %777 = vmatpush.msra.mxu1 %v517_v30  ;;  %v393_v29 = vld [vmem:[#allocation2 + $0x8] sm:$0xff] }
  0x68   : > { %798 = vmatpush.msra.mxu2 %v547_v31  ;;  %817 = vmatpush.msra.mxu3 %v581_v32 }
  0x69   : > { %759 = vmatpush.msra.mxu0 %v481_v33  ;;  %778 = vmatpush.msra.mxu1 %v515_v34 }
  0x6a   : > { %799 = vmatpush.msra.mxu2 %v545_v35  ;;  %818 = vmatpush.msra.mxu3 %v579_v36 }
  0x6b   : > { %760 = vmatpush.msra.mxu0 %v479_v37  ;;  %779 = vmatpush.msra.mxu1 %v513_v38 }
  0x6c   : > { %800 = vmatpush.msra.mxu2 %v543_v39  ;;  %819 = vmatpush.msra.mxu3 %v577_v40 }
  0x6d   : > { %761 = vmatpush.msra.mxu0 %v477_v41  ;;  %780 = vmatpush.msra.mxu1 %v511_v42 }
  0x6e   : > { %801 = vmatpush.msra.mxu2 %v541_v43  ;;  %820 = vmatpush.msra.mxu3 %v575_v44 }
  0x6f   : > { %762 = vmatpush.msra.mxu0 %v475_v45  ;;  %781 = vmatpush.msra.mxu1 %v509_v46 }
  0x70   : > { %802 = vmatpush.msra.mxu2 %v539_v47  ;;  %821 = vmatpush.msra.mxu3 %v573_v48 }
  0x71   : > { %763 = vmatpush.msra.mxu0 %v473_v49  ;;  %782 = vmatpush.msra.mxu1 %v507_v50 }
  0x72   : > { %803 = vmatpush.msra.mxu2 %v537_v51  ;;  %822 = vmatpush.msra.mxu3 %v571_v52 }
  0x73   : > { %728 = vmatmul.f32.vlgmr.msrb.gmra.mxu2 %v1276_v0  ;;  %748 = vmatmul.f32.vlgmr.msrb.gmra.mxu3 %v1288_v6  ;;  %v531_v0 = vld [vmem:[%s1143_s6 + $0x418] sm:$0xff] }
  0x74   : > { %764 = vmatpush.msra.mxu0 %v471_v53  ;;  %783 = vmatpush.msra.mxu1 %v505_v54  ;;  %v563_v6 = vld [vmem:[%s1143_s6 + $0x518] sm:$0xff] }
  0x75   : > { %804 = vmatpush.msra.mxu2 %v535_v55  ;;  %823 = vmatpush.msra.mxu3 %v569_v56 }
  0x76   : > { %765 = vmatpush.msra.mxu0 %v469_v57  ;;  %784 = vmatpush.msra.mxu1 %v503_v58 }
  0x77   : > { %805 = vmatpush.msra.mxu2 %v533_v60  ;;  %824 = vmatpush.msra.mxu3 %v567_v61 }
  0x78   : > { %766 = vmatpush.msra.mxu0 %v467_v62  ;;  %785 = vmatpush.msra.mxu1 %v501_v63 }
  0x79   : > { %806 = vmatpush.msra.mxu2 %v531_v0  ;;  %825 = vmatpush.msra.mxu3 %v565_v2 }
  0x7a   : > { %767 = vmatpush.msra.mxu0 %v465_v3  ;;  %786 = vmatpush.msra.mxu1 %v499_v4 }
  0x7b   : > { %807 = vmatpush.msra.mxu2 %v529_v5  ;;  %826 = vmatpush.msra.mxu3 %v563_v6 }
  0x7c   : > { %768 = vmatmul.f32.vlgmr.msra.gmra.mxu0 %v1269_v59  ;;  %808 = vmatmul.f32.vlgmr.msra.gmra.mxu2 %v1305_v19 }
  0x7d   : > { %787 = vmatpush.msra.mxu1 %v497_v7  ;;  %827 = vmatpush.msra.mxu3 %v561_v8 }
  0x7e   : > { %788 = vmatmul.f32.vlgmr.msra.gmra.mxu1 %v1280_v1  ;;  %828 = vmatmul.f32.vlgmr.msra.gmra.mxu3 %v1312_v24 }
  0xd5   : > { %v609_v9 = vpop.f32.mrf.mxu0 }
  0xd8   : > { %v629_v10 = vpop.f32.mrf.mxu1 }
  0xd9   : > { %v630_v11 = vadd.f32 %v629_v10, %v609_v9  ;;  %v649_v12 = vpop.f32.mrf.mxu2 }
  0xdb   : > { %v650_v13 = vadd.f32 %v649_v12, %v630_v11 }
  0xdc   : > { %v669_v14 = vpop.f32.mrf.mxu3 }
  0xdd   : > { %v670_v15 = vadd.f32 %v669_v14, %v650_v13 }
  0xdf   : > { %v689_v16 = vpop.f32.mrf.mxu0 }
  0xe0   : > { %v690_v17 = vadd.f32 %v689_v16, %v670_v15 }
  0xe1   : > { %v709_v20 = vpop.f32.mrf.mxu1 }
  0xe2   : > { %v710_v59 = vadd.f32 %v709_v20, %v690_v17 }
  0xe4   : > { %v832_v21 = vadd.f32 %v710_v59, %v392_v18 }
  0xe6   : > { %834 = vst [vmem:[#allocation2] sm:$0xff] %v832_v21 }
  0xf6   : > { %v729_v19 = vpop.f32.mrf.mxu2  ;;  %v749_v22 = vpop.f32.mrf.mxu3 }
  0xf7   : > { %v750_v23 = vadd.f32 %v749_v22, %v729_v19 }
  0xf9   : > { %v769_v1 = vpop.f32.mrf.mxu0 }
  0xfa   : > { %v770_v25 = vadd.f32 %v769_v1, %v750_v23 }
  0xfb   : > { %v789_v24 = vpop.f32.mrf.mxu1 }
  0xfc   : > { %v790_v26 = vadd.f32 %v789_v24, %v770_v25 }
  0xff   : > { %v809_v27 = vpop.f32.mrf.mxu2 }
 0x100   : > { %v810_v28 = vadd.f32 %v809_v27, %v790_v26 }
 0x101   : > { %v829_v30 = vpop.f32.mrf.mxu3 }
 0x102   : > { %v830_v31 = vadd.f32 %v829_v30, %v810_v28  ;;  %839 = sbr.rel (%p1027_p7) target bundleno = 279 (0x117), region = 48 }
 0x104   : > { %v833_v32 = vadd.f32 %v830_v31, %v393_v29 }
 0x106   : > { %835 = vst [vmem:[#allocation2 + $0x8] sm:$0xff] %v833_v32 }
 0x107   : > { %v840_v33 = vld [vmem:[#allocation2] sm:$0xff]  ;;  %v859_v44 = vld [vmem:[%s1400_s4 + $0x8] sm:$0xff] }
 0x108   : > { %v842_v34 = vld [vmem:[%s1398_s2] sm:$0x3] }
 0x109   : > { %v850_v35 = vld [vmem:[%s1399_s3] sm:$0x3]  ;;  %v844_v36 = vperm.slane %v842_v34, 0  ;;  %v845_v39 = vperm.slane %v842_v34, 1 }
 0x10a   : > { %v852_v37 = vperm.slane %v850_v35, 0  ;;  %v853_v40 = vperm.slane %v850_v35, 1  ;;  %v858_v43 = vld [vmem:[%s1400_s4] sm:$0xff] }
 0x10b   : > { %v848_v41 = vmul.f32 %v844_v36, %v840_v33 }
 0x10d   : > { %v841_v38 = vld [vmem:[#allocation2 + $0x8] sm:$0xff]  ;;  %v856_v45 = vadd.f32 %v852_v37, %v848_v41 }
 0x10e   : > { %v849_v42 = vmul.f32 %v845_v39, %v841_v38 }
 0x10f   : > { %v860_v47 = vadd.f32 %v858_v43, %v856_v45 }
 0x110   : > { %v857_v46 = vadd.f32 %v853_v40, %v849_v42 }
 0x111   : > { %v862_v49 = vmax.f32 %v860_v47, 0.0 }
 0x112   : > { %v861_v48 = vadd.f32 %v859_v44, %v857_v46 }
 0x113   : > { %864 = vst [vmem:[%s1401_s5] sm:$0xff] %v862_v49 }
 0x114   : > { %v863_v50 = vmax.f32 %v861_v48, 0.0 }
 0x116   : > { %865 = vst [vmem:[%s1401_s5 + $0x8] sm:$0xff] %v863_v50 }
 0x117 PF: > { %s15_s20 = sadd.s32 1, %s1080_s20   ;;  %s1402_s18 = smov %s1076_s19 }
 0x118   : > { %p12_p8 = scmp.ge.s32.totalorder %s15_s20, 5   ;;  %s1403_s19 = smov %s1405_s21 }
 0x11a   :  { %14 = sbr.rel (!%p12_p8) target bundleno = 2 (0x2), region = 90 }

// kernel: encoder_forward.35
= control target key start
LH: loop header
LB: loop body
LE: loop exit
PB: predicated region body
PF: predicated region fallthrough
CT: control target
= control target key end

     0   :  { %s1019_s15 = smov 0   ;;  %s1021_s16 = smov 0   ;;  %s1296_s0 = inlined_call_operand.vmem [shape: f32[8,2304], index: 0, kind: input, shape index: {}]   ;;  %s1297_s1 = inlined_call_operand.vmem [shape: f32[2304,256], index: 1, kind: input, shape index: {}]   ;;  %s1298_s2 = inlined_call_operand.vmem [shape: f32[1,256], index: 2, kind: input, shape index: {}]   ;;  %s1299_s3 = inlined_call_operand.vmem [shape: f32[1,256], index: 3, kind: input, shape index: {}]   ;;  %s1300_s4 = inlined_call_operand.vmem [shape: f32[8,256], index: 4, kind: output, shape index: {}]  }
   0x1   :  { %s1023_s17 = smov 0  }
   0x2 LB: > { %s26_s18 = sadd.s32 1, %s987_s16  ;;  %p933_p0 = scmp.ge.s32.totalorder %s991_s17, 1  ;;  %s991_s17 = sphi %s1023_s17, %s14_s17   ;;  %s987_s16 = sphi %s1021_s16, %s1302_s16   ;;  %s983_s15 = sphi %s1019_s15, %s1301_s15  }
   0x3   : > { %p27_p1 = scmp.ge.s32.totalorder %s26_s18, 3  ;;  %p229_p2 = scmp.lt.s32.totalorder %s991_s17, 4 }
   0x5   : > { %s1304_s18 = smov (%p27_p1, %s26_s18), 0  ;;  %p230_p3 = pnand %p933_p0, %p229_p2 }
   0x6   : > { %s281_s19 = smul.u32 (!%p230_p3), 6, %s983_s15  ;;  %p937_p6 = scmp.ne.s32.totalorder (!%p230_p3), %s983_s15, 0 }
   0x7   : > { %233 = sbr.rel (%p230_p3) target bundleno = 277 (0x115), region = 36 }
   0x8   : > { %s291_s20 = smul.u32 (!%p230_p3), 96, %s983_s15  ;;  %p284_p4 = scmp.lt.s32.totalorder (!%p230_p3), %s281_s19, 17 }
   0xa   : > { %p293_p5 = scmp.lt.s32.totalorder (!%p230_p3), %s291_s20, 287 }
   0xc   : > { %s1306_s19 = smov (!%p284_p4, %s281_s19), 17  ;;  %s1308_s20 = smov (!%p293_p5, %s291_s20), 287 }
   0xd   : > { %s934_s21 = sshll.u32 %s1306_s19, 3  ;;  %s943_s25 = sshll.u32 %s1308_s20, 4 }
   0xe   : > { %s1044_s24 = scalar_lea.vmem %s1296_s0, %s934_s21  ;;  %s1049_s28 = scalar_lea.vmem %s1297_s1, %s943_s25 }
   0xf   : > { %326 = sbr.rel (%p937_p6) target bundleno = 23 (0x17), region = 40 }
  0x14   : > { %v993_v0 = vmov 0.0  }
  0x15   : > { %327 = vst [vmem:[#allocation2] sm:$0xff] %v993_v0 }
  0x16   : > { %328 = vst [vmem:[#allocation2 + $0x8] sm:$0xff] %v993_v0 }
  0x17 PF: > { %v367_v1 = vld [vmem:[%s1049_s28 + $0xf0] sm:$0xff]  ;;  %v365_v3 = vld [vmem:[%s1049_s28 + $0xe0] sm:$0xff]  ;;  %v368_v0 = vld [vmem:[%s1049_s28 + $0xf8] sm:$0xff]  ;;  %p938_p7 = scmp.ne.s32.totalorder %s983_s15, 2 }
  0x18   : > { %v431_v2 = vld [vmem:[%s1049_s28 + $0x2f0] sm:$0xff]  ;;  %529 = vmatpush.msra.mxu0 %v367_v1  ;;  %v429_v5 = vld [vmem:[%s1049_s28 + $0x2e0] sm:$0xff] }
  0x19   : > { %569 = vmatpush.msra.mxu2 %v431_v2  ;;  %v399_v4 = vld [vmem:[%s1049_s28 + $0x1f0] sm:$0xff]  ;;  %v397_v8 = vld [vmem:[%s1049_s28 + $0x1e0] sm:$0xff] }
  0x1a   : > { %v463_v6 = vld [vmem:[%s1049_s28 + $0x3f0] sm:$0xff]  ;;  %549 = vmatpush.msra.mxu1 %v399_v4  ;;  %530 = vmatpush.msra.mxu0 %v365_v3  ;;  %v461_v10 = vld [vmem:[%s1049_s28 + $0x3e0] sm:$0xff] }
  0x1b   : > { %589 = vmatpush.msra.mxu3 %v463_v6  ;;  %v363_v7 = vld [vmem:[%s1049_s28 + $0xd0] sm:$0xff]  ;;  %570 = vmatpush.msra.mxu2 %v429_v5  ;;  %v361_v12 = vld [vmem:[%s1049_s28 + $0xc0] sm:$0xff]  ;;  %v366_v5 = vld [vmem:[%s1049_s28 + $0xe8] sm:$0xff] }
  0x1c   : > { %v427_v9 = vld [vmem:[%s1049_s28 + $0x2d0] sm:$0xff]  ;;  %550 = vmatpush.msra.mxu1 %v397_v8  ;;  %v425_v13 = vld [vmem:[%s1049_s28 + $0x2c0] sm:$0xff]  ;;  %531 = vmatpush.msra.mxu0 %v363_v7  ;;  %v400_v6 = vld [vmem:[%s1049_s28 + $0x1f8] sm:$0xff] }
  0x1d   : > { %v395_v11 = vld [vmem:[%s1049_s28 + $0x1d0] sm:$0xff]  ;;  %590 = vmatpush.msra.mxu3 %v461_v10  ;;  %571 = vmatpush.msra.mxu2 %v427_v9  ;;  %v393_v15 = vld [vmem:[%s1049_s28 + $0x1c0] sm:$0xff]  ;;  %v364_v9 = vld [vmem:[%s1049_s28 + $0xd8] sm:$0xff] }
  0x1e   : > { %v459_v14 = vld [vmem:[%s1049_s28 + $0x3d0] sm:$0xff]  ;;  %v457_v16 = vld [vmem:[%s1049_s28 + $0x3c0] sm:$0xff]  ;;  %551 = vmatpush.msra.mxu1 %v395_v11  ;;  %532 = vmatpush.msra.mxu0 %v361_v12  ;;  %v398_v10 = vld [vmem:[%s1049_s28 + $0x1e8] sm:$0xff] }
  0x1f   : > { %591 = vmatpush.msra.mxu3 %v459_v14  ;;  %v359_v17 = vld [vmem:[%s1049_s28 + $0xb0] sm:$0xff]  ;;  %572 = vmatpush.msra.mxu2 %v425_v13  ;;  %v357_v21 = vld [vmem:[%s1049_s28 + $0xa0] sm:$0xff]  ;;  %v362_v13 = vld [vmem:[%s1049_s28 + $0xc8] sm:$0xff] }
  0x20   : > { %v423_v18 = vld [vmem:[%s1049_s28 + $0x2b0] sm:$0xff]  ;;  %552 = vmatpush.msra.mxu1 %v393_v15  ;;  %v421_v22 = vld [vmem:[%s1049_s28 + $0x2a0] sm:$0xff]  ;;  %533 = vmatpush.msra.mxu0 %v359_v17  ;;  %v396_v14 = vld [vmem:[%s1049_s28 + $0x1d8] sm:$0xff] }
  0x21   : > { %v391_v19 = vld [vmem:[%s1049_s28 + $0x1b0] sm:$0xff]  ;;  %592 = vmatpush.msra.mxu3 %v457_v16  ;;  %573 = vmatpush.msra.mxu2 %v423_v18  ;;  %v389_v23 = vld [vmem:[%s1049_s28 + $0x1a0] sm:$0xff]  ;;  %v360_v17 = vld [vmem:[%s1049_s28 + $0xb8] sm:$0xff] }
  0x22   : > { %v455_v20 = vld [vmem:[%s1049_s28 + $0x3b0] sm:$0xff]  ;;  %v453_v24 = vld [vmem:[%s1049_s28 + $0x3a0] sm:$0xff]  ;;  %553 = vmatpush.msra.mxu1 %v391_v19  ;;  %534 = vmatpush.msra.mxu0 %v357_v21  ;;  %v394_v18 = vld [vmem:[%s1049_s28 + $0x1c8] sm:$0xff] }
  0x23   : > { %593 = vmatpush.msra.mxu3 %v455_v20  ;;  %v355_v25 = vld [vmem:[%s1049_s28 + $0x90] sm:$0xff]  ;;  %574 = vmatpush.msra.mxu2 %v421_v22  ;;  %v353_v29 = vld [vmem:[%s1049_s28 + $0x80] sm:$0xff]  ;;  %v358_v21 = vld [vmem:[%s1049_s28 + $0xa8] sm:$0xff] }
  0x24   : > { %v419_v26 = vld [vmem:[%s1049_s28 + $0x290] sm:$0xff]  ;;  %554 = vmatpush.msra.mxu1 %v389_v23  ;;  %v417_v30 = vld [vmem:[%s1049_s28 + $0x280] sm:$0xff]  ;;  %535 = vmatpush.msra.mxu0 %v355_v25  ;;  %v392_v22 = vld [vmem:[%s1049_s28 + $0x1b8] sm:$0xff] }
  0x25   : > { %v387_v27 = vld [vmem:[%s1049_s28 + $0x190] sm:$0xff]  ;;  %594 = vmatpush.msra.mxu3 %v453_v24  ;;  %575 = vmatpush.msra.mxu2 %v419_v26  ;;  %v385_v31 = vld [vmem:[%s1049_s28 + $0x180] sm:$0xff]  ;;  %v356_v25 = vld [vmem:[%s1049_s28 + $0x98] sm:$0xff] }
  0x26   : > { %v451_v28 = vld [vmem:[%s1049_s28 + $0x390] sm:$0xff]  ;;  %v449_v32 = vld [vmem:[%s1049_s28 + $0x380] sm:$0xff]  ;;  %555 = vmatpush.msra.mxu1 %v387_v27  ;;  %536 = vmatpush.msra.mxu0 %v353_v29  ;;  %v390_v26 = vld [vmem:[%s1049_s28 + $0x1a8] sm:$0xff] }
  0x27   : > { %595 = vmatpush.msra.mxu3 %v451_v28  ;;  %v351_v33 = vld [vmem:[%s1049_s28 + $0x70] sm:$0xff]  ;;  %576 = vmatpush.msra.mxu2 %v417_v30  ;;  %v349_v37 = vld [vmem:[%s1049_s28 + $0x60] sm:$0xff]  ;;  %v354_v29 = vld [vmem:[%s1049_s28 + $0x88] sm:$0xff] }
  0x28   : > { %v415_v34 = vld [vmem:[%s1049_s28 + $0x270] sm:$0xff]  ;;  %556 = vmatpush.msra.mxu1 %v385_v31  ;;  %v413_v38 = vld [vmem:[%s1049_s28 + $0x260] sm:$0xff]  ;;  %537 = vmatpush.msra.mxu0 %v351_v33  ;;  %v388_v30 = vld [vmem:[%s1049_s28 + $0x198] sm:$0xff] }
  0x29   : > { %v383_v35 = vld [vmem:[%s1049_s28 + $0x170] sm:$0xff]  ;;  %596 = vmatpush.msra.mxu3 %v449_v32  ;;  %577 = vmatpush.msra.mxu2 %v415_v34  ;;  %v381_v39 = vld [vmem:[%s1049_s28 + $0x160] sm:$0xff]  ;;  %v352_v33 = vld [vmem:[%s1049_s28 + $0x78] sm:$0xff] }
  0x2a   : > { %v447_v36 = vld [vmem:[%s1049_s28 + $0x370] sm:$0xff]  ;;  %v445_v40 = vld [vmem:[%s1049_s28 + $0x360] sm:$0xff]  ;;  %557 = vmatpush.msra.mxu1 %v383_v35  ;;  %538 = vmatpush.msra.mxu0 %v349_v37  ;;  %v386_v34 = vld [vmem:[%s1049_s28 + $0x188] sm:$0xff] }
  0x2b   : > { %597 = vmatpush.msra.mxu3 %v447_v36  ;;  %v347_v41 = vld [vmem:[%s1049_s28 + $0x50] sm:$0xff]  ;;  %578 = vmatpush.msra.mxu2 %v413_v38  ;;  %v345_v45 = vld [vmem:[%s1049_s28 + $0x40] sm:$0xff]  ;;  %v350_v37 = vld [vmem:[%s1049_s28 + $0x68] sm:$0xff] }
  0x2c   : > { %v411_v42 = vld [vmem:[%s1049_s28 + $0x250] sm:$0xff]  ;;  %558 = vmatpush.msra.mxu1 %v381_v39  ;;  %v409_v46 = vld [vmem:[%s1049_s28 + $0x240] sm:$0xff]  ;;  %539 = vmatpush.msra.mxu0 %v347_v41  ;;  %v384_v38 = vld [vmem:[%s1049_s28 + $0x178] sm:$0xff] }
  0x2d   : > { %v379_v43 = vld [vmem:[%s1049_s28 + $0x150] sm:$0xff]  ;;  %598 = vmatpush.msra.mxu3 %v445_v40  ;;  %579 = vmatpush.msra.mxu2 %v411_v42  ;;  %v377_v47 = vld [vmem:[%s1049_s28 + $0x140] sm:$0xff]  ;;  %v348_v41 = vld [vmem:[%s1049_s28 + $0x58] sm:$0xff] }
  0x2e   : > { %v443_v44 = vld [vmem:[%s1049_s28 + $0x350] sm:$0xff]  ;;  %v441_v48 = vld [vmem:[%s1049_s28 + $0x340] sm:$0xff]  ;;  %559 = vmatpush.msra.mxu1 %v379_v43  ;;  %540 = vmatpush.msra.mxu0 %v345_v45  ;;  %v382_v42 = vld [vmem:[%s1049_s28 + $0x168] sm:$0xff] }
  0x2f   : > { %599 = vmatpush.msra.mxu3 %v443_v44  ;;  %v343_v49 = vld [vmem:[%s1049_s28 + $0x30] sm:$0xff]  ;;  %580 = vmatpush.msra.mxu2 %v409_v46  ;;  %v341_v53 = vld [vmem:[%s1049_s28 + $0x20] sm:$0xff]  ;;  %v346_v45 = vld [vmem:[%s1049_s28 + $0x48] sm:$0xff] }
  0x30   : > { %v407_v50 = vld [vmem:[%s1049_s28 + $0x230] sm:$0xff]  ;;  %560 = vmatpush.msra.mxu1 %v377_v47  ;;  %v405_v54 = vld [vmem:[%s1049_s28 + $0x220] sm:$0xff]  ;;  %541 = vmatpush.msra.mxu0 %v343_v49  ;;  %v380_v46 = vld [vmem:[%s1049_s28 + $0x158] sm:$0xff] }
  0x31   : > { %v375_v51 = vld [vmem:[%s1049_s28 + $0x130] sm:$0xff]  ;;  %600 = vmatpush.msra.mxu3 %v441_v48  ;;  %581 = vmatpush.msra.mxu2 %v407_v50  ;;  %v373_v55 = vld [vmem:[%s1049_s28 + $0x120] sm:$0xff]  ;;  %v344_v49 = vld [vmem:[%s1049_s28 + $0x38] sm:$0xff] }
  0x32   : > { %v439_v52 = vld [vmem:[%s1049_s28 + $0x330] sm:$0xff]  ;;  %v437_v56 = vld [vmem:[%s1049_s28 + $0x320] sm:$0xff]  ;;  %561 = vmatpush.msra.mxu1 %v375_v51  ;;  %542 = vmatpush.msra.mxu0 %v341_v53  ;;  %v378_v50 = vld [vmem:[%s1049_s28 + $0x148] sm:$0xff] }
  0x33   : > { %601 = vmatpush.msra.mxu3 %v439_v52  ;;  %v339_v57 = vld [vmem:[%s1049_s28 + $0x10] sm:$0xff]  ;;  %582 = vmatpush.msra.mxu2 %v405_v54  ;;  %v337_v61 = vld [vmem:[%s1049_s28] sm:$0xff]  ;;  %v342_v53 = vld [vmem:[%s1049_s28 + $0x28] sm:$0xff] }
  0x34   : > { %v403_v58 = vld [vmem:[%s1049_s28 + $0x210] sm:$0xff]  ;;  %562 = vmatpush.msra.mxu1 %v373_v55  ;;  %v401_v62 = vld [vmem:[%s1049_s28 + $0x200] sm:$0xff]  ;;  %543 = vmatpush.msra.mxu0 %v339_v57  ;;  %v376_v54 = vld [vmem:[%s1049_s28 + $0x138] sm:$0xff] }
  0x35   : > { %v371_v59 = vld [vmem:[%s1049_s28 + $0x110] sm:$0xff]  ;;  %602 = vmatpush.msra.mxu3 %v437_v56  ;;  %583 = vmatpush.msra.mxu2 %v403_v58  ;;  %v369_v1 = vld [vmem:[%s1049_s28 + $0x100] sm:$0xff]  ;;  %v340_v57 = vld [vmem:[%s1049_s28 + $0x18] sm:$0xff] }
  0x36   : > { %v435_v60 = vld [vmem:[%s1049_s28 + $0x310] sm:$0xff]  ;;  %563 = vmatpush.msra.mxu1 %v371_v59  ;;  %v433_v2 = vld [vmem:[%s1049_s28 + $0x300] sm:$0xff]  ;;  %544 = vmatpush.msra.mxu0 %v337_v61  ;;  %v374_v58 = vld [vmem:[%s1049_s28 + $0x128] sm:$0xff] }
  0x37   : > { %v495_v63 = vld [vmem:[%s1049_s28 + $0x4f0] sm:$0xff]  ;;  %603 = vmatpush.msra.mxu3 %v435_v60  ;;  %584 = vmatpush.msra.mxu2 %v401_v62  ;;  %v493_v3 = vld [vmem:[%s1049_s28 + $0x4e0] sm:$0xff]  ;;  %v338_v62 = vld [vmem:[%s1049_s28 + $0x8] sm:$0xff] }
  0x38   : > { %v527_v4 = vld [vmem:[%s1049_s28 + $0x5f0] sm:$0xff]  ;;  %609 = vmatpush.msrb.mxu0 %v495_v63  ;;  %564 = vmatpush.msra.mxu1 %v369_v1  ;;  %v525_v8 = vld [vmem:[%s1049_s28 + $0x5e0] sm:$0xff]  ;;  %v372_v63 = vld [vmem:[%s1049_s28 + $0x118] sm:$0xff] }
  0x39   : > { %649 = vmatpush.msrb.mxu2 %v368_v0  ;;  %604 = vmatpush.msra.mxu3 %v433_v2  ;;  %v491_v7 = vld [vmem:[%s1049_s28 + $0x4d0] sm:$0xff]  ;;  %v489_v11 = vld [vmem:[%s1049_s28 + $0x4c0] sm:$0xff]  ;;  %v1186_v1 = vld [vmem:[%s1044_s24 + $0x18] sm:$0xff] }
  0x3a   : > { %610 = vmatpush.msrb.mxu0 %v493_v3  ;;  %629 = vmatpush.msrb.mxu1 %v527_v4  ;;  %v523_v12 = vld [vmem:[%s1049_s28 + $0x5d0] sm:$0xff]  ;;  %v521_v16 = vld [vmem:[%s1049_s28 + $0x5c0] sm:$0xff]  ;;  %v432_v2 = vld [vmem:[%s1049_s28 + $0x2f8] sm:$0xff] }
  0x3b   : > { %650 = vmatpush.msrb.mxu2 %v366_v5  ;;  %669 = vmatpush.msrb.mxu3 %v400_v6  ;;  %v487_v15 = vld [vmem:[%s1049_s28 + $0x4b0] sm:$0xff]  ;;  %v485_v19 = vld [vmem:[%s1049_s28 + $0x4a0] sm:$0xff]  ;;  %v496_v3 = vld [vmem:[%s1049_s28 + $0x4f8] sm:$0xff] }
  0x3c   : > { %611 = vmatpush.msrb.mxu0 %v491_v7  ;;  %630 = vmatpush.msrb.mxu1 %v525_v8  ;;  %v519_v20 = vld [vmem:[%s1049_s28 + $0x5b0] sm:$0xff]  ;;  %v517_v24 = vld [vmem:[%s1049_s28 + $0x5a0] sm:$0xff]  ;;  %v370_v5 = vld [vmem:[%s1049_s28 + $0x108] sm:$0xff] }
  0x3d   : > { %651 = vmatpush.msrb.mxu2 %v364_v9  ;;  %670 = vmatpush.msrb.mxu3 %v398_v10  ;;  %v483_v23 = vld [vmem:[%s1049_s28 + $0x490] sm:$0xff]  ;;  %v481_v27 = vld [vmem:[%s1049_s28 + $0x480] sm:$0xff]  ;;  %v1194_v6 = vld [vmem:[%s1044_s24 + $0x8] sm:$0xff] }
  0x3e   : > { %612 = vmatpush.msrb.mxu0 %v489_v11  ;;  %631 = vmatpush.msrb.mxu1 %v523_v12  ;;  %v515_v28 = vld [vmem:[%s1049_s28 + $0x590] sm:$0xff]  ;;  %v513_v32 = vld [vmem:[%s1049_s28 + $0x580] sm:$0xff]  ;;  %v430_v7 = vld [vmem:[%s1049_s28 + $0x2e8] sm:$0xff] }
  0x3f   : > { %652 = vmatpush.msrb.mxu2 %v362_v13  ;;  %671 = vmatpush.msrb.mxu3 %v396_v14  ;;  %v479_v31 = vld [vmem:[%s1049_s28 + $0x470] sm:$0xff]  ;;  %v477_v35 = vld [vmem:[%s1049_s28 + $0x460] sm:$0xff]  ;;  %v464_v8 = vld [vmem:[%s1049_s28 + $0x3f8] sm:$0xff] }
  0x40   : > { %613 = vmatpush.msrb.mxu0 %v487_v15  ;;  %632 = vmatpush.msrb.mxu1 %v521_v16  ;;  %v511_v36 = vld [vmem:[%s1049_s28 + $0x570] sm:$0xff]  ;;  %v509_v40 = vld [vmem:[%s1049_s28 + $0x560] sm:$0xff]  ;;  %v494_v9 = vld [vmem:[%s1049_s28 + $0x4e8] sm:$0xff] }
  0x41   : > { %653 = vmatpush.msrb.mxu2 %v360_v17  ;;  %672 = vmatpush.msrb.mxu3 %v394_v18  ;;  %v475_v39 = vld [vmem:[%s1049_s28 + $0x450] sm:$0xff]  ;;  %v473_v43 = vld [vmem:[%s1049_s28 + $0x440] sm:$0xff]  ;;  %v528_v10 = vld [vmem:[%s1049_s28 + $0x5f8] sm:$0xff] }
  0x42   : > { %614 = vmatpush.msrb.mxu0 %v485_v19  ;;  %633 = vmatpush.msrb.mxu1 %v519_v20  ;;  %v507_v44 = vld [vmem:[%s1049_s28 + $0x550] sm:$0xff]  ;;  %v505_v48 = vld [vmem:[%s1049_s28 + $0x540] sm:$0xff]  ;;  %v428_v11 = vld [vmem:[%s1049_s28 + $0x2d8] sm:$0xff] }
  0x43   : > { %654 = vmatpush.msrb.mxu2 %v358_v21  ;;  %673 = vmatpush.msrb.mxu3 %v392_v22  ;;  %v471_v47 = vld [vmem:[%s1049_s28 + $0x430] sm:$0xff]  ;;  %v469_v51 = vld [vmem:[%s1049_s28 + $0x420] sm:$0xff]  ;;  %v462_v12 = vld [vmem:[%s1049_s28 + $0x3e8] sm:$0xff] }
  0x44   : > { %615 = vmatpush.msrb.mxu0 %v483_v23  ;;  %634 = vmatpush.msrb.mxu1 %v517_v24  ;;  %v503_v52 = vld [vmem:[%s1049_s28 + $0x530] sm:$0xff]  ;;  %v501_v56 = vld [vmem:[%s1049_s28 + $0x520] sm:$0xff]  ;;  %v492_v13 = vld [vmem:[%s1049_s28 + $0x4d8] sm:$0xff] }
  0x45   : > { %655 = vmatpush.msrb.mxu2 %v356_v25  ;;  %674 = vmatpush.msrb.mxu3 %v390_v26  ;;  %v467_v55 = vld [vmem:[%s1049_s28 + $0x410] sm:$0xff]  ;;  %v465_v60 = vld [vmem:[%s1049_s28 + $0x400] sm:$0xff]  ;;  %v526_v14 = vld [vmem:[%s1049_s28 + $0x5e8] sm:$0xff] }
  0x46   : > { %616 = vmatpush.msrb.mxu0 %v481_v27  ;;  %635 = vmatpush.msrb.mxu1 %v515_v28  ;;  %v1175_v59 = vld [vmem:[%s1044_s24 + $0x10] sm:$0xff]  ;;  %v1182_v0 = vld [vmem:[%s1044_s24] sm:$0xff]  ;;  %v426_v15 = vld [vmem:[%s1049_s28 + $0x2c8] sm:$0xff] }
  0x47   : > { %656 = vmatpush.msrb.mxu2 %v354_v29  ;;  %675 = vmatpush.msrb.mxu3 %v388_v30  ;;  %v499_v61 = vld [vmem:[%s1049_s28 + $0x510] sm:$0xff]  ;;  %v497_v4 = vld [vmem:[%s1049_s28 + $0x500] sm:$0xff]  ;;  %v460_v16 = vld [vmem:[%s1049_s28 + $0x3d8] sm:$0xff] }
  0x48   : > { %617 = vmatpush.msrb.mxu0 %v479_v31  ;;  %636 = vmatpush.msrb.mxu1 %v513_v32  ;;  %v490_v17 = vld [vmem:[%s1049_s28 + $0x4c8] sm:$0xff]  ;;  %v524_v18 = vld [vmem:[%s1049_s28 + $0x5d8] sm:$0xff]  ;;  %v1211_v19 = vld [vmem:[%s1044_s24 + $0x20] sm:$0xff] }
  0x49   : > { %657 = vmatpush.msrb.mxu2 %v352_v33  ;;  %676 = vmatpush.msrb.mxu3 %v386_v34  ;;  %v458_v20 = vld [vmem:[%s1049_s28 + $0x3c8] sm:$0xff]  ;;  %v424_v21 = vld [vmem:[%s1049_s28 + $0x2b8] sm:$0xff] }
  0x4a   : > { %618 = vmatpush.msrb.mxu0 %v477_v35  ;;  %637 = vmatpush.msrb.mxu1 %v511_v36  ;;  %v488_v22 = vld [vmem:[%s1049_s28 + $0x4b8] sm:$0xff]  ;;  %v522_v23 = vld [vmem:[%s1049_s28 + $0x5c8] sm:$0xff] }
  0x4b   : > { %658 = vmatpush.msrb.mxu2 %v350_v37  ;;  %677 = vmatpush.msrb.mxu3 %v384_v38  ;;  %v1218_v24 = vld [vmem:[%s1044_s24 + $0x28] sm:$0xff]  ;;  %v456_v26 = vld [vmem:[%s1049_s28 + $0x3b8] sm:$0xff] }
  0x4c   : > { %619 = vmatpush.msrb.mxu0 %v475_v39  ;;  %638 = vmatpush.msrb.mxu1 %v509_v40  ;;  %v422_v25 = vld [vmem:[%s1049_s28 + $0x2a8] sm:$0xff]  ;;  %v520_v28 = vld [vmem:[%s1049_s28 + $0x5b8] sm:$0xff] }
  0x4d   : > { %659 = vmatpush.msrb.mxu2 %v348_v41  ;;  %678 = vmatpush.msrb.mxu3 %v382_v42  ;;  %v486_v27 = vld [vmem:[%s1049_s28 + $0x4a8] sm:$0xff]  ;;  %v420_v29 = vld [vmem:[%s1049_s28 + $0x298] sm:$0xff] }
  0x4e   : > { %620 = vmatpush.msrb.mxu0 %v473_v43  ;;  %639 = vmatpush.msrb.mxu1 %v507_v44  ;;  %v454_v30 = vld [vmem:[%s1049_s28 + $0x3a8] sm:$0xff]  ;;  %v484_v31 = vld [vmem:[%s1049_s28 + $0x498] sm:$0xff] }
  0x4f   : > { %660 = vmatpush.msrb.mxu2 %v346_v45  ;;  %679 = vmatpush.msrb.mxu3 %v380_v46  ;;  %v518_v32 = vld [vmem:[%s1049_s28 + $0x5a8] sm:$0xff]  ;;  %v452_v34 = vld [vmem:[%s1049_s28 + $0x398] sm:$0xff] }
  0x50   : > { %621 = vmatpush.msrb.mxu0 %v471_v47  ;;  %640 = vmatpush.msrb.mxu1 %v505_v48  ;;  %v418_v33 = vld [vmem:[%s1049_s28 + $0x288] sm:$0xff]  ;;  %v516_v36 = vld [vmem:[%s1049_s28 + $0x598] sm:$0xff] }
  0x51   : > { %661 = vmatpush.msrb.mxu2 %v344_v49  ;;  %680 = vmatpush.msrb.mxu3 %v378_v50  ;;  %v482_v35 = vld [vmem:[%s1049_s28 + $0x488] sm:$0xff]  ;;  %v416_v37 = vld [vmem:[%s1049_s28 + $0x278] sm:$0xff] }
  0x52   : > { %622 = vmatpush.msrb.mxu0 %v469_v51  ;;  %641 = vmatpush.msrb.mxu1 %v503_v52  ;;  %v450_v38 = vld [vmem:[%s1049_s28 + $0x388] sm:$0xff]  ;;  %v480_v39 = vld [vmem:[%s1049_s28 + $0x478] sm:$0xff] }
  0x53   : > { %662 = vmatpush.msrb.mxu2 %v342_v53  ;;  %681 = vmatpush.msrb.mxu3 %v376_v54  ;;  %v514_v40 = vld [vmem:[%s1049_s28 + $0x588] sm:$0xff]  ;;  %v448_v42 = vld [vmem:[%s1049_s28 + $0x378] sm:$0xff] }
  0x54   : > { %623 = vmatpush.msrb.mxu0 %v467_v55  ;;  %642 = vmatpush.msrb.mxu1 %v501_v56  ;;  %v414_v41 = vld [vmem:[%s1049_s28 + $0x268] sm:$0xff]  ;;  %v512_v44 = vld [vmem:[%s1049_s28 + $0x578] sm:$0xff] }
  0x55   : > { %663 = vmatpush.msrb.mxu2 %v340_v57  ;;  %682 = vmatpush.msrb.mxu3 %v374_v58  ;;  %v478_v43 = vld [vmem:[%s1049_s28 + $0x468] sm:$0xff]  ;;  %v412_v45 = vld [vmem:[%s1049_s28 + $0x258] sm:$0xff] }
  0x56   : > { %585 = vmatmul.f32.vlgmr.msra.gmra.mxu2 %v1175_v59  ;;  %624 = vmatpush.msrb.mxu0 %v465_v60  ;;  %v446_v46 = vld [vmem:[%s1049_s28 + $0x368] sm:$0xff]  ;;  %v476_v47 = vld [vmem:[%s1049_s28 + $0x458] sm:$0xff] }
  0x57   : > { %643 = vmatpush.msrb.mxu1 %v499_v61  ;;  %664 = vmatpush.msrb.mxu2 %v338_v62  ;;  %v510_v48 = vld [vmem:[%s1049_s28 + $0x568] sm:$0xff]  ;;  %v444_v50 = vld [vmem:[%s1049_s28 + $0x358] sm:$0xff] }
  0x58   : > { %683 = vmatpush.msrb.mxu3 %v372_v63  ;;  %545 = vmatmul.f32.vlgmr.msra.gmra.mxu0 %v1182_v0  ;;  %v410_v49 = vld [vmem:[%s1049_s28 + $0x248] sm:$0xff]  ;;  %v508_v52 = vld [vmem:[%s1049_s28 + $0x558] sm:$0xff] }
  0x59   : > { %605 = vmatmul.f32.vlgmr.msra.gmra.mxu3 %v1186_v1  ;;  %689 = vmatpush.msra.mxu0 %v432_v2  ;;  %v474_v51 = vld [vmem:[%s1049_s28 + $0x448] sm:$0xff]  ;;  %v408_v53 = vld [vmem:[%s1049_s28 + $0x238] sm:$0xff] }
  0x5a   : > { %729 = vmatpush.msra.mxu2 %v496_v3  ;;  %644 = vmatpush.msrb.mxu1 %v497_v4  ;;  %v442_v54 = vld [vmem:[%s1049_s28 + $0x348] sm:$0xff]  ;;  %v472_v55 = vld [vmem:[%s1049_s28 + $0x438] sm:$0xff] }
  0x5b   : > { %684 = vmatpush.msrb.mxu3 %v370_v5  ;;  %565 = vmatmul.f32.vlgmr.msra.gmra.mxu1 %v1194_v6  ;;  %v506_v56 = vld [vmem:[%s1049_s28 + $0x548] sm:$0xff]  ;;  %v440_v58 = vld [vmem:[%s1049_s28 + $0x338] sm:$0xff] }
  0x5c   : > { %690 = vmatpush.msra.mxu0 %v430_v7  ;;  %709 = vmatpush.msra.mxu1 %v464_v8  ;;  %v406_v57 = vld [vmem:[%s1049_s28 + $0x228] sm:$0xff]  ;;  %v504_v61 = vld [vmem:[%s1049_s28 + $0x538] sm:$0xff] }
  0x5d   : > { %730 = vmatpush.msra.mxu2 %v494_v9  ;;  %749 = vmatpush.msra.mxu3 %v528_v10  ;;  %v470_v60 = vld [vmem:[%s1049_s28 + $0x428] sm:$0xff]  ;;  %v404_v62 = vld [vmem:[%s1049_s28 + $0x218] sm:$0xff] }
  0x5e   : > { %691 = vmatpush.msra.mxu0 %v428_v11  ;;  %710 = vmatpush.msra.mxu1 %v462_v12  ;;  %v438_v63 = vld [vmem:[%s1049_s28 + $0x328] sm:$0xff]  ;;  %v436_v4 = vld [vmem:[%s1049_s28 + $0x318] sm:$0xff] }
  0x5f   : > { %731 = vmatpush.msra.mxu2 %v492_v13  ;;  %750 = vmatpush.msra.mxu3 %v526_v14  ;;  %v502_v2 = vld [vmem:[%s1049_s28 + $0x528] sm:$0xff] }
  0x60   : > { %692 = vmatpush.msra.mxu0 %v426_v15  ;;  %711 = vmatpush.msra.mxu1 %v460_v16  ;;  %v402_v3 = vld [vmem:[%s1049_s28 + $0x208] sm:$0xff] }
  0x61   : > { %732 = vmatpush.msra.mxu2 %v490_v17  ;;  %751 = vmatpush.msra.mxu3 %v524_v18  ;;  %v466_v5 = vld [vmem:[%s1049_s28 + $0x408] sm:$0xff]  ;;  %v329_v18 = vld [vmem:[#allocation2] sm:$0xff] }
  0x62   : > { %625 = vmatmul.f32.vlgmr.msrb.gmra.mxu0 %v1211_v19  ;;  %712 = vmatpush.msra.mxu1 %v458_v20  ;;  %v434_v7 = vld [vmem:[%s1049_s28 + $0x308] sm:$0xff] }
  0x63   : > { %693 = vmatpush.msra.mxu0 %v424_v21  ;;  %733 = vmatpush.msra.mxu2 %v488_v22  ;;  %v498_v8 = vld [vmem:[%s1049_s28 + $0x508] sm:$0xff] }
  0x64   : > { %752 = vmatpush.msra.mxu3 %v522_v23  ;;  %645 = vmatmul.f32.vlgmr.msrb.gmra.mxu1 %v1218_v24 }
  0x65   : > { %694 = vmatpush.msra.mxu0 %v422_v25  ;;  %713 = vmatpush.msra.mxu1 %v456_v26 }
  0x66   : > { %734 = vmatpush.msra.mxu2 %v486_v27  ;;  %753 = vmatpush.msra.mxu3 %v520_v28 }
  0x67   : > { %695 = vmatpush.msra.mxu0 %v420_v29  ;;  %714 = vmatpush.msra.mxu1 %v454_v30  ;;  %v330_v29 = vld [vmem:[#allocation2 + $0x8] sm:$0xff] }
  0x68   : > { %735 = vmatpush.msra.mxu2 %v484_v31  ;;  %754 = vmatpush.msra.mxu3 %v518_v32 }
  0x69   : > { %696 = vmatpush.msra.mxu0 %v418_v33  ;;  %715 = vmatpush.msra.mxu1 %v452_v34 }
  0x6a   : > { %736 = vmatpush.msra.mxu2 %v482_v35  ;;  %755 = vmatpush.msra.mxu3 %v516_v36 }
  0x6b   : > { %697 = vmatpush.msra.mxu0 %v416_v37  ;;  %716 = vmatpush.msra.mxu1 %v450_v38 }
  0x6c   : > { %737 = vmatpush.msra.mxu2 %v480_v39  ;;  %756 = vmatpush.msra.mxu3 %v514_v40 }
  0x6d   : > { %698 = vmatpush.msra.mxu0 %v414_v41  ;;  %717 = vmatpush.msra.mxu1 %v448_v42 }
  0x6e   : > { %738 = vmatpush.msra.mxu2 %v478_v43  ;;  %757 = vmatpush.msra.mxu3 %v512_v44 }
  0x6f   : > { %699 = vmatpush.msra.mxu0 %v412_v45  ;;  %718 = vmatpush.msra.mxu1 %v446_v46 }
  0x70   : > { %739 = vmatpush.msra.mxu2 %v476_v47  ;;  %758 = vmatpush.msra.mxu3 %v510_v48 }
  0x71   : > { %700 = vmatpush.msra.mxu0 %v410_v49  ;;  %719 = vmatpush.msra.mxu1 %v444_v50 }
  0x72   : > { %740 = vmatpush.msra.mxu2 %v474_v51  ;;  %759 = vmatpush.msra.mxu3 %v508_v52 }
  0x73   : > { %665 = vmatmul.f32.vlgmr.msrb.gmra.mxu2 %v1182_v0  ;;  %685 = vmatmul.f32.vlgmr.msrb.gmra.mxu3 %v1194_v6  ;;  %v468_v0 = vld [vmem:[%s1049_s28 + $0x418] sm:$0xff] }
  0x74   : > { %701 = vmatpush.msra.mxu0 %v408_v53  ;;  %720 = vmatpush.msra.mxu1 %v442_v54  ;;  %v500_v6 = vld [vmem:[%s1049_s28 + $0x518] sm:$0xff] }
  0x75   : > { %741 = vmatpush.msra.mxu2 %v472_v55  ;;  %760 = vmatpush.msra.mxu3 %v506_v56 }
  0x76   : > { %702 = vmatpush.msra.mxu0 %v406_v57  ;;  %721 = vmatpush.msra.mxu1 %v440_v58 }
  0x77   : > { %742 = vmatpush.msra.mxu2 %v470_v60  ;;  %761 = vmatpush.msra.mxu3 %v504_v61 }
  0x78   : > { %703 = vmatpush.msra.mxu0 %v404_v62  ;;  %722 = vmatpush.msra.mxu1 %v438_v63 }
  0x79   : > { %743 = vmatpush.msra.mxu2 %v468_v0  ;;  %762 = vmatpush.msra.mxu3 %v502_v2 }
  0x7a   : > { %704 = vmatpush.msra.mxu0 %v402_v3  ;;  %723 = vmatpush.msra.mxu1 %v436_v4 }
  0x7b   : > { %744 = vmatpush.msra.mxu2 %v466_v5  ;;  %763 = vmatpush.msra.mxu3 %v500_v6 }
  0x7c   : > { %705 = vmatmul.f32.vlgmr.msra.gmra.mxu0 %v1175_v59  ;;  %745 = vmatmul.f32.vlgmr.msra.gmra.mxu2 %v1211_v19 }
  0x7d   : > { %724 = vmatpush.msra.mxu1 %v434_v7  ;;  %764 = vmatpush.msra.mxu3 %v498_v8 }
  0x7e   : > { %725 = vmatmul.f32.vlgmr.msra.gmra.mxu1 %v1186_v1  ;;  %765 = vmatmul.f32.vlgmr.msra.gmra.mxu3 %v1218_v24 }
  0xd5   : > { %v546_v9 = vpop.f32.mrf.mxu0 }
  0xd8   : > { %v566_v10 = vpop.f32.mrf.mxu1 }
  0xd9   : > { %v567_v11 = vadd.f32 %v566_v10, %v546_v9  ;;  %v586_v12 = vpop.f32.mrf.mxu2 }
  0xdb   : > { %v587_v13 = vadd.f32 %v586_v12, %v567_v11 }
  0xdc   : > { %v606_v14 = vpop.f32.mrf.mxu3 }
  0xdd   : > { %v607_v15 = vadd.f32 %v606_v14, %v587_v13 }
  0xdf   : > { %v626_v16 = vpop.f32.mrf.mxu0 }
  0xe0   : > { %v627_v17 = vadd.f32 %v626_v16, %v607_v15 }
  0xe1   : > { %v646_v20 = vpop.f32.mrf.mxu1 }
  0xe2   : > { %v647_v59 = vadd.f32 %v646_v20, %v627_v17 }
  0xe4   : > { %v769_v21 = vadd.f32 %v647_v59, %v329_v18 }
  0xe6   : > { %771 = vst [vmem:[#allocation2] sm:$0xff] %v769_v21 }
  0xf6   : > { %v666_v19 = vpop.f32.mrf.mxu2  ;;  %v686_v22 = vpop.f32.mrf.mxu3 }
  0xf7   : > { %v687_v23 = vadd.f32 %v686_v22, %v666_v19 }
  0xf9   : > { %v706_v1 = vpop.f32.mrf.mxu0 }
  0xfa   : > { %v707_v25 = vadd.f32 %v706_v1, %v687_v23 }
  0xfb   : > { %v726_v24 = vpop.f32.mrf.mxu1 }
  0xfc   : > { %v727_v26 = vadd.f32 %v726_v24, %v707_v25 }
  0xff   : > { %v746_v27 = vpop.f32.mrf.mxu2 }
 0x100   : > { %v747_v28 = vadd.f32 %v746_v27, %v727_v26 }
 0x101   : > { %v766_v30 = vpop.f32.mrf.mxu3 }
 0x102   : > { %v767_v31 = vadd.f32 %v766_v30, %v747_v28  ;;  %776 = sbr.rel (%p938_p7) target bundleno = 277 (0x115), region = 44 }
 0x104   : > { %v770_v32 = vadd.f32 %v767_v31, %v330_v29 }
 0x106   : > { %772 = vst [vmem:[#allocation2 + $0x8] sm:$0xff] %v770_v32 }
 0x107   : > { %v777_v33 = vld [vmem:[#allocation2] sm:$0xff] }
 0x108   : > { %v779_v34 = vld [vmem:[%s1298_s2] sm:$0x3] }
 0x109   : > { %v787_v35 = vld [vmem:[%s1299_s3] sm:$0x3]  ;;  %v781_v36 = vperm.slane %v779_v34, 0  ;;  %v782_v39 = vperm.slane %v779_v34, 1 }
 0x10a   : > { %v789_v37 = vperm.slane %v787_v35, 0  ;;  %v790_v40 = vperm.slane %v787_v35, 1 }
 0x10b   : > { %v785_v41 = vmul.f32 %v781_v36, %v777_v33 }
 0x10d   : > { %v778_v38 = vld [vmem:[#allocation2 + $0x8] sm:$0xff]  ;;  %v793_v43 = vadd.f32 %v789_v37, %v785_v41 }
 0x10e   : > { %v786_v42 = vmul.f32 %v782_v39, %v778_v38 }
 0x10f   : > { %v795_v45 = vmax.f32 %v793_v43, 0.0 }
 0x110   : > { %v794_v44 = vadd.f32 %v790_v40, %v786_v42 }
 0x111   : > { %797 = vst [vmem:[%s1300_s4] sm:$0xff] %v795_v45 }
 0x112   : > { %v796_v46 = vmax.f32 %v794_v44, 0.0 }
 0x114   : > { %798 = vst [vmem:[%s1300_s4 + $0x8] sm:$0xff] %v796_v46 }
 0x115 PF: > { %s14_s17 = sadd.s32 1, %s991_s17   ;;  %s1301_s15 = smov %s987_s16 }
 0x116   : > { %p11_p8 = scmp.ge.s32.totalorder %s14_s17, 5   ;;  %s1302_s16 = smov %s1304_s18 }
 0x118   :  { %13 = sbr.rel (!%p11_p8) target bundleno = 2 (0x2), region = 83 }

// kernel: encoder_forward.37
= control target key start
LH: loop header
LB: loop body
LE: loop exit
PB: predicated region body
PF: predicated region fallthrough
CT: control target
= control target key end

     0   :  { %9 = vsyncpa [#allocation4], 0  ;;  %s2126_s0 = inlined_call_operand.vmem [shape: f32[8,2304], index: 0, kind: input, shape index: {}]   ;;  %s2127_s1 = inlined_call_operand.hbm [shape: f32[2304,512], index: 1, kind: input, shape index: {}]   ;;  %s2128_s2 = inlined_call_operand.vmem [shape: f32[1,512], index: 2, kind: input, shape index: {}]   ;;  %s2129_s3 = inlined_call_operand.vmem [shape: f32[1,512], index: 3, kind: input, shape index: {}]   ;;  %s2130_s4 = inlined_call_operand.vmem [shape: f32[8,512], index: 4, kind: output, shape index: {}]  }
   0x1   :  { %11 = vsyncpa [#allocation4 + $0x1], 0  ;;  %s1595_s15 = smov 0   ;;  %s1597_s16 = smov 0  }
   0x2   :  { %s1599_s17 = smov 0   ;;  %s1601_s18 = smov 0  }
   0x3   :  { %s1603_s19 = smov 0   ;;  %s1605_s20 = smov 0  }
   0x4 LB: > { %s1402_s21 = sadd.s32 4294967295, %s1565_s20   ;;  %s29_s22 = sadd.s32 1, %s1561_s19  ;;  %s1565_s20 = sphi %s1605_s20, %s17_s20   ;;  %s1561_s19 = sphi %s1603_s19, %s2136_s19   ;;  %s1557_s18 = sphi %s1601_s18, %s2135_s18   ;;  %s1553_s17 = sphi %s1599_s17, %s2134_s17   ;;  %s1549_s16 = sphi %s1597_s16, %s2133_s16   ;;  %s1545_s15 = sphi %s1595_s15, %s2132_s15  }
   0x5   : > { %p30_p0 = scmp.ge.s32.totalorder %s29_s22, 3  ;;  %s73_s23 = sadd.s32 1, %s1553_s17 }
   0x6   : > { %p80_p1 = scmp.ne.s32.totalorder %s1553_s17, %s1549_s16  ;;  %p81_p2 = scmp.eq.s32.totalorder %s1565_s20, 0 }
   0x7   : > { %s2138_s22 = smov (%p30_p0, %s29_s22), 0  ;;  %p86_p4 = scmp.ne.s32.totalorder %s1549_s16, %s1545_s15 }
   0x8   : > { %p82_p3 = por %p81_p2, %p80_p1  ;;  %s68_s24 = ssub.s32 %s1561_s19, %s2138_s22 }
   0x9   : > { %p87_p5 = scmp.eq.s32.totalorder %s1402_s21, 0  ;;  %p71_p6 = scmp.eq.s32.totalorder %s68_s24, 0 }
   0xa   : > { %p1428_p8 = scmp.lt.s32.totalorder %s1565_s20, 3  ;;  %s219_s27 = sand.u32 1, %s1553_s17  }
   0xb   : > { %p1634_p7 = por %p87_p5, %p86_p4  ;;  %s1419_s28 = smul.u32 3072, %s1561_s19 }
   0xc   : > { %s1640_s26 = scalar_select %p71_p6, %s1553_s17, %s73_s23  }
   0xd   : > { %s1420_s29 = smul.u32 3072, %s219_s27  ;;  %s231_s6 = scalar_lea.hbm %s2127_s1, %s1419_s28 }
   0xe   : > { %p1425_p9 = pnand %p1428_p8, %p82_p3  ;;  %s232_s7 = sshll.u32 %s231_s6, 4  ;;  %s233_s7 = int_to_ptr.hbm [resolvable:$true] %s232_s7 }
   0xf   : > { %s223_s8 = scalar_lea.vmem [#allocation3], %s1420_s29  ;;  %s220_s10 = scalar_lea.sflag [#allocation4], %s219_s27 }
  0x10   : > { %s234_s9 = sshll.u32 %s223_s8, 4  ;;  %s1567_s11 = smov 512   ;;  %s235_s9 = int_to_ptr.vmem [resolvable:$true] %s234_s9 }
  0x11   : > { %s1568_s12 = smov 32   ;;  %p1409_p10 = scmp.ge.s32.totalorder %s1565_s20, 1 }
  0x12   : > { %1427 = dma.hbm_to_vmem [thread:$0]  (!%p1425_p9), %s233_s7, 49152, %s235_s9, %s220_s10, %s1567_s11, %s1567_s11, %s1568_s12  }
  0x13   : > { %p242_p11 = scmp.lt.s32.totalorder %s1565_s20, 4 }
  0x15   : > { %p243_p12 = pnand %p1409_p10, %p242_p11 }
  0x16   : > { %s248_s13 = sand.u32 (!%p243_p12), 1, %s1549_s16  }
  0x17   : > { %246 = sbr.rel (%p243_p12) target bundleno = 428 (0x1ac), region = 36  ;;  %s249_s15 = scalar_lea.sflag (!%p243_p12), [#allocation4], %s248_s13 }
  0x18   : > { %s1421_s14 = smul.u32 (!%p243_p12), 3072, %s248_s13 }
  0x1a   : > { %s1650_s21 = scalar_lea.vmem (!%p243_p12), [#allocation3], %s1421_s14 }
  0x1c   : > { %1540 = dma.done.wait (%p1634_p7), %s249_s15, 49152  }
  0x1d   : > { %1542 = vsyncadd (%p1634_p7), %s249_s15, 4294918144  ;;  %s299_s23 = smul.u32 6, %s1557_s18  ;;  %p1411_p0 = scmp.ne.s32.totalorder %s1557_s18, 0 }
  0x1f   : > { %p302_p13 = scmp.lt.s32.totalorder %s299_s23, 17  ;;  %334 = sbr.rel (%p1411_p0) target bundleno = 41 (0x29), region = 44 }
  0x21   : > { %s2140_s23 = smov (!%p302_p13, %s299_s23), 17 }
  0x22   : > { %s1410_s24 = sshll.u32 %s2140_s23, 3 }
  0x23   : > { %s1660_s29 = scalar_lea.vmem %s2126_s0, %s1410_s24 }
  0x24   : > { %v1569_v0 = vmov 0.0  }
  0x25   : > { %335 = vst [vmem:[#allocation2 + $0x10] sm:$0xff] %v1569_v0 }
  0x26   : > { %336 = vst [vmem:[#allocation2] sm:$0xff] %v1569_v0 }
  0x27   : > { %337 = vst [vmem:[#allocation2 + $0x18] sm:$0xff] %v1569_v0 }
  0x28   : > { %338 = vst [vmem:[#allocation2 + $0x8] sm:$0xff] %v1569_v0 }
  0x29 PF: > { %v409_v1 = vld [vmem:[%s1650_s21 + $0x1e0] sm:$0xff]  ;;  %v410_v0 = vld [vmem:[%s1650_s21 + $0x1e8] sm:$0xff]  ;;  %p1412_p1 = scmp.ne.s32.totalorder %s1557_s18, 2 }
  0x2a   : > { %v537_v2 = vld [vmem:[%s1650_s21 + $0x5e0] sm:$0xff]  ;;  %733 = vmatpush.msra.mxu0 %v409_v1 }
  0x2b   : > { %v405_v3 = vld [vmem:[%s1650_s21 + $0x1c0] sm:$0xff]  ;;  %773 = vmatpush.msra.mxu2 %v537_v2 }
  0x2c   : > { %v473_v4 = vld [vmem:[%s1650_s21 + $0x3e0] sm:$0xff]  ;;  %734 = vmatpush.msra.mxu0 %v405_v3 }
  0x2d   : > { %v533_v5 = vld [vmem:[%s1650_s21 + $0x5c0] sm:$0xff]  ;;  %753 = vmatpush.msra.mxu1 %v473_v4 }
  0x2e   : > { %v601_v6 = vld [vmem:[%s1650_s21 + $0x7e0] sm:$0xff]  ;;  %774 = vmatpush.msra.mxu2 %v533_v5  ;;  %v406_v5 = vld [vmem:[%s1650_s21 + $0x1c8] sm:$0xff] }
  0x2f   : > { %793 = vmatpush.msra.mxu3 %v601_v6  ;;  %v401_v7 = vld [vmem:[%s1650_s21 + $0x1a0] sm:$0xff]  ;;  %v474_v6 = vld [vmem:[%s1650_s21 + $0x3e8] sm:$0xff] }
  0x30   : > { %v469_v8 = vld [vmem:[%s1650_s21 + $0x3c0] sm:$0xff]  ;;  %735 = vmatpush.msra.mxu0 %v401_v7 }
  0x31   : > { %v529_v9 = vld [vmem:[%s1650_s21 + $0x5a0] sm:$0xff]  ;;  %754 = vmatpush.msra.mxu1 %v469_v8 }
  0x32   : > { %v597_v10 = vld [vmem:[%s1650_s21 + $0x7c0] sm:$0xff]  ;;  %775 = vmatpush.msra.mxu2 %v529_v9  ;;  %v402_v9 = vld [vmem:[%s1650_s21 + $0x1a8] sm:$0xff] }
  0x33   : > { %v465_v11 = vld [vmem:[%s1650_s21 + $0x3a0] sm:$0xff]  ;;  %794 = vmatpush.msra.mxu3 %v597_v10  ;;  %v470_v10 = vld [vmem:[%s1650_s21 + $0x3c8] sm:$0xff] }
  0x34   : > { %v397_v12 = vld [vmem:[%s1650_s21 + $0x180] sm:$0xff]  ;;  %755 = vmatpush.msra.mxu1 %v465_v11 }
  0x35   : > { %v525_v13 = vld [vmem:[%s1650_s21 + $0x580] sm:$0xff]  ;;  %736 = vmatpush.msra.mxu0 %v397_v12 }
  0x36   : > { %v593_v14 = vld [vmem:[%s1650_s21 + $0x7a0] sm:$0xff]  ;;  %776 = vmatpush.msra.mxu2 %v525_v13  ;;  %v398_v13 = vld [vmem:[%s1650_s21 + $0x188] sm:$0xff] }
  0x37   : > { %v461_v15 = vld [vmem:[%s1650_s21 + $0x380] sm:$0xff]  ;;  %795 = vmatpush.msra.mxu3 %v593_v14  ;;  %v466_v14 = vld [vmem:[%s1650_s21 + $0x3a8] sm:$0xff] }
  0x38   : > { %v589_v16 = vld [vmem:[%s1650_s21 + $0x780] sm:$0xff]  ;;  %756 = vmatpush.msra.mxu1 %v461_v15 }
  0x39   : > { %v393_v17 = vld [vmem:[%s1650_s21 + $0x160] sm:$0xff]  ;;  %796 = vmatpush.msra.mxu3 %v589_v16 }
  0x3a   : > { %v521_v18 = vld [vmem:[%s1650_s21 + $0x560] sm:$0xff]  ;;  %737 = vmatpush.msra.mxu0 %v393_v17  ;;  %v394_v17 = vld [vmem:[%s1650_s21 + $0x168] sm:$0xff] }
  0x3b   : > { %v457_v19 = vld [vmem:[%s1650_s21 + $0x360] sm:$0xff]  ;;  %777 = vmatpush.msra.mxu2 %v521_v18  ;;  %v462_v18 = vld [vmem:[%s1650_s21 + $0x388] sm:$0xff] }
  0x3c   : > { %v585_v20 = vld [vmem:[%s1650_s21 + $0x760] sm:$0xff]  ;;  %757 = vmatpush.msra.mxu1 %v457_v19 }
  0x3d   : > { %v389_v21 = vld [vmem:[%s1650_s21 + $0x140] sm:$0xff]  ;;  %797 = vmatpush.msra.mxu3 %v585_v20 }
  0x3e   : > { %v517_v22 = vld [vmem:[%s1650_s21 + $0x540] sm:$0xff]  ;;  %738 = vmatpush.msra.mxu0 %v389_v21  ;;  %v390_v21 = vld [vmem:[%s1650_s21 + $0x148] sm:$0xff] }
  0x3f   : > { %v453_v23 = vld [vmem:[%s1650_s21 + $0x340] sm:$0xff]  ;;  %778 = vmatpush.msra.mxu2 %v517_v22  ;;  %v458_v22 = vld [vmem:[%s1650_s21 + $0x368] sm:$0xff] }
  0x40   : > { %v581_v24 = vld [vmem:[%s1650_s21 + $0x740] sm:$0xff]  ;;  %758 = vmatpush.msra.mxu1 %v453_v23 }
  0x41   : > { %v385_v25 = vld [vmem:[%s1650_s21 + $0x120] sm:$0xff]  ;;  %798 = vmatpush.msra.mxu3 %v581_v24 }
  0x42   : > { %v513_v26 = vld [vmem:[%s1650_s21 + $0x520] sm:$0xff]  ;;  %739 = vmatpush.msra.mxu0 %v385_v25  ;;  %v386_v25 = vld [vmem:[%s1650_s21 + $0x128] sm:$0xff] }
  0x43   : > { %v449_v27 = vld [vmem:[%s1650_s21 + $0x320] sm:$0xff]  ;;  %779 = vmatpush.msra.mxu2 %v513_v26  ;;  %v454_v26 = vld [vmem:[%s1650_s21 + $0x348] sm:$0xff] }
  0x44   : > { %v577_v28 = vld [vmem:[%s1650_s21 + $0x720] sm:$0xff]  ;;  %759 = vmatpush.msra.mxu1 %v449_v27 }
  0x45   : > { %v381_v29 = vld [vmem:[%s1650_s21 + $0x100] sm:$0xff]  ;;  %799 = vmatpush.msra.mxu3 %v577_v28 }
  0x46   : > { %v509_v30 = vld [vmem:[%s1650_s21 + $0x500] sm:$0xff]  ;;  %740 = vmatpush.msra.mxu0 %v381_v29  ;;  %v382_v29 = vld [vmem:[%s1650_s21 + $0x108] sm:$0xff] }
  0x47   : > { %v445_v31 = vld [vmem:[%s1650_s21 + $0x300] sm:$0xff]  ;;  %780 = vmatpush.msra.mxu2 %v509_v30  ;;  %v450_v30 = vld [vmem:[%s1650_s21 + $0x328] sm:$0xff] }
  0x48   : > { %v573_v32 = vld [vmem:[%s1650_s21 + $0x700] sm:$0xff]  ;;  %760 = vmatpush.msra.mxu1 %v445_v31 }
  0x49   : > { %v377_v33 = vld [vmem:[%s1650_s21 + $0xe0] sm:$0xff]  ;;  %800 = vmatpush.msra.mxu3 %v573_v32 }
  0x4a   : > { %v505_v34 = vld [vmem:[%s1650_s21 + $0x4e0] sm:$0xff]  ;;  %741 = vmatpush.msra.mxu0 %v377_v33  ;;  %v378_v33 = vld [vmem:[%s1650_s21 + $0xe8] sm:$0xff] }
  0x4b   : > { %v441_v35 = vld [vmem:[%s1650_s21 + $0x2e0] sm:$0xff]  ;;  %781 = vmatpush.msra.mxu2 %v505_v34  ;;  %v446_v34 = vld [vmem:[%s1650_s21 + $0x308] sm:$0xff] }
  0x4c   : > { %v569_v36 = vld [vmem:[%s1650_s21 + $0x6e0] sm:$0xff]  ;;  %761 = vmatpush.msra.mxu1 %v441_v35 }
  0x4d   : > { %v373_v37 = vld [vmem:[%s1650_s21 + $0xc0] sm:$0xff]  ;;  %801 = vmatpush.msra.mxu3 %v569_v36 }
  0x4e   : > { %v501_v38 = vld [vmem:[%s1650_s21 + $0x4c0] sm:$0xff]  ;;  %742 = vmatpush.msra.mxu0 %v373_v37  ;;  %v374_v37 = vld [vmem:[%s1650_s21 + $0xc8] sm:$0xff] }
  0x4f   : > { %v437_v39 = vld [vmem:[%s1650_s21 + $0x2c0] sm:$0xff]  ;;  %782 = vmatpush.msra.mxu2 %v501_v38  ;;  %v442_v38 = vld [vmem:[%s1650_s21 + $0x2e8] sm:$0xff] }
  0x50   : > { %v565_v40 = vld [vmem:[%s1650_s21 + $0x6c0] sm:$0xff]  ;;  %762 = vmatpush.msra.mxu1 %v437_v39 }
  0x51   : > { %v369_v41 = vld [vmem:[%s1650_s21 + $0xa0] sm:$0xff]  ;;  %802 = vmatpush.msra.mxu3 %v565_v40 }
  0x52   : > { %v497_v42 = vld [vmem:[%s1650_s21 + $0x4a0] sm:$0xff]  ;;  %743 = vmatpush.msra.mxu0 %v369_v41  ;;  %v370_v41 = vld [vmem:[%s1650_s21 + $0xa8] sm:$0xff] }
  0x53   : > { %v433_v43 = vld [vmem:[%s1650_s21 + $0x2a0] sm:$0xff]  ;;  %783 = vmatpush.msra.mxu2 %v497_v42  ;;  %v438_v42 = vld [vmem:[%s1650_s21 + $0x2c8] sm:$0xff] }
  0x54   : > { %v561_v44 = vld [vmem:[%s1650_s21 + $0x6a0] sm:$0xff]  ;;  %763 = vmatpush.msra.mxu1 %v433_v43 }
  0x55   : > { %v365_v45 = vld [vmem:[%s1650_s21 + $0x80] sm:$0xff]  ;;  %803 = vmatpush.msra.mxu3 %v561_v44 }
  0x56   : > { %v493_v46 = vld [vmem:[%s1650_s21 + $0x480] sm:$0xff]  ;;  %744 = vmatpush.msra.mxu0 %v365_v45  ;;  %v366_v45 = vld [vmem:[%s1650_s21 + $0x88] sm:$0xff] }
  0x57   : > { %v429_v47 = vld [vmem:[%s1650_s21 + $0x280] sm:$0xff]  ;;  %784 = vmatpush.msra.mxu2 %v493_v46  ;;  %v434_v46 = vld [vmem:[%s1650_s21 + $0x2a8] sm:$0xff] }
  0x58   : > { %v557_v48 = vld [vmem:[%s1650_s21 + $0x680] sm:$0xff]  ;;  %764 = vmatpush.msra.mxu1 %v429_v47 }
  0x59   : > { %v361_v49 = vld [vmem:[%s1650_s21 + $0x60] sm:$0xff]  ;;  %804 = vmatpush.msra.mxu3 %v557_v48 }
  0x5a   : > { %v489_v50 = vld [vmem:[%s1650_s21 + $0x460] sm:$0xff]  ;;  %745 = vmatpush.msra.mxu0 %v361_v49  ;;  %v362_v49 = vld [vmem:[%s1650_s21 + $0x68] sm:$0xff] }
  0x5b   : > { %v425_v51 = vld [vmem:[%s1650_s21 + $0x260] sm:$0xff]  ;;  %785 = vmatpush.msra.mxu2 %v489_v50  ;;  %v430_v50 = vld [vmem:[%s1650_s21 + $0x288] sm:$0xff] }
  0x5c   : > { %v553_v52 = vld [vmem:[%s1650_s21 + $0x660] sm:$0xff]  ;;  %765 = vmatpush.msra.mxu1 %v425_v51 }
  0x5d   : > { %v357_v53 = vld [vmem:[%s1650_s21 + $0x40] sm:$0xff]  ;;  %805 = vmatpush.msra.mxu3 %v553_v52 }
  0x5e   : > { %v485_v54 = vld [vmem:[%s1650_s21 + $0x440] sm:$0xff]  ;;  %746 = vmatpush.msra.mxu0 %v357_v53  ;;  %v358_v53 = vld [vmem:[%s1650_s21 + $0x48] sm:$0xff] }
  0x5f   : > { %v421_v55 = vld [vmem:[%s1650_s21 + $0x240] sm:$0xff]  ;;  %786 = vmatpush.msra.mxu2 %v485_v54  ;;  %v426_v54 = vld [vmem:[%s1650_s21 + $0x268] sm:$0xff] }
  0x60   : > { %v549_v56 = vld [vmem:[%s1650_s21 + $0x640] sm:$0xff]  ;;  %766 = vmatpush.msra.mxu1 %v421_v55 }
  0x61   : > { %v353_v57 = vld [vmem:[%s1650_s21 + $0x20] sm:$0xff]  ;;  %806 = vmatpush.msra.mxu3 %v549_v56 }
  0x62   : > { %v481_v58 = vld [vmem:[%s1650_s21 + $0x420] sm:$0xff]  ;;  %747 = vmatpush.msra.mxu0 %v353_v57  ;;  %v354_v57 = vld [vmem:[%s1650_s21 + $0x28] sm:$0xff] }
  0x63   : > { %v417_v59 = vld [vmem:[%s1650_s21 + $0x220] sm:$0xff]  ;;  %787 = vmatpush.msra.mxu2 %v481_v58  ;;  %v422_v58 = vld [vmem:[%s1650_s21 + $0x248] sm:$0xff] }
  0x64   : > { %v545_v60 = vld [vmem:[%s1650_s21 + $0x620] sm:$0xff]  ;;  %767 = vmatpush.msra.mxu1 %v417_v59  ;;  %v1786_v59 = vld [vmem:[%s1660_s29 + $0x10] sm:$0xff] }
  0x65   : > { %v349_v61 = vld [vmem:[%s1650_s21] sm:$0xff]  ;;  %807 = vmatpush.msra.mxu3 %v545_v60 }
  0x66   : > { %v477_v62 = vld [vmem:[%s1650_s21 + $0x400] sm:$0xff]  ;;  %748 = vmatpush.msra.mxu0 %v349_v61 }
  0x67   : > { %v665_v63 = vld [vmem:[%s1650_s21 + $0x9e0] sm:$0xff]  ;;  %788 = vmatpush.msra.mxu2 %v477_v62  ;;  %v350_v62 = vld [vmem:[%s1650_s21 + $0x8] sm:$0xff] }
  0x68   : > { %v413_v1 = vld [vmem:[%s1650_s21 + $0x200] sm:$0xff]  ;;  %813 = vmatpush.msrb.mxu0 %v665_v63  ;;  %v418_v63 = vld [vmem:[%s1650_s21 + $0x228] sm:$0xff]  ;;  %789 = vmatmul.f32.vlgmr.msra.gmra.mxu2 %v1786_v59 }
  0x69   : > { %v541_v2 = vld [vmem:[%s1650_s21 + $0x600] sm:$0xff]  ;;  %853 = vmatpush.msrb.mxu2 %v410_v0  ;;  %768 = vmatpush.msra.mxu1 %v413_v1  ;;  %v1797_v1 = vld [vmem:[%s1660_s29 + $0x18] sm:$0xff] }
  0x6a   : > { %v661_v3 = vld [vmem:[%s1650_s21 + $0x9c0] sm:$0xff]  ;;  %808 = vmatpush.msra.mxu3 %v541_v2  ;;  %v538_v2 = vld [vmem:[%s1650_s21 + $0x5e8] sm:$0xff] }
  0x6b   : > { %v729_v4 = vld [vmem:[%s1650_s21 + $0xbe0] sm:$0xff]  ;;  %814 = vmatpush.msrb.mxu0 %v661_v3  ;;  %854 = vmatpush.msrb.mxu2 %v406_v5  ;;  %v666_v3 = vld [vmem:[%s1650_s21 + $0x9e8] sm:$0xff] }
  0x6c   : > { %v657_v7 = vld [vmem:[%s1650_s21 + $0x9a0] sm:$0xff]  ;;  %833 = vmatpush.msrb.mxu1 %v729_v4  ;;  %873 = vmatpush.msrb.mxu3 %v474_v6  ;;  %v414_v5 = vld [vmem:[%s1650_s21 + $0x208] sm:$0xff] }
  0x6d   : > { %v725_v8 = vld [vmem:[%s1650_s21 + $0xbc0] sm:$0xff]  ;;  %815 = vmatpush.msrb.mxu0 %v657_v7  ;;  %855 = vmatpush.msrb.mxu2 %v402_v9  ;;  %v1805_v6 = vld [vmem:[%s1660_s29 + $0x8] sm:$0xff] }
  0x6e   : > { %v653_v11 = vld [vmem:[%s1650_s21 + $0x980] sm:$0xff]  ;;  %834 = vmatpush.msrb.mxu1 %v725_v8  ;;  %874 = vmatpush.msrb.mxu3 %v470_v10  ;;  %v534_v7 = vld [vmem:[%s1650_s21 + $0x5c8] sm:$0xff] }
  0x6f   : > { %v721_v12 = vld [vmem:[%s1650_s21 + $0xba0] sm:$0xff]  ;;  %816 = vmatpush.msrb.mxu0 %v653_v11  ;;  %856 = vmatpush.msrb.mxu2 %v398_v13  ;;  %v602_v8 = vld [vmem:[%s1650_s21 + $0x7e8] sm:$0xff] }
  0x70   : > { %v649_v15 = vld [vmem:[%s1650_s21 + $0x960] sm:$0xff]  ;;  %835 = vmatpush.msrb.mxu1 %v721_v12  ;;  %875 = vmatpush.msrb.mxu3 %v466_v14  ;;  %v662_v9 = vld [vmem:[%s1650_s21 + $0x9c8] sm:$0xff] }
  0x71   : > { %v717_v16 = vld [vmem:[%s1650_s21 + $0xb80] sm:$0xff]  ;;  %817 = vmatpush.msrb.mxu0 %v649_v15  ;;  %857 = vmatpush.msrb.mxu2 %v394_v17  ;;  %v730_v10 = vld [vmem:[%s1650_s21 + $0xbe8] sm:$0xff] }
  0x72   : > { %v645_v19 = vld [vmem:[%s1650_s21 + $0x940] sm:$0xff]  ;;  %836 = vmatpush.msrb.mxu1 %v717_v16  ;;  %876 = vmatpush.msrb.mxu3 %v462_v18  ;;  %v530_v11 = vld [vmem:[%s1650_s21 + $0x5a8] sm:$0xff] }
  0x73   : > { %v713_v20 = vld [vmem:[%s1650_s21 + $0xb60] sm:$0xff]  ;;  %818 = vmatpush.msrb.mxu0 %v645_v19  ;;  %858 = vmatpush.msrb.mxu2 %v390_v21  ;;  %v598_v12 = vld [vmem:[%s1650_s21 + $0x7c8] sm:$0xff] }
  0x74   : > { %v641_v23 = vld [vmem:[%s1650_s21 + $0x920] sm:$0xff]  ;;  %837 = vmatpush.msrb.mxu1 %v713_v20  ;;  %877 = vmatpush.msrb.mxu3 %v458_v22  ;;  %v658_v13 = vld [vmem:[%s1650_s21 + $0x9a8] sm:$0xff] }
  0x75   : > { %v709_v24 = vld [vmem:[%s1650_s21 + $0xb40] sm:$0xff]  ;;  %819 = vmatpush.msrb.mxu0 %v641_v23  ;;  %859 = vmatpush.msrb.mxu2 %v386_v25  ;;  %v726_v14 = vld [vmem:[%s1650_s21 + $0xbc8] sm:$0xff] }
  0x76   : > { %v637_v27 = vld [vmem:[%s1650_s21 + $0x900] sm:$0xff]  ;;  %838 = vmatpush.msrb.mxu1 %v709_v24  ;;  %878 = vmatpush.msrb.mxu3 %v454_v26  ;;  %v526_v15 = vld [vmem:[%s1650_s21 + $0x588] sm:$0xff] }
  0x77   : > { %v705_v28 = vld [vmem:[%s1650_s21 + $0xb20] sm:$0xff]  ;;  %820 = vmatpush.msrb.mxu0 %v637_v27  ;;  %860 = vmatpush.msrb.mxu2 %v382_v29  ;;  %v594_v16 = vld [vmem:[%s1650_s21 + $0x7a8] sm:$0xff] }
  0x78   : > { %v633_v31 = vld [vmem:[%s1650_s21 + $0x8e0] sm:$0xff]  ;;  %839 = vmatpush.msrb.mxu1 %v705_v28  ;;  %879 = vmatpush.msrb.mxu3 %v450_v30  ;;  %v654_v17 = vld [vmem:[%s1650_s21 + $0x988] sm:$0xff] }
  0x79   : > { %v701_v32 = vld [vmem:[%s1650_s21 + $0xb00] sm:$0xff]  ;;  %821 = vmatpush.msrb.mxu0 %v633_v31  ;;  %861 = vmatpush.msrb.mxu2 %v378_v33  ;;  %v722_v18 = vld [vmem:[%s1650_s21 + $0xba8] sm:$0xff] }
  0x7a   : > { %v629_v35 = vld [vmem:[%s1650_s21 + $0x8c0] sm:$0xff]  ;;  %840 = vmatpush.msrb.mxu1 %v701_v32  ;;  %880 = vmatpush.msrb.mxu3 %v446_v34  ;;  %v590_v20 = vld [vmem:[%s1650_s21 + $0x788] sm:$0xff] }
  0x7b   : > { %v697_v36 = vld [vmem:[%s1650_s21 + $0xae0] sm:$0xff]  ;;  %822 = vmatpush.msrb.mxu0 %v629_v35  ;;  %862 = vmatpush.msrb.mxu2 %v374_v37  ;;  %v522_v21 = vld [vmem:[%s1650_s21 + $0x568] sm:$0xff] }
  0x7c   : > { %v625_v39 = vld [vmem:[%s1650_s21 + $0x8a0] sm:$0xff]  ;;  %841 = vmatpush.msrb.mxu1 %v697_v36  ;;  %881 = vmatpush.msrb.mxu3 %v442_v38  ;;  %v650_v22 = vld [vmem:[%s1650_s21 + $0x968] sm:$0xff] }
  0x7d   : > { %v693_v40 = vld [vmem:[%s1650_s21 + $0xac0] sm:$0xff]  ;;  %823 = vmatpush.msrb.mxu0 %v625_v39  ;;  %863 = vmatpush.msrb.mxu2 %v370_v41  ;;  %v718_v23 = vld [vmem:[%s1650_s21 + $0xb88] sm:$0xff] }
  0x7e   : > { %v621_v43 = vld [vmem:[%s1650_s21 + $0x880] sm:$0xff]  ;;  %842 = vmatpush.msrb.mxu1 %v693_v40  ;;  %882 = vmatpush.msrb.mxu3 %v438_v42  ;;  %v1829_v24 = vld [vmem:[%s1660_s29 + $0x28] sm:$0xff] }
  0x7f   : > { %v689_v44 = vld [vmem:[%s1650_s21 + $0xaa0] sm:$0xff]  ;;  %824 = vmatpush.msrb.mxu0 %v621_v43  ;;  %864 = vmatpush.msrb.mxu2 %v366_v45  ;;  %v518_v25 = vld [vmem:[%s1650_s21 + $0x548] sm:$0xff] }
  0x80   : > { %v617_v47 = vld [vmem:[%s1650_s21 + $0x860] sm:$0xff]  ;;  %843 = vmatpush.msrb.mxu1 %v689_v44  ;;  %883 = vmatpush.msrb.mxu3 %v434_v46  ;;  %v586_v26 = vld [vmem:[%s1650_s21 + $0x768] sm:$0xff] }
  0x81   : > { %v685_v48 = vld [vmem:[%s1650_s21 + $0xa80] sm:$0xff]  ;;  %825 = vmatpush.msrb.mxu0 %v617_v47  ;;  %865 = vmatpush.msrb.mxu2 %v362_v49  ;;  %v646_v27 = vld [vmem:[%s1650_s21 + $0x948] sm:$0xff] }
  0x82   : > { %v613_v51 = vld [vmem:[%s1650_s21 + $0x840] sm:$0xff]  ;;  %844 = vmatpush.msrb.mxu1 %v685_v48  ;;  %884 = vmatpush.msrb.mxu3 %v430_v50  ;;  %v714_v28 = vld [vmem:[%s1650_s21 + $0xb68] sm:$0xff] }
  0x83   : > { %v681_v52 = vld [vmem:[%s1650_s21 + $0xa60] sm:$0xff]  ;;  %826 = vmatpush.msrb.mxu0 %v613_v51  ;;  %866 = vmatpush.msrb.mxu2 %v358_v53  ;;  %v514_v29 = vld [vmem:[%s1650_s21 + $0x528] sm:$0xff] }
  0x84   : > { %v609_v55 = vld [vmem:[%s1650_s21 + $0x820] sm:$0xff]  ;;  %845 = vmatpush.msrb.mxu1 %v681_v52  ;;  %885 = vmatpush.msrb.mxu3 %v426_v54  ;;  %v582_v30 = vld [vmem:[%s1650_s21 + $0x748] sm:$0xff] }
  0x85   : > { %v677_v56 = vld [vmem:[%s1650_s21 + $0xa40] sm:$0xff]  ;;  %827 = vmatpush.msrb.mxu0 %v609_v55  ;;  %867 = vmatpush.msrb.mxu2 %v354_v57  ;;  %v642_v31 = vld [vmem:[%s1650_s21 + $0x928] sm:$0xff] }
  0x86   : > { %v605_v60 = vld [vmem:[%s1650_s21 + $0x800] sm:$0xff]  ;;  %846 = vmatpush.msrb.mxu1 %v677_v56  ;;  %886 = vmatpush.msrb.mxu3 %v422_v58  ;;  %v710_v32 = vld [vmem:[%s1650_s21 + $0xb48] sm:$0xff] }
  0x87   : > { %v673_v61 = vld [vmem:[%s1650_s21 + $0xa20] sm:$0xff]  ;;  %828 = vmatpush.msrb.mxu0 %v605_v60  ;;  %868 = vmatpush.msrb.mxu2 %v350_v62  ;;  %v510_v33 = vld [vmem:[%s1650_s21 + $0x508] sm:$0xff] }
  0x88   : > { %v1793_v0 = vld [vmem:[%s1660_s29] sm:$0xff]  ;;  %847 = vmatpush.msrb.mxu1 %v673_v61  ;;  %887 = vmatpush.msrb.mxu3 %v418_v63  ;;  %v578_v34 = vld [vmem:[%s1650_s21 + $0x728] sm:$0xff] }
  0x89   : > { %v669_v4 = vld [vmem:[%s1650_s21 + $0xa00] sm:$0xff]  ;;  %749 = vmatmul.f32.vlgmr.msra.gmra.mxu0 %v1793_v0  ;;  %809 = vmatmul.f32.vlgmr.msra.gmra.mxu3 %v1797_v1  ;;  %v638_v35 = vld [vmem:[%s1650_s21 + $0x908] sm:$0xff] }
  0x8a   : > { %893 = vmatpush.msra.mxu0 %v538_v2  ;;  %933 = vmatpush.msra.mxu2 %v666_v3  ;;  %v1822_v19 = vld [vmem:[%s1660_s29 + $0x20] sm:$0xff]  ;;  %v706_v36 = vld [vmem:[%s1650_s21 + $0xb28] sm:$0xff] }
  0x8b   : > { %848 = vmatpush.msrb.mxu1 %v669_v4  ;;  %888 = vmatpush.msrb.mxu3 %v414_v5  ;;  %v506_v37 = vld [vmem:[%s1650_s21 + $0x4e8] sm:$0xff] }
  0x8c   : > { %769 = vmatmul.f32.vlgmr.msra.gmra.mxu1 %v1805_v6  ;;  %894 = vmatpush.msra.mxu0 %v534_v7  ;;  %v574_v38 = vld [vmem:[%s1650_s21 + $0x708] sm:$0xff] }
  0x8d   : > { %913 = vmatpush.msra.mxu1 %v602_v8  ;;  %934 = vmatpush.msra.mxu2 %v662_v9  ;;  %v634_v39 = vld [vmem:[%s1650_s21 + $0x8e8] sm:$0xff]  ;;  %v411_v9 = vld [vmem:[%s1650_s21 + $0x1f0] sm:$0xff] }
  0x8e   : > { %953 = vmatpush.msra.mxu3 %v730_v10  ;;  %895 = vmatpush.msra.mxu0 %v530_v11  ;;  %v702_v40 = vld [vmem:[%s1650_s21 + $0xb08] sm:$0xff]  ;;  %v539_v10 = vld [vmem:[%s1650_s21 + $0x5f0] sm:$0xff] }
  0x8f   : > { %914 = vmatpush.msra.mxu1 %v598_v12  ;;  %935 = vmatpush.msra.mxu2 %v658_v13  ;;  %v502_v41 = vld [vmem:[%s1650_s21 + $0x4c8] sm:$0xff]  ;;  %v407_v13 = vld [vmem:[%s1650_s21 + $0x1d0] sm:$0xff] }
  0x90   : > { %954 = vmatpush.msra.mxu3 %v726_v14  ;;  %896 = vmatpush.msra.mxu0 %v526_v15  ;;  %v570_v42 = vld [vmem:[%s1650_s21 + $0x6e8] sm:$0xff]  ;;  %v475_v14 = vld [vmem:[%s1650_s21 + $0x3f0] sm:$0xff] }
  0x91   : > { %915 = vmatpush.msra.mxu1 %v594_v16  ;;  %936 = vmatpush.msra.mxu2 %v654_v17  ;;  %v630_v43 = vld [vmem:[%s1650_s21 + $0x8c8] sm:$0xff]  ;;  %v535_v15 = vld [vmem:[%s1650_s21 + $0x5d0] sm:$0xff] }
  0x92   : > { %955 = vmatpush.msra.mxu3 %v722_v18  ;;  %829 = vmatmul.f32.vlgmr.msrb.gmra.mxu0 %v1822_v19  ;;  %v698_v44 = vld [vmem:[%s1650_s21 + $0xae8] sm:$0xff]  ;;  %v603_v16 = vld [vmem:[%s1650_s21 + $0x7f0] sm:$0xff] }
  0x93   : > { %916 = vmatpush.msra.mxu1 %v590_v20  ;;  %897 = vmatpush.msra.mxu0 %v522_v21  ;;  %v498_v45 = vld [vmem:[%s1650_s21 + $0x4a8] sm:$0xff]  ;;  %v403_v17 = vld [vmem:[%s1650_s21 + $0x1b0] sm:$0xff] }
  0x94   : > { %937 = vmatpush.msra.mxu2 %v650_v22  ;;  %956 = vmatpush.msra.mxu3 %v718_v23  ;;  %v566_v46 = vld [vmem:[%s1650_s21 + $0x6c8] sm:$0xff]  ;;  %v471_v18 = vld [vmem:[%s1650_s21 + $0x3d0] sm:$0xff] }
  0x95   : > { %849 = vmatmul.f32.vlgmr.msrb.gmra.mxu1 %v1829_v24  ;;  %898 = vmatpush.msra.mxu0 %v518_v25  ;;  %v626_v47 = vld [vmem:[%s1650_s21 + $0x8a8] sm:$0xff]  ;;  %v531_v20 = vld [vmem:[%s1650_s21 + $0x5b0] sm:$0xff] }
  0x96   : > { %917 = vmatpush.msra.mxu1 %v586_v26  ;;  %938 = vmatpush.msra.mxu2 %v646_v27  ;;  %v694_v48 = vld [vmem:[%s1650_s21 + $0xac8] sm:$0xff]  ;;  %v599_v21 = vld [vmem:[%s1650_s21 + $0x7d0] sm:$0xff] }
  0x97   : > { %957 = vmatpush.msra.mxu3 %v714_v28  ;;  %899 = vmatpush.msra.mxu0 %v514_v29  ;;  %v494_v49 = vld [vmem:[%s1650_s21 + $0x488] sm:$0xff]  ;;  %v399_v22 = vld [vmem:[%s1650_s21 + $0x190] sm:$0xff] }
  0x98   : > { %918 = vmatpush.msra.mxu1 %v582_v30  ;;  %939 = vmatpush.msra.mxu2 %v642_v31  ;;  %v562_v50 = vld [vmem:[%s1650_s21 + $0x6a8] sm:$0xff]  ;;  %v467_v23 = vld [vmem:[%s1650_s21 + $0x3b0] sm:$0xff] }
  0x99   : > { %958 = vmatpush.msra.mxu3 %v710_v32  ;;  %900 = vmatpush.msra.mxu0 %v510_v33  ;;  %v622_v51 = vld [vmem:[%s1650_s21 + $0x888] sm:$0xff]  ;;  %v527_v25 = vld [vmem:[%s1650_s21 + $0x590] sm:$0xff] }
  0x9a   : > { %919 = vmatpush.msra.mxu1 %v578_v34  ;;  %940 = vmatpush.msra.mxu2 %v638_v35  ;;  %v690_v52 = vld [vmem:[%s1650_s21 + $0xaa8] sm:$0xff]  ;;  %v595_v26 = vld [vmem:[%s1650_s21 + $0x7b0] sm:$0xff] }
  0x9b   : > { %959 = vmatpush.msra.mxu3 %v706_v36  ;;  %901 = vmatpush.msra.mxu0 %v506_v37  ;;  %v490_v53 = vld [vmem:[%s1650_s21 + $0x468] sm:$0xff]  ;;  %v395_v27 = vld [vmem:[%s1650_s21 + $0x170] sm:$0xff] }
  0x9c   : > { %920 = vmatpush.msra.mxu1 %v574_v38  ;;  %941 = vmatpush.msra.mxu2 %v634_v39  ;;  %v558_v54 = vld [vmem:[%s1650_s21 + $0x688] sm:$0xff]  ;;  %v463_v28 = vld [vmem:[%s1650_s21 + $0x390] sm:$0xff] }
  0x9d   : > { %960 = vmatpush.msra.mxu3 %v702_v40  ;;  %902 = vmatpush.msra.mxu0 %v502_v41  ;;  %v618_v55 = vld [vmem:[%s1650_s21 + $0x868] sm:$0xff]  ;;  %v523_v29 = vld [vmem:[%s1650_s21 + $0x570] sm:$0xff] }
  0x9e   : > { %921 = vmatpush.msra.mxu1 %v570_v42  ;;  %942 = vmatpush.msra.mxu2 %v630_v43  ;;  %v686_v56 = vld [vmem:[%s1650_s21 + $0xa88] sm:$0xff]  ;;  %v591_v30 = vld [vmem:[%s1650_s21 + $0x790] sm:$0xff] }
  0x9f   : > { %961 = vmatpush.msra.mxu3 %v698_v44  ;;  %903 = vmatpush.msra.mxu0 %v498_v45  ;;  %v486_v57 = vld [vmem:[%s1650_s21 + $0x448] sm:$0xff]  ;;  %v391_v31 = vld [vmem:[%s1650_s21 + $0x150] sm:$0xff] }
  0xa0   : > { %922 = vmatpush.msra.mxu1 %v566_v46  ;;  %943 = vmatpush.msra.mxu2 %v626_v47  ;;  %v554_v58 = vld [vmem:[%s1650_s21 + $0x668] sm:$0xff]  ;;  %v459_v32 = vld [vmem:[%s1650_s21 + $0x370] sm:$0xff] }
  0xa1   : > { %962 = vmatpush.msra.mxu3 %v694_v48  ;;  %904 = vmatpush.msra.mxu0 %v494_v49  ;;  %v614_v60 = vld [vmem:[%s1650_s21 + $0x848] sm:$0xff]  ;;  %v519_v33 = vld [vmem:[%s1650_s21 + $0x550] sm:$0xff] }
  0xa2   : > { %923 = vmatpush.msra.mxu1 %v562_v50  ;;  %944 = vmatpush.msra.mxu2 %v622_v51  ;;  %v682_v61 = vld [vmem:[%s1650_s21 + $0xa68] sm:$0xff]  ;;  %v587_v34 = vld [vmem:[%s1650_s21 + $0x770] sm:$0xff] }
  0xa3   : > { %963 = vmatpush.msra.mxu3 %v690_v52  ;;  %905 = vmatpush.msra.mxu0 %v490_v53  ;;  %v482_v62 = vld [vmem:[%s1650_s21 + $0x428] sm:$0xff]  ;;  %v387_v35 = vld [vmem:[%s1650_s21 + $0x130] sm:$0xff] }
  0xa4   : > { %924 = vmatpush.msra.mxu1 %v558_v54  ;;  %945 = vmatpush.msra.mxu2 %v618_v55  ;;  %v550_v63 = vld [vmem:[%s1650_s21 + $0x648] sm:$0xff]  ;;  %v455_v36 = vld [vmem:[%s1650_s21 + $0x350] sm:$0xff] }
  0xa5   : > { %964 = vmatpush.msra.mxu3 %v686_v56  ;;  %906 = vmatpush.msra.mxu0 %v486_v57  ;;  %v610_v2 = vld [vmem:[%s1650_s21 + $0x828] sm:$0xff]  ;;  %v515_v37 = vld [vmem:[%s1650_s21 + $0x530] sm:$0xff] }
  0xa6   : > { %925 = vmatpush.msra.mxu1 %v554_v58  ;;  %v678_v3 = vld [vmem:[%s1650_s21 + $0xa48] sm:$0xff]  ;;  %946 = vmatpush.msra.mxu2 %v614_v60  ;;  %v583_v38 = vld [vmem:[%s1650_s21 + $0x750] sm:$0xff] }
  0xa7   : > { %965 = vmatpush.msra.mxu3 %v682_v61  ;;  %v478_v4 = vld [vmem:[%s1650_s21 + $0x408] sm:$0xff]  ;;  %907 = vmatpush.msra.mxu0 %v482_v62  ;;  %v383_v39 = vld [vmem:[%s1650_s21 + $0x110] sm:$0xff] }
  0xa8   : > { %926 = vmatpush.msra.mxu1 %v550_v63  ;;  %v546_v5 = vld [vmem:[%s1650_s21 + $0x628] sm:$0xff]  ;;  %947 = vmatpush.msra.mxu2 %v610_v2  ;;  %v451_v40 = vld [vmem:[%s1650_s21 + $0x330] sm:$0xff] }
  0xa9   : > { %v606_v7 = vld [vmem:[%s1650_s21 + $0x808] sm:$0xff]  ;;  %966 = vmatpush.msra.mxu3 %v678_v3  ;;  %869 = vmatmul.f32.vlgmr.msrb.gmra.mxu2 %v1793_v0  ;;  %v511_v41 = vld [vmem:[%s1650_s21 + $0x510] sm:$0xff] }
  0xaa   : > { %v674_v8 = vld [vmem:[%s1650_s21 + $0xa28] sm:$0xff]  ;;  %908 = vmatpush.msra.mxu0 %v478_v4  ;;  %927 = vmatpush.msra.mxu1 %v546_v5  ;;  %v579_v42 = vld [vmem:[%s1650_s21 + $0x730] sm:$0xff] }
  0xab   : > { %948 = vmatpush.msra.mxu2 %v606_v7  ;;  %v542_v11 = vld [vmem:[%s1650_s21 + $0x608] sm:$0xff]  ;;  %967 = vmatpush.msra.mxu3 %v674_v8  ;;  %v379_v43 = vld [vmem:[%s1650_s21 + $0xf0] sm:$0xff] }
  0xac   : > { %v670_v12 = vld [vmem:[%s1650_s21 + $0xa08] sm:$0xff]  ;;  %973 = vmatpush.msrb.mxu0 %v411_v9  ;;  %889 = vmatmul.f32.vlgmr.msrb.gmra.mxu3 %v1805_v6  ;;  %v447_v44 = vld [vmem:[%s1650_s21 + $0x310] sm:$0xff] }
  0xad   : > { %1013 = vmatpush.msrb.mxu2 %v539_v10  ;;  %928 = vmatpush.msra.mxu1 %v542_v11  ;;  %v507_v45 = vld [vmem:[%s1650_s21 + $0x4f0] sm:$0xff] }
  0xae   : > { %968 = vmatpush.msra.mxu3 %v670_v12  ;;  %974 = vmatpush.msrb.mxu0 %v407_v13  ;;  %v575_v46 = vld [vmem:[%s1650_s21 + $0x710] sm:$0xff] }
  0xaf   : > { %993 = vmatpush.msrb.mxu1 %v475_v14  ;;  %1014 = vmatpush.msrb.mxu2 %v535_v15  ;;  %v375_v47 = vld [vmem:[%s1650_s21 + $0xd0] sm:$0xff] }
  0xb0   : > { %1033 = vmatpush.msrb.mxu3 %v603_v16  ;;  %975 = vmatpush.msrb.mxu0 %v403_v17  ;;  %v443_v48 = vld [vmem:[%s1650_s21 + $0x2f0] sm:$0xff]  ;;  %v412_v16 = vld [vmem:[%s1650_s21 + $0x1f8] sm:$0xff] }
  0xb1   : > { %994 = vmatpush.msrb.mxu1 %v471_v18  ;;  %1015 = vmatpush.msrb.mxu2 %v531_v20  ;;  %v503_v49 = vld [vmem:[%s1650_s21 + $0x4d0] sm:$0xff] }
  0xb2   : > { %1034 = vmatpush.msrb.mxu3 %v599_v21  ;;  %949 = vmatmul.f32.vlgmr.msra.gmra.mxu2 %v1822_v19  ;;  %v571_v50 = vld [vmem:[%s1650_s21 + $0x6f0] sm:$0xff] }
  0xb3   : > { %976 = vmatpush.msrb.mxu0 %v399_v22  ;;  %995 = vmatpush.msrb.mxu1 %v467_v23  ;;  %v371_v51 = vld [vmem:[%s1650_s21 + $0xb0] sm:$0xff]  ;;  %v408_v22 = vld [vmem:[%s1650_s21 + $0x1d8] sm:$0xff] }
  0xb4   : > { %1016 = vmatpush.msrb.mxu2 %v527_v25  ;;  %1035 = vmatpush.msrb.mxu3 %v595_v26  ;;  %v439_v52 = vld [vmem:[%s1650_s21 + $0x2d0] sm:$0xff]  ;;  %v476_v23 = vld [vmem:[%s1650_s21 + $0x3f8] sm:$0xff] }
  0xb5   : > { %909 = vmatmul.f32.vlgmr.msra.gmra.mxu0 %v1786_v59  ;;  %969 = vmatmul.f32.vlgmr.msra.gmra.mxu3 %v1829_v24  ;;  %v499_v53 = vld [vmem:[%s1650_s21 + $0x4b0] sm:$0xff] }
  0xb6   : > { %977 = vmatpush.msrb.mxu0 %v395_v27  ;;  %996 = vmatpush.msrb.mxu1 %v463_v28  ;;  %v567_v54 = vld [vmem:[%s1650_s21 + $0x6d0] sm:$0xff]  ;;  %v404_v27 = vld [vmem:[%s1650_s21 + $0x1b8] sm:$0xff] }
  0xb7   : > { %1017 = vmatpush.msrb.mxu2 %v523_v29  ;;  %1036 = vmatpush.msrb.mxu3 %v591_v30  ;;  %v367_v55 = vld [vmem:[%s1650_s21 + $0x90] sm:$0xff]  ;;  %v472_v28 = vld [vmem:[%s1650_s21 + $0x3d8] sm:$0xff] }
  0xb8   : > { %929 = vmatmul.f32.vlgmr.msra.gmra.mxu1 %v1797_v1  ;;  %978 = vmatpush.msrb.mxu0 %v391_v31  ;;  %v435_v56 = vld [vmem:[%s1650_s21 + $0x2b0] sm:$0xff]  ;;  %v400_v31 = vld [vmem:[%s1650_s21 + $0x198] sm:$0xff] }
  0xb9   : > { %997 = vmatpush.msrb.mxu1 %v459_v32  ;;  %1018 = vmatpush.msrb.mxu2 %v519_v33  ;;  %v495_v57 = vld [vmem:[%s1650_s21 + $0x490] sm:$0xff]  ;;  %v468_v32 = vld [vmem:[%s1650_s21 + $0x3b8] sm:$0xff] }
  0xba   : > { %1037 = vmatpush.msrb.mxu3 %v587_v34  ;;  %979 = vmatpush.msrb.mxu0 %v387_v35  ;;  %v563_v58 = vld [vmem:[%s1650_s21 + $0x6b0] sm:$0xff]  ;;  %v396_v35 = vld [vmem:[%s1650_s21 + $0x178] sm:$0xff] }
  0xbb   : > { %998 = vmatpush.msrb.mxu1 %v455_v36  ;;  %1019 = vmatpush.msrb.mxu2 %v515_v37  ;;  %v363_v60 = vld [vmem:[%s1650_s21 + $0x70] sm:$0xff]  ;;  %v464_v36 = vld [vmem:[%s1650_s21 + $0x398] sm:$0xff] }
  0xbc   : > { %1038 = vmatpush.msrb.mxu3 %v583_v38  ;;  %980 = vmatpush.msrb.mxu0 %v383_v39  ;;  %v431_v61 = vld [vmem:[%s1650_s21 + $0x290] sm:$0xff]  ;;  %v392_v39 = vld [vmem:[%s1650_s21 + $0x158] sm:$0xff] }
  0xbd   : > { %999 = vmatpush.msrb.mxu1 %v451_v40  ;;  %1020 = vmatpush.msrb.mxu2 %v511_v41  ;;  %v491_v62 = vld [vmem:[%s1650_s21 + $0x470] sm:$0xff]  ;;  %v460_v40 = vld [vmem:[%s1650_s21 + $0x378] sm:$0xff] }
  0xbe   : > { %1039 = vmatpush.msrb.mxu3 %v579_v42  ;;  %981 = vmatpush.msrb.mxu0 %v379_v43  ;;  %v559_v63 = vld [vmem:[%s1650_s21 + $0x690] sm:$0xff]  ;;  %v388_v43 = vld [vmem:[%s1650_s21 + $0x138] sm:$0xff] }
  0xbf   : > { %1000 = vmatpush.msrb.mxu1 %v447_v44  ;;  %1021 = vmatpush.msrb.mxu2 %v507_v45  ;;  %v359_v2 = vld [vmem:[%s1650_s21 + $0x50] sm:$0xff]  ;;  %v456_v44 = vld [vmem:[%s1650_s21 + $0x358] sm:$0xff] }
  0xc0   : > { %1040 = vmatpush.msrb.mxu3 %v575_v46  ;;  %982 = vmatpush.msrb.mxu0 %v375_v47  ;;  %v427_v3 = vld [vmem:[%s1650_s21 + $0x270] sm:$0xff]  ;;  %v384_v47 = vld [vmem:[%s1650_s21 + $0x118] sm:$0xff] }
  0xc1   : > { %1001 = vmatpush.msrb.mxu1 %v443_v48  ;;  %1022 = vmatpush.msrb.mxu2 %v503_v49  ;;  %v487_v4 = vld [vmem:[%s1650_s21 + $0x450] sm:$0xff]  ;;  %v452_v48 = vld [vmem:[%s1650_s21 + $0x338] sm:$0xff] }
  0xc2   : > { %1041 = vmatpush.msrb.mxu3 %v571_v50  ;;  %983 = vmatpush.msrb.mxu0 %v371_v51  ;;  %v555_v5 = vld [vmem:[%s1650_s21 + $0x670] sm:$0xff]  ;;  %v380_v51 = vld [vmem:[%s1650_s21 + $0xf8] sm:$0xff] }
  0xc3   : > { %1002 = vmatpush.msrb.mxu1 %v439_v52  ;;  %1023 = vmatpush.msrb.mxu2 %v499_v53  ;;  %v355_v7 = vld [vmem:[%s1650_s21 + $0x30] sm:$0xff]  ;;  %v448_v52 = vld [vmem:[%s1650_s21 + $0x318] sm:$0xff] }
  0xc4   : > { %1042 = vmatpush.msrb.mxu3 %v567_v54  ;;  %984 = vmatpush.msrb.mxu0 %v367_v55  ;;  %v423_v8 = vld [vmem:[%s1650_s21 + $0x250] sm:$0xff]  ;;  %v376_v55 = vld [vmem:[%s1650_s21 + $0xd8] sm:$0xff] }
  0xc5   : > { %1003 = vmatpush.msrb.mxu1 %v435_v56  ;;  %1024 = vmatpush.msrb.mxu2 %v495_v57  ;;  %v483_v9 = vld [vmem:[%s1650_s21 + $0x430] sm:$0xff]  ;;  %v444_v56 = vld [vmem:[%s1650_s21 + $0x2f8] sm:$0xff] }
  0xc6   : > { %1043 = vmatpush.msrb.mxu3 %v563_v58  ;;  %985 = vmatpush.msrb.mxu0 %v363_v60  ;;  %v551_v10 = vld [vmem:[%s1650_s21 + $0x650] sm:$0xff]  ;;  %v372_v60 = vld [vmem:[%s1650_s21 + $0xb8] sm:$0xff] }
  0xc7   : > { %1004 = vmatpush.msrb.mxu1 %v431_v61  ;;  %1025 = vmatpush.msrb.mxu2 %v491_v62  ;;  %v351_v11 = vld [vmem:[%s1650_s21 + $0x10] sm:$0xff]  ;;  %v440_v61 = vld [vmem:[%s1650_s21 + $0x2d8] sm:$0xff] }
  0xc8   : > { %1044 = vmatpush.msrb.mxu3 %v559_v63  ;;  %986 = vmatpush.msrb.mxu0 %v359_v2  ;;  %v419_v12 = vld [vmem:[%s1650_s21 + $0x230] sm:$0xff]  ;;  %v368_v2 = vld [vmem:[%s1650_s21 + $0x98] sm:$0xff] }
  0xc9   : > { %1005 = vmatpush.msrb.mxu1 %v427_v3  ;;  %1026 = vmatpush.msrb.mxu2 %v487_v4  ;;  %v479_v13 = vld [vmem:[%s1650_s21 + $0x410] sm:$0xff]  ;;  %v436_v3 = vld [vmem:[%s1650_s21 + $0x2b8] sm:$0xff] }
  0xca   : > { %1045 = vmatpush.msrb.mxu3 %v555_v5  ;;  %987 = vmatpush.msrb.mxu0 %v355_v7  ;;  %v547_v14 = vld [vmem:[%s1650_s21 + $0x630] sm:$0xff]  ;;  %v364_v7 = vld [vmem:[%s1650_s21 + $0x78] sm:$0xff] }
  0xcb   : > { %1006 = vmatpush.msrb.mxu1 %v423_v8  ;;  %1027 = vmatpush.msrb.mxu2 %v483_v9  ;;  %v667_v15 = vld [vmem:[%s1650_s21 + $0x9f0] sm:$0xff]  ;;  %v432_v8 = vld [vmem:[%s1650_s21 + $0x298] sm:$0xff] }
  0xcc   : > { %1046 = vmatpush.msrb.mxu3 %v551_v10  ;;  %988 = vmatpush.msrb.mxu0 %v351_v11  ;;  %v415_v17 = vld [vmem:[%s1650_s21 + $0x210] sm:$0xff]  ;;  %v360_v11 = vld [vmem:[%s1650_s21 + $0x58] sm:$0xff] }
  0xcd   : > { %1007 = vmatpush.msrb.mxu1 %v419_v12  ;;  %v543_v18 = vld [vmem:[%s1650_s21 + $0x610] sm:$0xff]  ;;  %1028 = vmatpush.msrb.mxu2 %v479_v13  ;;  %v428_v12 = vld [vmem:[%s1650_s21 + $0x278] sm:$0xff] }
  0xce   : > { %1047 = vmatpush.msrb.mxu3 %v547_v14  ;;  %v663_v20 = vld [vmem:[%s1650_s21 + $0x9d0] sm:$0xff]  ;;  %1053 = vmatpush.msra.mxu0 %v667_v15  ;;  %v356_v15 = vld [vmem:[%s1650_s21 + $0x38] sm:$0xff] }
  0xcf   : > { %v731_v21 = vld [vmem:[%s1650_s21 + $0xbf0] sm:$0xff]  ;;  %1093 = vmatpush.msra.mxu2 %v412_v16  ;;  %1008 = vmatpush.msrb.mxu1 %v415_v17  ;;  %v424_v16 = vld [vmem:[%s1650_s21 + $0x258] sm:$0xff] }
  0xd0   : > { %1048 = vmatpush.msrb.mxu3 %v543_v18  ;;  %v659_v25 = vld [vmem:[%s1650_s21 + $0x9b0] sm:$0xff]  ;;  %1054 = vmatpush.msra.mxu0 %v663_v20  ;;  %v352_v20 = vld [vmem:[%s1650_s21 + $0x18] sm:$0xff] }
  0xd1   : > { %v727_v26 = vld [vmem:[%s1650_s21 + $0xbd0] sm:$0xff]  ;;  %1073 = vmatpush.msra.mxu1 %v731_v21  ;;  %1094 = vmatpush.msra.mxu2 %v408_v22  ;;  %v420_v21 = vld [vmem:[%s1650_s21 + $0x238] sm:$0xff] }
  0xd2   : > { %1113 = vmatpush.msra.mxu3 %v476_v23  ;;  %v655_v29 = vld [vmem:[%s1650_s21 + $0x990] sm:$0xff]  ;;  %1055 = vmatpush.msra.mxu0 %v659_v25  ;;  %v540_v22 = vld [vmem:[%s1650_s21 + $0x5f8] sm:$0xff] }
  0xd3   : > { %v723_v30 = vld [vmem:[%s1650_s21 + $0xbb0] sm:$0xff]  ;;  %1074 = vmatpush.msra.mxu1 %v727_v26  ;;  %1095 = vmatpush.msra.mxu2 %v404_v27  ;;  %v668_v23 = vld [vmem:[%s1650_s21 + $0x9f8] sm:$0xff] }
  0xd4   : > { %1114 = vmatpush.msra.mxu3 %v472_v28  ;;  %v651_v33 = vld [vmem:[%s1650_s21 + $0x970] sm:$0xff]  ;;  %1056 = vmatpush.msra.mxu0 %v655_v29  ;;  %v416_v26 = vld [vmem:[%s1650_s21 + $0x218] sm:$0xff] }
  0xd5   : > { %v719_v34 = vld [vmem:[%s1650_s21 + $0xb90] sm:$0xff]  ;;  %1075 = vmatpush.msra.mxu1 %v723_v30  ;;  %1096 = vmatpush.msra.mxu2 %v400_v31  ;;  %v604_v27 = vld [vmem:[%s1650_s21 + $0x7f8] sm:$0xff] }
  0xd6   : > { %1115 = vmatpush.msra.mxu3 %v468_v32  ;;  %v647_v37 = vld [vmem:[%s1650_s21 + $0x950] sm:$0xff]  ;;  %1057 = vmatpush.msra.mxu0 %v651_v33  ;;  %v664_v28 = vld [vmem:[%s1650_s21 + $0x9d8] sm:$0xff] }
  0xd7   : > { %v715_v38 = vld [vmem:[%s1650_s21 + $0xb70] sm:$0xff]  ;;  %1076 = vmatpush.msra.mxu1 %v719_v34  ;;  %1097 = vmatpush.msra.mxu2 %v396_v35  ;;  %v732_v29 = vld [vmem:[%s1650_s21 + $0xbf8] sm:$0xff] }
  0xd8   : > { %1116 = vmatpush.msra.mxu3 %v464_v36  ;;  %v643_v41 = vld [vmem:[%s1650_s21 + $0x930] sm:$0xff]  ;;  %1058 = vmatpush.msra.mxu0 %v647_v37  ;;  %v600_v30 = vld [vmem:[%s1650_s21 + $0x7d8] sm:$0xff] }
  0xd9   : > { %v711_v42 = vld [vmem:[%s1650_s21 + $0xb50] sm:$0xff]  ;;  %1077 = vmatpush.msra.mxu1 %v715_v38  ;;  %1098 = vmatpush.msra.mxu2 %v392_v39  ;;  %v728_v31 = vld [vmem:[%s1650_s21 + $0xbd8] sm:$0xff] }
  0xda   : > { %1117 = vmatpush.msra.mxu3 %v460_v40  ;;  %v639_v45 = vld [vmem:[%s1650_s21 + $0x910] sm:$0xff]  ;;  %1059 = vmatpush.msra.mxu0 %v643_v41  ;;  %v528_v32 = vld [vmem:[%s1650_s21 + $0x598] sm:$0xff] }
  0xdb   : > { %v707_v46 = vld [vmem:[%s1650_s21 + $0xb30] sm:$0xff]  ;;  %1078 = vmatpush.msra.mxu1 %v711_v42  ;;  %1099 = vmatpush.msra.mxu2 %v388_v43  ;;  %v596_v33 = vld [vmem:[%s1650_s21 + $0x7b8] sm:$0xff] }
  0xdc   : > { %1118 = vmatpush.msra.mxu3 %v456_v44  ;;  %v635_v49 = vld [vmem:[%s1650_s21 + $0x8f0] sm:$0xff]  ;;  %1060 = vmatpush.msra.mxu0 %v639_v45  ;;  %v656_v34 = vld [vmem:[%s1650_s21 + $0x998] sm:$0xff] }
  0xdd   : > { %v703_v50 = vld [vmem:[%s1650_s21 + $0xb10] sm:$0xff]  ;;  %1079 = vmatpush.msra.mxu1 %v707_v46  ;;  %1100 = vmatpush.msra.mxu2 %v384_v47  ;;  %v724_v35 = vld [vmem:[%s1650_s21 + $0xbb8] sm:$0xff] }
  0xde   : > { %1119 = vmatpush.msra.mxu3 %v452_v48  ;;  %v631_v53 = vld [vmem:[%s1650_s21 + $0x8d0] sm:$0xff]  ;;  %1061 = vmatpush.msra.mxu0 %v635_v49  ;;  %v592_v36 = vld [vmem:[%s1650_s21 + $0x798] sm:$0xff] }
  0xdf   : > { %v699_v54 = vld [vmem:[%s1650_s21 + $0xaf0] sm:$0xff]  ;;  %1080 = vmatpush.msra.mxu1 %v703_v50  ;;  %1101 = vmatpush.msra.mxu2 %v380_v51  ;;  %v524_v37 = vld [vmem:[%s1650_s21 + $0x578] sm:$0xff] }
  0xe0   : > { %1120 = vmatpush.msra.mxu3 %v448_v52  ;;  %v627_v57 = vld [vmem:[%s1650_s21 + $0x8b0] sm:$0xff]  ;;  %1062 = vmatpush.msra.mxu0 %v631_v53  ;;  %v652_v38 = vld [vmem:[%s1650_s21 + $0x978] sm:$0xff] }
  0xe1   : > { %v695_v58 = vld [vmem:[%s1650_s21 + $0xad0] sm:$0xff]  ;;  %1081 = vmatpush.msra.mxu1 %v699_v54  ;;  %1102 = vmatpush.msra.mxu2 %v376_v55  ;;  %v720_v39 = vld [vmem:[%s1650_s21 + $0xb98] sm:$0xff] }
  0xe2   : > { %1121 = vmatpush.msra.mxu3 %v444_v56  ;;  %v623_v62 = vld [vmem:[%s1650_s21 + $0x890] sm:$0xff]  ;;  %1063 = vmatpush.msra.mxu0 %v627_v57  ;;  %v520_v40 = vld [vmem:[%s1650_s21 + $0x558] sm:$0xff] }
  0xe3   : > { %v691_v63 = vld [vmem:[%s1650_s21 + $0xab0] sm:$0xff]  ;;  %1082 = vmatpush.msra.mxu1 %v695_v58  ;;  %1103 = vmatpush.msra.mxu2 %v372_v60  ;;  %v588_v41 = vld [vmem:[%s1650_s21 + $0x778] sm:$0xff] }
  0xe4   : > { %1122 = vmatpush.msra.mxu3 %v440_v61  ;;  %v619_v4 = vld [vmem:[%s1650_s21 + $0x870] sm:$0xff]  ;;  %1064 = vmatpush.msra.mxu0 %v623_v62  ;;  %v648_v42 = vld [vmem:[%s1650_s21 + $0x958] sm:$0xff] }
  0xe5   : > { %v687_v5 = vld [vmem:[%s1650_s21 + $0xa90] sm:$0xff]  ;;  %1083 = vmatpush.msra.mxu1 %v691_v63  ;;  %1104 = vmatpush.msra.mxu2 %v368_v2  ;;  %v716_v43 = vld [vmem:[%s1650_s21 + $0xb78] sm:$0xff] }
  0xe6   : > { %1123 = vmatpush.msra.mxu3 %v436_v3  ;;  %v615_v9 = vld [vmem:[%s1650_s21 + $0x850] sm:$0xff]  ;;  %1065 = vmatpush.msra.mxu0 %v619_v4  ;;  %v516_v44 = vld [vmem:[%s1650_s21 + $0x538] sm:$0xff] }
  0xe7   : > { %v683_v10 = vld [vmem:[%s1650_s21 + $0xa70] sm:$0xff]  ;;  %1084 = vmatpush.msra.mxu1 %v687_v5  ;;  %1105 = vmatpush.msra.mxu2 %v364_v7  ;;  %v584_v45 = vld [vmem:[%s1650_s21 + $0x758] sm:$0xff] }
  0xe8   : > { %1124 = vmatpush.msra.mxu3 %v432_v8  ;;  %v611_v13 = vld [vmem:[%s1650_s21 + $0x830] sm:$0xff]  ;;  %1066 = vmatpush.msra.mxu0 %v615_v9  ;;  %v712_v46 = vld [vmem:[%s1650_s21 + $0xb58] sm:$0xff] }
  0xe9   : > { %v679_v14 = vld [vmem:[%s1650_s21 + $0xa50] sm:$0xff]  ;;  %1085 = vmatpush.msra.mxu1 %v683_v10  ;;  %1106 = vmatpush.msra.mxu2 %v360_v11  ;;  %v512_v47 = vld [vmem:[%s1650_s21 + $0x518] sm:$0xff] }
  0xea   : > { %1125 = vmatpush.msra.mxu3 %v428_v12  ;;  %v607_v17 = vld [vmem:[%s1650_s21 + $0x810] sm:$0xff]  ;;  %1067 = vmatpush.msra.mxu0 %v611_v13  ;;  %v580_v48 = vld [vmem:[%s1650_s21 + $0x738] sm:$0xff]  ;;  %v1480_v12 = vld [vmem:[%s1660_s29] sm:$0xff] }
  0xeb   : > { %1086 = vmatpush.msra.mxu1 %v679_v14  ;;  %v675_v18 = vld [vmem:[%s1650_s21 + $0xa30] sm:$0xff]  ;;  %1107 = vmatpush.msra.mxu2 %v356_v15  ;;  %v640_v49 = vld [vmem:[%s1650_s21 + $0x918] sm:$0xff] }
  0xec   : > { %1126 = vmatpush.msra.mxu3 %v424_v16  ;;  %1029 = vmatmul.f32.vlgmr.msrb.gmra.mxu2 %v1786_v59  ;;  %v671_v25 = vld [vmem:[%s1650_s21 + $0xa10] sm:$0xff]  ;;  %v536_v59 = vld [vmem:[%s1650_s21 + $0x5d8] sm:$0xff]  ;;  %v790_v16 = vpop.f32.mrf.mxu2 }
  0xed   : > { %1068 = vmatpush.msra.mxu0 %v607_v17  ;;  %1087 = vmatpush.msra.mxu1 %v675_v18  ;;  %v508_v50 = vld [vmem:[%s1650_s21 + $0x4f8] sm:$0xff] }
  0xee   : > { %1108 = vmatpush.msra.mxu2 %v352_v20  ;;  %1127 = vmatpush.msra.mxu3 %v420_v21  ;;  %v576_v51 = vld [vmem:[%s1650_s21 + $0x718] sm:$0xff] }
  0xef   : > { %989 = vmatmul.f32.vlgmr.msrb.gmra.mxu0 %v1793_v0  ;;  %1049 = vmatmul.f32.vlgmr.msrb.gmra.mxu3 %v1797_v1  ;;  %v532_v0 = vld [vmem:[%s1650_s21 + $0x5b8] sm:$0xff] }
  0xf0   : > { %1133 = vmatpush.msrb.mxu0 %v540_v22  ;;  %1173 = vmatpush.msrb.mxu2 %v668_v23  ;;  %v660_v1 = vld [vmem:[%s1650_s21 + $0x9b8] sm:$0xff] }
  0xf1   : > { %1088 = vmatpush.msra.mxu1 %v671_v25  ;;  %1128 = vmatpush.msra.mxu3 %v416_v26  ;;  %v636_v52 = vld [vmem:[%s1650_s21 + $0x8f8] sm:$0xff] }
  0xf2   : > { %1009 = vmatmul.f32.vlgmr.msrb.gmra.mxu1 %v1805_v6  ;;  %1134 = vmatpush.msrb.mxu0 %v536_v59  ;;  %v704_v53 = vld [vmem:[%s1650_s21 + $0xb18] sm:$0xff] }
  0xf3   : > { %1153 = vmatpush.msrb.mxu1 %v604_v27  ;;  %1174 = vmatpush.msrb.mxu2 %v664_v28  ;;  %v504_v54 = vld [vmem:[%s1650_s21 + $0x4d8] sm:$0xff] }
  0xf4   : > { %1193 = vmatpush.msrb.mxu3 %v732_v29  ;;  %1135 = vmatpush.msrb.mxu0 %v532_v0  ;;  %v572_v55 = vld [vmem:[%s1650_s21 + $0x6f8] sm:$0xff] }
  0xf5   : > { %1154 = vmatpush.msrb.mxu1 %v600_v30  ;;  %1175 = vmatpush.msrb.mxu2 %v660_v1  ;;  %v632_v56 = vld [vmem:[%s1650_s21 + $0x8d8] sm:$0xff] }
  0xf6   : > { %1194 = vmatpush.msrb.mxu3 %v728_v31  ;;  %1136 = vmatpush.msrb.mxu0 %v528_v32  ;;  %v700_v57 = vld [vmem:[%s1650_s21 + $0xaf8] sm:$0xff]  ;;  %v339_v32 = vld [vmem:[#allocation2 + $0x10] sm:$0xff] }
  0xf7   : > { %1155 = vmatpush.msrb.mxu1 %v596_v33  ;;  %1176 = vmatpush.msrb.mxu2 %v656_v34  ;;  %v500_v58 = vld [vmem:[%s1650_s21 + $0x4b8] sm:$0xff]  ;;  %v1481_v34 = vld [vmem:[%s1660_s29 + $0x10] sm:$0xff] }
  0xf8   : > { %1195 = vmatpush.msrb.mxu3 %v724_v35  ;;  %1069 = vmatmul.f32.vlgmr.msra.gmra.mxu0 %v1822_v19  ;;  %v644_v19 = vld [vmem:[%s1650_s21 + $0x938] sm:$0xff]  ;;  %v1482_v35 = vld [vmem:[%s1660_s29 + $0x20] sm:$0xff] }
  0xf9   : > { %1156 = vmatpush.msrb.mxu1 %v592_v36  ;;  %1137 = vmatpush.msrb.mxu0 %v524_v37  ;;  %v568_v60 = vld [vmem:[%s1650_s21 + $0x6d8] sm:$0xff] }
  0xfa   : > { %1177 = vmatpush.msrb.mxu2 %v652_v38  ;;  %1196 = vmatpush.msrb.mxu3 %v720_v39  ;;  %v628_v61 = vld [vmem:[%s1650_s21 + $0x8b8] sm:$0xff]  ;;  %v1484_v38 = vld [vmem:[%s1660_s29 + $0x28] sm:$0xff] }
  0xfb   : > { %1089 = vmatmul.f32.vlgmr.msra.gmra.mxu1 %v1829_v24  ;;  %1138 = vmatpush.msrb.mxu0 %v520_v40  ;;  %v708_v24 = vld [vmem:[%s1650_s21 + $0xb38] sm:$0xff] }
  0xfc   : > { %1157 = vmatpush.msrb.mxu1 %v588_v41  ;;  %1178 = vmatpush.msrb.mxu2 %v648_v42  ;;  %v696_v62 = vld [vmem:[%s1650_s21 + $0xad8] sm:$0xff] }
  0xfd   : > { %1197 = vmatpush.msrb.mxu3 %v716_v43  ;;  %1139 = vmatpush.msrb.mxu0 %v516_v44  ;;  %v496_v63 = vld [vmem:[%s1650_s21 + $0x498] sm:$0xff] }
  0xfe   : > { %1158 = vmatpush.msrb.mxu1 %v584_v45  ;;  %1179 = vmatpush.msrb.mxu2 %v644_v19  ;;  %v564_v2 = vld [vmem:[%s1650_s21 + $0x6b8] sm:$0xff] }
  0xff   : > { %1198 = vmatpush.msrb.mxu3 %v712_v46  ;;  %1140 = vmatpush.msrb.mxu0 %v512_v47  ;;  %v624_v3 = vld [vmem:[%s1650_s21 + $0x898] sm:$0xff] }
 0x100   : > { %1159 = vmatpush.msrb.mxu1 %v580_v48  ;;  %1180 = vmatpush.msrb.mxu2 %v640_v49  ;;  %v692_v4 = vld [vmem:[%s1650_s21 + $0xab8] sm:$0xff]  ;;  %v340_v48 = vld [vmem:[#allocation2] sm:$0xff] }
 0x101   : > { %1199 = vmatpush.msrb.mxu3 %v708_v24  ;;  %1141 = vmatpush.msrb.mxu0 %v508_v50  ;;  %v492_v7 = vld [vmem:[%s1650_s21 + $0x478] sm:$0xff] }
 0x102   : > { %1160 = vmatpush.msrb.mxu1 %v576_v51  ;;  %1181 = vmatpush.msrb.mxu2 %v636_v52  ;;  %v560_v8 = vld [vmem:[%s1650_s21 + $0x698] sm:$0xff] }
 0x103   : > { %1200 = vmatpush.msrb.mxu3 %v704_v53  ;;  %1142 = vmatpush.msrb.mxu0 %v504_v54  ;;  %v620_v9 = vld [vmem:[%s1650_s21 + $0x878] sm:$0xff] }
 0x104   : > { %1161 = vmatpush.msrb.mxu1 %v572_v55  ;;  %1182 = vmatpush.msrb.mxu2 %v632_v56  ;;  %v688_v10 = vld [vmem:[%s1650_s21 + $0xa98] sm:$0xff] }
 0x105   : > { %1201 = vmatpush.msrb.mxu3 %v700_v57  ;;  %1143 = vmatpush.msrb.mxu0 %v500_v58  ;;  %v488_v13 = vld [vmem:[%s1650_s21 + $0x458] sm:$0xff] }
 0x106   : > { %1162 = vmatpush.msrb.mxu1 %v568_v60  ;;  %v750_v5 = vpop.f32.mrf.mxu0  ;;  %1183 = vmatpush.msrb.mxu2 %v628_v61  ;;  %v556_v14 = vld [vmem:[%s1650_s21 + $0x678] sm:$0xff] }
 0x107   : > { %1202 = vmatpush.msrb.mxu3 %v696_v62  ;;  %1144 = vmatpush.msrb.mxu0 %v496_v63  ;;  %v616_v17 = vld [vmem:[%s1650_s21 + $0x858] sm:$0xff] }
 0x108   : > { %1163 = vmatpush.msrb.mxu1 %v564_v2  ;;  %1184 = vmatpush.msrb.mxu2 %v624_v3  ;;  %v684_v18 = vld [vmem:[%s1650_s21 + $0xa78] sm:$0xff] }
 0x109   : > { %1203 = vmatpush.msrb.mxu3 %v692_v4  ;;  %v770_v11 = vpop.f32.mrf.mxu1  ;;  %1109 = vmatmul.f32.vlgmr.msra.gmra.mxu2 %v1480_v12  ;;  %v484_v20 = vld [vmem:[%s1650_s21 + $0x438] sm:$0xff] }
 0x10a   : > { %1129 = vmatmul.f32.vlgmr.msra.gmra.mxu3 %v1805_v6  ;;  %v771_v15 = vadd.f32 %v770_v11, %v750_v5  ;;  %1145 = vmatpush.msrb.mxu0 %v492_v7  ;;  %v552_v21 = vld [vmem:[%s1650_s21 + $0x658] sm:$0xff] }
 0x10b   : > { %1164 = vmatpush.msrb.mxu1 %v560_v8  ;;  %1185 = vmatpush.msrb.mxu2 %v620_v9  ;;  %v612_v6 = vld [vmem:[%s1650_s21 + $0x838] sm:$0xff] }
 0x10c   : > { %1204 = vmatpush.msrb.mxu3 %v688_v10  ;;  %v791_v22 = vadd.f32 %v790_v16, %v771_v15  ;;  %1146 = vmatpush.msrb.mxu0 %v488_v13  ;;  %v680_v23 = vld [vmem:[%s1650_s21 + $0xa58] sm:$0xff]  ;;  %v810_v25 = vpop.f32.mrf.mxu3  ;;  %v342_v13 = vld [vmem:[#allocation2 + $0x8] sm:$0xff] }
 0x10d   : > { %1165 = vmatpush.msrb.mxu1 %v556_v14  ;;  %1186 = vmatpush.msrb.mxu2 %v616_v17  ;;  %v480_v26 = vld [vmem:[%s1650_s21 + $0x418] sm:$0xff] }
 0x10e   : > { %1205 = vmatpush.msrb.mxu3 %v684_v18  ;;  %v548_v59 = vld [vmem:[%s1650_s21 + $0x638] sm:$0xff]  ;;  %v811_v27 = vadd.f32 %v810_v25, %v791_v22  ;;  %1147 = vmatpush.msrb.mxu0 %v484_v20 }
 0x10f   : > { %1166 = vmatpush.msrb.mxu1 %v552_v21  ;;  %v608_v28 = vld [vmem:[%s1650_s21 + $0x818] sm:$0xff]  ;;  %1187 = vmatpush.msrb.mxu2 %v612_v6  ;;  %v830_v0 = vpop.f32.mrf.mxu0 }
 0x110   : > { %v676_v29 = vld [vmem:[%s1650_s21 + $0xa38] sm:$0xff]  ;;  %1206 = vmatpush.msrb.mxu3 %v680_v23  ;;  %1148 = vmatpush.msrb.mxu0 %v480_v26  ;;  %v831_v31 = vadd.f32 %v830_v0, %v811_v27 }
 0x111   : > { %1167 = vmatpush.msrb.mxu1 %v548_v59  ;;  %v544_v30 = vld [vmem:[%s1650_s21 + $0x618] sm:$0xff]  ;;  %1188 = vmatpush.msrb.mxu2 %v608_v28 }
 0x112   : > { %v672_v1 = vld [vmem:[%s1650_s21 + $0xa18] sm:$0xff]  ;;  %1207 = vmatpush.msrb.mxu3 %v676_v29  ;;  %v850_v33 = vpop.f32.mrf.mxu1  ;;  %1149 = vmatmul.f32.vlgmr.msrb.gmra.mxu0 %v1481_v34 }
 0x113   : > { %1189 = vmatmul.f32.vlgmr.msrb.gmra.mxu2 %v1482_v35  ;;  %v851_v36 = vadd.f32 %v850_v33, %v831_v31  ;;  %1168 = vmatpush.msrb.mxu1 %v544_v30  ;;  %v1483_v37 = vld [vmem:[%s1660_s29 + $0x18] sm:$0xff] }
 0x114   : > { %1208 = vmatpush.msrb.mxu3 %v672_v1  ;;  %1169 = vmatmul.f32.vlgmr.msrb.gmra.mxu1 %v1483_v37  ;;  %v341_v61 = vld [vmem:[#allocation2 + $0x18] sm:$0xff] }
 0x115   : > { %1209 = vmatmul.f32.vlgmr.msrb.gmra.mxu3 %v1484_v38  ;;  %v1213_v39 = vadd.f32 %v851_v36, %v339_v32 }
 0x117   : > { %1217 = vst [vmem:[#allocation2 + $0x10] sm:$0xff] %v1213_v39 }
 0x12c   : > { %v870_v40 = vpop.f32.mrf.mxu2 }
 0x12f   : > { %v890_v41 = vpop.f32.mrf.mxu3 }
 0x130   : > { %v891_v42 = vadd.f32 %v890_v41, %v870_v40 }
 0x132   : > { %v910_v43 = vpop.f32.mrf.mxu0 }
 0x133   : > { %v911_v44 = vadd.f32 %v910_v43, %v891_v42 }
 0x135   : > { %v930_v45 = vpop.f32.mrf.mxu1  ;;  %v950_v46 = vpop.f32.mrf.mxu2 }
 0x136   : > { %v931_v19 = vadd.f32 %v930_v45, %v911_v44 }
 0x138   : > { %v951_v47 = vadd.f32 %v950_v46, %v931_v19  ;;  %v970_v49 = vpop.f32.mrf.mxu3 }
 0x13a   : > { %v971_v24 = vadd.f32 %v970_v49, %v951_v47 }
 0x13c   : > { %v1214_v50 = vadd.f32 %v971_v24, %v340_v48 }
 0x13e   : > { %1218 = vst [vmem:[#allocation2] sm:$0xff] %v1214_v50 }
 0x16c   : > { %v990_v51 = vpop.f32.mrf.mxu0 }
 0x16f   : > { %v1010_v52 = vpop.f32.mrf.mxu1  ;;  %v1030_v54 = vpop.f32.mrf.mxu2 }
 0x170   : > { %v1011_v53 = vadd.f32 %v1010_v52, %v990_v51 }
 0x172   : > { %v1031_v55 = vadd.f32 %v1030_v54, %v1011_v53  ;;  %v1050_v56 = vpop.f32.mrf.mxu3 }
 0x174   : > { %v1051_v57 = vadd.f32 %v1050_v56, %v1031_v55 }
 0x175   : > { %v1070_v58 = vpop.f32.mrf.mxu0 }
 0x176   : > { %v1071_v60 = vadd.f32 %v1070_v58, %v1051_v57 }
 0x178   : > { %v1090_v62 = vpop.f32.mrf.mxu1 }
 0x179   : > { %v1091_v63 = vadd.f32 %v1090_v62, %v1071_v60 }
 0x17b   : > { %v1215_v2 = vadd.f32 %v1091_v63, %v341_v61 }
 0x17d   : > { %1219 = vst [vmem:[#allocation2 + $0x18] sm:$0xff] %v1215_v2 }
 0x18c   : > { %v1110_v3 = vpop.f32.mrf.mxu2 }
 0x18d   : > { %v1130_v4 = vpop.f32.mrf.mxu3 }
 0x18e   : > { %v1131_v5 = vadd.f32 %v1130_v4, %v1110_v3 }
 0x18f   : > { %v1150_v7 = vpop.f32.mrf.mxu0 }
 0x190   : > { %v1151_v8 = vadd.f32 %v1150_v7, %v1131_v5 }
 0x191   : > { %v1170_v9 = vpop.f32.mrf.mxu1 }
 0x192   : > { %v1171_v10 = vadd.f32 %v1170_v9, %v1151_v8 }
 0x196   : > { %v1190_v11 = vpop.f32.mrf.mxu2 }
 0x197   : > { %v1191_v12 = vadd.f32 %v1190_v11, %v1171_v10 }
 0x198   : > { %v1210_v14 = vpop.f32.mrf.mxu3 }
 0x199   : > { %v1211_v15 = vadd.f32 %v1210_v14, %v1191_v12  ;;  %1224 = sbr.rel (%p1412_p1) target bundleno = 428 (0x1ac), region = 48 }
 0x19b   : > { %v1216_v16 = vadd.f32 %v1211_v15, %v342_v13 }
 0x19d   : > { %1220 = vst [vmem:[#allocation2 + $0x8] sm:$0xff] %v1216_v16 }
 0x19e   : > { %v1225_v17 = vld [vmem:[#allocation2 + $0x10] sm:$0xff]  ;;  %v1229_v18 = vld [vmem:[%s2128_s2] sm:$0xf]  ;;  %v1227_v26 = vld [vmem:[#allocation2 + $0x18] sm:$0xff] }
 0x19f   : > { %v1243_v20 = vld [vmem:[%s2129_s3] sm:$0xf]  ;;  %v1231_v21 = vperm.slane %v1229_v18, 0  ;;  %v1232_v23 = vperm.slane %v1229_v18, 1  ;;  %v1233_v59 = vperm.slane %v1229_v18, 2  ;;  %v1234_v29 = vperm.slane %v1229_v18, 3 }
 0x1a0   : > { %v1245_v22 = vperm.slane %v1243_v20, 0  ;;  %v1226_v6 = vld [vmem:[#allocation2] sm:$0xff]  ;;  %v1246_v25 = vperm.slane %v1243_v20, 1  ;;  %v1247_v27 = vperm.slane %v1243_v20, 2  ;;  %v1248_v0 = vperm.slane %v1243_v20, 3 }
 0x1a1   : > { %v1239_v30 = vmul.f32 %v1231_v21, %v1225_v17  ;;  %v1240_v1 = vmul.f32 %v1232_v23, %v1226_v6  ;;  %v1241_v31 = vmul.f32 %v1233_v59, %v1227_v26 }
 0x1a3   : > { %v1253_v33 = vadd.f32 %v1245_v22, %v1239_v30  ;;  %v1254_v34 = vadd.f32 %v1246_v25, %v1240_v1  ;;  %v1255_v35 = vadd.f32 %v1247_v27, %v1241_v31 }
 0x1a4   : > { %v1228_v28 = vld [vmem:[#allocation2 + $0x8] sm:$0xff] }
 0x1a5   : > { %v1242_v32 = vmul.f32 %v1234_v29, %v1228_v28  ;;  %v1257_v37 = vmax.f32 %v1253_v33, 0.0  ;;  %v1258_v38 = vmax.f32 %v1254_v34, 0.0  ;;  %v1259_v39 = vmax.f32 %v1255_v35, 0.0 }
 0x1a7   : > { %v1256_v36 = vadd.f32 %v1248_v0, %v1242_v32  ;;  %1261 = vst [vmem:[%s2130_s4] sm:$0xff] %v1257_v37 }
 0x1a8   : > { %1262 = vst [vmem:[%s2130_s4 + $0x8] sm:$0xff] %v1258_v38 }
 0x1a9   : > { %v1260_v40 = vmax.f32 %v1256_v36, 0.0  ;;  %1263 = vst [vmem:[%s2130_s4 + $0x10] sm:$0xff] %v1259_v39 }
 0x1ab   : > { %1264 = vst [vmem:[%s2130_s4 + $0x18] sm:$0xff] %v1260_v40 }
 0x1ac PF: > { %s17_s20 = sadd.s32 1, %s1565_s20   ;;  %s2132_s15 = smov %s1549_s16 }
 0x1ad   : > { %p14_p2 = scmp.ge.s32.totalorder %s17_s20, 5   ;;  %s2133_s16 = smov %s1553_s17 }
 0x1ae   : > { %s2134_s17 = smov %s1640_s26  ;;  %s2135_s18 = smov %s1561_s19 }
 0x1af   : > { %s2136_s19 = smov %s2138_s22  ;;  %16 = sbr.rel (!%p14_p2) target bundleno = 4 (0x4), region = 93 }
 0x1b4   :  { %1295 = vsyncpa [#allocation4], 1 }
 0x1b5   :  { %1297 = vsyncpa [#allocation4 + $0x1], 1 }

// kernel: encoder_forward.38
= control target key start
LH: loop header
LB: loop body
LE: loop exit
PB: predicated region body
PF: predicated region fallthrough
CT: control target
= control target key end

     0   :  { %s803_s1 = inlined_call_operand.vmem [shape: f32[256,512], index: 1, kind: input, shape index: {}]   ;;  %s804_s0 = inlined_call_operand.vmem [shape: f32[8,256], index: 0, kind: input, shape index: {}]   ;;  %s805_s2 = inlined_call_operand.vmem [shape: f32[1,512], index: 2, kind: input, shape index: {}]   ;;  %s806_s3 = inlined_call_operand.vmem [shape: f32[1,512], index: 3, kind: input, shape index: {}]   ;;  %s807_s4 = inlined_call_operand.vmem [shape: f32[8,512], index: 4, kind: output, shape index: {}]  }
   0x1   :  { %v92_v0 = vld [vmem:[%s803_s1 + $0x1e8] sm:$0xff]  ;;  %v91_v6 = vld [vmem:[%s803_s1 + $0x1e0] sm:$0xff]  ;;  %v94_v60 = vld [vmem:[%s803_s1 + $0x1f8] sm:$0xff] }
   0x2   :  { %v156_v1 = vld [vmem:[%s803_s1 + $0x3e8] sm:$0xff]  ;;  %199 = vmatpush.msra.mxu2 %v92_v0  ;;  %v155_v7 = vld [vmem:[%s803_s1 + $0x3e0] sm:$0xff]  ;;  %159 = vmatpush.msra.mxu0 %v91_v6  ;;  %v158_v61 = vld [vmem:[%s803_s1 + $0x3f8] sm:$0xff] }
   0x3   :  { %v88_v2 = vld [vmem:[%s803_s1 + $0x1c8] sm:$0xff]  ;;  %219 = vmatpush.msra.mxu3 %v156_v1  ;;  %v87_v8 = vld [vmem:[%s803_s1 + $0x1c0] sm:$0xff]  ;;  %179 = vmatpush.msra.mxu1 %v155_v7  ;;  %v90_v0 = vld [vmem:[%s803_s1 + $0x1d8] sm:$0xff] }
   0x4   :  { %v152_v3 = vld [vmem:[%s803_s1 + $0x3c8] sm:$0xff]  ;;  %200 = vmatpush.msra.mxu2 %v88_v2  ;;  %v151_v9 = vld [vmem:[%s803_s1 + $0x3c0] sm:$0xff]  ;;  %160 = vmatpush.msra.mxu0 %v87_v8  ;;  %v154_v1 = vld [vmem:[%s803_s1 + $0x3d8] sm:$0xff] }
   0x5   :  { %v84_v4 = vld [vmem:[%s803_s1 + $0x1a8] sm:$0xff]  ;;  %220 = vmatpush.msra.mxu3 %v152_v3  ;;  %v83_v12 = vld [vmem:[%s803_s1 + $0x1a0] sm:$0xff]  ;;  %180 = vmatpush.msra.mxu1 %v151_v9  ;;  %v93_v6 = vld [vmem:[%s803_s1 + $0x1f0] sm:$0xff] }
   0x6   :  { %v148_v5 = vld [vmem:[%s803_s1 + $0x3a8] sm:$0xff]  ;;  %201 = vmatpush.msra.mxu2 %v84_v4  ;;  %v147_v13 = vld [vmem:[%s803_s1 + $0x3a0] sm:$0xff]  ;;  %161 = vmatpush.msra.mxu0 %v83_v12  ;;  %v86_v4 = vld [vmem:[%s803_s1 + $0x1b8] sm:$0xff] }
   0x7   :  { %v80_v10 = vld [vmem:[%s803_s1 + $0x188] sm:$0xff]  ;;  %221 = vmatpush.msra.mxu3 %v148_v5  ;;  %v79_v16 = vld [vmem:[%s803_s1 + $0x180] sm:$0xff]  ;;  %181 = vmatpush.msra.mxu1 %v147_v13  ;;  %v150_v5 = vld [vmem:[%s803_s1 + $0x3b8] sm:$0xff] }
   0x8   :  { %v144_v11 = vld [vmem:[%s803_s1 + $0x388] sm:$0xff]  ;;  %202 = vmatpush.msra.mxu2 %v80_v10  ;;  %v143_v17 = vld [vmem:[%s803_s1 + $0x380] sm:$0xff]  ;;  %162 = vmatpush.msra.mxu0 %v79_v16  ;;  %v157_v7 = vld [vmem:[%s803_s1 + $0x3f0] sm:$0xff] }
   0x9   :  { %v76_v14 = vld [vmem:[%s803_s1 + $0x168] sm:$0xff]  ;;  %222 = vmatpush.msra.mxu3 %v144_v11  ;;  %v75_v20 = vld [vmem:[%s803_s1 + $0x160] sm:$0xff]  ;;  %182 = vmatpush.msra.mxu1 %v143_v17  ;;  %v82_v8 = vld [vmem:[%s803_s1 + $0x198] sm:$0xff] }
   0xa   :  { %v140_v15 = vld [vmem:[%s803_s1 + $0x368] sm:$0xff]  ;;  %203 = vmatpush.msra.mxu2 %v76_v14  ;;  %v139_v21 = vld [vmem:[%s803_s1 + $0x360] sm:$0xff]  ;;  %163 = vmatpush.msra.mxu0 %v75_v20  ;;  %v146_v9 = vld [vmem:[%s803_s1 + $0x398] sm:$0xff] }
   0xb   :  { %v72_v18 = vld [vmem:[%s803_s1 + $0x148] sm:$0xff]  ;;  %223 = vmatpush.msra.mxu3 %v140_v15  ;;  %v71_v24 = vld [vmem:[%s803_s1 + $0x140] sm:$0xff]  ;;  %183 = vmatpush.msra.mxu1 %v139_v21  ;;  %v89_v10 = vld [vmem:[%s803_s1 + $0x1d0] sm:$0xff] }
   0xc   :  { %v136_v19 = vld [vmem:[%s803_s1 + $0x348] sm:$0xff]  ;;  %204 = vmatpush.msra.mxu2 %v72_v18  ;;  %v135_v25 = vld [vmem:[%s803_s1 + $0x340] sm:$0xff]  ;;  %164 = vmatpush.msra.mxu0 %v71_v24  ;;  %v153_v11 = vld [vmem:[%s803_s1 + $0x3d0] sm:$0xff] }
   0xd   :  { %v68_v22 = vld [vmem:[%s803_s1 + $0x128] sm:$0xff]  ;;  %224 = vmatpush.msra.mxu3 %v136_v19  ;;  %v67_v28 = vld [vmem:[%s803_s1 + $0x120] sm:$0xff]  ;;  %184 = vmatpush.msra.mxu1 %v135_v25  ;;  %v78_v12 = vld [vmem:[%s803_s1 + $0x178] sm:$0xff] }
   0xe   :  { %v132_v23 = vld [vmem:[%s803_s1 + $0x328] sm:$0xff]  ;;  %205 = vmatpush.msra.mxu2 %v68_v22  ;;  %v131_v29 = vld [vmem:[%s803_s1 + $0x320] sm:$0xff]  ;;  %165 = vmatpush.msra.mxu0 %v67_v28  ;;  %v142_v13 = vld [vmem:[%s803_s1 + $0x378] sm:$0xff] }
   0xf   :  { %v64_v26 = vld [vmem:[%s803_s1 + $0x108] sm:$0xff]  ;;  %225 = vmatpush.msra.mxu3 %v132_v23  ;;  %v63_v32 = vld [vmem:[%s803_s1 + $0x100] sm:$0xff]  ;;  %185 = vmatpush.msra.mxu1 %v131_v29  ;;  %v85_v14 = vld [vmem:[%s803_s1 + $0x1b0] sm:$0xff] }
  0x10   :  { %v128_v27 = vld [vmem:[%s803_s1 + $0x308] sm:$0xff]  ;;  %206 = vmatpush.msra.mxu2 %v64_v26  ;;  %v127_v33 = vld [vmem:[%s803_s1 + $0x300] sm:$0xff]  ;;  %166 = vmatpush.msra.mxu0 %v63_v32  ;;  %v149_v15 = vld [vmem:[%s803_s1 + $0x3b0] sm:$0xff] }
  0x11   :  { %v60_v30 = vld [vmem:[%s803_s1 + $0xe8] sm:$0xff]  ;;  %226 = vmatpush.msra.mxu3 %v128_v27  ;;  %v59_v36 = vld [vmem:[%s803_s1 + $0xe0] sm:$0xff]  ;;  %186 = vmatpush.msra.mxu1 %v127_v33  ;;  %v74_v16 = vld [vmem:[%s803_s1 + $0x158] sm:$0xff] }
  0x12   :  { %v124_v31 = vld [vmem:[%s803_s1 + $0x2e8] sm:$0xff]  ;;  %207 = vmatpush.msra.mxu2 %v60_v30  ;;  %v123_v37 = vld [vmem:[%s803_s1 + $0x2e0] sm:$0xff]  ;;  %167 = vmatpush.msra.mxu0 %v59_v36  ;;  %v138_v17 = vld [vmem:[%s803_s1 + $0x358] sm:$0xff] }
  0x13   :  { %v56_v34 = vld [vmem:[%s803_s1 + $0xc8] sm:$0xff]  ;;  %227 = vmatpush.msra.mxu3 %v124_v31  ;;  %v55_v40 = vld [vmem:[%s803_s1 + $0xc0] sm:$0xff]  ;;  %187 = vmatpush.msra.mxu1 %v123_v37  ;;  %v81_v18 = vld [vmem:[%s803_s1 + $0x190] sm:$0xff] }
  0x14   :  { %v120_v35 = vld [vmem:[%s803_s1 + $0x2c8] sm:$0xff]  ;;  %208 = vmatpush.msra.mxu2 %v56_v34  ;;  %v119_v41 = vld [vmem:[%s803_s1 + $0x2c0] sm:$0xff]  ;;  %168 = vmatpush.msra.mxu0 %v55_v40  ;;  %v145_v19 = vld [vmem:[%s803_s1 + $0x390] sm:$0xff] }
  0x15   :  { %v52_v38 = vld [vmem:[%s803_s1 + $0xa8] sm:$0xff]  ;;  %228 = vmatpush.msra.mxu3 %v120_v35  ;;  %v51_v44 = vld [vmem:[%s803_s1 + $0xa0] sm:$0xff]  ;;  %188 = vmatpush.msra.mxu1 %v119_v41  ;;  %v70_v20 = vld [vmem:[%s803_s1 + $0x138] sm:$0xff] }
  0x16   :  { %v116_v39 = vld [vmem:[%s803_s1 + $0x2a8] sm:$0xff]  ;;  %209 = vmatpush.msra.mxu2 %v52_v38  ;;  %v115_v45 = vld [vmem:[%s803_s1 + $0x2a0] sm:$0xff]  ;;  %169 = vmatpush.msra.mxu0 %v51_v44  ;;  %v134_v21 = vld [vmem:[%s803_s1 + $0x338] sm:$0xff] }
  0x17   :  { %v48_v42 = vld [vmem:[%s803_s1 + $0x88] sm:$0xff]  ;;  %229 = vmatpush.msra.mxu3 %v116_v39  ;;  %v47_v48 = vld [vmem:[%s803_s1 + $0x80] sm:$0xff]  ;;  %189 = vmatpush.msra.mxu1 %v115_v45  ;;  %v77_v22 = vld [vmem:[%s803_s1 + $0x170] sm:$0xff] }
  0x18   :  { %v112_v43 = vld [vmem:[%s803_s1 + $0x288] sm:$0xff]  ;;  %210 = vmatpush.msra.mxu2 %v48_v42  ;;  %v111_v49 = vld [vmem:[%s803_s1 + $0x280] sm:$0xff]  ;;  %170 = vmatpush.msra.mxu0 %v47_v48  ;;  %v141_v23 = vld [vmem:[%s803_s1 + $0x370] sm:$0xff] }
  0x19   :  { %v44_v46 = vld [vmem:[%s803_s1 + $0x68] sm:$0xff]  ;;  %230 = vmatpush.msra.mxu3 %v112_v43  ;;  %v43_v52 = vld [vmem:[%s803_s1 + $0x60] sm:$0xff]  ;;  %190 = vmatpush.msra.mxu1 %v111_v49  ;;  %v66_v24 = vld [vmem:[%s803_s1 + $0x118] sm:$0xff] }
  0x1a   :  { %v108_v47 = vld [vmem:[%s803_s1 + $0x268] sm:$0xff]  ;;  %211 = vmatpush.msra.mxu2 %v44_v46  ;;  %v107_v53 = vld [vmem:[%s803_s1 + $0x260] sm:$0xff]  ;;  %171 = vmatpush.msra.mxu0 %v43_v52  ;;  %v130_v25 = vld [vmem:[%s803_s1 + $0x318] sm:$0xff] }
  0x1b   :  { %v40_v50 = vld [vmem:[%s803_s1 + $0x48] sm:$0xff]  ;;  %231 = vmatpush.msra.mxu3 %v108_v47  ;;  %v39_v56 = vld [vmem:[%s803_s1 + $0x40] sm:$0xff]  ;;  %191 = vmatpush.msra.mxu1 %v107_v53  ;;  %v73_v26 = vld [vmem:[%s803_s1 + $0x150] sm:$0xff] }
  0x1c   :  { %v104_v51 = vld [vmem:[%s803_s1 + $0x248] sm:$0xff]  ;;  %212 = vmatpush.msra.mxu2 %v40_v50  ;;  %v103_v57 = vld [vmem:[%s803_s1 + $0x240] sm:$0xff]  ;;  %172 = vmatpush.msra.mxu0 %v39_v56  ;;  %v137_v27 = vld [vmem:[%s803_s1 + $0x350] sm:$0xff] }
  0x1d   :  { %v36_v54 = vld [vmem:[%s803_s1 + $0x28] sm:$0xff]  ;;  %232 = vmatpush.msra.mxu3 %v104_v51  ;;  %192 = vmatpush.msra.mxu1 %v103_v57  ;;  %v35_v62 = vld [vmem:[%s803_s1 + $0x20] sm:$0xff]  ;;  %v62_v28 = vld [vmem:[%s803_s1 + $0xf8] sm:$0xff] }
  0x1e   :  { %v100_v55 = vld [vmem:[%s803_s1 + $0x228] sm:$0xff]  ;;  %213 = vmatpush.msra.mxu2 %v36_v54  ;;  %v99_v63 = vld [vmem:[%s803_s1 + $0x220] sm:$0xff]  ;;  %173 = vmatpush.msra.mxu0 %v35_v62  ;;  %v126_v29 = vld [vmem:[%s803_s1 + $0x2f8] sm:$0xff] }
  0x1f   :  { %v32_v58 = vld [vmem:[%s803_s1 + $0x8] sm:$0xff]  ;;  %233 = vmatpush.msra.mxu3 %v100_v55  ;;  %v31_v2 = vld [vmem:[%s803_s1] sm:$0xff]  ;;  %193 = vmatpush.msra.mxu1 %v99_v63  ;;  %v69_v30 = vld [vmem:[%s803_s1 + $0x130] sm:$0xff] }
  0x20   :  { %v96_v59 = vld [vmem:[%s803_s1 + $0x208] sm:$0xff]  ;;  %214 = vmatpush.msra.mxu2 %v32_v58  ;;  %v95_v3 = vld [vmem:[%s803_s1 + $0x200] sm:$0xff]  ;;  %174 = vmatpush.msra.mxu0 %v31_v2  ;;  %v133_v31 = vld [vmem:[%s803_s1 + $0x330] sm:$0xff] }
  0x21   :  { %234 = vmatpush.msra.mxu3 %v96_v59  ;;  %194 = vmatpush.msra.mxu1 %v95_v3  ;;  %v58_v32 = vld [vmem:[%s803_s1 + $0xd8] sm:$0xff]  ;;  %v65_v34 = vld [vmem:[%s803_s1 + $0x110] sm:$0xff]  ;;  %v29_v42 = vld [vmem:[%s804_s0] sm:$0xff] }
  0x22   :  { %279 = vmatpush.msrb.mxu2 %v94_v60  ;;  %239 = vmatpush.msrb.mxu0 %v93_v6  ;;  %v122_v33 = vld [vmem:[%s803_s1 + $0x2d8] sm:$0xff]  ;;  %v129_v35 = vld [vmem:[%s803_s1 + $0x310] sm:$0xff]  ;;  %v30_v43 = vld [vmem:[%s804_s0 + $0x8] sm:$0xff] }
  0x23   :  { %299 = vmatpush.msrb.mxu3 %v158_v61  ;;  %259 = vmatpush.msrb.mxu1 %v157_v7  ;;  %v54_v36 = vld [vmem:[%s803_s1 + $0xb8] sm:$0xff]  ;;  %v61_v38 = vld [vmem:[%s803_s1 + $0xf0] sm:$0xff]  ;;  %v334_v2 = vld [vmem:[%s805_s2] sm:$0xf] }
  0x24   :  { %280 = vmatpush.msrb.mxu2 %v90_v0  ;;  %240 = vmatpush.msrb.mxu0 %v89_v10  ;;  %v118_v37 = vld [vmem:[%s803_s1 + $0x2b8] sm:$0xff]  ;;  %v125_v39 = vld [vmem:[%s803_s1 + $0x2f0] sm:$0xff]  ;;  %v348_v3 = vld [vmem:[%s806_s3] sm:$0xf] }
  0x25   :  { %300 = vmatpush.msrb.mxu3 %v154_v1  ;;  %260 = vmatpush.msrb.mxu1 %v153_v11  ;;  %v50_v40 = vld [vmem:[%s803_s1 + $0x98] sm:$0xff]  ;;  %v57_v44 = vld [vmem:[%s803_s1 + $0xd0] sm:$0xff]  ;;  %v351_v11 = vperm.slane %v348_v3, 1 }
  0x26   :  { %281 = vmatpush.msrb.mxu2 %v86_v4  ;;  %241 = vmatpush.msrb.mxu0 %v85_v14  ;;  %v114_v41 = vld [vmem:[%s803_s1 + $0x298] sm:$0xff]  ;;  %v121_v45 = vld [vmem:[%s803_s1 + $0x2d0] sm:$0xff]  ;;  %v337_v4 = vperm.slane %v334_v2, 1 }
  0x27   :  { %301 = vmatpush.msrb.mxu3 %v150_v5  ;;  %261 = vmatpush.msrb.mxu1 %v149_v15  ;;  %v46_v46 = vld [vmem:[%s803_s1 + $0x78] sm:$0xff]  ;;  %v53_v48 = vld [vmem:[%s803_s1 + $0xb0] sm:$0xff]  ;;  %v336_v5 = vperm.slane %v334_v2, 0 }
  0x28   :  { %282 = vmatpush.msrb.mxu2 %v82_v8  ;;  %242 = vmatpush.msrb.mxu0 %v81_v18  ;;  %v110_v47 = vld [vmem:[%s803_s1 + $0x278] sm:$0xff]  ;;  %v117_v49 = vld [vmem:[%s803_s1 + $0x2b0] sm:$0xff]  ;;  %v338_v18 = vperm.slane %v334_v2, 2 }
  0x29   :  { %302 = vmatpush.msrb.mxu3 %v146_v9  ;;  %262 = vmatpush.msrb.mxu1 %v145_v19  ;;  %v42_v50 = vld [vmem:[%s803_s1 + $0x58] sm:$0xff]  ;;  %v49_v52 = vld [vmem:[%s803_s1 + $0x90] sm:$0xff] }
  0x2a   :  { %283 = vmatpush.msrb.mxu2 %v78_v12  ;;  %243 = vmatpush.msrb.mxu0 %v77_v22  ;;  %v106_v51 = vld [vmem:[%s803_s1 + $0x258] sm:$0xff]  ;;  %v113_v53 = vld [vmem:[%s803_s1 + $0x290] sm:$0xff] }
  0x2b   :  { %303 = vmatpush.msrb.mxu3 %v142_v13  ;;  %263 = vmatpush.msrb.mxu1 %v141_v23  ;;  %v38_v54 = vld [vmem:[%s803_s1 + $0x38] sm:$0xff]  ;;  %v45_v56 = vld [vmem:[%s803_s1 + $0x70] sm:$0xff]  ;;  %v350_v13 = vperm.slane %v348_v3, 0  ;;  %v352_v23 = vperm.slane %v348_v3, 2 }
  0x2c   :  { %284 = vmatpush.msrb.mxu2 %v74_v16  ;;  %244 = vmatpush.msrb.mxu0 %v73_v26  ;;  %v102_v55 = vld [vmem:[%s803_s1 + $0x238] sm:$0xff]  ;;  %v109_v57 = vld [vmem:[%s803_s1 + $0x270] sm:$0xff] }
  0x2d   :  { %304 = vmatpush.msrb.mxu3 %v138_v17  ;;  %264 = vmatpush.msrb.mxu1 %v137_v27  ;;  %v34_v58 = vld [vmem:[%s803_s1 + $0x18] sm:$0xff]  ;;  %v41_v60 = vld [vmem:[%s803_s1 + $0x50] sm:$0xff]  ;;  %v353_v27 = vperm.slane %v348_v3, 3 }
  0x2e   :  { %285 = vmatpush.msrb.mxu2 %v70_v20  ;;  %245 = vmatpush.msrb.mxu0 %v69_v30  ;;  %v98_v59 = vld [vmem:[%s803_s1 + $0x218] sm:$0xff]  ;;  %v105_v61 = vld [vmem:[%s803_s1 + $0x250] sm:$0xff] }
  0x2f   :  { %305 = vmatpush.msrb.mxu3 %v134_v21  ;;  %265 = vmatpush.msrb.mxu1 %v133_v31  ;;  %v37_v62 = vld [vmem:[%s803_s1 + $0x30] sm:$0xff]  ;;  %v339_v21 = vperm.slane %v334_v2, 3 }
  0x30   :  { %286 = vmatpush.msrb.mxu2 %v66_v24  ;;  %246 = vmatpush.msrb.mxu0 %v65_v34  ;;  %v101_v63 = vld [vmem:[%s803_s1 + $0x230] sm:$0xff] }
  0x31   :  { %306 = vmatpush.msrb.mxu3 %v130_v25  ;;  %266 = vmatpush.msrb.mxu1 %v129_v35  ;;  %v33_v0 = vld [vmem:[%s803_s1 + $0x10] sm:$0xff] }
  0x32   :  { %287 = vmatpush.msrb.mxu2 %v62_v28  ;;  %247 = vmatpush.msrb.mxu0 %v61_v38  ;;  %v97_v1 = vld [vmem:[%s803_s1 + $0x210] sm:$0xff] }
  0x33   :  { %307 = vmatpush.msrb.mxu3 %v126_v29  ;;  %267 = vmatpush.msrb.mxu1 %v125_v39 }
  0x34   :  { %288 = vmatpush.msrb.mxu2 %v58_v32  ;;  %235 = vmatmul.f32.vlgmr.msra.gmra.mxu3 %v30_v43 }
  0x35   :  { %308 = vmatpush.msrb.mxu3 %v122_v33  ;;  %215 = vmatmul.f32.vlgmr.msra.gmra.mxu2 %v29_v42 }
  0x36   :  { %289 = vmatpush.msrb.mxu2 %v54_v36  ;;  %248 = vmatpush.msrb.mxu0 %v57_v44 }
  0x37   :  { %309 = vmatpush.msrb.mxu3 %v118_v37  ;;  %268 = vmatpush.msrb.mxu1 %v121_v45 }
  0x38   :  { %290 = vmatpush.msrb.mxu2 %v50_v40  ;;  %249 = vmatpush.msrb.mxu0 %v53_v48 }
  0x39   :  { %310 = vmatpush.msrb.mxu3 %v114_v41  ;;  %269 = vmatpush.msrb.mxu1 %v117_v49 }
  0x3a   :  { %291 = vmatpush.msrb.mxu2 %v46_v46  ;;  %250 = vmatpush.msrb.mxu0 %v49_v52 }
  0x3b   :  { %311 = vmatpush.msrb.mxu3 %v110_v47  ;;  %270 = vmatpush.msrb.mxu1 %v113_v53 }
  0x3c   :  { %292 = vmatpush.msrb.mxu2 %v42_v50  ;;  %175 = vmatmul.f32.vlgmr.msra.gmra.mxu0 %v29_v42 }
  0x3d   :  { %312 = vmatpush.msrb.mxu3 %v106_v51  ;;  %195 = vmatmul.f32.vlgmr.msra.gmra.mxu1 %v30_v43 }
  0x3e   :  { %293 = vmatpush.msrb.mxu2 %v38_v54  ;;  %251 = vmatpush.msrb.mxu0 %v45_v56 }
  0x3f   :  { %313 = vmatpush.msrb.mxu3 %v102_v55  ;;  %271 = vmatpush.msrb.mxu1 %v109_v57 }
  0x40   :  { %294 = vmatpush.msrb.mxu2 %v34_v58  ;;  %252 = vmatpush.msrb.mxu0 %v41_v60 }
  0x41   :  { %314 = vmatpush.msrb.mxu3 %v98_v59  ;;  %295 = vmatmul.f32.vlgmr.msrb.gmra.mxu2 %v29_v42 }
  0x42   :  { %315 = vmatmul.f32.vlgmr.msrb.gmra.mxu3 %v30_v43  ;;  %272 = vmatpush.msrb.mxu1 %v105_v61 }
  0x43   :  { %253 = vmatpush.msrb.mxu0 %v37_v62 }
  0x44   :  { %273 = vmatpush.msrb.mxu1 %v101_v63 }
  0x45   :  { %254 = vmatpush.msrb.mxu0 %v33_v0 }
  0x46   :  { %274 = vmatpush.msrb.mxu1 %v97_v1  ;;  %255 = vmatmul.f32.vlgmr.msrb.gmra.mxu0 %v29_v42 }
  0x47   :  { %275 = vmatmul.f32.vlgmr.msrb.gmra.mxu1 %v30_v43 }
  0xb7   :  { %v236_v7 = vpop.f32.mrf.mxu3 }
  0xb8   :  { %v216_v6 = vpop.f32.mrf.mxu2 }
  0xb9   :  { %v176_v8 = vpop.f32.mrf.mxu0  ;;  %v237_v10 = vadd.f32 %v236_v7, %v216_v6 }
  0xba   :  { %v196_v9 = vpop.f32.mrf.mxu1 }
  0xbb   :  { %v197_v12 = vadd.f32 %v196_v9, %v176_v8  ;;  %v345_v14 = vmul.f32 %v337_v4, %v237_v10 }
  0xbd   :  { %v344_v15 = vmul.f32 %v336_v5, %v197_v12  ;;  %v359_v16 = vadd.f32 %v351_v11, %v345_v14 }
  0xbf   :  { %v358_v17 = vadd.f32 %v350_v13, %v344_v15  ;;  %363 = vst [vmem:[%s807_s4 + $0x8] sm:$0xff] %v359_v16 }
  0xc1   :  { %362 = vst [vmem:[%s807_s4] sm:$0xff] %v358_v17 }
  0xc3   :  { %v256_v19 = vpop.f32.mrf.mxu0 }
  0xc4   :  { %v276_v20 = vpop.f32.mrf.mxu1  ;;  %v296_v24 = vpop.f32.mrf.mxu2 }
  0xc5   :  { %v277_v22 = vadd.f32 %v276_v20, %v256_v19  ;;  %v316_v25 = vpop.f32.mrf.mxu3 }
  0xc6   :  { %v317_v26 = vadd.f32 %v316_v25, %v296_v24 }
  0xc7   :  { %v346_v28 = vmul.f32 %v338_v18, %v277_v22 }
  0xc8   :  { %v347_v29 = vmul.f32 %v339_v21, %v317_v26 }
  0xc9   :  { %v360_v30 = vadd.f32 %v352_v23, %v346_v28 }
  0xca   :  { %v361_v31 = vadd.f32 %v353_v27, %v347_v29 }
  0xcb   :  { %364 = vst [vmem:[%s807_s4 + $0x10] sm:$0xff] %v360_v30 }
  0xcc   :  { %365 = vst [vmem:[%s807_s4 + $0x18] sm:$0xff] %v361_v31 }

// kernel: encoder_forward.39
= control target key start
LH: loop header
LB: loop body
LE: loop exit
PB: predicated region body
PF: predicated region fallthrough
CT: control target
= control target key end

     0   :  { %s1287_s18 = smov 0   ;;  %s1289_s19 = smov 0   ;;  %s1644_s0 = inlined_call_operand.vmem [shape: f32[8,4608], index: 0, kind: input, shape index: {}]   ;;  %s1645_s1 = inlined_call_operand.vmem [shape: f32[4608,512], index: 1, kind: input, shape index: {}]   ;;  %s1646_s2 = inlined_call_operand.vmem [shape: f32[1,512], index: 2, kind: input, shape index: {}]   ;;  %s1647_s3 = inlined_call_operand.vmem [shape: f32[1,512], index: 3, kind: input, shape index: {}]   ;;  %s1648_s4 = inlined_call_operand.vmem [shape: f32[8,512], index: 4, kind: input, shape index: {}]   ;;  %s1649_s5 = inlined_call_operand.vmem [shape: f32[8,512], index: 5, kind: output, shape index: {}]  }
   0x1   :  { %s1291_s20 = smov 0  }
   0x2 LB: > { %s27_s21 = sadd.s32 1, %s1250_s19  ;;  %p1194_p0 = scmp.ge.s32.totalorder %s1254_s20, 1  ;;  %s1254_s20 = sphi %s1291_s20, %s15_s20   ;;  %s1250_s19 = sphi %s1289_s19, %s1651_s19   ;;  %s1246_s18 = sphi %s1287_s18, %s1650_s18  }
   0x3   : > { %p28_p1 = scmp.ge.s32.totalorder %s27_s21, 9  ;;  %p271_p2 = scmp.lt.s32.totalorder %s1254_s20, 10 }
   0x5   : > { %s1653_s21 = smov (%p28_p1, %s27_s21), 0  ;;  %p272_p3 = pnand %p1194_p0, %p271_p2 }
   0x6   : > { %s1195_s22 = sshll.u32 (!%p272_p3), %s1246_s18, 2  ;;  %s1197_s23 = sshll.u32 (!%p272_p3), %s1246_s18, 6 }
   0x7   : > { %275 = sbr.rel (%p272_p3) target bundleno = 343 (0x157), region = 40  ;;  %p337_p4 = scmp.lt.s32.totalorder (!%p272_p3), %s1195_s22, 35 }
   0x8   : > { %p346_p5 = scmp.lt.s32.totalorder (!%p272_p3), %s1197_s23, 575  ;;  %p1200_p6 = scmp.ne.s32.totalorder (!%p272_p3), %s1246_s18, 0 }
   0xc   : > { %s1655_s22 = smov (!%p337_p4, %s1195_s22), 35  ;;  %s1657_s23 = smov (!%p346_p5, %s1197_s23), 575 }
   0xd   : > { %s1196_s24 = sshll.u32 %s1655_s22, 3  ;;  %s1206_s28 = sshll.u32 %s1657_s23, 5 }
   0xe   : > { %s1312_s27 = scalar_lea.vmem %s1644_s0, %s1196_s24  ;;  %s1317_s6 = scalar_lea.vmem %s1645_s1, %s1206_s28 }
   0xf   : > { %389 = sbr.rel (%p1200_p6) target bundleno = 25 (0x19), region = 44 }
  0x14   : > { %v1256_v0 = vmov 0.0  }
  0x15   : > { %390 = vst [vmem:[#allocation2 + $0x10] sm:$0xff] %v1256_v0 }
  0x16   : > { %391 = vst [vmem:[#allocation2] sm:$0xff] %v1256_v0 }
  0x17   : > { %392 = vst [vmem:[#allocation2 + $0x18] sm:$0xff] %v1256_v0 }
  0x18   : > { %393 = vst [vmem:[#allocation2 + $0x8] sm:$0xff] %v1256_v0 }
  0x19 PF: > { %v590_v1 = vld [vmem:[%s1317_s6 + $0x5e0] sm:$0xff]  ;;  %v591_v63 = vld [vmem:[%s1317_s6 + $0x5e8] sm:$0xff]  ;;  %p1201_p7 = scmp.ne.s32.totalorder %s1246_s18, 8 }
  0x1a   : > { %v586_v2 = vld [vmem:[%s1317_s6 + $0x5c0] sm:$0xff]  ;;  %698 = vmatpush.msra.mxu2 %v590_v1  ;;  %v655_v0 = vld [vmem:[%s1317_s6 + $0x7e8] sm:$0xff] }
  0x1b   : > { %v654_v3 = vld [vmem:[%s1317_s6 + $0x7e0] sm:$0xff] }
  0x1c   : > { %718 = vmatpush.msra.mxu3 %v654_v3  ;;  %v462_v4 = vld [vmem:[%s1317_s6 + $0x1e0] sm:$0xff]  ;;  %699 = vmatpush.msra.mxu2 %v586_v2  ;;  %v587_v3 = vld [vmem:[%s1317_s6 + $0x5c8] sm:$0xff] }
  0x1d   : > { %v526_v5 = vld [vmem:[%s1317_s6 + $0x3e0] sm:$0xff]  ;;  %658 = vmatpush.msra.mxu0 %v462_v4  ;;  %v463_v4 = vld [vmem:[%s1317_s6 + $0x1e8] sm:$0xff] }
  0x1e   : > { %v582_v6 = vld [vmem:[%s1317_s6 + $0x5a0] sm:$0xff]  ;;  %678 = vmatpush.msra.mxu1 %v526_v5  ;;  %v527_v5 = vld [vmem:[%s1317_s6 + $0x3e8] sm:$0xff] }
  0x1f   : > { %v650_v7 = vld [vmem:[%s1317_s6 + $0x7c0] sm:$0xff]  ;;  %700 = vmatpush.msra.mxu2 %v582_v6  ;;  %v651_v6 = vld [vmem:[%s1317_s6 + $0x7c8] sm:$0xff] }
  0x20   : > { %v458_v8 = vld [vmem:[%s1317_s6 + $0x1c0] sm:$0xff]  ;;  %719 = vmatpush.msra.mxu3 %v650_v7  ;;  %v583_v7 = vld [vmem:[%s1317_s6 + $0x5a8] sm:$0xff] }
  0x21   : > { %v522_v9 = vld [vmem:[%s1317_s6 + $0x3c0] sm:$0xff]  ;;  %659 = vmatpush.msra.mxu0 %v458_v8  ;;  %v459_v8 = vld [vmem:[%s1317_s6 + $0x1c8] sm:$0xff] }
  0x22   : > { %v646_v10 = vld [vmem:[%s1317_s6 + $0x7a0] sm:$0xff]  ;;  %679 = vmatpush.msra.mxu1 %v522_v9  ;;  %v523_v9 = vld [vmem:[%s1317_s6 + $0x3c8] sm:$0xff] }
  0x23   : > { %v454_v11 = vld [vmem:[%s1317_s6 + $0x1a0] sm:$0xff]  ;;  %720 = vmatpush.msra.mxu3 %v646_v10  ;;  %v647_v10 = vld [vmem:[%s1317_s6 + $0x7a8] sm:$0xff] }
  0x24   : > { %v578_v12 = vld [vmem:[%s1317_s6 + $0x580] sm:$0xff]  ;;  %660 = vmatpush.msra.mxu0 %v454_v11  ;;  %v579_v11 = vld [vmem:[%s1317_s6 + $0x588] sm:$0xff] }
  0x25   : > { %v518_v13 = vld [vmem:[%s1317_s6 + $0x3a0] sm:$0xff]  ;;  %701 = vmatpush.msra.mxu2 %v578_v12  ;;  %v455_v12 = vld [vmem:[%s1317_s6 + $0x1a8] sm:$0xff] }
  0x26   : > { %v642_v14 = vld [vmem:[%s1317_s6 + $0x780] sm:$0xff]  ;;  %680 = vmatpush.msra.mxu1 %v518_v13  ;;  %v519_v13 = vld [vmem:[%s1317_s6 + $0x3a8] sm:$0xff] }
  0x27   : > { %v450_v15 = vld [vmem:[%s1317_s6 + $0x180] sm:$0xff]  ;;  %721 = vmatpush.msra.mxu3 %v642_v14  ;;  %v643_v14 = vld [vmem:[%s1317_s6 + $0x788] sm:$0xff] }
  0x28   : > { %v514_v16 = vld [vmem:[%s1317_s6 + $0x380] sm:$0xff]  ;;  %661 = vmatpush.msra.mxu0 %v450_v15  ;;  %v575_v15 = vld [vmem:[%s1317_s6 + $0x568] sm:$0xff] }
  0x29   : > { %v574_v17 = vld [vmem:[%s1317_s6 + $0x560] sm:$0xff]  ;;  %681 = vmatpush.msra.mxu1 %v514_v16  ;;  %v451_v16 = vld [vmem:[%s1317_s6 + $0x188] sm:$0xff] }
  0x2a   : > { %v638_v18 = vld [vmem:[%s1317_s6 + $0x760] sm:$0xff]  ;;  %702 = vmatpush.msra.mxu2 %v574_v17  ;;  %v515_v17 = vld [vmem:[%s1317_s6 + $0x388] sm:$0xff] }
  0x2b   : > { %v446_v19 = vld [vmem:[%s1317_s6 + $0x160] sm:$0xff]  ;;  %722 = vmatpush.msra.mxu3 %v638_v18  ;;  %v639_v18 = vld [vmem:[%s1317_s6 + $0x768] sm:$0xff] }
  0x2c   : > { %v510_v20 = vld [vmem:[%s1317_s6 + $0x360] sm:$0xff]  ;;  %662 = vmatpush.msra.mxu0 %v446_v19  ;;  %v571_v19 = vld [vmem:[%s1317_s6 + $0x548] sm:$0xff] }
  0x2d   : > { %v570_v21 = vld [vmem:[%s1317_s6 + $0x540] sm:$0xff]  ;;  %682 = vmatpush.msra.mxu1 %v510_v20  ;;  %v447_v20 = vld [vmem:[%s1317_s6 + $0x168] sm:$0xff] }
  0x2e   : > { %v634_v22 = vld [vmem:[%s1317_s6 + $0x740] sm:$0xff]  ;;  %703 = vmatpush.msra.mxu2 %v570_v21  ;;  %v511_v21 = vld [vmem:[%s1317_s6 + $0x368] sm:$0xff] }
  0x2f   : > { %v442_v23 = vld [vmem:[%s1317_s6 + $0x140] sm:$0xff]  ;;  %723 = vmatpush.msra.mxu3 %v634_v22  ;;  %v635_v22 = vld [vmem:[%s1317_s6 + $0x748] sm:$0xff] }
  0x30   : > { %v506_v24 = vld [vmem:[%s1317_s6 + $0x340] sm:$0xff]  ;;  %663 = vmatpush.msra.mxu0 %v442_v23  ;;  %v567_v23 = vld [vmem:[%s1317_s6 + $0x528] sm:$0xff] }
  0x31   : > { %v566_v25 = vld [vmem:[%s1317_s6 + $0x520] sm:$0xff]  ;;  %683 = vmatpush.msra.mxu1 %v506_v24  ;;  %v443_v24 = vld [vmem:[%s1317_s6 + $0x148] sm:$0xff] }
  0x32   : > { %v630_v26 = vld [vmem:[%s1317_s6 + $0x720] sm:$0xff]  ;;  %704 = vmatpush.msra.mxu2 %v566_v25  ;;  %v507_v25 = vld [vmem:[%s1317_s6 + $0x348] sm:$0xff] }
  0x33   : > { %v438_v27 = vld [vmem:[%s1317_s6 + $0x120] sm:$0xff]  ;;  %724 = vmatpush.msra.mxu3 %v630_v26  ;;  %v631_v26 = vld [vmem:[%s1317_s6 + $0x728] sm:$0xff] }
  0x34   : > { %v502_v28 = vld [vmem:[%s1317_s6 + $0x320] sm:$0xff]  ;;  %664 = vmatpush.msra.mxu0 %v438_v27  ;;  %v563_v27 = vld [vmem:[%s1317_s6 + $0x508] sm:$0xff] }
  0x35   : > { %v562_v29 = vld [vmem:[%s1317_s6 + $0x500] sm:$0xff]  ;;  %684 = vmatpush.msra.mxu1 %v502_v28  ;;  %v439_v28 = vld [vmem:[%s1317_s6 + $0x128] sm:$0xff] }
  0x36   : > { %v626_v30 = vld [vmem:[%s1317_s6 + $0x700] sm:$0xff]  ;;  %705 = vmatpush.msra.mxu2 %v562_v29  ;;  %v503_v29 = vld [vmem:[%s1317_s6 + $0x328] sm:$0xff] }
  0x37   : > { %v434_v31 = vld [vmem:[%s1317_s6 + $0x100] sm:$0xff]  ;;  %725 = vmatpush.msra.mxu3 %v626_v30  ;;  %v627_v30 = vld [vmem:[%s1317_s6 + $0x708] sm:$0xff] }
  0x38   : > { %v498_v32 = vld [vmem:[%s1317_s6 + $0x300] sm:$0xff]  ;;  %665 = vmatpush.msra.mxu0 %v434_v31  ;;  %v559_v31 = vld [vmem:[%s1317_s6 + $0x4e8] sm:$0xff] }
  0x39   : > { %v558_v33 = vld [vmem:[%s1317_s6 + $0x4e0] sm:$0xff]  ;;  %685 = vmatpush.msra.mxu1 %v498_v32  ;;  %v435_v32 = vld [vmem:[%s1317_s6 + $0x108] sm:$0xff] }
  0x3a   : > { %v622_v34 = vld [vmem:[%s1317_s6 + $0x6e0] sm:$0xff]  ;;  %706 = vmatpush.msra.mxu2 %v558_v33  ;;  %v499_v33 = vld [vmem:[%s1317_s6 + $0x308] sm:$0xff] }
  0x3b   : > { %v430_v35 = vld [vmem:[%s1317_s6 + $0xe0] sm:$0xff]  ;;  %726 = vmatpush.msra.mxu3 %v622_v34  ;;  %v623_v34 = vld [vmem:[%s1317_s6 + $0x6e8] sm:$0xff] }
  0x3c   : > { %v494_v36 = vld [vmem:[%s1317_s6 + $0x2e0] sm:$0xff]  ;;  %666 = vmatpush.msra.mxu0 %v430_v35  ;;  %v555_v35 = vld [vmem:[%s1317_s6 + $0x4c8] sm:$0xff] }
  0x3d   : > { %v554_v37 = vld [vmem:[%s1317_s6 + $0x4c0] sm:$0xff]  ;;  %686 = vmatpush.msra.mxu1 %v494_v36  ;;  %v431_v36 = vld [vmem:[%s1317_s6 + $0xe8] sm:$0xff] }
  0x3e   : > { %v618_v38 = vld [vmem:[%s1317_s6 + $0x6c0] sm:$0xff]  ;;  %707 = vmatpush.msra.mxu2 %v554_v37  ;;  %v495_v37 = vld [vmem:[%s1317_s6 + $0x2e8] sm:$0xff] }
  0x3f   : > { %v426_v39 = vld [vmem:[%s1317_s6 + $0xc0] sm:$0xff]  ;;  %727 = vmatpush.msra.mxu3 %v618_v38  ;;  %v619_v38 = vld [vmem:[%s1317_s6 + $0x6c8] sm:$0xff] }
  0x40   : > { %v490_v40 = vld [vmem:[%s1317_s6 + $0x2c0] sm:$0xff]  ;;  %667 = vmatpush.msra.mxu0 %v426_v39  ;;  %v551_v39 = vld [vmem:[%s1317_s6 + $0x4a8] sm:$0xff] }
  0x41   : > { %v550_v41 = vld [vmem:[%s1317_s6 + $0x4a0] sm:$0xff]  ;;  %687 = vmatpush.msra.mxu1 %v490_v40  ;;  %v427_v40 = vld [vmem:[%s1317_s6 + $0xc8] sm:$0xff] }
  0x42   : > { %v614_v42 = vld [vmem:[%s1317_s6 + $0x6a0] sm:$0xff]  ;;  %708 = vmatpush.msra.mxu2 %v550_v41  ;;  %v491_v41 = vld [vmem:[%s1317_s6 + $0x2c8] sm:$0xff] }
  0x43   : > { %v422_v43 = vld [vmem:[%s1317_s6 + $0xa0] sm:$0xff]  ;;  %728 = vmatpush.msra.mxu3 %v614_v42  ;;  %v615_v42 = vld [vmem:[%s1317_s6 + $0x6a8] sm:$0xff] }
  0x44   : > { %v486_v44 = vld [vmem:[%s1317_s6 + $0x2a0] sm:$0xff]  ;;  %668 = vmatpush.msra.mxu0 %v422_v43  ;;  %v547_v43 = vld [vmem:[%s1317_s6 + $0x488] sm:$0xff] }
  0x45   : > { %v546_v45 = vld [vmem:[%s1317_s6 + $0x480] sm:$0xff]  ;;  %688 = vmatpush.msra.mxu1 %v486_v44  ;;  %v423_v44 = vld [vmem:[%s1317_s6 + $0xa8] sm:$0xff] }
  0x46   : > { %v610_v46 = vld [vmem:[%s1317_s6 + $0x680] sm:$0xff]  ;;  %709 = vmatpush.msra.mxu2 %v546_v45  ;;  %v487_v45 = vld [vmem:[%s1317_s6 + $0x2a8] sm:$0xff] }
  0x47   : > { %v418_v47 = vld [vmem:[%s1317_s6 + $0x80] sm:$0xff]  ;;  %729 = vmatpush.msra.mxu3 %v610_v46  ;;  %v611_v46 = vld [vmem:[%s1317_s6 + $0x688] sm:$0xff] }
  0x48   : > { %v482_v48 = vld [vmem:[%s1317_s6 + $0x280] sm:$0xff]  ;;  %669 = vmatpush.msra.mxu0 %v418_v47  ;;  %v543_v47 = vld [vmem:[%s1317_s6 + $0x468] sm:$0xff] }
  0x49   : > { %v542_v49 = vld [vmem:[%s1317_s6 + $0x460] sm:$0xff]  ;;  %689 = vmatpush.msra.mxu1 %v482_v48  ;;  %v419_v48 = vld [vmem:[%s1317_s6 + $0x88] sm:$0xff] }
  0x4a   : > { %v606_v50 = vld [vmem:[%s1317_s6 + $0x660] sm:$0xff]  ;;  %710 = vmatpush.msra.mxu2 %v542_v49  ;;  %v483_v49 = vld [vmem:[%s1317_s6 + $0x288] sm:$0xff] }
  0x4b   : > { %v414_v51 = vld [vmem:[%s1317_s6 + $0x60] sm:$0xff]  ;;  %730 = vmatpush.msra.mxu3 %v606_v50  ;;  %v607_v50 = vld [vmem:[%s1317_s6 + $0x668] sm:$0xff] }
  0x4c   : > { %v478_v52 = vld [vmem:[%s1317_s6 + $0x260] sm:$0xff]  ;;  %670 = vmatpush.msra.mxu0 %v414_v51  ;;  %v539_v51 = vld [vmem:[%s1317_s6 + $0x448] sm:$0xff] }
  0x4d   : > { %v538_v53 = vld [vmem:[%s1317_s6 + $0x440] sm:$0xff]  ;;  %690 = vmatpush.msra.mxu1 %v478_v52  ;;  %v415_v52 = vld [vmem:[%s1317_s6 + $0x68] sm:$0xff] }
  0x4e   : > { %v602_v54 = vld [vmem:[%s1317_s6 + $0x640] sm:$0xff]  ;;  %711 = vmatpush.msra.mxu2 %v538_v53  ;;  %v479_v53 = vld [vmem:[%s1317_s6 + $0x268] sm:$0xff] }
  0x4f   : > { %v410_v55 = vld [vmem:[%s1317_s6 + $0x40] sm:$0xff]  ;;  %731 = vmatpush.msra.mxu3 %v602_v54  ;;  %v603_v54 = vld [vmem:[%s1317_s6 + $0x648] sm:$0xff] }
  0x50   : > { %v474_v56 = vld [vmem:[%s1317_s6 + $0x240] sm:$0xff]  ;;  %671 = vmatpush.msra.mxu0 %v410_v55  ;;  %v535_v55 = vld [vmem:[%s1317_s6 + $0x428] sm:$0xff] }
  0x51   : > { %v534_v57 = vld [vmem:[%s1317_s6 + $0x420] sm:$0xff]  ;;  %691 = vmatpush.msra.mxu1 %v474_v56  ;;  %v411_v56 = vld [vmem:[%s1317_s6 + $0x48] sm:$0xff] }
  0x52   : > { %v598_v58 = vld [vmem:[%s1317_s6 + $0x620] sm:$0xff]  ;;  %712 = vmatpush.msra.mxu2 %v534_v57  ;;  %v475_v57 = vld [vmem:[%s1317_s6 + $0x248] sm:$0xff] }
  0x53   : > { %v406_v59 = vld [vmem:[%s1317_s6 + $0x20] sm:$0xff]  ;;  %732 = vmatpush.msra.mxu3 %v598_v58  ;;  %v599_v58 = vld [vmem:[%s1317_s6 + $0x628] sm:$0xff] }
  0x54   : > { %v470_v60 = vld [vmem:[%s1317_s6 + $0x220] sm:$0xff]  ;;  %672 = vmatpush.msra.mxu0 %v406_v59  ;;  %v531_v59 = vld [vmem:[%s1317_s6 + $0x408] sm:$0xff] }
  0x55   : > { %v530_v61 = vld [vmem:[%s1317_s6 + $0x400] sm:$0xff]  ;;  %692 = vmatpush.msra.mxu1 %v470_v60  ;;  %v407_v60 = vld [vmem:[%s1317_s6 + $0x28] sm:$0xff] }
  0x56   : > { %v594_v62 = vld [vmem:[%s1317_s6 + $0x600] sm:$0xff]  ;;  %713 = vmatpush.msra.mxu2 %v530_v61  ;;  %v1445_v61 = vld [vmem:[%s1312_s27 + $0x10] sm:$0xff] }
  0x57   : > { %v402_v1 = vld [vmem:[%s1317_s6] sm:$0xff]  ;;  %733 = vmatpush.msra.mxu3 %v594_v62  ;;  %v471_v62 = vld [vmem:[%s1317_s6 + $0x228] sm:$0xff]  ;;  %714 = vmatmul.f32.vlgmr.msra.gmra.mxu2 %v1445_v61 }
  0x58   : > { %v466_v2 = vld [vmem:[%s1317_s6 + $0x200] sm:$0xff]  ;;  %778 = vmatpush.msrb.mxu2 %v591_v63  ;;  %673 = vmatpush.msra.mxu0 %v402_v1  ;;  %v592_v63 = vld [vmem:[%s1317_s6 + $0x5f0] sm:$0xff]  ;;  %v1451_v1 = vld [vmem:[%s1312_s27 + $0x18] sm:$0xff] }
  0x59   : > { %798 = vmatpush.msrb.mxu3 %v655_v0  ;;  %693 = vmatpush.msra.mxu1 %v466_v2  ;;  %v595_v0 = vld [vmem:[%s1317_s6 + $0x608] sm:$0xff] }
  0x5a   : > { %779 = vmatpush.msrb.mxu2 %v587_v3  ;;  %738 = vmatpush.msrb.mxu0 %v463_v4  ;;  %v403_v2 = vld [vmem:[%s1317_s6 + $0x8] sm:$0xff]  ;;  %v588_v3 = vld [vmem:[%s1317_s6 + $0x5d0] sm:$0xff] }
  0x5b   : > { %758 = vmatpush.msrb.mxu1 %v527_v5  ;;  %799 = vmatpush.msrb.mxu3 %v651_v6  ;;  %v656_v4 = vld [vmem:[%s1317_s6 + $0x7f0] sm:$0xff]  ;;  %v467_v5 = vld [vmem:[%s1317_s6 + $0x208] sm:$0xff]  ;;  %v1459_v6 = vld [vmem:[%s1312_s27] sm:$0xff] }
  0x5c   : > { %780 = vmatpush.msrb.mxu2 %v583_v7  ;;  %739 = vmatpush.msrb.mxu0 %v459_v8  ;;  %v1463_v7 = vld [vmem:[%s1312_s27 + $0x8] sm:$0xff]  ;;  %v464_v8 = vld [vmem:[%s1317_s6 + $0x1f0] sm:$0xff] }
  0x5d   : > { %759 = vmatpush.msrb.mxu1 %v523_v9  ;;  %800 = vmatpush.msrb.mxu3 %v647_v10  ;;  %v528_v9 = vld [vmem:[%s1317_s6 + $0x3f0] sm:$0xff] }
  0x5e   : > { %781 = vmatpush.msrb.mxu2 %v579_v11  ;;  %740 = vmatpush.msrb.mxu0 %v455_v12  ;;  %v584_v10 = vld [vmem:[%s1317_s6 + $0x5b0] sm:$0xff] }
  0x5f   : > { %760 = vmatpush.msrb.mxu1 %v519_v13  ;;  %801 = vmatpush.msrb.mxu3 %v643_v14  ;;  %v652_v11 = vld [vmem:[%s1317_s6 + $0x7d0] sm:$0xff] }
  0x60   : > { %782 = vmatpush.msrb.mxu2 %v575_v15  ;;  %741 = vmatpush.msrb.mxu0 %v451_v16  ;;  %v460_v12 = vld [vmem:[%s1317_s6 + $0x1d0] sm:$0xff] }
  0x61   : > { %761 = vmatpush.msrb.mxu1 %v515_v17  ;;  %802 = vmatpush.msrb.mxu3 %v639_v18  ;;  %v524_v13 = vld [vmem:[%s1317_s6 + $0x3d0] sm:$0xff] }
  0x62   : > { %783 = vmatpush.msrb.mxu2 %v571_v19  ;;  %742 = vmatpush.msrb.mxu0 %v447_v20  ;;  %v580_v14 = vld [vmem:[%s1317_s6 + $0x590] sm:$0xff] }
  0x63   : > { %762 = vmatpush.msrb.mxu1 %v511_v21  ;;  %803 = vmatpush.msrb.mxu3 %v635_v22  ;;  %v648_v15 = vld [vmem:[%s1317_s6 + $0x7b0] sm:$0xff] }
  0x64   : > { %784 = vmatpush.msrb.mxu2 %v567_v23  ;;  %743 = vmatpush.msrb.mxu0 %v443_v24  ;;  %v456_v16 = vld [vmem:[%s1317_s6 + $0x1b0] sm:$0xff] }
  0x65   : > { %763 = vmatpush.msrb.mxu1 %v507_v25  ;;  %804 = vmatpush.msrb.mxu3 %v631_v26  ;;  %v520_v17 = vld [vmem:[%s1317_s6 + $0x3b0] sm:$0xff] }
  0x66   : > { %785 = vmatpush.msrb.mxu2 %v563_v27  ;;  %744 = vmatpush.msrb.mxu0 %v439_v28  ;;  %v576_v18 = vld [vmem:[%s1317_s6 + $0x570] sm:$0xff] }
  0x67   : > { %764 = vmatpush.msrb.mxu1 %v503_v29  ;;  %805 = vmatpush.msrb.mxu3 %v627_v30  ;;  %v644_v19 = vld [vmem:[%s1317_s6 + $0x790] sm:$0xff] }
  0x68   : > { %786 = vmatpush.msrb.mxu2 %v559_v31  ;;  %745 = vmatpush.msrb.mxu0 %v435_v32  ;;  %v452_v20 = vld [vmem:[%s1317_s6 + $0x190] sm:$0xff] }
  0x69   : > { %765 = vmatpush.msrb.mxu1 %v499_v33  ;;  %806 = vmatpush.msrb.mxu3 %v623_v34  ;;  %v516_v21 = vld [vmem:[%s1317_s6 + $0x390] sm:$0xff] }
  0x6a   : > { %787 = vmatpush.msrb.mxu2 %v555_v35  ;;  %746 = vmatpush.msrb.mxu0 %v431_v36  ;;  %v572_v22 = vld [vmem:[%s1317_s6 + $0x550] sm:$0xff] }
  0x6b   : > { %766 = vmatpush.msrb.mxu1 %v495_v37  ;;  %807 = vmatpush.msrb.mxu3 %v619_v38  ;;  %v640_v23 = vld [vmem:[%s1317_s6 + $0x770] sm:$0xff] }
  0x6c   : > { %788 = vmatpush.msrb.mxu2 %v551_v39  ;;  %747 = vmatpush.msrb.mxu0 %v427_v40  ;;  %v448_v24 = vld [vmem:[%s1317_s6 + $0x170] sm:$0xff] }
  0x6d   : > { %767 = vmatpush.msrb.mxu1 %v491_v41  ;;  %808 = vmatpush.msrb.mxu3 %v615_v42  ;;  %v512_v25 = vld [vmem:[%s1317_s6 + $0x370] sm:$0xff] }
  0x6e   : > { %789 = vmatpush.msrb.mxu2 %v547_v43  ;;  %748 = vmatpush.msrb.mxu0 %v423_v44  ;;  %v568_v26 = vld [vmem:[%s1317_s6 + $0x530] sm:$0xff] }
  0x6f   : > { %768 = vmatpush.msrb.mxu1 %v487_v45  ;;  %809 = vmatpush.msrb.mxu3 %v611_v46  ;;  %v636_v27 = vld [vmem:[%s1317_s6 + $0x750] sm:$0xff] }
  0x70   : > { %790 = vmatpush.msrb.mxu2 %v543_v47  ;;  %749 = vmatpush.msrb.mxu0 %v419_v48  ;;  %v444_v28 = vld [vmem:[%s1317_s6 + $0x150] sm:$0xff] }
  0x71   : > { %769 = vmatpush.msrb.mxu1 %v483_v49  ;;  %810 = vmatpush.msrb.mxu3 %v607_v50  ;;  %v508_v29 = vld [vmem:[%s1317_s6 + $0x350] sm:$0xff] }
  0x72   : > { %791 = vmatpush.msrb.mxu2 %v539_v51  ;;  %750 = vmatpush.msrb.mxu0 %v415_v52  ;;  %v564_v30 = vld [vmem:[%s1317_s6 + $0x510] sm:$0xff] }
  0x73   : > { %770 = vmatpush.msrb.mxu1 %v479_v53  ;;  %811 = vmatpush.msrb.mxu3 %v603_v54  ;;  %v632_v31 = vld [vmem:[%s1317_s6 + $0x730] sm:$0xff] }
  0x74   : > { %792 = vmatpush.msrb.mxu2 %v535_v55  ;;  %751 = vmatpush.msrb.mxu0 %v411_v56  ;;  %v440_v32 = vld [vmem:[%s1317_s6 + $0x130] sm:$0xff] }
  0x75   : > { %771 = vmatpush.msrb.mxu1 %v475_v57  ;;  %812 = vmatpush.msrb.mxu3 %v599_v58  ;;  %v504_v33 = vld [vmem:[%s1317_s6 + $0x330] sm:$0xff] }
  0x76   : > { %793 = vmatpush.msrb.mxu2 %v531_v59  ;;  %752 = vmatpush.msrb.mxu0 %v407_v60  ;;  %v560_v34 = vld [vmem:[%s1317_s6 + $0x4f0] sm:$0xff] }
  0x77   : > { %772 = vmatpush.msrb.mxu1 %v471_v62  ;;  %813 = vmatpush.msrb.mxu3 %v595_v0  ;;  %v628_v35 = vld [vmem:[%s1317_s6 + $0x710] sm:$0xff] }
  0x78   : > { %858 = vmatpush.msra.mxu2 %v592_v63  ;;  %734 = vmatmul.f32.vlgmr.msra.gmra.mxu3 %v1451_v1  ;;  %v436_v36 = vld [vmem:[%s1317_s6 + $0x110] sm:$0xff] }
  0x79   : > { %753 = vmatpush.msrb.mxu0 %v403_v2  ;;  %878 = vmatpush.msra.mxu3 %v656_v4  ;;  %v500_v37 = vld [vmem:[%s1317_s6 + $0x310] sm:$0xff]  ;;  %v593_v2 = vld [vmem:[%s1317_s6 + $0x5f8] sm:$0xff] }
  0x7a   : > { %859 = vmatpush.msra.mxu2 %v588_v3  ;;  %773 = vmatpush.msrb.mxu1 %v467_v5  ;;  %v556_v38 = vld [vmem:[%s1317_s6 + $0x4d0] sm:$0xff] }
  0x7b   : > { %674 = vmatmul.f32.vlgmr.msra.gmra.mxu0 %v1459_v6  ;;  %694 = vmatmul.f32.vlgmr.msra.gmra.mxu1 %v1463_v7  ;;  %v624_v39 = vld [vmem:[%s1317_s6 + $0x6f0] sm:$0xff] }
  0x7c   : > { %818 = vmatpush.msra.mxu0 %v464_v8  ;;  %838 = vmatpush.msra.mxu1 %v528_v9  ;;  %v432_v40 = vld [vmem:[%s1317_s6 + $0xf0] sm:$0xff]  ;;  %v589_v8 = vld [vmem:[%s1317_s6 + $0x5d8] sm:$0xff] }
  0x7d   : > { %860 = vmatpush.msra.mxu2 %v584_v10  ;;  %879 = vmatpush.msra.mxu3 %v652_v11  ;;  %v496_v41 = vld [vmem:[%s1317_s6 + $0x2f0] sm:$0xff]  ;;  %v657_v9 = vld [vmem:[%s1317_s6 + $0x7f8] sm:$0xff] }
  0x7e   : > { %819 = vmatpush.msra.mxu0 %v460_v12  ;;  %839 = vmatpush.msra.mxu1 %v524_v13  ;;  %v552_v42 = vld [vmem:[%s1317_s6 + $0x4b0] sm:$0xff]  ;;  %v465_v12 = vld [vmem:[%s1317_s6 + $0x1f8] sm:$0xff] }
  0x7f   : > { %861 = vmatpush.msra.mxu2 %v580_v14  ;;  %880 = vmatpush.msra.mxu3 %v648_v15  ;;  %v620_v43 = vld [vmem:[%s1317_s6 + $0x6d0] sm:$0xff]  ;;  %v529_v13 = vld [vmem:[%s1317_s6 + $0x3f8] sm:$0xff] }
  0x80   : > { %820 = vmatpush.msra.mxu0 %v456_v16  ;;  %840 = vmatpush.msra.mxu1 %v520_v17  ;;  %v428_v44 = vld [vmem:[%s1317_s6 + $0xd0] sm:$0xff]  ;;  %v585_v14 = vld [vmem:[%s1317_s6 + $0x5b8] sm:$0xff] }
  0x81   : > { %862 = vmatpush.msra.mxu2 %v576_v18  ;;  %881 = vmatpush.msra.mxu3 %v644_v19  ;;  %v492_v45 = vld [vmem:[%s1317_s6 + $0x2d0] sm:$0xff]  ;;  %v653_v15 = vld [vmem:[%s1317_s6 + $0x7d8] sm:$0xff] }
  0x82   : > { %821 = vmatpush.msra.mxu0 %v452_v20  ;;  %841 = vmatpush.msra.mxu1 %v516_v21  ;;  %v548_v46 = vld [vmem:[%s1317_s6 + $0x490] sm:$0xff]  ;;  %v461_v16 = vld [vmem:[%s1317_s6 + $0x1d8] sm:$0xff] }
  0x83   : > { %863 = vmatpush.msra.mxu2 %v572_v22  ;;  %882 = vmatpush.msra.mxu3 %v640_v23  ;;  %v616_v47 = vld [vmem:[%s1317_s6 + $0x6b0] sm:$0xff]  ;;  %v525_v17 = vld [vmem:[%s1317_s6 + $0x3d8] sm:$0xff] }
  0x84   : > { %822 = vmatpush.msra.mxu0 %v448_v24  ;;  %842 = vmatpush.msra.mxu1 %v512_v25  ;;  %v424_v48 = vld [vmem:[%s1317_s6 + $0xb0] sm:$0xff]  ;;  %v581_v18 = vld [vmem:[%s1317_s6 + $0x598] sm:$0xff] }
  0x85   : > { %864 = vmatpush.msra.mxu2 %v568_v26  ;;  %883 = vmatpush.msra.mxu3 %v636_v27  ;;  %v488_v49 = vld [vmem:[%s1317_s6 + $0x2b0] sm:$0xff]  ;;  %v649_v19 = vld [vmem:[%s1317_s6 + $0x7b8] sm:$0xff] }
  0x86   : > { %823 = vmatpush.msra.mxu0 %v444_v28  ;;  %843 = vmatpush.msra.mxu1 %v508_v29  ;;  %v544_v50 = vld [vmem:[%s1317_s6 + $0x470] sm:$0xff]  ;;  %v457_v20 = vld [vmem:[%s1317_s6 + $0x1b8] sm:$0xff] }
  0x87   : > { %865 = vmatpush.msra.mxu2 %v564_v30  ;;  %884 = vmatpush.msra.mxu3 %v632_v31  ;;  %v612_v51 = vld [vmem:[%s1317_s6 + $0x690] sm:$0xff]  ;;  %v521_v21 = vld [vmem:[%s1317_s6 + $0x3b8] sm:$0xff] }
  0x88   : > { %824 = vmatpush.msra.mxu0 %v440_v32  ;;  %844 = vmatpush.msra.mxu1 %v504_v33  ;;  %v420_v52 = vld [vmem:[%s1317_s6 + $0x90] sm:$0xff]  ;;  %v577_v22 = vld [vmem:[%s1317_s6 + $0x578] sm:$0xff] }
  0x89   : > { %866 = vmatpush.msra.mxu2 %v560_v34  ;;  %885 = vmatpush.msra.mxu3 %v628_v35  ;;  %v484_v53 = vld [vmem:[%s1317_s6 + $0x290] sm:$0xff]  ;;  %v645_v23 = vld [vmem:[%s1317_s6 + $0x798] sm:$0xff] }
  0x8a   : > { %825 = vmatpush.msra.mxu0 %v436_v36  ;;  %845 = vmatpush.msra.mxu1 %v500_v37  ;;  %v540_v54 = vld [vmem:[%s1317_s6 + $0x450] sm:$0xff]  ;;  %v453_v24 = vld [vmem:[%s1317_s6 + $0x198] sm:$0xff] }
  0x8b   : > { %867 = vmatpush.msra.mxu2 %v556_v38  ;;  %886 = vmatpush.msra.mxu3 %v624_v39  ;;  %v608_v55 = vld [vmem:[%s1317_s6 + $0x670] sm:$0xff]  ;;  %v517_v25 = vld [vmem:[%s1317_s6 + $0x398] sm:$0xff] }
  0x8c   : > { %826 = vmatpush.msra.mxu0 %v432_v40  ;;  %846 = vmatpush.msra.mxu1 %v496_v41  ;;  %v416_v56 = vld [vmem:[%s1317_s6 + $0x70] sm:$0xff]  ;;  %v573_v26 = vld [vmem:[%s1317_s6 + $0x558] sm:$0xff] }
  0x8d   : > { %868 = vmatpush.msra.mxu2 %v552_v42  ;;  %887 = vmatpush.msra.mxu3 %v620_v43  ;;  %v480_v57 = vld [vmem:[%s1317_s6 + $0x270] sm:$0xff]  ;;  %v641_v27 = vld [vmem:[%s1317_s6 + $0x778] sm:$0xff] }
  0x8e   : > { %827 = vmatpush.msra.mxu0 %v428_v44  ;;  %847 = vmatpush.msra.mxu1 %v492_v45  ;;  %v536_v58 = vld [vmem:[%s1317_s6 + $0x430] sm:$0xff]  ;;  %v449_v28 = vld [vmem:[%s1317_s6 + $0x178] sm:$0xff] }
  0x8f   : > { %869 = vmatpush.msra.mxu2 %v548_v46  ;;  %888 = vmatpush.msra.mxu3 %v616_v47  ;;  %v604_v59 = vld [vmem:[%s1317_s6 + $0x650] sm:$0xff]  ;;  %v513_v29 = vld [vmem:[%s1317_s6 + $0x378] sm:$0xff] }
  0x90   : > { %828 = vmatpush.msra.mxu0 %v424_v48  ;;  %848 = vmatpush.msra.mxu1 %v488_v49  ;;  %v412_v60 = vld [vmem:[%s1317_s6 + $0x50] sm:$0xff]  ;;  %v569_v30 = vld [vmem:[%s1317_s6 + $0x538] sm:$0xff] }
  0x91   : > { %870 = vmatpush.msra.mxu2 %v544_v50  ;;  %889 = vmatpush.msra.mxu3 %v612_v51  ;;  %v476_v62 = vld [vmem:[%s1317_s6 + $0x250] sm:$0xff]  ;;  %v637_v31 = vld [vmem:[%s1317_s6 + $0x758] sm:$0xff] }
  0x92   : > { %829 = vmatpush.msra.mxu0 %v420_v52  ;;  %849 = vmatpush.msra.mxu1 %v484_v53  ;;  %v532_v63 = vld [vmem:[%s1317_s6 + $0x410] sm:$0xff]  ;;  %v445_v32 = vld [vmem:[%s1317_s6 + $0x158] sm:$0xff] }
  0x93   : > { %871 = vmatpush.msra.mxu2 %v540_v54  ;;  %890 = vmatpush.msra.mxu3 %v608_v55  ;;  %v600_v0 = vld [vmem:[%s1317_s6 + $0x630] sm:$0xff]  ;;  %v509_v33 = vld [vmem:[%s1317_s6 + $0x358] sm:$0xff] }
  0x94   : > { %830 = vmatpush.msra.mxu0 %v416_v56  ;;  %850 = vmatpush.msra.mxu1 %v480_v57  ;;  %v408_v3 = vld [vmem:[%s1317_s6 + $0x30] sm:$0xff]  ;;  %v565_v34 = vld [vmem:[%s1317_s6 + $0x518] sm:$0xff] }
  0x95   : > { %872 = vmatpush.msra.mxu2 %v536_v58  ;;  %891 = vmatpush.msra.mxu3 %v604_v59  ;;  %v472_v4 = vld [vmem:[%s1317_s6 + $0x230] sm:$0xff]  ;;  %v633_v35 = vld [vmem:[%s1317_s6 + $0x738] sm:$0xff] }
  0x96   : > { %831 = vmatpush.msra.mxu0 %v412_v60  ;;  %851 = vmatpush.msra.mxu1 %v476_v62  ;;  %v596_v5 = vld [vmem:[%s1317_s6 + $0x610] sm:$0xff]  ;;  %v441_v36 = vld [vmem:[%s1317_s6 + $0x138] sm:$0xff] }
  0x97   : > { %873 = vmatpush.msra.mxu2 %v532_v63  ;;  %892 = vmatpush.msra.mxu3 %v600_v0  ;;  %v404_v10 = vld [vmem:[%s1317_s6 + $0x10] sm:$0xff]  ;;  %v505_v37 = vld [vmem:[%s1317_s6 + $0x338] sm:$0xff] }
  0x98   : > { %794 = vmatmul.f32.vlgmr.msrb.gmra.mxu2 %v1445_v61  ;;  %832 = vmatpush.msra.mxu0 %v408_v3  ;;  %v468_v11 = vld [vmem:[%s1317_s6 + $0x210] sm:$0xff]  ;;  %v561_v38 = vld [vmem:[%s1317_s6 + $0x4f8] sm:$0xff] }
  0x99   : > { %938 = vmatpush.msrb.mxu2 %v593_v2  ;;  %852 = vmatpush.msra.mxu1 %v472_v4  ;;  %v629_v39 = vld [vmem:[%s1317_s6 + $0x718] sm:$0xff] }
  0x9a   : > { %893 = vmatpush.msra.mxu3 %v596_v5  ;;  %833 = vmatpush.msra.mxu0 %v404_v10  ;;  %v437_v40 = vld [vmem:[%s1317_s6 + $0x118] sm:$0xff] }
  0x9b   : > { %814 = vmatmul.f32.vlgmr.msrb.gmra.mxu3 %v1451_v1  ;;  %939 = vmatpush.msrb.mxu2 %v589_v8  ;;  %v501_v41 = vld [vmem:[%s1317_s6 + $0x318] sm:$0xff] }
  0x9c   : > { %958 = vmatpush.msrb.mxu3 %v657_v9  ;;  %853 = vmatpush.msra.mxu1 %v468_v11  ;;  %v557_v42 = vld [vmem:[%s1317_s6 + $0x4d8] sm:$0xff] }
  0x9d   : > { %754 = vmatmul.f32.vlgmr.msrb.gmra.mxu0 %v1459_v6  ;;  %774 = vmatmul.f32.vlgmr.msrb.gmra.mxu1 %v1463_v7  ;;  %v625_v43 = vld [vmem:[%s1317_s6 + $0x6f8] sm:$0xff] }
  0x9e   : > { %898 = vmatpush.msrb.mxu0 %v465_v12  ;;  %918 = vmatpush.msrb.mxu1 %v529_v13  ;;  %v433_v44 = vld [vmem:[%s1317_s6 + $0xf8] sm:$0xff] }
  0x9f   : > { %940 = vmatpush.msrb.mxu2 %v585_v14  ;;  %959 = vmatpush.msrb.mxu3 %v653_v15  ;;  %v497_v45 = vld [vmem:[%s1317_s6 + $0x2f8] sm:$0xff] }
  0xa0   : > { %899 = vmatpush.msrb.mxu0 %v461_v16  ;;  %919 = vmatpush.msrb.mxu1 %v525_v17  ;;  %v553_v46 = vld [vmem:[%s1317_s6 + $0x4b8] sm:$0xff] }
  0xa1   : > { %941 = vmatpush.msrb.mxu2 %v581_v18  ;;  %960 = vmatpush.msrb.mxu3 %v649_v19  ;;  %v621_v47 = vld [vmem:[%s1317_s6 + $0x6d8] sm:$0xff] }
  0xa2   : > { %900 = vmatpush.msrb.mxu0 %v457_v20  ;;  %920 = vmatpush.msrb.mxu1 %v521_v21  ;;  %v429_v48 = vld [vmem:[%s1317_s6 + $0xd8] sm:$0xff] }
  0xa3   : > { %942 = vmatpush.msrb.mxu2 %v577_v22  ;;  %961 = vmatpush.msrb.mxu3 %v645_v23  ;;  %v493_v49 = vld [vmem:[%s1317_s6 + $0x2d8] sm:$0xff] }
  0xa4   : > { %901 = vmatpush.msrb.mxu0 %v453_v24  ;;  %921 = vmatpush.msrb.mxu1 %v517_v25  ;;  %v549_v50 = vld [vmem:[%s1317_s6 + $0x498] sm:$0xff] }
  0xa5   : > { %943 = vmatpush.msrb.mxu2 %v573_v26  ;;  %962 = vmatpush.msrb.mxu3 %v641_v27  ;;  %v617_v51 = vld [vmem:[%s1317_s6 + $0x6b8] sm:$0xff]  ;;  %v395_v26 = vld [vmem:[#allocation2] sm:$0xff] }
  0xa6   : > { %902 = vmatpush.msrb.mxu0 %v449_v28  ;;  %922 = vmatpush.msrb.mxu1 %v513_v29  ;;  %v425_v52 = vld [vmem:[%s1317_s6 + $0xb8] sm:$0xff] }
  0xa7   : > { %944 = vmatpush.msrb.mxu2 %v569_v30  ;;  %963 = vmatpush.msrb.mxu3 %v637_v31  ;;  %v489_v53 = vld [vmem:[%s1317_s6 + $0x2b8] sm:$0xff] }
  0xa8   : > { %903 = vmatpush.msrb.mxu0 %v445_v32  ;;  %923 = vmatpush.msrb.mxu1 %v509_v33  ;;  %v545_v54 = vld [vmem:[%s1317_s6 + $0x478] sm:$0xff] }
  0xa9   : > { %945 = vmatpush.msrb.mxu2 %v565_v34  ;;  %964 = vmatpush.msrb.mxu3 %v633_v35  ;;  %v613_v55 = vld [vmem:[%s1317_s6 + $0x698] sm:$0xff] }
  0xaa   : > { %904 = vmatpush.msrb.mxu0 %v441_v36  ;;  %924 = vmatpush.msrb.mxu1 %v505_v37  ;;  %v421_v56 = vld [vmem:[%s1317_s6 + $0x98] sm:$0xff] }
  0xab   : > { %946 = vmatpush.msrb.mxu2 %v561_v38  ;;  %965 = vmatpush.msrb.mxu3 %v629_v39  ;;  %v485_v57 = vld [vmem:[%s1317_s6 + $0x298] sm:$0xff] }
  0xac   : > { %905 = vmatpush.msrb.mxu0 %v437_v40  ;;  %925 = vmatpush.msrb.mxu1 %v501_v41  ;;  %v541_v58 = vld [vmem:[%s1317_s6 + $0x458] sm:$0xff]  ;;  %v397_v41 = vld [vmem:[#allocation2 + $0x8] sm:$0xff] }
  0xad   : > { %947 = vmatpush.msrb.mxu2 %v557_v42  ;;  %966 = vmatpush.msrb.mxu3 %v625_v43  ;;  %v609_v59 = vld [vmem:[%s1317_s6 + $0x678] sm:$0xff] }
  0xae   : > { %906 = vmatpush.msrb.mxu0 %v433_v44  ;;  %926 = vmatpush.msrb.mxu1 %v497_v45  ;;  %v417_v60 = vld [vmem:[%s1317_s6 + $0x78] sm:$0xff] }
  0xaf   : > { %948 = vmatpush.msrb.mxu2 %v553_v46  ;;  %967 = vmatpush.msrb.mxu3 %v621_v47  ;;  %v481_v62 = vld [vmem:[%s1317_s6 + $0x278] sm:$0xff] }
  0xb0   : > { %907 = vmatpush.msrb.mxu0 %v429_v48  ;;  %927 = vmatpush.msrb.mxu1 %v493_v49  ;;  %v537_v63 = vld [vmem:[%s1317_s6 + $0x438] sm:$0xff] }
  0xb1   : > { %949 = vmatpush.msrb.mxu2 %v549_v50  ;;  %968 = vmatpush.msrb.mxu3 %v617_v51  ;;  %v605_v0 = vld [vmem:[%s1317_s6 + $0x658] sm:$0xff] }
  0xb2   : > { %874 = vmatmul.f32.vlgmr.msra.gmra.mxu2 %v1445_v61  ;;  %908 = vmatpush.msrb.mxu0 %v425_v52  ;;  %v413_v2 = vld [vmem:[%s1317_s6 + $0x58] sm:$0xff] }
  0xb3   : > { %928 = vmatpush.msrb.mxu1 %v489_v53  ;;  %950 = vmatpush.msrb.mxu2 %v545_v54  ;;  %v477_v3 = vld [vmem:[%s1317_s6 + $0x258] sm:$0xff] }
  0xb4   : > { %969 = vmatpush.msrb.mxu3 %v613_v55  ;;  %909 = vmatpush.msrb.mxu0 %v421_v56  ;;  %v533_v4 = vld [vmem:[%s1317_s6 + $0x418] sm:$0xff] }
  0xb5   : > { %894 = vmatmul.f32.vlgmr.msra.gmra.mxu3 %v1451_v1  ;;  %929 = vmatpush.msrb.mxu1 %v485_v57  ;;  %v601_v5 = vld [vmem:[%s1317_s6 + $0x638] sm:$0xff] }
  0xb6   : > { %951 = vmatpush.msrb.mxu2 %v541_v58  ;;  %970 = vmatpush.msrb.mxu3 %v609_v59  ;;  %v409_v8 = vld [vmem:[%s1317_s6 + $0x38] sm:$0xff] }
  0xb7   : > { %834 = vmatmul.f32.vlgmr.msra.gmra.mxu0 %v1459_v6  ;;  %854 = vmatmul.f32.vlgmr.msra.gmra.mxu1 %v1463_v7  ;;  %v473_v9 = vld [vmem:[%s1317_s6 + $0x238] sm:$0xff] }
  0xb8   : > { %910 = vmatpush.msrb.mxu0 %v417_v60  ;;  %930 = vmatpush.msrb.mxu1 %v481_v62  ;;  %v597_v10 = vld [vmem:[%s1317_s6 + $0x618] sm:$0xff] }
  0xb9   : > { %952 = vmatpush.msrb.mxu2 %v537_v63  ;;  %971 = vmatpush.msrb.mxu3 %v605_v0  ;;  %v405_v11 = vld [vmem:[%s1317_s6 + $0x18] sm:$0xff] }
  0xba   : > { %911 = vmatpush.msrb.mxu0 %v413_v2  ;;  %931 = vmatpush.msrb.mxu1 %v477_v3  ;;  %v469_v12 = vld [vmem:[%s1317_s6 + $0x218] sm:$0xff] }
  0xbb   : > { %953 = vmatpush.msrb.mxu2 %v533_v4  ;;  %972 = vmatpush.msrb.mxu3 %v601_v5  ;;  %v396_v33 = vld [vmem:[#allocation2 + $0x18] sm:$0xff] }
  0xbc   : > { %954 = vmatmul.f32.vlgmr.msrb.gmra.mxu2 %v1445_v61  ;;  %912 = vmatpush.msrb.mxu0 %v409_v8  ;;  %v394_v61 = vld [vmem:[#allocation2 + $0x10] sm:$0xff] }
  0xbd   : > { %932 = vmatpush.msrb.mxu1 %v473_v9  ;;  %973 = vmatpush.msrb.mxu3 %v597_v10 }
  0xbe   : > { %974 = vmatmul.f32.vlgmr.msrb.gmra.mxu3 %v1451_v1  ;;  %913 = vmatpush.msrb.mxu0 %v405_v11 }
  0xbf   : > { %933 = vmatpush.msrb.mxu1 %v469_v12  ;;  %914 = vmatmul.f32.vlgmr.msrb.gmra.mxu0 %v1459_v6 }
  0xc0   : > { %934 = vmatmul.f32.vlgmr.msrb.gmra.mxu1 %v1463_v7 }
  0xda   : > { %v715_v16 = vpop.f32.mrf.mxu2 }
  0xf8   : > { %v675_v13 = vpop.f32.mrf.mxu0  ;;  %v695_v14 = vpop.f32.mrf.mxu1 }
  0xf9   : > { %v696_v15 = vadd.f32 %v695_v14, %v675_v13 }
  0xfb   : > { %v716_v17 = vadd.f32 %v715_v16, %v696_v15  ;;  %v735_v18 = vpop.f32.mrf.mxu3 }
  0xfd   : > { %v736_v19 = vadd.f32 %v735_v18, %v716_v17 }
  0xff   : > { %v978_v20 = vadd.f32 %v736_v19, %v394_v61 }
 0x101   : > { %982 = vst [vmem:[#allocation2 + $0x10] sm:$0xff] %v978_v20 }
 0x11a   : > { %v755_v21 = vpop.f32.mrf.mxu0  ;;  %v775_v22 = vpop.f32.mrf.mxu1 }
 0x11b   : > { %v795_v23 = vpop.f32.mrf.mxu2  ;;  %v776_v1 = vadd.f32 %v775_v22, %v755_v21 }
 0x11d   : > { %v796_v24 = vadd.f32 %v795_v23, %v776_v1 }
 0x11e   : > { %v815_v25 = vpop.f32.mrf.mxu3 }
 0x11f   : > { %v816_v6 = vadd.f32 %v815_v25, %v796_v24 }
 0x121   : > { %v979_v27 = vadd.f32 %v816_v6, %v395_v26 }
 0x123   : > { %983 = vst [vmem:[#allocation2] sm:$0xff] %v979_v27 }
 0x134   : > { %v835_v7 = vpop.f32.mrf.mxu0  ;;  %v855_v28 = vpop.f32.mrf.mxu1 }
 0x135   : > { %v875_v29 = vpop.f32.mrf.mxu2  ;;  %v856_v30 = vadd.f32 %v855_v28, %v835_v7 }
 0x137   : > { %v876_v31 = vadd.f32 %v875_v29, %v856_v30 }
 0x138   : > { %v895_v32 = vpop.f32.mrf.mxu3 }
 0x139   : > { %v896_v34 = vadd.f32 %v895_v32, %v876_v31 }
 0x13b   : > { %v980_v35 = vadd.f32 %v896_v34, %v396_v33 }
 0x13c   : > { %v915_v36 = vpop.f32.mrf.mxu0 }
 0x13d   : > { %984 = vst [vmem:[#allocation2 + $0x18] sm:$0xff] %v980_v35  ;;  %v935_v37 = vpop.f32.mrf.mxu1 }
 0x13e   : > { %v936_v38 = vadd.f32 %v935_v37, %v915_v36 }
 0x13f   : > { %v955_v39 = vpop.f32.mrf.mxu2 }
 0x140   : > { %v956_v40 = vadd.f32 %v955_v39, %v936_v38 }
 0x141   : > { %v975_v42 = vpop.f32.mrf.mxu3 }
 0x142   : > { %v976_v43 = vadd.f32 %v975_v42, %v956_v40  ;;  %989 = sbr.rel (%p1201_p7) target bundleno = 343 (0x157), region = 48 }
 0x144   : > { %v981_v44 = vadd.f32 %v976_v43, %v397_v41 }
 0x146   : > { %985 = vst [vmem:[#allocation2 + $0x8] sm:$0xff] %v981_v44 }
 0x147   : > { %v990_v45 = vld [vmem:[#allocation2 + $0x10] sm:$0xff]  ;;  %v994_v46 = vld [vmem:[%s1646_s2] sm:$0xf]  ;;  %v992_v53 = vld [vmem:[#allocation2 + $0x18] sm:$0xff] }
 0x148   : > { %v1008_v47 = vld [vmem:[%s1647_s3] sm:$0xf]  ;;  %v996_v48 = vperm.slane %v994_v46, 0  ;;  %v997_v51 = vperm.slane %v994_v46, 1  ;;  %v998_v54 = vperm.slane %v994_v46, 2  ;;  %v999_v56 = vperm.slane %v994_v46, 3 }
 0x149   : > { %v1010_v49 = vperm.slane %v1008_v47, 0  ;;  %v991_v50 = vld [vmem:[#allocation2] sm:$0xff]  ;;  %v1011_v52 = vperm.slane %v1008_v47, 1  ;;  %v1012_v55 = vperm.slane %v1008_v47, 2  ;;  %v1013_v60 = vperm.slane %v1008_v47, 3  ;;  %v1023_v63 = vld [vmem:[%s1648_s4 + $0x8] sm:$0xff] }
 0x14a   : > { %v1004_v57 = vmul.f32 %v996_v48, %v990_v45  ;;  %v1005_v58 = vmul.f32 %v997_v51, %v991_v50  ;;  %v1022_v62 = vld [vmem:[%s1648_s4] sm:$0xff]  ;;  %v1006_v0 = vmul.f32 %v998_v54, %v992_v53  ;;  %v1024_v5 = vld [vmem:[%s1648_s4 + $0x10] sm:$0xff]  ;;  %v1025_v8 = vld [vmem:[%s1648_s4 + $0x18] sm:$0xff] }
 0x14c   : > { %v1018_v3 = vadd.f32 %v1010_v49, %v1004_v57  ;;  %v1019_v4 = vadd.f32 %v1011_v52, %v1005_v58  ;;  %v1020_v9 = vadd.f32 %v1012_v55, %v1006_v0 }
 0x14d   : > { %v993_v59 = vld [vmem:[#allocation2 + $0x8] sm:$0xff] }
 0x14e   : > { %v1007_v2 = vmul.f32 %v999_v56, %v993_v59  ;;  %v1026_v11 = vadd.f32 %v1022_v62, %v1018_v3  ;;  %v1027_v12 = vadd.f32 %v1023_v63, %v1019_v4  ;;  %v1028_v13 = vadd.f32 %v1024_v5, %v1020_v9 }
 0x150   : > { %v1021_v10 = vadd.f32 %v1013_v60, %v1007_v2  ;;  %v1030_v15 = vmax.f32 %v1026_v11, 0.0  ;;  %v1031_v16 = vmax.f32 %v1027_v12, 0.0  ;;  %v1032_v17 = vmax.f32 %v1028_v13, 0.0 }
 0x152   : > { %v1029_v14 = vadd.f32 %v1025_v8, %v1021_v10  ;;  %1034 = vst [vmem:[%s1649_s5] sm:$0xff] %v1030_v15 }
 0x153   : > { %1035 = vst [vmem:[%s1649_s5 + $0x8] sm:$0xff] %v1031_v16 }
 0x154   : > { %v1033_v18 = vmax.f32 %v1029_v14, 0.0  ;;  %1036 = vst [vmem:[%s1649_s5 + $0x10] sm:$0xff] %v1032_v17 }
 0x156   : > { %1037 = vst [vmem:[%s1649_s5 + $0x18] sm:$0xff] %v1033_v18 }
 0x157 PF: > { %s15_s20 = sadd.s32 1, %s1254_s20   ;;  %s1650_s18 = smov %s1250_s19 }
 0x158   : > { %p12_p8 = scmp.ge.s32.totalorder %s15_s20, 11   ;;  %s1651_s19 = smov %s1653_s21 }
 0x15a   :  { %14 = sbr.rel (!%p12_p8) target bundleno = 2 (0x2), region = 90 }

// kernel: encoder_forward.40
= control target key start
LH: loop header
LB: loop body
LE: loop exit
PB: predicated region body
PF: predicated region fallthrough
CT: control target
= control target key end

     0   :  { %9 = vsyncpa [#allocation4], 0  ;;  %s1696_s0 = inlined_call_operand.vmem [shape: f32[8,4608], index: 0, kind: input, shape index: {}]   ;;  %s1697_s1 = inlined_call_operand.hbm [shape: f32[4608,512], index: 1, kind: input, shape index: {}]   ;;  %s1698_s2 = inlined_call_operand.vmem [shape: f32[1,512], index: 2, kind: input, shape index: {}]   ;;  %s1699_s3 = inlined_call_operand.vmem [shape: f32[1,512], index: 3, kind: input, shape index: {}]   ;;  %s1700_s4 = inlined_call_operand.vmem [shape: f32[8,512], index: 4, kind: output, shape index: {}]  }
   0x1   :  { %11 = vsyncpa [#allocation4 + $0x1], 0  ;;  %s1301_s15 = smov 0   ;;  %s1303_s16 = smov 0  }
   0x2   :  { %s1305_s17 = smov 0   ;;  %s1307_s18 = smov 0  }
   0x3   :  { %s1309_s19 = smov 0   ;;  %s1311_s20 = smov 0  }
   0x4 LB: > { %s1112_s21 = sadd.s32 4294967295, %s1271_s20   ;;  %s29_s22 = sadd.s32 1, %s1267_s19  ;;  %s1271_s20 = sphi %s1311_s20, %s17_s20   ;;  %s1267_s19 = sphi %s1309_s19, %s1707_s19   ;;  %s1263_s18 = sphi %s1307_s18, %s1706_s18   ;;  %s1259_s17 = sphi %s1305_s17, %s1705_s17   ;;  %s1255_s16 = sphi %s1303_s16, %s1704_s16   ;;  %s1251_s15 = sphi %s1301_s15, %s1703_s15  }
   0x5   : > { %p30_p0 = scmp.ge.s32.totalorder %s29_s22, 9  ;;  %s73_s23 = sadd.s32 1, %s1259_s17 }
   0x6   : > { %p80_p1 = scmp.ne.s32.totalorder %s1259_s17, %s1255_s16  ;;  %p81_p2 = scmp.eq.s32.totalorder %s1271_s20, 0 }
   0x7   : > { %s1709_s22 = smov (%p30_p0, %s29_s22), 0  ;;  %p86_p4 = scmp.ne.s32.totalorder %s1255_s16, %s1251_s15 }
   0x8   : > { %p1337_p3 = por %p81_p2, %p80_p1  ;;  %s68_s25 = ssub.s32 %s1267_s19, %s1709_s22 }
   0x9   : > { %p87_p5 = scmp.eq.s32.totalorder %s1112_s21, 0  ;;  %p71_p6 = scmp.eq.s32.totalorder %s68_s25, 0 }
   0xa   : > { %p1139_p8 = scmp.lt.s32.totalorder %s1271_s20, 9  ;;  %s219_s28 = sand.u32 1, %s1259_s17  }
   0xb   : > { %p1344_p7 = por %p87_p5, %p86_p4  ;;  %s1132_s29 = sshll.u32 %s1267_s19, 11 }
   0xc   : > { %s1350_s27 = scalar_select %p71_p6, %s1259_s17, %s73_s23  }
   0xd   : > { %s1117_s30 = sshll.u32 %s219_s28, 11  ;;  %s231_s7 = scalar_lea.hbm %s1697_s1, %s1132_s29 }
   0xe   : > { %s232_s8 = sshll.u32 %s231_s7, 4  ;;  %s223_s9 = scalar_lea.vmem [#allocation3], %s1117_s30  ;;  %s233_s8 = int_to_ptr.hbm [resolvable:$true] %s232_s8 }
   0xf   : > { %s234_s10 = sshll.u32 %s223_s9, 4  ;;  %p1136_p9 = pnand %p1139_p8, %p1337_p3  ;;  %s235_s10 = int_to_ptr.vmem [resolvable:$true] %s234_s10 }
  0x10   : > { %p1121_p10 = scmp.ge.s32.totalorder %s1271_s20, 1  ;;  %p242_p11 = scmp.lt.s32.totalorder %s1271_s20, 10 }
  0x11   : > { %s220_s11 = scalar_lea.sflag [#allocation4], %s219_s28  ;;  %s1273_s12 = smov 512  }
  0x12   : > { %s1274_s13 = smov 32   ;;  %p243_p12 = pnand %p1121_p10, %p242_p11 }
  0x13   : > { %1138 = dma.hbm_to_vmem [thread:$0]  (!%p1136_p9), %s233_s8, 32768, %s235_s10, %s220_s11, %s1273_s12, %s1273_s12, %s1274_s13  }
  0x14   : > { %246 = sbr.rel (%p243_p12) target bundleno = 354 (0x162), region = 36  ;;  %s248_s14 = sand.u32 (!%p243_p12), 1, %s1255_s16  }
  0x15   : > { %s1122_s15 = sshll.u32 (!%p243_p12), %s248_s14, 11  ;;  %s249_s21 = scalar_lea.sflag (!%p243_p12), [#allocation4], %s248_s14 }
  0x16   : > { %s1362_s23 = scalar_lea.vmem (!%p243_p12), [#allocation3], %s1122_s15 }
  0x19   : > { %1246 = dma.done.wait (%p1344_p7), %s249_s21, 32768  }
  0x1a   : > { %1248 = vsyncadd (%p1344_p7), %s249_s21, 4294934528  ;;  %s1123_s24 = sshll.u32 %s1263_s18, 2  ;;  %p1125_p0 = scmp.ne.s32.totalorder %s1263_s18, 0 }
  0x1b   : > { %p302_p13 = scmp.lt.s32.totalorder %s1123_s24, 35 }
  0x1c   : > { %334 = sbr.rel (%p1125_p0) target bundleno = 38 (0x26), region = 44 }
  0x1d   : > { %s1711_s24 = smov (!%p302_p13, %s1123_s24), 35 }
  0x1e   : > { %s1124_s25 = sshll.u32 %s1711_s24, 3 }
  0x1f   : > { %s1372_s30 = scalar_lea.vmem %s1696_s0, %s1124_s25 }
  0x21   : > { %v1275_v0 = vmov 0.0  }
  0x22   : > { %335 = vst [vmem:[#allocation2 + $0x10] sm:$0xff] %v1275_v0 }
  0x23   : > { %336 = vst [vmem:[#allocation2] sm:$0xff] %v1275_v0 }
  0x24   : > { %337 = vst [vmem:[#allocation2 + $0x18] sm:$0xff] %v1275_v0 }
  0x25   : > { %338 = vst [vmem:[#allocation2 + $0x8] sm:$0xff] %v1275_v0 }
  0x26 PF: > { %v535_v1 = vld [vmem:[%s1362_s23 + $0x5e0] sm:$0xff]  ;;  %v536_v63 = vld [vmem:[%s1362_s23 + $0x5e8] sm:$0xff]  ;;  %p1126_p1 = scmp.ne.s32.totalorder %s1263_s18, 8 }
  0x27   : > { %v531_v2 = vld [vmem:[%s1362_s23 + $0x5c0] sm:$0xff]  ;;  %643 = vmatpush.msra.mxu2 %v535_v1  ;;  %v600_v0 = vld [vmem:[%s1362_s23 + $0x7e8] sm:$0xff] }
  0x28   : > { %v599_v3 = vld [vmem:[%s1362_s23 + $0x7e0] sm:$0xff] }
  0x29   : > { %663 = vmatpush.msra.mxu3 %v599_v3  ;;  %v407_v4 = vld [vmem:[%s1362_s23 + $0x1e0] sm:$0xff]  ;;  %644 = vmatpush.msra.mxu2 %v531_v2  ;;  %v532_v3 = vld [vmem:[%s1362_s23 + $0x5c8] sm:$0xff] }
  0x2a   : > { %v471_v5 = vld [vmem:[%s1362_s23 + $0x3e0] sm:$0xff]  ;;  %603 = vmatpush.msra.mxu0 %v407_v4  ;;  %v408_v4 = vld [vmem:[%s1362_s23 + $0x1e8] sm:$0xff] }
  0x2b   : > { %v527_v6 = vld [vmem:[%s1362_s23 + $0x5a0] sm:$0xff]  ;;  %623 = vmatpush.msra.mxu1 %v471_v5  ;;  %v472_v5 = vld [vmem:[%s1362_s23 + $0x3e8] sm:$0xff] }
  0x2c   : > { %v595_v7 = vld [vmem:[%s1362_s23 + $0x7c0] sm:$0xff]  ;;  %645 = vmatpush.msra.mxu2 %v527_v6  ;;  %v596_v6 = vld [vmem:[%s1362_s23 + $0x7c8] sm:$0xff] }
  0x2d   : > { %v403_v8 = vld [vmem:[%s1362_s23 + $0x1c0] sm:$0xff]  ;;  %664 = vmatpush.msra.mxu3 %v595_v7  ;;  %v528_v7 = vld [vmem:[%s1362_s23 + $0x5a8] sm:$0xff] }
  0x2e   : > { %v467_v9 = vld [vmem:[%s1362_s23 + $0x3c0] sm:$0xff]  ;;  %604 = vmatpush.msra.mxu0 %v403_v8  ;;  %v404_v8 = vld [vmem:[%s1362_s23 + $0x1c8] sm:$0xff] }
  0x2f   : > { %v591_v10 = vld [vmem:[%s1362_s23 + $0x7a0] sm:$0xff]  ;;  %624 = vmatpush.msra.mxu1 %v467_v9  ;;  %v468_v9 = vld [vmem:[%s1362_s23 + $0x3c8] sm:$0xff] }
  0x30   : > { %v399_v11 = vld [vmem:[%s1362_s23 + $0x1a0] sm:$0xff]  ;;  %665 = vmatpush.msra.mxu3 %v591_v10  ;;  %v592_v10 = vld [vmem:[%s1362_s23 + $0x7a8] sm:$0xff] }
  0x31   : > { %v523_v12 = vld [vmem:[%s1362_s23 + $0x580] sm:$0xff]  ;;  %605 = vmatpush.msra.mxu0 %v399_v11  ;;  %v524_v11 = vld [vmem:[%s1362_s23 + $0x588] sm:$0xff] }
  0x32   : > { %v463_v13 = vld [vmem:[%s1362_s23 + $0x3a0] sm:$0xff]  ;;  %646 = vmatpush.msra.mxu2 %v523_v12  ;;  %v400_v12 = vld [vmem:[%s1362_s23 + $0x1a8] sm:$0xff] }
  0x33   : > { %v587_v14 = vld [vmem:[%s1362_s23 + $0x780] sm:$0xff]  ;;  %625 = vmatpush.msra.mxu1 %v463_v13  ;;  %v464_v13 = vld [vmem:[%s1362_s23 + $0x3a8] sm:$0xff] }
  0x34   : > { %v395_v15 = vld [vmem:[%s1362_s23 + $0x180] sm:$0xff]  ;;  %666 = vmatpush.msra.mxu3 %v587_v14  ;;  %v588_v14 = vld [vmem:[%s1362_s23 + $0x788] sm:$0xff] }
  0x35   : > { %v459_v16 = vld [vmem:[%s1362_s23 + $0x380] sm:$0xff]  ;;  %606 = vmatpush.msra.mxu0 %v395_v15  ;;  %v520_v15 = vld [vmem:[%s1362_s23 + $0x568] sm:$0xff] }
  0x36   : > { %v519_v17 = vld [vmem:[%s1362_s23 + $0x560] sm:$0xff]  ;;  %626 = vmatpush.msra.mxu1 %v459_v16  ;;  %v396_v16 = vld [vmem:[%s1362_s23 + $0x188] sm:$0xff] }
  0x37   : > { %v583_v18 = vld [vmem:[%s1362_s23 + $0x760] sm:$0xff]  ;;  %647 = vmatpush.msra.mxu2 %v519_v17  ;;  %v460_v17 = vld [vmem:[%s1362_s23 + $0x388] sm:$0xff] }
  0x38   : > { %v391_v19 = vld [vmem:[%s1362_s23 + $0x160] sm:$0xff]  ;;  %667 = vmatpush.msra.mxu3 %v583_v18  ;;  %v584_v18 = vld [vmem:[%s1362_s23 + $0x768] sm:$0xff] }
  0x39   : > { %v455_v20 = vld [vmem:[%s1362_s23 + $0x360] sm:$0xff]  ;;  %607 = vmatpush.msra.mxu0 %v391_v19  ;;  %v516_v19 = vld [vmem:[%s1362_s23 + $0x548] sm:$0xff] }
  0x3a   : > { %v515_v21 = vld [vmem:[%s1362_s23 + $0x540] sm:$0xff]  ;;  %627 = vmatpush.msra.mxu1 %v455_v20  ;;  %v392_v20 = vld [vmem:[%s1362_s23 + $0x168] sm:$0xff] }
  0x3b   : > { %v579_v22 = vld [vmem:[%s1362_s23 + $0x740] sm:$0xff]  ;;  %648 = vmatpush.msra.mxu2 %v515_v21  ;;  %v456_v21 = vld [vmem:[%s1362_s23 + $0x368] sm:$0xff] }
  0x3c   : > { %v387_v23 = vld [vmem:[%s1362_s23 + $0x140] sm:$0xff]  ;;  %668 = vmatpush.msra.mxu3 %v579_v22  ;;  %v580_v22 = vld [vmem:[%s1362_s23 + $0x748] sm:$0xff] }
  0x3d   : > { %v451_v24 = vld [vmem:[%s1362_s23 + $0x340] sm:$0xff]  ;;  %608 = vmatpush.msra.mxu0 %v387_v23  ;;  %v512_v23 = vld [vmem:[%s1362_s23 + $0x528] sm:$0xff] }
  0x3e   : > { %v511_v25 = vld [vmem:[%s1362_s23 + $0x520] sm:$0xff]  ;;  %628 = vmatpush.msra.mxu1 %v451_v24  ;;  %v388_v24 = vld [vmem:[%s1362_s23 + $0x148] sm:$0xff] }
  0x3f   : > { %v575_v26 = vld [vmem:[%s1362_s23 + $0x720] sm:$0xff]  ;;  %649 = vmatpush.msra.mxu2 %v511_v25  ;;  %v452_v25 = vld [vmem:[%s1362_s23 + $0x348] sm:$0xff] }
  0x40   : > { %v383_v27 = vld [vmem:[%s1362_s23 + $0x120] sm:$0xff]  ;;  %669 = vmatpush.msra.mxu3 %v575_v26  ;;  %v576_v26 = vld [vmem:[%s1362_s23 + $0x728] sm:$0xff] }
  0x41   : > { %v447_v28 = vld [vmem:[%s1362_s23 + $0x320] sm:$0xff]  ;;  %609 = vmatpush.msra.mxu0 %v383_v27  ;;  %v508_v27 = vld [vmem:[%s1362_s23 + $0x508] sm:$0xff] }
  0x42   : > { %v507_v29 = vld [vmem:[%s1362_s23 + $0x500] sm:$0xff]  ;;  %629 = vmatpush.msra.mxu1 %v447_v28  ;;  %v384_v28 = vld [vmem:[%s1362_s23 + $0x128] sm:$0xff] }
  0x43   : > { %v571_v30 = vld [vmem:[%s1362_s23 + $0x700] sm:$0xff]  ;;  %650 = vmatpush.msra.mxu2 %v507_v29  ;;  %v448_v29 = vld [vmem:[%s1362_s23 + $0x328] sm:$0xff] }
  0x44   : > { %v379_v31 = vld [vmem:[%s1362_s23 + $0x100] sm:$0xff]  ;;  %670 = vmatpush.msra.mxu3 %v571_v30  ;;  %v572_v30 = vld [vmem:[%s1362_s23 + $0x708] sm:$0xff] }
  0x45   : > { %v443_v32 = vld [vmem:[%s1362_s23 + $0x300] sm:$0xff]  ;;  %610 = vmatpush.msra.mxu0 %v379_v31  ;;  %v504_v31 = vld [vmem:[%s1362_s23 + $0x4e8] sm:$0xff] }
  0x46   : > { %v503_v33 = vld [vmem:[%s1362_s23 + $0x4e0] sm:$0xff]  ;;  %630 = vmatpush.msra.mxu1 %v443_v32  ;;  %v380_v32 = vld [vmem:[%s1362_s23 + $0x108] sm:$0xff] }
  0x47   : > { %v567_v34 = vld [vmem:[%s1362_s23 + $0x6e0] sm:$0xff]  ;;  %651 = vmatpush.msra.mxu2 %v503_v33  ;;  %v444_v33 = vld [vmem:[%s1362_s23 + $0x308] sm:$0xff] }
  0x48   : > { %v375_v35 = vld [vmem:[%s1362_s23 + $0xe0] sm:$0xff]  ;;  %671 = vmatpush.msra.mxu3 %v567_v34  ;;  %v568_v34 = vld [vmem:[%s1362_s23 + $0x6e8] sm:$0xff] }
  0x49   : > { %v439_v36 = vld [vmem:[%s1362_s23 + $0x2e0] sm:$0xff]  ;;  %611 = vmatpush.msra.mxu0 %v375_v35  ;;  %v500_v35 = vld [vmem:[%s1362_s23 + $0x4c8] sm:$0xff] }
  0x4a   : > { %v499_v37 = vld [vmem:[%s1362_s23 + $0x4c0] sm:$0xff]  ;;  %631 = vmatpush.msra.mxu1 %v439_v36  ;;  %v376_v36 = vld [vmem:[%s1362_s23 + $0xe8] sm:$0xff] }
  0x4b   : > { %v563_v38 = vld [vmem:[%s1362_s23 + $0x6c0] sm:$0xff]  ;;  %652 = vmatpush.msra.mxu2 %v499_v37  ;;  %v440_v37 = vld [vmem:[%s1362_s23 + $0x2e8] sm:$0xff] }
  0x4c   : > { %v371_v39 = vld [vmem:[%s1362_s23 + $0xc0] sm:$0xff]  ;;  %672 = vmatpush.msra.mxu3 %v563_v38  ;;  %v564_v38 = vld [vmem:[%s1362_s23 + $0x6c8] sm:$0xff] }
  0x4d   : > { %v435_v40 = vld [vmem:[%s1362_s23 + $0x2c0] sm:$0xff]  ;;  %612 = vmatpush.msra.mxu0 %v371_v39  ;;  %v496_v39 = vld [vmem:[%s1362_s23 + $0x4a8] sm:$0xff] }
  0x4e   : > { %v495_v41 = vld [vmem:[%s1362_s23 + $0x4a0] sm:$0xff]  ;;  %632 = vmatpush.msra.mxu1 %v435_v40  ;;  %v372_v40 = vld [vmem:[%s1362_s23 + $0xc8] sm:$0xff] }
  0x4f   : > { %v559_v42 = vld [vmem:[%s1362_s23 + $0x6a0] sm:$0xff]  ;;  %653 = vmatpush.msra.mxu2 %v495_v41  ;;  %v436_v41 = vld [vmem:[%s1362_s23 + $0x2c8] sm:$0xff] }
  0x50   : > { %v367_v43 = vld [vmem:[%s1362_s23 + $0xa0] sm:$0xff]  ;;  %673 = vmatpush.msra.mxu3 %v559_v42  ;;  %v560_v42 = vld [vmem:[%s1362_s23 + $0x6a8] sm:$0xff] }
  0x51   : > { %v431_v44 = vld [vmem:[%s1362_s23 + $0x2a0] sm:$0xff]  ;;  %613 = vmatpush.msra.mxu0 %v367_v43  ;;  %v492_v43 = vld [vmem:[%s1362_s23 + $0x488] sm:$0xff] }
  0x52   : > { %v491_v45 = vld [vmem:[%s1362_s23 + $0x480] sm:$0xff]  ;;  %633 = vmatpush.msra.mxu1 %v431_v44  ;;  %v368_v44 = vld [vmem:[%s1362_s23 + $0xa8] sm:$0xff] }
  0x53   : > { %v555_v46 = vld [vmem:[%s1362_s23 + $0x680] sm:$0xff]  ;;  %654 = vmatpush.msra.mxu2 %v491_v45  ;;  %v432_v45 = vld [vmem:[%s1362_s23 + $0x2a8] sm:$0xff] }
  0x54   : > { %v363_v47 = vld [vmem:[%s1362_s23 + $0x80] sm:$0xff]  ;;  %674 = vmatpush.msra.mxu3 %v555_v46  ;;  %v556_v46 = vld [vmem:[%s1362_s23 + $0x688] sm:$0xff] }
  0x55   : > { %v427_v48 = vld [vmem:[%s1362_s23 + $0x280] sm:$0xff]  ;;  %614 = vmatpush.msra.mxu0 %v363_v47  ;;  %v488_v47 = vld [vmem:[%s1362_s23 + $0x468] sm:$0xff] }
  0x56   : > { %v487_v49 = vld [vmem:[%s1362_s23 + $0x460] sm:$0xff]  ;;  %634 = vmatpush.msra.mxu1 %v427_v48  ;;  %v364_v48 = vld [vmem:[%s1362_s23 + $0x88] sm:$0xff] }
  0x57   : > { %v551_v50 = vld [vmem:[%s1362_s23 + $0x660] sm:$0xff]  ;;  %655 = vmatpush.msra.mxu2 %v487_v49  ;;  %v428_v49 = vld [vmem:[%s1362_s23 + $0x288] sm:$0xff] }
  0x58   : > { %v359_v51 = vld [vmem:[%s1362_s23 + $0x60] sm:$0xff]  ;;  %675 = vmatpush.msra.mxu3 %v551_v50  ;;  %v552_v50 = vld [vmem:[%s1362_s23 + $0x668] sm:$0xff] }
  0x59   : > { %v423_v52 = vld [vmem:[%s1362_s23 + $0x260] sm:$0xff]  ;;  %615 = vmatpush.msra.mxu0 %v359_v51  ;;  %v484_v51 = vld [vmem:[%s1362_s23 + $0x448] sm:$0xff] }
  0x5a   : > { %v483_v53 = vld [vmem:[%s1362_s23 + $0x440] sm:$0xff]  ;;  %635 = vmatpush.msra.mxu1 %v423_v52  ;;  %v360_v52 = vld [vmem:[%s1362_s23 + $0x68] sm:$0xff] }
  0x5b   : > { %v547_v54 = vld [vmem:[%s1362_s23 + $0x640] sm:$0xff]  ;;  %656 = vmatpush.msra.mxu2 %v483_v53  ;;  %v424_v53 = vld [vmem:[%s1362_s23 + $0x268] sm:$0xff] }
  0x5c   : > { %v355_v55 = vld [vmem:[%s1362_s23 + $0x40] sm:$0xff]  ;;  %676 = vmatpush.msra.mxu3 %v547_v54  ;;  %v548_v54 = vld [vmem:[%s1362_s23 + $0x648] sm:$0xff] }
  0x5d   : > { %v419_v56 = vld [vmem:[%s1362_s23 + $0x240] sm:$0xff]  ;;  %616 = vmatpush.msra.mxu0 %v355_v55  ;;  %v480_v55 = vld [vmem:[%s1362_s23 + $0x428] sm:$0xff] }
  0x5e   : > { %v479_v57 = vld [vmem:[%s1362_s23 + $0x420] sm:$0xff]  ;;  %636 = vmatpush.msra.mxu1 %v419_v56  ;;  %v356_v56 = vld [vmem:[%s1362_s23 + $0x48] sm:$0xff] }
  0x5f   : > { %v543_v58 = vld [vmem:[%s1362_s23 + $0x620] sm:$0xff]  ;;  %657 = vmatpush.msra.mxu2 %v479_v57  ;;  %v420_v57 = vld [vmem:[%s1362_s23 + $0x248] sm:$0xff] }
  0x60   : > { %v351_v59 = vld [vmem:[%s1362_s23 + $0x20] sm:$0xff]  ;;  %677 = vmatpush.msra.mxu3 %v543_v58  ;;  %v544_v58 = vld [vmem:[%s1362_s23 + $0x628] sm:$0xff] }
  0x61   : > { %v415_v60 = vld [vmem:[%s1362_s23 + $0x220] sm:$0xff]  ;;  %617 = vmatpush.msra.mxu0 %v351_v59  ;;  %v476_v59 = vld [vmem:[%s1362_s23 + $0x408] sm:$0xff] }
  0x62   : > { %v475_v61 = vld [vmem:[%s1362_s23 + $0x400] sm:$0xff]  ;;  %637 = vmatpush.msra.mxu1 %v415_v60  ;;  %v352_v60 = vld [vmem:[%s1362_s23 + $0x28] sm:$0xff] }
  0x63   : > { %v539_v62 = vld [vmem:[%s1362_s23 + $0x600] sm:$0xff]  ;;  %658 = vmatpush.msra.mxu2 %v475_v61  ;;  %v1500_v61 = vld [vmem:[%s1372_s30 + $0x10] sm:$0xff] }
  0x64   : > { %v347_v1 = vld [vmem:[%s1362_s23] sm:$0xff]  ;;  %678 = vmatpush.msra.mxu3 %v539_v62  ;;  %v416_v62 = vld [vmem:[%s1362_s23 + $0x228] sm:$0xff]  ;;  %659 = vmatmul.f32.vlgmr.msra.gmra.mxu2 %v1500_v61 }
  0x65   : > { %v411_v2 = vld [vmem:[%s1362_s23 + $0x200] sm:$0xff]  ;;  %723 = vmatpush.msrb.mxu2 %v536_v63  ;;  %618 = vmatpush.msra.mxu0 %v347_v1  ;;  %v537_v63 = vld [vmem:[%s1362_s23 + $0x5f0] sm:$0xff]  ;;  %v1506_v1 = vld [vmem:[%s1372_s30 + $0x18] sm:$0xff] }
  0x66   : > { %743 = vmatpush.msrb.mxu3 %v600_v0  ;;  %638 = vmatpush.msra.mxu1 %v411_v2  ;;  %v540_v0 = vld [vmem:[%s1362_s23 + $0x608] sm:$0xff] }
  0x67   : > { %724 = vmatpush.msrb.mxu2 %v532_v3  ;;  %683 = vmatpush.msrb.mxu0 %v408_v4  ;;  %v348_v2 = vld [vmem:[%s1362_s23 + $0x8] sm:$0xff]  ;;  %v533_v3 = vld [vmem:[%s1362_s23 + $0x5d0] sm:$0xff] }
  0x68   : > { %703 = vmatpush.msrb.mxu1 %v472_v5  ;;  %744 = vmatpush.msrb.mxu3 %v596_v6  ;;  %v601_v4 = vld [vmem:[%s1362_s23 + $0x7f0] sm:$0xff]  ;;  %v412_v5 = vld [vmem:[%s1362_s23 + $0x208] sm:$0xff]  ;;  %v1514_v6 = vld [vmem:[%s1372_s30] sm:$0xff] }
  0x69   : > { %725 = vmatpush.msrb.mxu2 %v528_v7  ;;  %684 = vmatpush.msrb.mxu0 %v404_v8  ;;  %v1518_v7 = vld [vmem:[%s1372_s30 + $0x8] sm:$0xff]  ;;  %v409_v8 = vld [vmem:[%s1362_s23 + $0x1f0] sm:$0xff] }
  0x6a   : > { %704 = vmatpush.msrb.mxu1 %v468_v9  ;;  %745 = vmatpush.msrb.mxu3 %v592_v10  ;;  %v473_v9 = vld [vmem:[%s1362_s23 + $0x3f0] sm:$0xff] }
  0x6b   : > { %726 = vmatpush.msrb.mxu2 %v524_v11  ;;  %685 = vmatpush.msrb.mxu0 %v400_v12  ;;  %v529_v10 = vld [vmem:[%s1362_s23 + $0x5b0] sm:$0xff] }
  0x6c   : > { %705 = vmatpush.msrb.mxu1 %v464_v13  ;;  %746 = vmatpush.msrb.mxu3 %v588_v14  ;;  %v597_v11 = vld [vmem:[%s1362_s23 + $0x7d0] sm:$0xff] }
  0x6d   : > { %727 = vmatpush.msrb.mxu2 %v520_v15  ;;  %686 = vmatpush.msrb.mxu0 %v396_v16  ;;  %v405_v12 = vld [vmem:[%s1362_s23 + $0x1d0] sm:$0xff] }
  0x6e   : > { %706 = vmatpush.msrb.mxu1 %v460_v17  ;;  %747 = vmatpush.msrb.mxu3 %v584_v18  ;;  %v469_v13 = vld [vmem:[%s1362_s23 + $0x3d0] sm:$0xff] }
  0x6f   : > { %728 = vmatpush.msrb.mxu2 %v516_v19  ;;  %687 = vmatpush.msrb.mxu0 %v392_v20  ;;  %v525_v14 = vld [vmem:[%s1362_s23 + $0x590] sm:$0xff] }
  0x70   : > { %707 = vmatpush.msrb.mxu1 %v456_v21  ;;  %748 = vmatpush.msrb.mxu3 %v580_v22  ;;  %v593_v15 = vld [vmem:[%s1362_s23 + $0x7b0] sm:$0xff] }
  0x71   : > { %729 = vmatpush.msrb.mxu2 %v512_v23  ;;  %688 = vmatpush.msrb.mxu0 %v388_v24  ;;  %v401_v16 = vld [vmem:[%s1362_s23 + $0x1b0] sm:$0xff] }
  0x72   : > { %708 = vmatpush.msrb.mxu1 %v452_v25  ;;  %749 = vmatpush.msrb.mxu3 %v576_v26  ;;  %v465_v17 = vld [vmem:[%s1362_s23 + $0x3b0] sm:$0xff] }
  0x73   : > { %730 = vmatpush.msrb.mxu2 %v508_v27  ;;  %689 = vmatpush.msrb.mxu0 %v384_v28  ;;  %v521_v18 = vld [vmem:[%s1362_s23 + $0x570] sm:$0xff] }
  0x74   : > { %709 = vmatpush.msrb.mxu1 %v448_v29  ;;  %750 = vmatpush.msrb.mxu3 %v572_v30  ;;  %v589_v19 = vld [vmem:[%s1362_s23 + $0x790] sm:$0xff] }
  0x75   : > { %731 = vmatpush.msrb.mxu2 %v504_v31  ;;  %690 = vmatpush.msrb.mxu0 %v380_v32  ;;  %v397_v20 = vld [vmem:[%s1362_s23 + $0x190] sm:$0xff] }
  0x76   : > { %710 = vmatpush.msrb.mxu1 %v444_v33  ;;  %751 = vmatpush.msrb.mxu3 %v568_v34  ;;  %v461_v21 = vld [vmem:[%s1362_s23 + $0x390] sm:$0xff] }
  0x77   : > { %732 = vmatpush.msrb.mxu2 %v500_v35  ;;  %691 = vmatpush.msrb.mxu0 %v376_v36  ;;  %v517_v22 = vld [vmem:[%s1362_s23 + $0x550] sm:$0xff] }
  0x78   : > { %711 = vmatpush.msrb.mxu1 %v440_v37  ;;  %752 = vmatpush.msrb.mxu3 %v564_v38  ;;  %v585_v23 = vld [vmem:[%s1362_s23 + $0x770] sm:$0xff] }
  0x79   : > { %733 = vmatpush.msrb.mxu2 %v496_v39  ;;  %692 = vmatpush.msrb.mxu0 %v372_v40  ;;  %v393_v24 = vld [vmem:[%s1362_s23 + $0x170] sm:$0xff] }
  0x7a   : > { %712 = vmatpush.msrb.mxu1 %v436_v41  ;;  %753 = vmatpush.msrb.mxu3 %v560_v42  ;;  %v457_v25 = vld [vmem:[%s1362_s23 + $0x370] sm:$0xff] }
  0x7b   : > { %734 = vmatpush.msrb.mxu2 %v492_v43  ;;  %693 = vmatpush.msrb.mxu0 %v368_v44  ;;  %v513_v26 = vld [vmem:[%s1362_s23 + $0x530] sm:$0xff] }
  0x7c   : > { %713 = vmatpush.msrb.mxu1 %v432_v45  ;;  %754 = vmatpush.msrb.mxu3 %v556_v46  ;;  %v581_v27 = vld [vmem:[%s1362_s23 + $0x750] sm:$0xff] }
  0x7d   : > { %735 = vmatpush.msrb.mxu2 %v488_v47  ;;  %694 = vmatpush.msrb.mxu0 %v364_v48  ;;  %v389_v28 = vld [vmem:[%s1362_s23 + $0x150] sm:$0xff] }
  0x7e   : > { %714 = vmatpush.msrb.mxu1 %v428_v49  ;;  %755 = vmatpush.msrb.mxu3 %v552_v50  ;;  %v453_v29 = vld [vmem:[%s1362_s23 + $0x350] sm:$0xff] }
  0x7f   : > { %736 = vmatpush.msrb.mxu2 %v484_v51  ;;  %695 = vmatpush.msrb.mxu0 %v360_v52  ;;  %v509_v30 = vld [vmem:[%s1362_s23 + $0x510] sm:$0xff] }
  0x80   : > { %715 = vmatpush.msrb.mxu1 %v424_v53  ;;  %756 = vmatpush.msrb.mxu3 %v548_v54  ;;  %v577_v31 = vld [vmem:[%s1362_s23 + $0x730] sm:$0xff] }
  0x81   : > { %737 = vmatpush.msrb.mxu2 %v480_v55  ;;  %696 = vmatpush.msrb.mxu0 %v356_v56  ;;  %v385_v32 = vld [vmem:[%s1362_s23 + $0x130] sm:$0xff] }
  0x82   : > { %716 = vmatpush.msrb.mxu1 %v420_v57  ;;  %757 = vmatpush.msrb.mxu3 %v544_v58  ;;  %v449_v33 = vld [vmem:[%s1362_s23 + $0x330] sm:$0xff] }
  0x83   : > { %738 = vmatpush.msrb.mxu2 %v476_v59  ;;  %697 = vmatpush.msrb.mxu0 %v352_v60  ;;  %v505_v34 = vld [vmem:[%s1362_s23 + $0x4f0] sm:$0xff] }
  0x84   : > { %717 = vmatpush.msrb.mxu1 %v416_v62  ;;  %758 = vmatpush.msrb.mxu3 %v540_v0  ;;  %v573_v35 = vld [vmem:[%s1362_s23 + $0x710] sm:$0xff] }
  0x85   : > { %803 = vmatpush.msra.mxu2 %v537_v63  ;;  %679 = vmatmul.f32.vlgmr.msra.gmra.mxu3 %v1506_v1  ;;  %v381_v36 = vld [vmem:[%s1362_s23 + $0x110] sm:$0xff] }
  0x86   : > { %698 = vmatpush.msrb.mxu0 %v348_v2  ;;  %823 = vmatpush.msra.mxu3 %v601_v4  ;;  %v445_v37 = vld [vmem:[%s1362_s23 + $0x310] sm:$0xff]  ;;  %v538_v2 = vld [vmem:[%s1362_s23 + $0x5f8] sm:$0xff] }
  0x87   : > { %804 = vmatpush.msra.mxu2 %v533_v3  ;;  %718 = vmatpush.msrb.mxu1 %v412_v5  ;;  %v501_v38 = vld [vmem:[%s1362_s23 + $0x4d0] sm:$0xff] }
  0x88   : > { %619 = vmatmul.f32.vlgmr.msra.gmra.mxu0 %v1514_v6  ;;  %639 = vmatmul.f32.vlgmr.msra.gmra.mxu1 %v1518_v7  ;;  %v569_v39 = vld [vmem:[%s1362_s23 + $0x6f0] sm:$0xff] }
  0x89   : > { %763 = vmatpush.msra.mxu0 %v409_v8  ;;  %783 = vmatpush.msra.mxu1 %v473_v9  ;;  %v377_v40 = vld [vmem:[%s1362_s23 + $0xf0] sm:$0xff]  ;;  %v534_v8 = vld [vmem:[%s1362_s23 + $0x5d8] sm:$0xff] }
  0x8a   : > { %805 = vmatpush.msra.mxu2 %v529_v10  ;;  %824 = vmatpush.msra.mxu3 %v597_v11  ;;  %v441_v41 = vld [vmem:[%s1362_s23 + $0x2f0] sm:$0xff]  ;;  %v602_v9 = vld [vmem:[%s1362_s23 + $0x7f8] sm:$0xff] }
  0x8b   : > { %764 = vmatpush.msra.mxu0 %v405_v12  ;;  %784 = vmatpush.msra.mxu1 %v469_v13  ;;  %v497_v42 = vld [vmem:[%s1362_s23 + $0x4b0] sm:$0xff]  ;;  %v410_v12 = vld [vmem:[%s1362_s23 + $0x1f8] sm:$0xff] }
  0x8c   : > { %806 = vmatpush.msra.mxu2 %v525_v14  ;;  %825 = vmatpush.msra.mxu3 %v593_v15  ;;  %v565_v43 = vld [vmem:[%s1362_s23 + $0x6d0] sm:$0xff]  ;;  %v474_v13 = vld [vmem:[%s1362_s23 + $0x3f8] sm:$0xff] }
  0x8d   : > { %765 = vmatpush.msra.mxu0 %v401_v16  ;;  %785 = vmatpush.msra.mxu1 %v465_v17  ;;  %v373_v44 = vld [vmem:[%s1362_s23 + $0xd0] sm:$0xff]  ;;  %v530_v14 = vld [vmem:[%s1362_s23 + $0x5b8] sm:$0xff] }
  0x8e   : > { %807 = vmatpush.msra.mxu2 %v521_v18  ;;  %826 = vmatpush.msra.mxu3 %v589_v19  ;;  %v437_v45 = vld [vmem:[%s1362_s23 + $0x2d0] sm:$0xff]  ;;  %v598_v15 = vld [vmem:[%s1362_s23 + $0x7d8] sm:$0xff] }
  0x8f   : > { %766 = vmatpush.msra.mxu0 %v397_v20  ;;  %786 = vmatpush.msra.mxu1 %v461_v21  ;;  %v493_v46 = vld [vmem:[%s1362_s23 + $0x490] sm:$0xff]  ;;  %v406_v16 = vld [vmem:[%s1362_s23 + $0x1d8] sm:$0xff] }
  0x90   : > { %808 = vmatpush.msra.mxu2 %v517_v22  ;;  %827 = vmatpush.msra.mxu3 %v585_v23  ;;  %v561_v47 = vld [vmem:[%s1362_s23 + $0x6b0] sm:$0xff]  ;;  %v470_v17 = vld [vmem:[%s1362_s23 + $0x3d8] sm:$0xff] }
  0x91   : > { %767 = vmatpush.msra.mxu0 %v393_v24  ;;  %787 = vmatpush.msra.mxu1 %v457_v25  ;;  %v369_v48 = vld [vmem:[%s1362_s23 + $0xb0] sm:$0xff]  ;;  %v526_v18 = vld [vmem:[%s1362_s23 + $0x598] sm:$0xff] }
  0x92   : > { %809 = vmatpush.msra.mxu2 %v513_v26  ;;  %828 = vmatpush.msra.mxu3 %v581_v27  ;;  %v433_v49 = vld [vmem:[%s1362_s23 + $0x2b0] sm:$0xff]  ;;  %v594_v19 = vld [vmem:[%s1362_s23 + $0x7b8] sm:$0xff] }
  0x93   : > { %768 = vmatpush.msra.mxu0 %v389_v28  ;;  %788 = vmatpush.msra.mxu1 %v453_v29  ;;  %v489_v50 = vld [vmem:[%s1362_s23 + $0x470] sm:$0xff]  ;;  %v402_v20 = vld [vmem:[%s1362_s23 + $0x1b8] sm:$0xff] }
  0x94   : > { %810 = vmatpush.msra.mxu2 %v509_v30  ;;  %829 = vmatpush.msra.mxu3 %v577_v31  ;;  %v557_v51 = vld [vmem:[%s1362_s23 + $0x690] sm:$0xff]  ;;  %v466_v21 = vld [vmem:[%s1362_s23 + $0x3b8] sm:$0xff] }
  0x95   : > { %769 = vmatpush.msra.mxu0 %v385_v32  ;;  %789 = vmatpush.msra.mxu1 %v449_v33  ;;  %v365_v52 = vld [vmem:[%s1362_s23 + $0x90] sm:$0xff]  ;;  %v522_v22 = vld [vmem:[%s1362_s23 + $0x578] sm:$0xff] }
  0x96   : > { %811 = vmatpush.msra.mxu2 %v505_v34  ;;  %830 = vmatpush.msra.mxu3 %v573_v35  ;;  %v429_v53 = vld [vmem:[%s1362_s23 + $0x290] sm:$0xff]  ;;  %v590_v23 = vld [vmem:[%s1362_s23 + $0x798] sm:$0xff] }
  0x97   : > { %770 = vmatpush.msra.mxu0 %v381_v36  ;;  %790 = vmatpush.msra.mxu1 %v445_v37  ;;  %v485_v54 = vld [vmem:[%s1362_s23 + $0x450] sm:$0xff]  ;;  %v398_v24 = vld [vmem:[%s1362_s23 + $0x198] sm:$0xff] }
  0x98   : > { %812 = vmatpush.msra.mxu2 %v501_v38  ;;  %831 = vmatpush.msra.mxu3 %v569_v39  ;;  %v553_v55 = vld [vmem:[%s1362_s23 + $0x670] sm:$0xff]  ;;  %v462_v25 = vld [vmem:[%s1362_s23 + $0x398] sm:$0xff] }
  0x99   : > { %771 = vmatpush.msra.mxu0 %v377_v40  ;;  %791 = vmatpush.msra.mxu1 %v441_v41  ;;  %v361_v56 = vld [vmem:[%s1362_s23 + $0x70] sm:$0xff]  ;;  %v518_v26 = vld [vmem:[%s1362_s23 + $0x558] sm:$0xff] }
  0x9a   : > { %813 = vmatpush.msra.mxu2 %v497_v42  ;;  %832 = vmatpush.msra.mxu3 %v565_v43  ;;  %v425_v57 = vld [vmem:[%s1362_s23 + $0x270] sm:$0xff]  ;;  %v586_v27 = vld [vmem:[%s1362_s23 + $0x778] sm:$0xff] }
  0x9b   : > { %772 = vmatpush.msra.mxu0 %v373_v44  ;;  %792 = vmatpush.msra.mxu1 %v437_v45  ;;  %v481_v58 = vld [vmem:[%s1362_s23 + $0x430] sm:$0xff]  ;;  %v394_v28 = vld [vmem:[%s1362_s23 + $0x178] sm:$0xff] }
  0x9c   : > { %814 = vmatpush.msra.mxu2 %v493_v46  ;;  %833 = vmatpush.msra.mxu3 %v561_v47  ;;  %v549_v59 = vld [vmem:[%s1362_s23 + $0x650] sm:$0xff]  ;;  %v458_v29 = vld [vmem:[%s1362_s23 + $0x378] sm:$0xff] }
  0x9d   : > { %773 = vmatpush.msra.mxu0 %v369_v48  ;;  %793 = vmatpush.msra.mxu1 %v433_v49  ;;  %v357_v60 = vld [vmem:[%s1362_s23 + $0x50] sm:$0xff]  ;;  %v514_v30 = vld [vmem:[%s1362_s23 + $0x538] sm:$0xff] }
  0x9e   : > { %815 = vmatpush.msra.mxu2 %v489_v50  ;;  %834 = vmatpush.msra.mxu3 %v557_v51  ;;  %v421_v62 = vld [vmem:[%s1362_s23 + $0x250] sm:$0xff]  ;;  %v582_v31 = vld [vmem:[%s1362_s23 + $0x758] sm:$0xff] }
  0x9f   : > { %774 = vmatpush.msra.mxu0 %v365_v52  ;;  %794 = vmatpush.msra.mxu1 %v429_v53  ;;  %v477_v63 = vld [vmem:[%s1362_s23 + $0x410] sm:$0xff]  ;;  %v390_v32 = vld [vmem:[%s1362_s23 + $0x158] sm:$0xff] }
  0xa0   : > { %816 = vmatpush.msra.mxu2 %v485_v54  ;;  %835 = vmatpush.msra.mxu3 %v553_v55  ;;  %v545_v0 = vld [vmem:[%s1362_s23 + $0x630] sm:$0xff]  ;;  %v454_v33 = vld [vmem:[%s1362_s23 + $0x358] sm:$0xff] }
  0xa1   : > { %775 = vmatpush.msra.mxu0 %v361_v56  ;;  %795 = vmatpush.msra.mxu1 %v425_v57  ;;  %v353_v3 = vld [vmem:[%s1362_s23 + $0x30] sm:$0xff]  ;;  %v510_v34 = vld [vmem:[%s1362_s23 + $0x518] sm:$0xff] }
  0xa2   : > { %817 = vmatpush.msra.mxu2 %v481_v58  ;;  %836 = vmatpush.msra.mxu3 %v549_v59  ;;  %v417_v4 = vld [vmem:[%s1362_s23 + $0x230] sm:$0xff]  ;;  %v578_v35 = vld [vmem:[%s1362_s23 + $0x738] sm:$0xff] }
  0xa3   : > { %776 = vmatpush.msra.mxu0 %v357_v60  ;;  %796 = vmatpush.msra.mxu1 %v421_v62  ;;  %v541_v5 = vld [vmem:[%s1362_s23 + $0x610] sm:$0xff]  ;;  %v386_v36 = vld [vmem:[%s1362_s23 + $0x138] sm:$0xff] }
  0xa4   : > { %818 = vmatpush.msra.mxu2 %v477_v63  ;;  %837 = vmatpush.msra.mxu3 %v545_v0  ;;  %v349_v10 = vld [vmem:[%s1362_s23 + $0x10] sm:$0xff]  ;;  %v450_v37 = vld [vmem:[%s1362_s23 + $0x338] sm:$0xff] }
  0xa5   : > { %739 = vmatmul.f32.vlgmr.msrb.gmra.mxu2 %v1500_v61  ;;  %777 = vmatpush.msra.mxu0 %v353_v3  ;;  %v413_v11 = vld [vmem:[%s1362_s23 + $0x210] sm:$0xff]  ;;  %v506_v38 = vld [vmem:[%s1362_s23 + $0x4f8] sm:$0xff] }
  0xa6   : > { %883 = vmatpush.msrb.mxu2 %v538_v2  ;;  %797 = vmatpush.msra.mxu1 %v417_v4  ;;  %v574_v39 = vld [vmem:[%s1362_s23 + $0x718] sm:$0xff] }
  0xa7   : > { %838 = vmatpush.msra.mxu3 %v541_v5  ;;  %778 = vmatpush.msra.mxu0 %v349_v10  ;;  %v382_v40 = vld [vmem:[%s1362_s23 + $0x118] sm:$0xff] }
  0xa8   : > { %759 = vmatmul.f32.vlgmr.msrb.gmra.mxu3 %v1506_v1  ;;  %884 = vmatpush.msrb.mxu2 %v534_v8  ;;  %v446_v41 = vld [vmem:[%s1362_s23 + $0x318] sm:$0xff] }
  0xa9   : > { %903 = vmatpush.msrb.mxu3 %v602_v9  ;;  %798 = vmatpush.msra.mxu1 %v413_v11  ;;  %v502_v42 = vld [vmem:[%s1362_s23 + $0x4d8] sm:$0xff] }
  0xaa   : > { %699 = vmatmul.f32.vlgmr.msrb.gmra.mxu0 %v1514_v6  ;;  %719 = vmatmul.f32.vlgmr.msrb.gmra.mxu1 %v1518_v7  ;;  %v570_v43 = vld [vmem:[%s1362_s23 + $0x6f8] sm:$0xff] }
  0xab   : > { %843 = vmatpush.msrb.mxu0 %v410_v12  ;;  %863 = vmatpush.msrb.mxu1 %v474_v13  ;;  %v378_v44 = vld [vmem:[%s1362_s23 + $0xf8] sm:$0xff] }
  0xac   : > { %885 = vmatpush.msrb.mxu2 %v530_v14  ;;  %904 = vmatpush.msrb.mxu3 %v598_v15  ;;  %v442_v45 = vld [vmem:[%s1362_s23 + $0x2f8] sm:$0xff] }
  0xad   : > { %844 = vmatpush.msrb.mxu0 %v406_v16  ;;  %864 = vmatpush.msrb.mxu1 %v470_v17  ;;  %v498_v46 = vld [vmem:[%s1362_s23 + $0x4b8] sm:$0xff] }
  0xae   : > { %886 = vmatpush.msrb.mxu2 %v526_v18  ;;  %905 = vmatpush.msrb.mxu3 %v594_v19  ;;  %v566_v47 = vld [vmem:[%s1362_s23 + $0x6d8] sm:$0xff] }
  0xaf   : > { %845 = vmatpush.msrb.mxu0 %v402_v20  ;;  %865 = vmatpush.msrb.mxu1 %v466_v21  ;;  %v374_v48 = vld [vmem:[%s1362_s23 + $0xd8] sm:$0xff] }
  0xb0   : > { %887 = vmatpush.msrb.mxu2 %v522_v22  ;;  %906 = vmatpush.msrb.mxu3 %v590_v23  ;;  %v438_v49 = vld [vmem:[%s1362_s23 + $0x2d8] sm:$0xff] }
  0xb1   : > { %846 = vmatpush.msrb.mxu0 %v398_v24  ;;  %866 = vmatpush.msrb.mxu1 %v462_v25  ;;  %v494_v50 = vld [vmem:[%s1362_s23 + $0x498] sm:$0xff] }
  0xb2   : > { %888 = vmatpush.msrb.mxu2 %v518_v26  ;;  %907 = vmatpush.msrb.mxu3 %v586_v27  ;;  %v562_v51 = vld [vmem:[%s1362_s23 + $0x6b8] sm:$0xff]  ;;  %v340_v26 = vld [vmem:[#allocation2] sm:$0xff] }
  0xb3   : > { %847 = vmatpush.msrb.mxu0 %v394_v28  ;;  %867 = vmatpush.msrb.mxu1 %v458_v29  ;;  %v370_v52 = vld [vmem:[%s1362_s23 + $0xb8] sm:$0xff] }
  0xb4   : > { %889 = vmatpush.msrb.mxu2 %v514_v30  ;;  %908 = vmatpush.msrb.mxu3 %v582_v31  ;;  %v434_v53 = vld [vmem:[%s1362_s23 + $0x2b8] sm:$0xff] }
  0xb5   : > { %848 = vmatpush.msrb.mxu0 %v390_v32  ;;  %868 = vmatpush.msrb.mxu1 %v454_v33  ;;  %v490_v54 = vld [vmem:[%s1362_s23 + $0x478] sm:$0xff] }
  0xb6   : > { %890 = vmatpush.msrb.mxu2 %v510_v34  ;;  %909 = vmatpush.msrb.mxu3 %v578_v35  ;;  %v558_v55 = vld [vmem:[%s1362_s23 + $0x698] sm:$0xff] }
  0xb7   : > { %849 = vmatpush.msrb.mxu0 %v386_v36  ;;  %869 = vmatpush.msrb.mxu1 %v450_v37  ;;  %v366_v56 = vld [vmem:[%s1362_s23 + $0x98] sm:$0xff] }
  0xb8   : > { %891 = vmatpush.msrb.mxu2 %v506_v38  ;;  %910 = vmatpush.msrb.mxu3 %v574_v39  ;;  %v430_v57 = vld [vmem:[%s1362_s23 + $0x298] sm:$0xff] }
  0xb9   : > { %850 = vmatpush.msrb.mxu0 %v382_v40  ;;  %870 = vmatpush.msrb.mxu1 %v446_v41  ;;  %v486_v58 = vld [vmem:[%s1362_s23 + $0x458] sm:$0xff]  ;;  %v342_v41 = vld [vmem:[#allocation2 + $0x8] sm:$0xff] }
  0xba   : > { %892 = vmatpush.msrb.mxu2 %v502_v42  ;;  %911 = vmatpush.msrb.mxu3 %v570_v43  ;;  %v554_v59 = vld [vmem:[%s1362_s23 + $0x678] sm:$0xff] }
  0xbb   : > { %851 = vmatpush.msrb.mxu0 %v378_v44  ;;  %871 = vmatpush.msrb.mxu1 %v442_v45  ;;  %v362_v60 = vld [vmem:[%s1362_s23 + $0x78] sm:$0xff] }
  0xbc   : > { %893 = vmatpush.msrb.mxu2 %v498_v46  ;;  %912 = vmatpush.msrb.mxu3 %v566_v47  ;;  %v426_v62 = vld [vmem:[%s1362_s23 + $0x278] sm:$0xff] }
  0xbd   : > { %852 = vmatpush.msrb.mxu0 %v374_v48  ;;  %872 = vmatpush.msrb.mxu1 %v438_v49  ;;  %v482_v63 = vld [vmem:[%s1362_s23 + $0x438] sm:$0xff] }
  0xbe   : > { %894 = vmatpush.msrb.mxu2 %v494_v50  ;;  %913 = vmatpush.msrb.mxu3 %v562_v51  ;;  %v550_v0 = vld [vmem:[%s1362_s23 + $0x658] sm:$0xff] }
  0xbf   : > { %819 = vmatmul.f32.vlgmr.msra.gmra.mxu2 %v1500_v61  ;;  %853 = vmatpush.msrb.mxu0 %v370_v52  ;;  %v358_v2 = vld [vmem:[%s1362_s23 + $0x58] sm:$0xff] }
  0xc0   : > { %873 = vmatpush.msrb.mxu1 %v434_v53  ;;  %895 = vmatpush.msrb.mxu2 %v490_v54  ;;  %v422_v3 = vld [vmem:[%s1362_s23 + $0x258] sm:$0xff] }
  0xc1   : > { %914 = vmatpush.msrb.mxu3 %v558_v55  ;;  %854 = vmatpush.msrb.mxu0 %v366_v56  ;;  %v478_v4 = vld [vmem:[%s1362_s23 + $0x418] sm:$0xff] }
  0xc2   : > { %839 = vmatmul.f32.vlgmr.msra.gmra.mxu3 %v1506_v1  ;;  %874 = vmatpush.msrb.mxu1 %v430_v57  ;;  %v546_v5 = vld [vmem:[%s1362_s23 + $0x638] sm:$0xff] }
  0xc3   : > { %896 = vmatpush.msrb.mxu2 %v486_v58  ;;  %915 = vmatpush.msrb.mxu3 %v554_v59  ;;  %v354_v8 = vld [vmem:[%s1362_s23 + $0x38] sm:$0xff] }
  0xc4   : > { %779 = vmatmul.f32.vlgmr.msra.gmra.mxu0 %v1514_v6  ;;  %799 = vmatmul.f32.vlgmr.msra.gmra.mxu1 %v1518_v7  ;;  %v418_v9 = vld [vmem:[%s1362_s23 + $0x238] sm:$0xff] }
  0xc5   : > { %855 = vmatpush.msrb.mxu0 %v362_v60  ;;  %875 = vmatpush.msrb.mxu1 %v426_v62  ;;  %v542_v10 = vld [vmem:[%s1362_s23 + $0x618] sm:$0xff] }
  0xc6   : > { %897 = vmatpush.msrb.mxu2 %v482_v63  ;;  %916 = vmatpush.msrb.mxu3 %v550_v0  ;;  %v350_v11 = vld [vmem:[%s1362_s23 + $0x18] sm:$0xff] }
  0xc7   : > { %856 = vmatpush.msrb.mxu0 %v358_v2  ;;  %876 = vmatpush.msrb.mxu1 %v422_v3  ;;  %v414_v12 = vld [vmem:[%s1362_s23 + $0x218] sm:$0xff] }
  0xc8   : > { %898 = vmatpush.msrb.mxu2 %v478_v4  ;;  %917 = vmatpush.msrb.mxu3 %v546_v5  ;;  %v341_v33 = vld [vmem:[#allocation2 + $0x18] sm:$0xff] }
  0xc9   : > { %899 = vmatmul.f32.vlgmr.msrb.gmra.mxu2 %v1500_v61  ;;  %857 = vmatpush.msrb.mxu0 %v354_v8  ;;  %v339_v61 = vld [vmem:[#allocation2 + $0x10] sm:$0xff] }
  0xca   : > { %877 = vmatpush.msrb.mxu1 %v418_v9  ;;  %918 = vmatpush.msrb.mxu3 %v542_v10 }
  0xcb   : > { %919 = vmatmul.f32.vlgmr.msrb.gmra.mxu3 %v1506_v1  ;;  %858 = vmatpush.msrb.mxu0 %v350_v11 }
  0xcc   : > { %878 = vmatpush.msrb.mxu1 %v414_v12  ;;  %859 = vmatmul.f32.vlgmr.msrb.gmra.mxu0 %v1514_v6 }
  0xcd   : > { %879 = vmatmul.f32.vlgmr.msrb.gmra.mxu1 %v1518_v7 }
  0xe7   : > { %v660_v16 = vpop.f32.mrf.mxu2 }
 0x105   : > { %v620_v13 = vpop.f32.mrf.mxu0  ;;  %v640_v14 = vpop.f32.mrf.mxu1 }
 0x106   : > { %v641_v15 = vadd.f32 %v640_v14, %v620_v13 }
 0x108   : > { %v661_v17 = vadd.f32 %v660_v16, %v641_v15  ;;  %v680_v18 = vpop.f32.mrf.mxu3 }
 0x10a   : > { %v681_v19 = vadd.f32 %v680_v18, %v661_v17 }
 0x10c   : > { %v923_v20 = vadd.f32 %v681_v19, %v339_v61 }
 0x10e   : > { %927 = vst [vmem:[#allocation2 + $0x10] sm:$0xff] %v923_v20 }
 0x127   : > { %v700_v21 = vpop.f32.mrf.mxu0  ;;  %v720_v22 = vpop.f32.mrf.mxu1 }
 0x128   : > { %v740_v23 = vpop.f32.mrf.mxu2  ;;  %v721_v1 = vadd.f32 %v720_v22, %v700_v21 }
 0x12a   : > { %v741_v24 = vadd.f32 %v740_v23, %v721_v1 }
 0x12b   : > { %v760_v25 = vpop.f32.mrf.mxu3 }
 0x12c   : > { %v761_v6 = vadd.f32 %v760_v25, %v741_v24 }
 0x12e   : > { %v924_v27 = vadd.f32 %v761_v6, %v340_v26 }
 0x130   : > { %928 = vst [vmem:[#allocation2] sm:$0xff] %v924_v27 }
 0x141   : > { %v780_v7 = vpop.f32.mrf.mxu0  ;;  %v800_v28 = vpop.f32.mrf.mxu1 }
 0x142   : > { %v820_v29 = vpop.f32.mrf.mxu2  ;;  %v801_v30 = vadd.f32 %v800_v28, %v780_v7 }
 0x144   : > { %v821_v31 = vadd.f32 %v820_v29, %v801_v30 }
 0x145   : > { %v840_v32 = vpop.f32.mrf.mxu3 }
 0x146   : > { %v841_v34 = vadd.f32 %v840_v32, %v821_v31 }
 0x148   : > { %v925_v35 = vadd.f32 %v841_v34, %v341_v33 }
 0x149   : > { %v860_v36 = vpop.f32.mrf.mxu0 }
 0x14a   : > { %929 = vst [vmem:[#allocation2 + $0x18] sm:$0xff] %v925_v35  ;;  %v880_v37 = vpop.f32.mrf.mxu1 }
 0x14b   : > { %v881_v38 = vadd.f32 %v880_v37, %v860_v36 }
 0x14c   : > { %v900_v39 = vpop.f32.mrf.mxu2 }
 0x14d   : > { %v901_v40 = vadd.f32 %v900_v39, %v881_v38 }
 0x14e   : > { %v920_v42 = vpop.f32.mrf.mxu3 }
 0x14f   : > { %v921_v43 = vadd.f32 %v920_v42, %v901_v40  ;;  %934 = sbr.rel (%p1126_p1) target bundleno = 354 (0x162), region = 48 }
 0x151   : > { %v926_v44 = vadd.f32 %v921_v43, %v342_v41 }
 0x153   : > { %930 = vst [vmem:[#allocation2 + $0x8] sm:$0xff] %v926_v44 }
 0x154   : > { %v935_v45 = vld [vmem:[#allocation2 + $0x10] sm:$0xff]  ;;  %v939_v46 = vld [vmem:[%s1698_s2] sm:$0xf]  ;;  %v937_v53 = vld [vmem:[#allocation2 + $0x18] sm:$0xff] }
 0x155   : > { %v953_v47 = vld [vmem:[%s1699_s3] sm:$0xf]  ;;  %v941_v48 = vperm.slane %v939_v46, 0  ;;  %v942_v51 = vperm.slane %v939_v46, 1  ;;  %v943_v54 = vperm.slane %v939_v46, 2  ;;  %v944_v57 = vperm.slane %v939_v46, 3 }
 0x156   : > { %v955_v49 = vperm.slane %v953_v47, 0  ;;  %v936_v50 = vld [vmem:[#allocation2] sm:$0xff]  ;;  %v956_v52 = vperm.slane %v953_v47, 1  ;;  %v957_v55 = vperm.slane %v953_v47, 2  ;;  %v958_v58 = vperm.slane %v953_v47, 3 }
 0x157   : > { %v949_v59 = vmul.f32 %v941_v48, %v935_v45  ;;  %v950_v60 = vmul.f32 %v942_v51, %v936_v50  ;;  %v951_v62 = vmul.f32 %v943_v54, %v937_v53 }
 0x159   : > { %v963_v0 = vadd.f32 %v955_v49, %v949_v59  ;;  %v964_v2 = vadd.f32 %v956_v52, %v950_v60  ;;  %v965_v3 = vadd.f32 %v957_v55, %v951_v62 }
 0x15a   : > { %v938_v56 = vld [vmem:[#allocation2 + $0x8] sm:$0xff] }
 0x15b   : > { %v952_v63 = vmul.f32 %v944_v57, %v938_v56  ;;  %v967_v5 = vmax.f32 %v963_v0, 0.0  ;;  %v968_v8 = vmax.f32 %v964_v2, 0.0  ;;  %v969_v9 = vmax.f32 %v965_v3, 0.0 }
 0x15d   : > { %v966_v4 = vadd.f32 %v958_v58, %v952_v63  ;;  %971 = vst [vmem:[%s1700_s4] sm:$0xff] %v967_v5 }
 0x15e   : > { %972 = vst [vmem:[%s1700_s4 + $0x8] sm:$0xff] %v968_v8 }
 0x15f   : > { %v970_v10 = vmax.f32 %v966_v4, 0.0  ;;  %973 = vst [vmem:[%s1700_s4 + $0x10] sm:$0xff] %v969_v9 }
 0x161   : > { %974 = vst [vmem:[%s1700_s4 + $0x18] sm:$0xff] %v970_v10 }
 0x162 PF: > { %s17_s20 = sadd.s32 1, %s1271_s20   ;;  %s1703_s15 = smov %s1255_s16 }
 0x163   : > { %p14_p2 = scmp.ge.s32.totalorder %s17_s20, 11   ;;  %s1704_s16 = smov %s1259_s17 }
 0x164   : > { %s1705_s17 = smov %s1350_s27  ;;  %s1706_s18 = smov %s1267_s19 }
 0x165   : > { %s1707_s19 = smov %s1709_s22  ;;  %16 = sbr.rel (!%p14_p2) target bundleno = 4 (0x4), region = 93 }
 0x16a   :  { %1005 = vsyncpa [#allocation4], 1 }
 0x16b   :  { %1007 = vsyncpa [#allocation4 + $0x1], 1 }

</bundles_post_ra>
